<compile_context>
chip_gen: v6e
topology: v6e:2x2x1
jax: 0.10.0
libtpu: 0.0.40
codegen_flags: <defaults>
</compile_context>

<pallas_src>
import functools

import jax
import jax.numpy as jnp
from jax.experimental import pallas as pl
from jax.experimental.pallas import tpu as pltpu


# ------------------------------ frame geometry -------------------------------

def _frame_geometry(H, W):
    """Row-padded, flattened frame used inside the kernel.

    The (H, W) image is flattened to H*W lanes and embedded (row padding only)
    into a zero frame of (H + 2P) rows, so every depthwise-conv tap becomes a
    static slice along the lane axis.  P must cover conv0 (pad 2) plus
    conv_spatial (pad 9, dilation 3); it is then bumped so the image starts at
    a 128-lane-aligned offset (dense, unmasked stores).
    """
    P = 11 + -(-11 // W)                  # smallest P with P*W >= 11*W + 11
    for cand in range(P, P + 128):
        if (cand * W) % 128 == 0:
            P = cand
            break
    O2, L2 = P * W, H * W                 # output window = the H image rows
    R1 = 9 * W + 9                        # max |flat offset| of 7x7 dil-3 conv
    O1, L1 = O2 - R1, L2 + 2 * R1         # a1 window (everything conv_spatial reads)
    F = (H + 2 * P) * W                   # frame length
    return P, F, O1, L1, O2, L2, R1


# ----------------------------- the fused kernel -------------------------------

def _ciu_kernel(x_ref, y_ref, rowmask_ref, cm0_ref, cm1_ref,
                w0x_ref, wsx_ref, w1x_ref, wgy_ref, colsx_ref,
                w0y_ref, wsy_ref, w1y_ref, wgx_ref, colsy_ref,
                xout_ref, yout_ref,
                frame_ref, a1_ref,
                *, C, H, W):
    f32 = jnp.float32
    P, F, O1, L1, O2, L2, R1 = _frame_geometry(H, W)
    HW = H * W

    x = x_ref[0].astype(f32)                               # (C, H*W), lane dense
    y = y_ref[0].astype(f32)

    # Per-channel spatial means for the cross gates.  AdaptiveAvgPool2d(1) is
    # linear, so it is folded in front of the gating 1x1 conv + BN.
    inv_hw = 1.0 / float(HW)
    mean_x = jnp.sum(x, axis=1, keepdims=True) * inv_hw    # (C, 1)
    mean_y = jnp.sum(y, axis=1, keepdims=True) * inv_hw

    def gate_factor(mean_col, wg_ref, cols_ref):
        """(1 + sigmoid(BN(conv1x1(mean)))) as a (C, 1) column (VPU matvec)."""
        wg = wg_ref[...].astype(f32)                       # (C_out, C_in)
        cols = cols_ref[...].astype(f32)
        t = cols[:, 5:6]                                   # conv1x1 bias
        for ci in range(C):
            t = t + wg[:, ci:ci + 1] * mean_col[ci:ci + 1, :]
        t = t * cols[:, 6:7] + cols[:, 7:8]                # folded BatchNorm
        return 1.0 + jax.nn.sigmoid(t)                     # X1*g + X1 == X1*(1+g)

    def branch(src, gfac, w0_ref, ws_ref, w1_ref, cols_ref, out_ref):
        w0 = w0_ref[...].astype(f32)                       # (C, 25)
        ws = ws_ref[...].astype(f32)                       # (C, 49)
        w1 = w1_ref[...].astype(f32)                       # (C_out, C_in)
        cols = cols_ref[...].astype(f32)                   # (C, 8)

        # ---- in-kernel zero padding: embed the image in a zeroed VMEM frame
        #      (both stores are 128-lane aligned -> dense, unmasked vst). ----
        frame_ref[...] = jnp.zeros((C, F), f32)
        frame_ref[:, O2:O2 + L2] = src

        # ---- depthwise 5x5, pad 2 (computed over the a1 window) ----
        a1 = jnp.broadcast_to(cols[:, 0:1], (C, L1))       # bias b0
        for dx in range(5):
            acc = jnp.zeros((C, L1), f32)
            for dy in range(5):
                s = O1 + (dy - 2) * W + (dx - 2)
                k = dy * 5 + dx
                acc = acc + frame_ref[:, s:s + L1] * w0[:, k:k + 1]
            # column mask emulates the conv's horizontal zero padding
            a1 = a1 + acc * cm0_ref[dx:dx + 1, :]
        # Zero a1 outside its real HxW support: this is the zero padding the
        # PyTorch module applies to a1 before conv_spatial (padding=9).
        a1_ref[...] = a1 * rowmask_ref[...]

        # ---- depthwise 7x7, dilation 3, pad 9 (computed over the image rows) ----
        a2 = jnp.broadcast_to(cols[:, 1:2], (C, L2))       # bias bs
        for dx in range(7):
            acc = jnp.zeros((C, L2), f32)
            for dy in range(7):
                s = R1 + 3 * (dy - 3) * W + 3 * (dx - 3)
                k = dy * 7 + dx
                acc = acc + a1_ref[:, s:s + L2] * ws[:, k:k + 1]
            a2 = a2 + acc * cm1_ref[dx:dx + 1, :]

        # ---- 1x1 conv across channels: VPU broadcast-FMA (no MXU) ----
        attn = jnp.broadcast_to(cols[:, 2:3], (C, L2))     # bias b1
        for ci in range(C):
            attn = attn + a2[ci:ci + 1, :] * w1[:, ci:ci + 1]

        # ---- u * attn, BatchNorm (inference), ReLU, (1 + gate) residual ----
        z = src * attn
        z = z * cols[:, 3:4] + cols[:, 4:5]
        z = jnp.maximum(z, 0.0)
        out_ref[0] = (z * gfac).astype(out_ref.dtype)

    # X_out is gated by sigmoid(conv1x1_Y(Y)); Y_out by sigmoid(conv1x1_X(X)).
    branch(x, gate_factor(mean_y, wgy_ref, colsx_ref),
           w0x_ref, wsx_ref, w1x_ref, colsx_ref, xout_ref)
    branch(y, gate_factor(mean_x, wgx_ref, colsy_ref),
           w0y_ref, wsy_ref, w1y_ref, colsy_ref, yout_ref)


# ------------------------------- wrapper --------------------------------------

def _pack_ciu_params(p):
    """Repack the math-level parameters into the lane-friendly kernel layout."""
    def dw(w):                          # (K, K, C) -> (C, K*K), tap index dy*K+dx
        K = w.shape[0]
        return jnp.transpose(w.reshape(K * K, -1))

    def col(v):                         # (1, C) -> (C, 1)
        return jnp.transpose(v)

    def path(ap, bn_scale, bn_shift, gate_w, gate_b, gate_scale, gate_shift):
        cols = jnp.concatenate(
            [col(ap["b0"]), col(ap["bs"]), col(ap["b1"]),
             col(bn_scale), col(bn_shift),
             col(gate_b), col(gate_scale), col(gate_shift)], axis=1)    # (C, 8)
        return dict(w0=dw(ap["w0"]), ws=dw(ap["ws"]),
                    w1=jnp.transpose(ap["w1"]),           # (c_out, c_in)
                    wg=jnp.transpose(gate_w),             # (c_out, c_in)
                    cols=cols)

    px = path(p["attn_x"], p["bnx_scale"], p["bnx_shift"],
              p["c1y_w"], p["c1y_b"], p["c1y_scale"], p["c1y_shift"])
    py = path(p["attn_y"], p["bny_scale"], p["bny_shift"],
              p["c1x_w"], p["c1x_b"], p["c1x_scale"], p["c1x_shift"])
    return px, py


def ciu_forward(X_nchw, Y_nchw, p):
    """Fused Pallas forward.  X, Y: (B, C, H, W) float32 (NCHW, like PyTorch)."""
    B, C, H, W = X_nchw.shape
    P, F, O1, L1, O2, L2, R1 = _frame_geometry(H, W)
    HW = H * W
    assert O1 - (2 * W + 2) >= 0 and O1 + L1 + (2 * W + 2) <= F

    # Host-side constants: row / per-tap column validity masks (tiny).
    pos1 = jnp.arange(O1, O1 + L1)
    row1, col1 = pos1 // W, pos1 % W
    rowmask = ((row1 >= P) & (row1 < P + H)).astype(jnp.float32)[None, :]   # (1, L1)
    cm0 = jnp.stack(
        [((col1 + (dx - 2) >= 0) & (col1 + (dx - 2) < W)).astype(jnp.float32)
         for dx in range(5)], axis=0)                                       # (5, L1)
    col2 = jnp.arange(O2, O2 + L2) % W
    cm1 = jnp.stack(
        [((col2 + 3 * (dx - 3) >= 0) & (col2 + 3 * (dx - 3) < W)).astype(jnp.float32)
         for dx in range(7)], axis=0)                                       # (7, L2)

    px, py = _pack_ciu_params(p)
    weights = [px["w0"], px["ws"], px["w1"], px["wg"], px["cols"],
               py["w0"], py["ws"], py["w1"], py["wg"], py["cols"]]

    x = X_nchw.reshape(B, C, HW)       # lane-dense flattened spatial axis
    y = Y_nchw.reshape(B, C, HW)

    def rep(arr):                      # whole small array, same block every step
        zeros = (0,) * arr.ndim
        return pl.BlockSpec(arr.shape, lambda b: zeros)

    grid_spec = pltpu.PrefetchScalarGridSpec(
        num_scalar_prefetch=0,
        grid=(B,),
        in_specs=[
            pl.BlockSpec((1, C, HW), lambda b: (b, 0, 0)),
            pl.BlockSpec((1, C, HW), lambda b: (b, 0, 0)),
            rep(rowmask), rep(cm0), rep(cm1),
            *[rep(a) for a in weights],
        ],
        out_specs=[
            pl.BlockSpec((1, C, HW), lambda b: (b, 0, 0)),
            pl.BlockSpec((1, C, HW), lambda b: (b, 0, 0)),
        ],
        scratch_shapes=[
            pltpu.VMEM((C, F), jnp.float32),    # zero-padded image frame
            pltpu.VMEM((C, L1), jnp.float32),   # masked conv0 output (a1)
        ],
    )

    kernel = functools.partial(_ciu_kernel, C=C, H=H, W=W)
    out_dt = X_nchw.dtype
    xo, yo = pl.pallas_call(
        kernel,
        out_shape=(jax.ShapeDtypeStruct((B, C, HW), out_dt),
                   jax.ShapeDtypeStruct((B, C, HW), out_dt)),
        grid_spec=grid_spec,
        compiler_params=pltpu.CompilerParams(
            dimension_semantics=("parallel",)),   # batch axis -> v7x megacore
    )(x, y, rowmask, cm0, cm1, *weights)

    return xo.reshape(B, C, H, W), yo.reshape(B, C, H, W)


# ------------------------- deterministic parameters --------------------------

def init_ciu_params(key, c_in, c_out):
    ks = list(jax.random.split(key, 32))
    it = iter(ks)

    def nrm(shape, s=0.1):
        return s * jax.random.normal(next(it), shape, jnp.float32)

    def attn_params():
        return dict(
            w0=nrm((5, 5, c_in)), b0=nrm((1, c_in)),      # conv0 (depthwise 5x5)
            ws=nrm((7, 7, c_in)), bs=nrm((1, c_in)),      # conv_spatial (dw 7x7, dil 3)
            w1=nrm((c_in, c_in), 0.3), b1=nrm((1, c_in)), # conv1 (1x1)
        )

    def bn(c):
        gamma = 1.0 + nrm((1, c))
        beta = nrm((1, c))
        mean = nrm((1, c), 0.05)
        var = 1.0 + jnp.abs(nrm((1, c)))
        scale = gamma / jnp.sqrt(var + 1e-5)
        shift = beta - mean * scale
        return scale, shift

    p = {}
    p["attn_x"] = attn_params()
    p["bnx_scale"], p["bnx_shift"] = bn(c_in)
    p["attn_y"] = attn_params()
    p["bny_scale"], p["bny_shift"] = bn(c_in)
    p["c1x_w"], p["c1x_b"] = nrm((c_in, c_out), 0.3), nrm((1, c_out))
    p["c1x_scale"], p["c1x_shift"] = bn(c_out)
    p["c1y_w"], p["c1y_b"] = nrm((c_in, c_out), 0.3), nrm((1, c_out))
    p["c1y_scale"], p["c1y_shift"] = bn(c_out)
    return p


# ---------------------------- pure-JAX reference -----------------------------

def _ref_dw_conv(x, w_kkc, b, dilation, pad):
    C = x.shape[-1]
    k = w_kkc[:, :, None, :]                              # HWIO, I=1 (depthwise)
    y = jax.lax.conv_general_dilated(
        x, k, (1, 1), [(pad, pad), (pad, pad)],
        rhs_dilation=(dilation, dilation),
        dimension_numbers=("NHWC", "HWIO", "NHWC"),
        feature_group_count=C,
        precision=jax.lax.Precision.HIGHEST)
    return y + b


def ciu_reference(X_nchw, Y_nchw, p):
    X = jnp.transpose(X_nchw, (0, 2, 3, 1))
    Y = jnp.transpose(Y_nchw, (0, 2, 3, 1))
    hi = jax.lax.Precision.HIGHEST

    def ref_gate(x, w, b, scale, shift):
        y = jnp.einsum("bhwc,cd->bhwd", x, w, precision=hi) + b
        y = y * scale + shift
        return jax.nn.sigmoid(jnp.mean(y, axis=(1, 2)))   # (B, Cout)

    def ref_branch(x, ap, scale, shift, gate):
        a = _ref_dw_conv(x, ap["w0"], ap["b0"], 1, 2)
        a = _ref_dw_conv(a, ap["ws"], ap["bs"], 3, 9)
        a = jnp.einsum("bhwc,cd->bhwd", a, ap["w1"], precision=hi) + ap["b1"]
        z = jnp.maximum((x * a) * scale + shift, 0.0)
        return z * (1.0 + gate[:, None, None, :])

    gate_y = ref_gate(Y, p["c1y_w"], p["c1y_b"], p["c1y_scale"], p["c1y_shift"])
    X_out = ref_branch(X, p["attn_x"], p["bnx_scale"], p["bnx_shift"], gate_y)
    gate_x = ref_gate(X, p["c1x_w"], p["c1x_b"], p["c1x_scale"], p["c1x_shift"])
    Y_out = ref_branch(Y, p["attn_y"], p["bny_scale"], p["bny_shift"], gate_x)
    return (jnp.transpose(X_out, (0, 3, 1, 2)), jnp.transpose(Y_out, (0, 3, 1, 2)))


# ----------------------------------- main ------------------------------------

if __name__ == "__main__":
    key = jax.random.PRNGKey(0)
    kx, ky, kp = jax.random.split(key, 3)

    B, C, H, W = 2, 4, 16, 16                # in_channels == out_channels (required
    X = jax.random.normal(kx, (B, C, H, W), jnp.float32)  # by the X1*Y2 broadcast)
    Y = jax.random.normal(ky, (B, C, H, W), jnp.float32)
    params = init_ciu_params(kp, C, C)

    X_out, Y_out = jax.jit(ciu_forward)(X, Y, params)
    jax.block_until_ready((X_out, Y_out))

    Xr, Yr = ciu_reference(X, Y, params)
    assert bool(jnp.allclose(X_out, Xr, atol=1e-3, rtol=1e-3)), "X_out mismatch"
    assert bool(jnp.allclose(Y_out, Yr, atol=1e-3, rtol=1e-3)), "Y_out mismatch"

    print("KERNEL_OK")
</pallas_src>

<mosaic_0001>
module attributes {stable_mosaic.version = 11 : i64} {
  func.func @_ciu_kernel(%arg0: i32, %arg1: memref<1x4x256xf32, #tpu.memory_space<vmem>>, %arg2: memref<1x4x256xf32, #tpu.memory_space<vmem>>, %arg3: memref<1x562xf32, #tpu.memory_space<vmem>>, %arg4: memref<5x562xf32, #tpu.memory_space<vmem>>, %arg5: memref<7x256xf32, #tpu.memory_space<vmem>>, %arg6: memref<4x25xf32, #tpu.memory_space<vmem>>, %arg7: memref<4x49xf32, #tpu.memory_space<vmem>>, %arg8: memref<4x4xf32, #tpu.memory_space<vmem>>, %arg9: memref<4x4xf32, #tpu.memory_space<vmem>>, %arg10: memref<4x8xf32, #tpu.memory_space<vmem>>, %arg11: memref<4x25xf32, #tpu.memory_space<vmem>>, %arg12: memref<4x49xf32, #tpu.memory_space<vmem>>, %arg13: memref<4x4xf32, #tpu.memory_space<vmem>>, %arg14: memref<4x4xf32, #tpu.memory_space<vmem>>, %arg15: memref<4x8xf32, #tpu.memory_space<vmem>>, %arg16: memref<1x4x256xf32, #tpu.memory_space<vmem>>, %arg17: memref<1x4x256xf32, #tpu.memory_space<vmem>>, %arg18: memref<4x768xf32, #tpu.memory_space<vmem>>, %arg19: memref<4x562xf32, #tpu.memory_space<vmem>>) attributes {dimension_semantics = [#tpu.dimension_semantics<parallel>], iteration_bounds = array<i64: 2>, scalar_prefetch = 0 : i64, scratch_operands = 2 : i64, tpu.core_type = #tpu.core_type<tc>, window_params = [{transform_indices = @transform_0, window_bounds = array<i64: 1, 4, 256>}, {transform_indices = @transform_1, window_bounds = array<i64: 1, 4, 256>}, {pipeline_mode = #tpu.pipeline_mode<synchronous>, transform_indices = @transform_2, window_bounds = array<i64: 1, 562>}, {pipeline_mode = #tpu.pipeline_mode<synchronous>, transform_indices = @transform_3, window_bounds = array<i64: 5, 562>}, {pipeline_mode = #tpu.pipeline_mode<synchronous>, transform_indices = @transform_4, window_bounds = array<i64: 7, 256>}, {pipeline_mode = #tpu.pipeline_mode<synchronous>, transform_indices = @transform_5, window_bounds = array<i64: 4, 25>}, {pipeline_mode = #tpu.pipeline_mode<synchronous>, transform_indices = @transform_6, window_bounds = array<i64: 4, 49>}, {pipeline_mode = #tpu.pipeline_mode<synchronous>, transform_indices = @transform_7, window_bounds = array<i64: 4, 4>}, {pipeline_mode = #tpu.pipeline_mode<synchronous>, transform_indices = @transform_8, window_bounds = array<i64: 4, 4>}, {pipeline_mode = #tpu.pipeline_mode<synchronous>, transform_indices = @transform_9, window_bounds = array<i64: 4, 8>}, {pipeline_mode = #tpu.pipeline_mode<synchronous>, transform_indices = @transform_10, window_bounds = array<i64: 4, 25>}, {pipeline_mode = #tpu.pipeline_mode<synchronous>, transform_indices = @transform_11, window_bounds = array<i64: 4, 49>}, {pipeline_mode = #tpu.pipeline_mode<synchronous>, transform_indices = @transform_12, window_bounds = array<i64: 4, 4>}, {pipeline_mode = #tpu.pipeline_mode<synchronous>, transform_indices = @transform_13, window_bounds = array<i64: 4, 4>}, {pipeline_mode = #tpu.pipeline_mode<synchronous>, transform_indices = @transform_14, window_bounds = array<i64: 4, 8>}, {transform_indices = @transform_15, window_bounds = array<i64: 1, 4, 256>}, {transform_indices = @transform_16, window_bounds = array<i64: 1, 4, 256>}]} {
    %c0 = arith.constant 0 : index
    %c0_0 = arith.constant 0 : index
    %c0_1 = arith.constant 0 : index
    %0 = vector.load %arg1[%c0, %c0_0, %c0_1] : memref<1x4x256xf32, #tpu.memory_space<vmem>>, vector<1x4x256xf32>
    %1 = vector.shape_cast %0 : vector<1x4x256xf32> to vector<4x256xf32>
    %c0_2 = arith.constant 0 : index
    %c0_3 = arith.constant 0 : index
    %c0_4 = arith.constant 0 : index
    %2 = vector.load %arg2[%c0_2, %c0_3, %c0_4] : memref<1x4x256xf32, #tpu.memory_space<vmem>>, vector<1x4x256xf32>
    %3 = vector.shape_cast %2 : vector<1x4x256xf32> to vector<4x256xf32>
    %cst = arith.constant dense<0.000000e+00> : vector<4xf32>
    %4 = vector.multi_reduction <add>, %1, %cst [1] : vector<4x256xf32> to vector<4xf32>
    %5 = vector.shape_cast %4 : vector<4xf32> to vector<4x1xf32>
    %cst_5 = arith.constant 3.906250e-03 : f32
    %6 = vector.broadcast %cst_5 : f32 to vector<4x1xf32>
    %7 = arith.mulf %5, %6 : vector<4x1xf32>
    %cst_6 = arith.constant dense<0.000000e+00> : vector<4xf32>
    %8 = vector.multi_reduction <add>, %3, %cst_6 [1] : vector<4x256xf32> to vector<4xf32>
    %9 = vector.shape_cast %8 : vector<4xf32> to vector<4x1xf32>
    %cst_7 = arith.constant 3.906250e-03 : f32
    %10 = vector.broadcast %cst_7 : f32 to vector<4x1xf32>
    %11 = arith.mulf %9, %10 : vector<4x1xf32>
    %c0_8 = arith.constant 0 : index
    %c0_9 = arith.constant 0 : index
    %12 = vector.load %arg9[%c0_8, %c0_9] : memref<4x4xf32, #tpu.memory_space<vmem>>, vector<4x4xf32>
    %c0_10 = arith.constant 0 : index
    %c0_11 = arith.constant 0 : index
    %13 = vector.load %arg10[%c0_10, %c0_11] : memref<4x8xf32, #tpu.memory_space<vmem>>, vector<4x8xf32>
    %14 = vector.extract_strided_slice %13 {offsets = [0, 5], sizes = [4, 1], strides = [1, 1]} : vector<4x8xf32> to vector<4x1xf32>
    %15 = vector.extract_strided_slice %12 {offsets = [0, 0], sizes = [4, 1], strides = [1, 1]} : vector<4x4xf32> to vector<4x1xf32>
    %16 = vector.extract_strided_slice %11 {offsets = [0, 0], sizes = [1, 1], strides = [1, 1]} : vector<4x1xf32> to vector<1x1xf32>
    %17 = vector.broadcast %16 : vector<1x1xf32> to vector<4x1xf32>
    %18 = arith.mulf %15, %17 : vector<4x1xf32>
    %19 = arith.addf %14, %18 : vector<4x1xf32>
    %20 = vector.extract_strided_slice %12 {offsets = [0, 1], sizes = [4, 1], strides = [1, 1]} : vector<4x4xf32> to vector<4x1xf32>
    %21 = vector.extract_strided_slice %11 {offsets = [1, 0], sizes = [1, 1], strides = [1, 1]} : vector<4x1xf32> to vector<1x1xf32>
    %22 = vector.broadcast %21 : vector<1x1xf32> to vector<4x1xf32>
    %23 = arith.mulf %20, %22 : vector<4x1xf32>
    %24 = arith.addf %19, %23 : vector<4x1xf32>
    %25 = vector.extract_strided_slice %12 {offsets = [0, 2], sizes = [4, 1], strides = [1, 1]} : vector<4x4xf32> to vector<4x1xf32>
    %26 = vector.extract_strided_slice %11 {offsets = [2, 0], sizes = [1, 1], strides = [1, 1]} : vector<4x1xf32> to vector<1x1xf32>
    %27 = vector.broadcast %26 : vector<1x1xf32> to vector<4x1xf32>
    %28 = arith.mulf %25, %27 : vector<4x1xf32>
    %29 = arith.addf %24, %28 : vector<4x1xf32>
    %30 = vector.extract_strided_slice %12 {offsets = [0, 3], sizes = [4, 1], strides = [1, 1]} : vector<4x4xf32> to vector<4x1xf32>
    %31 = vector.extract_strided_slice %11 {offsets = [3, 0], sizes = [1, 1], strides = [1, 1]} : vector<4x1xf32> to vector<1x1xf32>
    %32 = vector.broadcast %31 : vector<1x1xf32> to vector<4x1xf32>
    %33 = arith.mulf %30, %32 : vector<4x1xf32>
    %34 = arith.addf %29, %33 : vector<4x1xf32>
    %35 = vector.extract_strided_slice %13 {offsets = [0, 6], sizes = [4, 1], strides = [1, 1]} : vector<4x8xf32> to vector<4x1xf32>
    %36 = arith.mulf %34, %35 : vector<4x1xf32>
    %37 = vector.extract_strided_slice %13 {offsets = [0, 7], sizes = [4, 1], strides = [1, 1]} : vector<4x8xf32> to vector<4x1xf32>
    %38 = arith.addf %36, %37 : vector<4x1xf32>
    %39 = arith.negf %38 : vector<4x1xf32>
    %40 = math.exp %39 : vector<4x1xf32>
    %cst_12 = arith.constant 1.000000e+00 : f32
    %41 = vector.broadcast %cst_12 : f32 to vector<4x1xf32>
    %42 = arith.addf %41, %40 : vector<4x1xf32>
    %43 = arith.divf %41, %42 : vector<4x1xf32>
    %cst_13 = arith.constant 1.000000e+00 : f32
    %44 = vector.broadcast %cst_13 : f32 to vector<4x1xf32>
    %45 = arith.addf %44, %43 : vector<4x1xf32>
    %c0_14 = arith.constant 0 : index
    %c0_15 = arith.constant 0 : index
    %46 = vector.load %arg6[%c0_14, %c0_15] : memref<4x25xf32, #tpu.memory_space<vmem>>, vector<4x25xf32>
    %c0_16 = arith.constant 0 : index
    %c0_17 = arith.constant 0 : index
    %47 = vector.load %arg7[%c0_16, %c0_17] : memref<4x49xf32, #tpu.memory_space<vmem>>, vector<4x49xf32>
    %c0_18 = arith.constant 0 : index
    %c0_19 = arith.constant 0 : index
    %48 = vector.load %arg8[%c0_18, %c0_19] : memref<4x4xf32, #tpu.memory_space<vmem>>, vector<4x4xf32>
    %c0_20 = arith.constant 0 : index
    %c0_21 = arith.constant 0 : index
    %49 = vector.load %arg10[%c0_20, %c0_21] : memref<4x8xf32, #tpu.memory_space<vmem>>, vector<4x8xf32>
    %cst_22 = arith.constant 0.000000e+00 : f32
    %50 = vector.broadcast %cst_22 : f32 to vector<4x768xf32>
    %c0_23 = arith.constant 0 : index
    %c0_24 = arith.constant 0 : index
    %51 = vector.load %arg18[%c0_23, %c0_24] : memref<4x768xf32, #tpu.memory_space<vmem>>, vector<4x768xf32>
    tpu.vector_store %arg18[%c0_23, %c0_24], %50 {strides = array<i32>} : memref<4x768xf32, #tpu.memory_space<vmem>>, vector<4x768xf32>,
    %c0_25 = arith.constant 0 : index
    %c256 = arith.constant 256 : index
    %52 = vector.load %arg18[%c0_25, %c256] : memref<4x768xf32, #tpu.memory_space<vmem>>, vector<4x256xf32>
    tpu.vector_store %arg18[%c0_25, %c256], %1 {strides = array<i32>} : memref<4x768xf32, #tpu.memory_space<vmem>>, vector<4x256xf32>,
    %53 = vector.extract_strided_slice %49 {offsets = [0, 0], sizes = [4, 1], strides = [1, 1]} : vector<4x8xf32> to vector<4x1xf32>
    %54 = vector.shape_cast %53 : vector<4x1xf32> to vector<4x1xf32>
    %55 = vector.broadcast %54 : vector<4x1xf32> to vector<4x562xf32>
    %cst_26 = arith.constant 0.000000e+00 : f32
    %56 = vector.broadcast %cst_26 : f32 to vector<4x562xf32>
    %c0_27 = arith.constant 0 : index
    %c69 = arith.constant 69 : index
    %57 = vector.load %arg18[%c0_27, %c69] : memref<4x768xf32, #tpu.memory_space<vmem>>, vector<4x562xf32>
    %58 = vector.extract_strided_slice %46 {offsets = [0, 0], sizes = [4, 1], strides = [1, 1]} : vector<4x25xf32> to vector<4x1xf32>
    %59 = vector.broadcast %58 : vector<4x1xf32> to vector<4x562xf32>
    %60 = arith.mulf %57, %59 : vector<4x562xf32>
    %61 = arith.addf %56, %60 : vector<4x562xf32>
    %c0_28 = arith.constant 0 : index
    %c85 = arith.constant 85 : index
    %62 = vector.load %arg18[%c0_28, %c85] : memref<4x768xf32, #tpu.memory_space<vmem>>, vector<4x562xf32>
    %63 = vector.extract_strided_slice %46 {offsets = [0, 5], sizes = [4, 1], strides = [1, 1]} : vector<4x25xf32> to vector<4x1xf32>
    %64 = vector.broadcast %63 : vector<4x1xf32> to vector<4x562xf32>
    %65 = arith.mulf %62, %64 : vector<4x562xf32>
    %66 = arith.addf %61, %65 : vector<4x562xf32>
    %c0_29 = arith.constant 0 : index
    %c101 = arith.constant 101 : index
    %67 = vector.load %arg18[%c0_29, %c101] : memref<4x768xf32, #tpu.memory_space<vmem>>, vector<4x562xf32>
    %68 = vector.extract_strided_slice %46 {offsets = [0, 10], sizes = [4, 1], strides = [1, 1]} : vector<4x25xf32> to vector<4x1xf32>
    %69 = vector.broadcast %68 : vector<4x1xf32> to vector<4x562xf32>
    %70 = arith.mulf %67, %69 : vector<4x562xf32>
    %71 = arith.addf %66, %70 : vector<4x562xf32>
    %c0_30 = arith.constant 0 : index
    %c117 = arith.constant 117 : index
    %72 = vector.load %arg18[%c0_30, %c117] : memref<4x768xf32, #tpu.memory_space<vmem>>, vector<4x562xf32>
    %73 = vector.extract_strided_slice %46 {offsets = [0, 15], sizes = [4, 1], strides = [1, 1]} : vector<4x25xf32> to vector<4x1xf32>
    %74 = vector.broadcast %73 : vector<4x1xf32> to vector<4x562xf32>
    %75 = arith.mulf %72, %74 : vector<4x562xf32>
    %76 = arith.addf %71, %75 : vector<4x562xf32>
    %c0_31 = arith.constant 0 : index
    %c133 = arith.constant 133 : index
    %77 = vector.load %arg18[%c0_31, %c133] : memref<4x768xf32, #tpu.memory_space<vmem>>, vector<4x562xf32>
    %78 = vector.extract_strided_slice %46 {offsets = [0, 20], sizes = [4, 1], strides = [1, 1]} : vector<4x25xf32> to vector<4x1xf32>
    %79 = vector.broadcast %78 : vector<4x1xf32> to vector<4x562xf32>
    %80 = arith.mulf %77, %79 : vector<4x562xf32>
    %81 = arith.addf %76, %80 : vector<4x562xf32>
    %c0_32 = arith.constant 0 : index
    %c0_33 = arith.constant 0 : index
    %82 = vector.load %arg4[%c0_32, %c0_33] : memref<5x562xf32, #tpu.memory_space<vmem>>, vector<1x562xf32>
    %83 = vector.broadcast %82 : vector<1x562xf32> to vector<4x562xf32>
    %84 = arith.mulf %81, %83 : vector<4x562xf32>
    %85 = arith.addf %55, %84 : vector<4x562xf32>
    %cst_34 = arith.constant 0.000000e+00 : f32
    %86 = vector.broadcast %cst_34 : f32 to vector<4x562xf32>
    %c0_35 = arith.constant 0 : index
    %c70 = arith.constant 70 : index
    %87 = vector.load %arg18[%c0_35, %c70] : memref<4x768xf32, #tpu.memory_space<vmem>>, vector<4x562xf32>
    %88 = vector.extract_strided_slice %46 {offsets = [0, 1], sizes = [4, 1], strides = [1, 1]} : vector<4x25xf32> to vector<4x1xf32>
    %89 = vector.broadcast %88 : vector<4x1xf32> to vector<4x562xf32>
    %90 = arith.mulf %87, %89 : vector<4x562xf32>
    %91 = arith.addf %86, %90 : vector<4x562xf32>
    %c0_36 = arith.constant 0 : index
    %c86 = arith.constant 86 : index
    %92 = vector.load %arg18[%c0_36, %c86] : memref<4x768xf32, #tpu.memory_space<vmem>>, vector<4x562xf32>
    %93 = vector.extract_strided_slice %46 {offsets = [0, 6], sizes = [4, 1], strides = [1, 1]} : vector<4x25xf32> to vector<4x1xf32>
    %94 = vector.broadcast %93 : vector<4x1xf32> to vector<4x562xf32>
    %95 = arith.mulf %92, %94 : vector<4x562xf32>
    %96 = arith.addf %91, %95 : vector<4x562xf32>
    %c0_37 = arith.constant 0 : index
    %c102 = arith.constant 102 : index
    %97 = vector.load %arg18[%c0_37, %c102] : memref<4x768xf32, #tpu.memory_space<vmem>>, vector<4x562xf32>
    %98 = vector.extract_strided_slice %46 {offsets = [0, 11], sizes = [4, 1], strides = [1, 1]} : vector<4x25xf32> to vector<4x1xf32>
    %99 = vector.broadcast %98 : vector<4x1xf32> to vector<4x562xf32>
    %100 = arith.mulf %97, %99 : vector<4x562xf32>
    %101 = arith.addf %96, %100 : vector<4x562xf32>
    %c0_38 = arith.constant 0 : index
    %c118 = arith.constant 118 : index
    %102 = vector.load %arg18[%c0_38, %c118] : memref<4x768xf32, #tpu.memory_space<vmem>>, vector<4x562xf32>
    %103 = vector.extract_strided_slice %46 {offsets = [0, 16], sizes = [4, 1], strides = [1, 1]} : vector<4x25xf32> to vector<4x1xf32>
    %104 = vector.broadcast %103 : vector<4x1xf32> to vector<4x562xf32>
    %105 = arith.mulf %102, %104 : vector<4x562xf32>
    %106 = arith.addf %101, %105 : vector<4x562xf32>
    %c0_39 = arith.constant 0 : index
    %c134 = arith.constant 134 : index
    %107 = vector.load %arg18[%c0_39, %c134] : memref<4x768xf32, #tpu.memory_space<vmem>>, vector<4x562xf32>
    %108 = vector.extract_strided_slice %46 {offsets = [0, 21], sizes = [4, 1], strides = [1, 1]} : vector<4x25xf32> to vector<4x1xf32>
    %109 = vector.broadcast %108 : vector<4x1xf32> to vector<4x562xf32>
    %110 = arith.mulf %107, %109 : vector<4x562xf32>
    %111 = arith.addf %106, %110 : vector<4x562xf32>
    %c1 = arith.constant 1 : index
    %c0_40 = arith.constant 0 : index
    %112 = vector.load %arg4[%c1, %c0_40] : memref<5x562xf32, #tpu.memory_space<vmem>>, vector<1x562xf32>
    %113 = vector.broadcast %112 : vector<1x562xf32> to vector<4x562xf32>
    %114 = arith.mulf %111, %113 : vector<4x562xf32>
    %115 = arith.addf %85, %114 : vector<4x562xf32>
    %cst_41 = arith.constant 0.000000e+00 : f32
    %116 = vector.broadcast %cst_41 : f32 to vector<4x562xf32>
    %c0_42 = arith.constant 0 : index
    %c71 = arith.constant 71 : index
    %117 = vector.load %arg18[%c0_42, %c71] : memref<4x768xf32, #tpu.memory_space<vmem>>, vector<4x562xf32>
    %118 = vector.extract_strided_slice %46 {offsets = [0, 2], sizes = [4, 1], strides = [1, 1]} : vector<4x25xf32> to vector<4x1xf32>
    %119 = vector.broadcast %118 : vector<4x1xf32> to vector<4x562xf32>
    %120 = arith.mulf %117, %119 : vector<4x562xf32>
    %121 = arith.addf %116, %120 : vector<4x562xf32>
    %c0_43 = arith.constant 0 : index
    %c87 = arith.constant 87 : index
    %122 = vector.load %arg18[%c0_43, %c87] : memref<4x768xf32, #tpu.memory_space<vmem>>, vector<4x562xf32>
    %123 = vector.extract_strided_slice %46 {offsets = [0, 7], sizes = [4, 1], strides = [1, 1]} : vector<4x25xf32> to vector<4x1xf32>
    %124 = vector.broadcast %123 : vector<4x1xf32> to vector<4x562xf32>
    %125 = arith.mulf %122, %124 : vector<4x562xf32>
    %126 = arith.addf %121, %125 : vector<4x562xf32>
    %c0_44 = arith.constant 0 : index
    %c103 = arith.constant 103 : index
    %127 = vector.load %arg18[%c0_44, %c103] : memref<4x768xf32, #tpu.memory_space<vmem>>, vector<4x562xf32>
    %128 = vector.extract_strided_slice %46 {offsets = [0, 12], sizes = [4, 1], strides = [1, 1]} : vector<4x25xf32> to vector<4x1xf32>
    %129 = vector.broadcast %128 : vector<4x1xf32> to vector<4x562xf32>
    %130 = arith.mulf %127, %129 : vector<4x562xf32>
    %131 = arith.addf %126, %130 : vector<4x562xf32>
    %c0_45 = arith.constant 0 : index
    %c119 = arith.constant 119 : index
    %132 = vector.load %arg18[%c0_45, %c119] : memref<4x768xf32, #tpu.memory_space<vmem>>, vector<4x562xf32>
    %133 = vector.extract_strided_slice %46 {offsets = [0, 17], sizes = [4, 1], strides = [1, 1]} : vector<4x25xf32> to vector<4x1xf32>
    %134 = vector.broadcast %133 : vector<4x1xf32> to vector<4x562xf32>
    %135 = arith.mulf %132, %134 : vector<4x562xf32>
    %136 = arith.addf %131, %135 : vector<4x562xf32>
    %c0_46 = arith.constant 0 : index
    %c135 = arith.constant 135 : index
    %137 = vector.load %arg18[%c0_46, %c135] : memref<4x768xf32, #tpu.memory_space<vmem>>, vector<4x562xf32>
    %138 = vector.extract_strided_slice %46 {offsets = [0, 22], sizes = [4, 1], strides = [1, 1]} : vector<4x25xf32> to vector<4x1xf32>
    %139 = vector.broadcast %138 : vector<4x1xf32> to vector<4x562xf32>
    %140 = arith.mulf %137, %139 : vector<4x562xf32>
    %141 = arith.addf %136, %140 : vector<4x562xf32>
    %c2 = arith.constant 2 : index
    %c0_47 = arith.constant 0 : index
    %142 = vector.load %arg4[%c2, %c0_47] : memref<5x562xf32, #tpu.memory_space<vmem>>, vector<1x562xf32>
    %143 = vector.broadcast %142 : vector<1x562xf32> to vector<4x562xf32>
    %144 = arith.mulf %141, %143 : vector<4x562xf32>
    %145 = arith.addf %115, %144 : vector<4x562xf32>
    %cst_48 = arith.constant 0.000000e+00 : f32
    %146 = vector.broadcast %cst_48 : f32 to vector<4x562xf32>
    %c0_49 = arith.constant 0 : index
    %c72 = arith.constant 72 : index
    %147 = vector.load %arg18[%c0_49, %c72] : memref<4x768xf32, #tpu.memory_space<vmem>>, vector<4x562xf32>
    %148 = vector.extract_strided_slice %46 {offsets = [0, 3], sizes = [4, 1], strides = [1, 1]} : vector<4x25xf32> to vector<4x1xf32>
    %149 = vector.broadcast %148 : vector<4x1xf32> to vector<4x562xf32>
    %150 = arith.mulf %147, %149 : vector<4x562xf32>
    %151 = arith.addf %146, %150 : vector<4x562xf32>
    %c0_50 = arith.constant 0 : index
    %c88 = arith.constant 88 : index
    %152 = vector.load %arg18[%c0_50, %c88] : memref<4x768xf32, #tpu.memory_space<vmem>>, vector<4x562xf32>
    %153 = vector.extract_strided_slice %46 {offsets = [0, 8], sizes = [4, 1], strides = [1, 1]} : vector<4x25xf32> to vector<4x1xf32>
    %154 = vector.broadcast %153 : vector<4x1xf32> to vector<4x562xf32>
    %155 = arith.mulf %152, %154 : vector<4x562xf32>
    %156 = arith.addf %151, %155 : vector<4x562xf32>
    %c0_51 = arith.constant 0 : index
    %c104 = arith.constant 104 : index
    %157 = vector.load %arg18[%c0_51, %c104] : memref<4x768xf32, #tpu.memory_space<vmem>>, vector<4x562xf32>
    %158 = vector.extract_strided_slice %46 {offsets = [0, 13], sizes = [4, 1], strides = [1, 1]} : vector<4x25xf32> to vector<4x1xf32>
    %159 = vector.broadcast %158 : vector<4x1xf32> to vector<4x562xf32>
    %160 = arith.mulf %157, %159 : vector<4x562xf32>
    %161 = arith.addf %156, %160 : vector<4x562xf32>
    %c0_52 = arith.constant 0 : index
    %c120 = arith.constant 120 : index
    %162 = vector.load %arg18[%c0_52, %c120] : memref<4x768xf32, #tpu.memory_space<vmem>>, vector<4x562xf32>
    %163 = vector.extract_strided_slice %46 {offsets = [0, 18], sizes = [4, 1], strides = [1, 1]} : vector<4x25xf32> to vector<4x1xf32>
    %164 = vector.broadcast %163 : vector<4x1xf32> to vector<4x562xf32>
    %165 = arith.mulf %162, %164 : vector<4x562xf32>
    %166 = arith.addf %161, %165 : vector<4x562xf32>
    %c0_53 = arith.constant 0 : index
    %c136 = arith.constant 136 : index
    %167 = vector.load %arg18[%c0_53, %c136] : memref<4x768xf32, #tpu.memory_space<vmem>>, vector<4x562xf32>
    %168 = vector.extract_strided_slice %46 {offsets = [0, 23], sizes = [4, 1], strides = [1, 1]} : vector<4x25xf32> to vector<4x1xf32>
    %169 = vector.broadcast %168 : vector<4x1xf32> to vector<4x562xf32>
    %170 = arith.mulf %167, %169 : vector<4x562xf32>
    %171 = arith.addf %166, %170 : vector<4x562xf32>
    %c3 = arith.constant 3 : index
    %c0_54 = arith.constant 0 : index
    %172 = vector.load %arg4[%c3, %c0_54] : memref<5x562xf32, #tpu.memory_space<vmem>>, vector<1x562xf32>
    %173 = vector.broadcast %172 : vector<1x562xf32> to vector<4x562xf32>
    %174 = arith.mulf %171, %173 : vector<4x562xf32>
    %175 = arith.addf %145, %174 : vector<4x562xf32>
    %cst_55 = arith.constant 0.000000e+00 : f32
    %176 = vector.broadcast %cst_55 : f32 to vector<4x562xf32>
    %c0_56 = arith.constant 0 : index
    %c73 = arith.constant 73 : index
    %177 = vector.load %arg18[%c0_56, %c73] : memref<4x768xf32, #tpu.memory_space<vmem>>, vector<4x562xf32>
    %178 = vector.extract_strided_slice %46 {offsets = [0, 4], sizes = [4, 1], strides = [1, 1]} : vector<4x25xf32> to vector<4x1xf32>
    %179 = vector.broadcast %178 : vector<4x1xf32> to vector<4x562xf32>
    %180 = arith.mulf %177, %179 : vector<4x562xf32>
    %181 = arith.addf %176, %180 : vector<4x562xf32>
    %c0_57 = arith.constant 0 : index
    %c89 = arith.constant 89 : index
    %182 = vector.load %arg18[%c0_57, %c89] : memref<4x768xf32, #tpu.memory_space<vmem>>, vector<4x562xf32>
    %183 = vector.extract_strided_slice %46 {offsets = [0, 9], sizes = [4, 1], strides = [1, 1]} : vector<4x25xf32> to vector<4x1xf32>
    %184 = vector.broadcast %183 : vector<4x1xf32> to vector<4x562xf32>
    %185 = arith.mulf %182, %184 : vector<4x562xf32>
    %186 = arith.addf %181, %185 : vector<4x562xf32>
    %c0_58 = arith.constant 0 : index
    %c105 = arith.constant 105 : index
    %187 = vector.load %arg18[%c0_58, %c105] : memref<4x768xf32, #tpu.memory_space<vmem>>, vector<4x562xf32>
    %188 = vector.extract_strided_slice %46 {offsets = [0, 14], sizes = [4, 1], strides = [1, 1]} : vector<4x25xf32> to vector<4x1xf32>
    %189 = vector.broadcast %188 : vector<4x1xf32> to vector<4x562xf32>
    %190 = arith.mulf %187, %189 : vector<4x562xf32>
    %191 = arith.addf %186, %190 : vector<4x562xf32>
    %c0_59 = arith.constant 0 : index
    %c121 = arith.constant 121 : index
    %192 = vector.load %arg18[%c0_59, %c121] : memref<4x768xf32, #tpu.memory_space<vmem>>, vector<4x562xf32>
    %193 = vector.extract_strided_slice %46 {offsets = [0, 19], sizes = [4, 1], strides = [1, 1]} : vector<4x25xf32> to vector<4x1xf32>
    %194 = vector.broadcast %193 : vector<4x1xf32> to vector<4x562xf32>
    %195 = arith.mulf %192, %194 : vector<4x562xf32>
    %196 = arith.addf %191, %195 : vector<4x562xf32>
    %c0_60 = arith.constant 0 : index
    %c137 = arith.constant 137 : index
    %197 = vector.load %arg18[%c0_60, %c137] : memref<4x768xf32, #tpu.memory_space<vmem>>, vector<4x562xf32>
    %198 = vector.extract_strided_slice %46 {offsets = [0, 24], sizes = [4, 1], strides = [1, 1]} : vector<4x25xf32> to vector<4x1xf32>
    %199 = vector.broadcast %198 : vector<4x1xf32> to vector<4x562xf32>
    %200 = arith.mulf %197, %199 : vector<4x562xf32>
    %201 = arith.addf %196, %200 : vector<4x562xf32>
    %c4 = arith.constant 4 : index
    %c0_61 = arith.constant 0 : index
    %202 = vector.load %arg4[%c4, %c0_61] : memref<5x562xf32, #tpu.memory_space<vmem>>, vector<1x562xf32>
    %203 = vector.broadcast %202 : vector<1x562xf32> to vector<4x562xf32>
    %204 = arith.mulf %201, %203 : vector<4x562xf32>
    %205 = arith.addf %175, %204 : vector<4x562xf32>
    %c0_62 = arith.constant 0 : index
    %c0_63 = arith.constant 0 : index
    %206 = vector.load %arg3[%c0_62, %c0_63] : memref<1x562xf32, #tpu.memory_space<vmem>>, vector<1x562xf32>
    %207 = vector.broadcast %206 : vector<1x562xf32> to vector<4x562xf32>
    %208 = arith.mulf %205, %207 : vector<4x562xf32>
    %c0_64 = arith.constant 0 : index
    %c0_65 = arith.constant 0 : index
    %209 = vector.load %arg19[%c0_64, %c0_65] : memref<4x562xf32, #tpu.memory_space<vmem>>, vector<4x562xf32>
    tpu.vector_store %arg19[%c0_64, %c0_65], %208 {strides = array<i32>} : memref<4x562xf32, #tpu.memory_space<vmem>>, vector<4x562xf32>,
    %210 = vector.extract_strided_slice %49 {offsets = [0, 1], sizes = [4, 1], strides = [1, 1]} : vector<4x8xf32> to vector<4x1xf32>
    %211 = vector.shape_cast %210 : vector<4x1xf32> to vector<4x1xf32>
    %212 = vector.broadcast %211 : vector<4x1xf32> to vector<4x256xf32>
    %cst_66 = arith.constant 0.000000e+00 : f32
    %213 = vector.broadcast %cst_66 : f32 to vector<4x256xf32>
    %c0_67 = arith.constant 0 : index
    %c0_68 = arith.constant 0 : index
    %214 = vector.load %arg19[%c0_67, %c0_68] : memref<4x562xf32, #tpu.memory_space<vmem>>, vector<4x256xf32>
    %215 = vector.extract_strided_slice %47 {offsets = [0, 0], sizes = [4, 1], strides = [1, 1]} : vector<4x49xf32> to vector<4x1xf32>
    %216 = vector.broadcast %215 : vector<4x1xf32> to vector<4x256xf32>
    %217 = arith.mulf %214, %216 : vector<4x256xf32>
    %218 = arith.addf %213, %217 : vector<4x256xf32>
    %c0_69 = arith.constant 0 : index
    %c48 = arith.constant 48 : index
    %219 = vector.load %arg19[%c0_69, %c48] : memref<4x562xf32, #tpu.memory_space<vmem>>, vector<4x256xf32>
    %220 = vector.extract_strided_slice %47 {offsets = [0, 7], sizes = [4, 1], strides = [1, 1]} : vector<4x49xf32> to vector<4x1xf32>
    %221 = vector.broadcast %220 : vector<4x1xf32> to vector<4x256xf32>
    %222 = arith.mulf %219, %221 : vector<4x256xf32>
    %223 = arith.addf %218, %222 : vector<4x256xf32>
    %c0_70 = arith.constant 0 : index
    %c96 = arith.constant 96 : index
    %224 = vector.load %arg19[%c0_70, %c96] : memref<4x562xf32, #tpu.memory_space<vmem>>, vector<4x256xf32>
    %225 = vector.extract_strided_slice %47 {offsets = [0, 14], sizes = [4, 1], strides = [1, 1]} : vector<4x49xf32> to vector<4x1xf32>
    %226 = vector.broadcast %225 : vector<4x1xf32> to vector<4x256xf32>
    %227 = arith.mulf %224, %226 : vector<4x256xf32>
    %228 = arith.addf %223, %227 : vector<4x256xf32>
    %c0_71 = arith.constant 0 : index
    %c144 = arith.constant 144 : index
    %229 = vector.load %arg19[%c0_71, %c144] : memref<4x562xf32, #tpu.memory_space<vmem>>, vector<4x256xf32>
    %230 = vector.extract_strided_slice %47 {offsets = [0, 21], sizes = [4, 1], strides = [1, 1]} : vector<4x49xf32> to vector<4x1xf32>
    %231 = vector.broadcast %230 : vector<4x1xf32> to vector<4x256xf32>
    %232 = arith.mulf %229, %231 : vector<4x256xf32>
    %233 = arith.addf %228, %232 : vector<4x256xf32>
    %c0_72 = arith.constant 0 : index
    %c192 = arith.constant 192 : index
    %234 = vector.load %arg19[%c0_72, %c192] : memref<4x562xf32, #tpu.memory_space<vmem>>, vector<4x256xf32>
    %235 = vector.extract_strided_slice %47 {offsets = [0, 28], sizes = [4, 1], strides = [1, 1]} : vector<4x49xf32> to vector<4x1xf32>
    %236 = vector.broadcast %235 : vector<4x1xf32> to vector<4x256xf32>
    %237 = arith.mulf %234, %236 : vector<4x256xf32>
    %238 = arith.addf %233, %237 : vector<4x256xf32>
    %c0_73 = arith.constant 0 : index
    %c240 = arith.constant 240 : index
    %239 = vector.load %arg19[%c0_73, %c240] : memref<4x562xf32, #tpu.memory_space<vmem>>, vector<4x256xf32>
    %240 = vector.extract_strided_slice %47 {offsets = [0, 35], sizes = [4, 1], strides = [1, 1]} : vector<4x49xf32> to vector<4x1xf32>
    %241 = vector.broadcast %240 : vector<4x1xf32> to vector<4x256xf32>
    %242 = arith.mulf %239, %241 : vector<4x256xf32>
    %243 = arith.addf %238, %242 : vector<4x256xf32>
    %c0_74 = arith.constant 0 : index
    %c288 = arith.constant 288 : index
    %244 = vector.load %arg19[%c0_74, %c288] : memref<4x562xf32, #tpu.memory_space<vmem>>, vector<4x256xf32>
    %245 = vector.extract_strided_slice %47 {offsets = [0, 42], sizes = [4, 1], strides = [1, 1]} : vector<4x49xf32> to vector<4x1xf32>
    %246 = vector.broadcast %245 : vector<4x1xf32> to vector<4x256xf32>
    %247 = arith.mulf %244, %246 : vector<4x256xf32>
    %248 = arith.addf %243, %247 : vector<4x256xf32>
    %c0_75 = arith.constant 0 : index
    %c0_76 = arith.constant 0 : index
    %249 = vector.load %arg5[%c0_75, %c0_76] : memref<7x256xf32, #tpu.memory_space<vmem>>, vector<1x256xf32>
    %250 = vector.broadcast %249 : vector<1x256xf32> to vector<4x256xf32>
    %251 = arith.mulf %248, %250 : vector<4x256xf32>
    %252 = arith.addf %212, %251 : vector<4x256xf32>
    %cst_77 = arith.constant 0.000000e+00 : f32
    %253 = vector.broadcast %cst_77 : f32 to vector<4x256xf32>
    %c0_78 = arith.constant 0 : index
    %c3_79 = arith.constant 3 : index
    %254 = vector.load %arg19[%c0_78, %c3_79] : memref<4x562xf32, #tpu.memory_space<vmem>>, vector<4x256xf32>
    %255 = vector.extract_strided_slice %47 {offsets = [0, 1], sizes = [4, 1], strides = [1, 1]} : vector<4x49xf32> to vector<4x1xf32>
    %256 = vector.broadcast %255 : vector<4x1xf32> to vector<4x256xf32>
    %257 = arith.mulf %254, %256 : vector<4x256xf32>
    %258 = arith.addf %253, %257 : vector<4x256xf32>
    %c0_80 = arith.constant 0 : index
    %c51 = arith.constant 51 : index
    %259 = vector.load %arg19[%c0_80, %c51] : memref<4x562xf32, #tpu.memory_space<vmem>>, vector<4x256xf32>
    %260 = vector.extract_strided_slice %47 {offsets = [0, 8], sizes = [4, 1], strides = [1, 1]} : vector<4x49xf32> to vector<4x1xf32>
    %261 = vector.broadcast %260 : vector<4x1xf32> to vector<4x256xf32>
    %262 = arith.mulf %259, %261 : vector<4x256xf32>
    %263 = arith.addf %258, %262 : vector<4x256xf32>
    %c0_81 = arith.constant 0 : index
    %c99 = arith.constant 99 : index
    %264 = vector.load %arg19[%c0_81, %c99] : memref<4x562xf32, #tpu.memory_space<vmem>>, vector<4x256xf32>
    %265 = vector.extract_strided_slice %47 {offsets = [0, 15], sizes = [4, 1], strides = [1, 1]} : vector<4x49xf32> to vector<4x1xf32>
    %266 = vector.broadcast %265 : vector<4x1xf32> to vector<4x256xf32>
    %267 = arith.mulf %264, %266 : vector<4x256xf32>
    %268 = arith.addf %263, %267 : vector<4x256xf32>
    %c0_82 = arith.constant 0 : index
    %c147 = arith.constant 147 : index
    %269 = vector.load %arg19[%c0_82, %c147] : memref<4x562xf32, #tpu.memory_space<vmem>>, vector<4x256xf32>
    %270 = vector.extract_strided_slice %47 {offsets = [0, 22], sizes = [4, 1], strides = [1, 1]} : vector<4x49xf32> to vector<4x1xf32>
    %271 = vector.broadcast %270 : vector<4x1xf32> to vector<4x256xf32>
    %272 = arith.mulf %269, %271 : vector<4x256xf32>
    %273 = arith.addf %268, %272 : vector<4x256xf32>
    %c0_83 = arith.constant 0 : index
    %c195 = arith.constant 195 : index
    %274 = vector.load %arg19[%c0_83, %c195] : memref<4x562xf32, #tpu.memory_space<vmem>>, vector<4x256xf32>
    %275 = vector.extract_strided_slice %47 {offsets = [0, 29], sizes = [4, 1], strides = [1, 1]} : vector<4x49xf32> to vector<4x1xf32>
    %276 = vector.broadcast %275 : vector<4x1xf32> to vector<4x256xf32>
    %277 = arith.mulf %274, %276 : vector<4x256xf32>
    %278 = arith.addf %273, %277 : vector<4x256xf32>
    %c0_84 = arith.constant 0 : index
    %c243 = arith.constant 243 : index
    %279 = vector.load %arg19[%c0_84, %c243] : memref<4x562xf32, #tpu.memory_space<vmem>>, vector<4x256xf32>
    %280 = vector.extract_strided_slice %47 {offsets = [0, 36], sizes = [4, 1], strides = [1, 1]} : vector<4x49xf32> to vector<4x1xf32>
    %281 = vector.broadcast %280 : vector<4x1xf32> to vector<4x256xf32>
    %282 = arith.mulf %279, %281 : vector<4x256xf32>
    %283 = arith.addf %278, %282 : vector<4x256xf32>
    %c0_85 = arith.constant 0 : index
    %c291 = arith.constant 291 : index
    %284 = vector.load %arg19[%c0_85, %c291] : memref<4x562xf32, #tpu.memory_space<vmem>>, vector<4x256xf32>
    %285 = vector.extract_strided_slice %47 {offsets = [0, 43], sizes = [4, 1], strides = [1, 1]} : vector<4x49xf32> to vector<4x1xf32>
    %286 = vector.broadcast %285 : vector<4x1xf32> to vector<4x256xf32>
    %287 = arith.mulf %284, %286 : vector<4x256xf32>
    %288 = arith.addf %283, %287 : vector<4x256xf32>
    %c1_86 = arith.constant 1 : index
    %c0_87 = arith.constant 0 : index
    %289 = vector.load %arg5[%c1_86, %c0_87] : memref<7x256xf32, #tpu.memory_space<vmem>>, vector<1x256xf32>
    %290 = vector.broadcast %289 : vector<1x256xf32> to vector<4x256xf32>
    %291 = arith.mulf %288, %290 : vector<4x256xf32>
    %292 = arith.addf %252, %291 : vector<4x256xf32>
    %cst_88 = arith.constant 0.000000e+00 : f32
    %293 = vector.broadcast %cst_88 : f32 to vector<4x256xf32>
    %c0_89 = arith.constant 0 : index
    %c6 = arith.constant 6 : index
    %294 = vector.load %arg19[%c0_89, %c6] : memref<4x562xf32, #tpu.memory_space<vmem>>, vector<4x256xf32>
    %295 = vector.extract_strided_slice %47 {offsets = [0, 2], sizes = [4, 1], strides = [1, 1]} : vector<4x49xf32> to vector<4x1xf32>
    %296 = vector.broadcast %295 : vector<4x1xf32> to vector<4x256xf32>
    %297 = arith.mulf %294, %296 : vector<4x256xf32>
    %298 = arith.addf %293, %297 : vector<4x256xf32>
    %c0_90 = arith.constant 0 : index
    %c54 = arith.constant 54 : index
    %299 = vector.load %arg19[%c0_90, %c54] : memref<4x562xf32, #tpu.memory_space<vmem>>, vector<4x256xf32>
    %300 = vector.extract_strided_slice %47 {offsets = [0, 9], sizes = [4, 1], strides = [1, 1]} : vector<4x49xf32> to vector<4x1xf32>
    %301 = vector.broadcast %300 : vector<4x1xf32> to vector<4x256xf32>
    %302 = arith.mulf %299, %301 : vector<4x256xf32>
    %303 = arith.addf %298, %302 : vector<4x256xf32>
    %c0_91 = arith.constant 0 : index
    %c102_92 = arith.constant 102 : index
    %304 = vector.load %arg19[%c0_91, %c102_92] : memref<4x562xf32, #tpu.memory_space<vmem>>, vector<4x256xf32>
    %305 = vector.extract_strided_slice %47 {offsets = [0, 16], sizes = [4, 1], strides = [1, 1]} : vector<4x49xf32> to vector<4x1xf32>
    %306 = vector.broadcast %305 : vector<4x1xf32> to vector<4x256xf32>
    %307 = arith.mulf %304, %306 : vector<4x256xf32>
    %308 = arith.addf %303, %307 : vector<4x256xf32>
    %c0_93 = arith.constant 0 : index
    %c150 = arith.constant 150 : index
    %309 = vector.load %arg19[%c0_93, %c150] : memref<4x562xf32, #tpu.memory_space<vmem>>, vector<4x256xf32>
    %310 = vector.extract_strided_slice %47 {offsets = [0, 23], sizes = [4, 1], strides = [1, 1]} : vector<4x49xf32> to vector<4x1xf32>
    %311 = vector.broadcast %310 : vector<4x1xf32> to vector<4x256xf32>
    %312 = arith.mulf %309, %311 : vector<4x256xf32>
    %313 = arith.addf %308, %312 : vector<4x256xf32>
    %c0_94 = arith.constant 0 : index
    %c198 = arith.constant 198 : index
    %314 = vector.load %arg19[%c0_94, %c198] : memref<4x562xf32, #tpu.memory_space<vmem>>, vector<4x256xf32>
    %315 = vector.extract_strided_slice %47 {offsets = [0, 30], sizes = [4, 1], strides = [1, 1]} : vector<4x49xf32> to vector<4x1xf32>
    %316 = vector.broadcast %315 : vector<4x1xf32> to vector<4x256xf32>
    %317 = arith.mulf %314, %316 : vector<4x256xf32>
    %318 = arith.addf %313, %317 : vector<4x256xf32>
    %c0_95 = arith.constant 0 : index
    %c246 = arith.constant 246 : index
    %319 = vector.load %arg19[%c0_95, %c246] : memref<4x562xf32, #tpu.memory_space<vmem>>, vector<4x256xf32>
    %320 = vector.extract_strided_slice %47 {offsets = [0, 37], sizes = [4, 1], strides = [1, 1]} : vector<4x49xf32> to vector<4x1xf32>
    %321 = vector.broadcast %320 : vector<4x1xf32> to vector<4x256xf32>
    %322 = arith.mulf %319, %321 : vector<4x256xf32>
    %323 = arith.addf %318, %322 : vector<4x256xf32>
    %c0_96 = arith.constant 0 : index
    %c294 = arith.constant 294 : index
    %324 = vector.load %arg19[%c0_96, %c294] : memref<4x562xf32, #tpu.memory_space<vmem>>, vector<4x256xf32>
    %325 = vector.extract_strided_slice %47 {offsets = [0, 44], sizes = [4, 1], strides = [1, 1]} : vector<4x49xf32> to vector<4x1xf32>
    %326 = vector.broadcast %325 : vector<4x1xf32> to vector<4x256xf32>
    %327 = arith.mulf %324, %326 : vector<4x256xf32>
    %328 = arith.addf %323, %327 : vector<4x256xf32>
    %c2_97 = arith.constant 2 : index
    %c0_98 = arith.constant 0 : index
    %329 = vector.load %arg5[%c2_97, %c0_98] : memref<7x256xf32, #tpu.memory_space<vmem>>, vector<1x256xf32>
    %330 = vector.broadcast %329 : vector<1x256xf32> to vector<4x256xf32>
    %331 = arith.mulf %328, %330 : vector<4x256xf32>
    %332 = arith.addf %292, %331 : vector<4x256xf32>
    %cst_99 = arith.constant 0.000000e+00 : f32
    %333 = vector.broadcast %cst_99 : f32 to vector<4x256xf32>
    %c0_100 = arith.constant 0 : index
    %c9 = arith.constant 9 : index
    %334 = vector.load %arg19[%c0_100, %c9] : memref<4x562xf32, #tpu.memory_space<vmem>>, vector<4x256xf32>
    %335 = vector.extract_strided_slice %47 {offsets = [0, 3], sizes = [4, 1], strides = [1, 1]} : vector<4x49xf32> to vector<4x1xf32>
    %336 = vector.broadcast %335 : vector<4x1xf32> to vector<4x256xf32>
    %337 = arith.mulf %334, %336 : vector<4x256xf32>
    %338 = arith.addf %333, %337 : vector<4x256xf32>
    %c0_101 = arith.constant 0 : index
    %c57 = arith.constant 57 : index
    %339 = vector.load %arg19[%c0_101, %c57] : memref<4x562xf32, #tpu.memory_space<vmem>>, vector<4x256xf32>
    %340 = vector.extract_strided_slice %47 {offsets = [0, 10], sizes = [4, 1], strides = [1, 1]} : vector<4x49xf32> to vector<4x1xf32>
    %341 = vector.broadcast %340 : vector<4x1xf32> to vector<4x256xf32>
    %342 = arith.mulf %339, %341 : vector<4x256xf32>
    %343 = arith.addf %338, %342 : vector<4x256xf32>
    %c0_102 = arith.constant 0 : index
    %c105_103 = arith.constant 105 : index
    %344 = vector.load %arg19[%c0_102, %c105_103] : memref<4x562xf32, #tpu.memory_space<vmem>>, vector<4x256xf32>
    %345 = vector.extract_strided_slice %47 {offsets = [0, 17], sizes = [4, 1], strides = [1, 1]} : vector<4x49xf32> to vector<4x1xf32>
    %346 = vector.broadcast %345 : vector<4x1xf32> to vector<4x256xf32>
    %347 = arith.mulf %344, %346 : vector<4x256xf32>
    %348 = arith.addf %343, %347 : vector<4x256xf32>
    %c0_104 = arith.constant 0 : index
    %c153 = arith.constant 153 : index
    %349 = vector.load %arg19[%c0_104, %c153] : memref<4x562xf32, #tpu.memory_space<vmem>>, vector<4x256xf32>
    %350 = vector.extract_strided_slice %47 {offsets = [0, 24], sizes = [4, 1], strides = [1, 1]} : vector<4x49xf32> to vector<4x1xf32>
    %351 = vector.broadcast %350 : vector<4x1xf32> to vector<4x256xf32>
    %352 = arith.mulf %349, %351 : vector<4x256xf32>
    %353 = arith.addf %348, %352 : vector<4x256xf32>
    %c0_105 = arith.constant 0 : index
    %c201 = arith.constant 201 : index
    %354 = vector.load %arg19[%c0_105, %c201] : memref<4x562xf32, #tpu.memory_space<vmem>>, vector<4x256xf32>
    %355 = vector.extract_strided_slice %47 {offsets = [0, 31], sizes = [4, 1], strides = [1, 1]} : vector<4x49xf32> to vector<4x1xf32>
    %356 = vector.broadcast %355 : vector<4x1xf32> to vector<4x256xf32>
    %357 = arith.mulf %354, %356 : vector<4x256xf32>
    %358 = arith.addf %353, %357 : vector<4x256xf32>
    %c0_106 = arith.constant 0 : index
    %c249 = arith.constant 249 : index
    %359 = vector.load %arg19[%c0_106, %c249] : memref<4x562xf32, #tpu.memory_space<vmem>>, vector<4x256xf32>
    %360 = vector.extract_strided_slice %47 {offsets = [0, 38], sizes = [4, 1], strides = [1, 1]} : vector<4x49xf32> to vector<4x1xf32>
    %361 = vector.broadcast %360 : vector<4x1xf32> to vector<4x256xf32>
    %362 = arith.mulf %359, %361 : vector<4x256xf32>
    %363 = arith.addf %358, %362 : vector<4x256xf32>
    %c0_107 = arith.constant 0 : index
    %c297 = arith.constant 297 : index
    %364 = vector.load %arg19[%c0_107, %c297] : memref<4x562xf32, #tpu.memory_space<vmem>>, vector<4x256xf32>
    %365 = vector.extract_strided_slice %47 {offsets = [0, 45], sizes = [4, 1], strides = [1, 1]} : vector<4x49xf32> to vector<4x1xf32>
    %366 = vector.broadcast %365 : vector<4x1xf32> to vector<4x256xf32>
    %367 = arith.mulf %364, %366 : vector<4x256xf32>
    %368 = arith.addf %363, %367 : vector<4x256xf32>
    %c3_108 = arith.constant 3 : index
    %c0_109 = arith.constant 0 : index
    %369 = vector.load %arg5[%c3_108, %c0_109] : memref<7x256xf32, #tpu.memory_space<vmem>>, vector<1x256xf32>
    %370 = vector.broadcast %369 : vector<1x256xf32> to vector<4x256xf32>
    %371 = arith.mulf %368, %370 : vector<4x256xf32>
    %372 = arith.addf %332, %371 : vector<4x256xf32>
    %cst_110 = arith.constant 0.000000e+00 : f32
    %373 = vector.broadcast %cst_110 : f32 to vector<4x256xf32>
    %c0_111 = arith.constant 0 : index
    %c12 = arith.constant 12 : index
    %374 = vector.load %arg19[%c0_111, %c12] : memref<4x562xf32, #tpu.memory_space<vmem>>, vector<4x256xf32>
    %375 = vector.extract_strided_slice %47 {offsets = [0, 4], sizes = [4, 1], strides = [1, 1]} : vector<4x49xf32> to vector<4x1xf32>
    %376 = vector.broadcast %375 : vector<4x1xf32> to vector<4x256xf32>
    %377 = arith.mulf %374, %376 : vector<4x256xf32>
    %378 = arith.addf %373, %377 : vector<4x256xf32>
    %c0_112 = arith.constant 0 : index
    %c60 = arith.constant 60 : index
    %379 = vector.load %arg19[%c0_112, %c60] : memref<4x562xf32, #tpu.memory_space<vmem>>, vector<4x256xf32>
    %380 = vector.extract_strided_slice %47 {offsets = [0, 11], sizes = [4, 1], strides = [1, 1]} : vector<4x49xf32> to vector<4x1xf32>
    %381 = vector.broadcast %380 : vector<4x1xf32> to vector<4x256xf32>
    %382 = arith.mulf %379, %381 : vector<4x256xf32>
    %383 = arith.addf %378, %382 : vector<4x256xf32>
    %c0_113 = arith.constant 0 : index
    %c108 = arith.constant 108 : index
    %384 = vector.load %arg19[%c0_113, %c108] : memref<4x562xf32, #tpu.memory_space<vmem>>, vector<4x256xf32>
    %385 = vector.extract_strided_slice %47 {offsets = [0, 18], sizes = [4, 1], strides = [1, 1]} : vector<4x49xf32> to vector<4x1xf32>
    %386 = vector.broadcast %385 : vector<4x1xf32> to vector<4x256xf32>
    %387 = arith.mulf %384, %386 : vector<4x256xf32>
    %388 = arith.addf %383, %387 : vector<4x256xf32>
    %c0_114 = arith.constant 0 : index
    %c156 = arith.constant 156 : index
    %389 = vector.load %arg19[%c0_114, %c156] : memref<4x562xf32, #tpu.memory_space<vmem>>, vector<4x256xf32>
    %390 = vector.extract_strided_slice %47 {offsets = [0, 25], sizes = [4, 1], strides = [1, 1]} : vector<4x49xf32> to vector<4x1xf32>
    %391 = vector.broadcast %390 : vector<4x1xf32> to vector<4x256xf32>
    %392 = arith.mulf %389, %391 : vector<4x256xf32>
    %393 = arith.addf %388, %392 : vector<4x256xf32>
    %c0_115 = arith.constant 0 : index
    %c204 = arith.constant 204 : index
    %394 = vector.load %arg19[%c0_115, %c204] : memref<4x562xf32, #tpu.memory_space<vmem>>, vector<4x256xf32>
    %395 = vector.extract_strided_slice %47 {offsets = [0, 32], sizes = [4, 1], strides = [1, 1]} : vector<4x49xf32> to vector<4x1xf32>
    %396 = vector.broadcast %395 : vector<4x1xf32> to vector<4x256xf32>
    %397 = arith.mulf %394, %396 : vector<4x256xf32>
    %398 = arith.addf %393, %397 : vector<4x256xf32>
    %c0_116 = arith.constant 0 : index
    %c252 = arith.constant 252 : index
    %399 = vector.load %arg19[%c0_116, %c252] : memref<4x562xf32, #tpu.memory_space<vmem>>, vector<4x256xf32>
    %400 = vector.extract_strided_slice %47 {offsets = [0, 39], sizes = [4, 1], strides = [1, 1]} : vector<4x49xf32> to vector<4x1xf32>
    %401 = vector.broadcast %400 : vector<4x1xf32> to vector<4x256xf32>
    %402 = arith.mulf %399, %401 : vector<4x256xf32>
    %403 = arith.addf %398, %402 : vector<4x256xf32>
    %c0_117 = arith.constant 0 : index
    %c300 = arith.constant 300 : index
    %404 = vector.load %arg19[%c0_117, %c300] : memref<4x562xf32, #tpu.memory_space<vmem>>, vector<4x256xf32>
    %405 = vector.extract_strided_slice %47 {offsets = [0, 46], sizes = [4, 1], strides = [1, 1]} : vector<4x49xf32> to vector<4x1xf32>
    %406 = vector.broadcast %405 : vector<4x1xf32> to vector<4x256xf32>
    %407 = arith.mulf %404, %406 : vector<4x256xf32>
    %408 = arith.addf %403, %407 : vector<4x256xf32>
    %c4_118 = arith.constant 4 : index
    %c0_119 = arith.constant 0 : index
    %409 = vector.load %arg5[%c4_118, %c0_119] : memref<7x256xf32, #tpu.memory_space<vmem>>, vector<1x256xf32>
    %410 = vector.broadcast %409 : vector<1x256xf32> to vector<4x256xf32>
    %411 = arith.mulf %408, %410 : vector<4x256xf32>
    %412 = arith.addf %372, %411 : vector<4x256xf32>
    %cst_120 = arith.constant 0.000000e+00 : f32
    %413 = vector.broadcast %cst_120 : f32 to vector<4x256xf32>
    %c0_121 = arith.constant 0 : index
    %c15 = arith.constant 15 : index
    %414 = vector.load %arg19[%c0_121, %c15] : memref<4x562xf32, #tpu.memory_space<vmem>>, vector<4x256xf32>
    %415 = vector.extract_strided_slice %47 {offsets = [0, 5], sizes = [4, 1], strides = [1, 1]} : vector<4x49xf32> to vector<4x1xf32>
    %416 = vector.broadcast %415 : vector<4x1xf32> to vector<4x256xf32>
    %417 = arith.mulf %414, %416 : vector<4x256xf32>
    %418 = arith.addf %413, %417 : vector<4x256xf32>
    %c0_122 = arith.constant 0 : index
    %c63 = arith.constant 63 : index
    %419 = vector.load %arg19[%c0_122, %c63] : memref<4x562xf32, #tpu.memory_space<vmem>>, vector<4x256xf32>
    %420 = vector.extract_strided_slice %47 {offsets = [0, 12], sizes = [4, 1], strides = [1, 1]} : vector<4x49xf32> to vector<4x1xf32>
    %421 = vector.broadcast %420 : vector<4x1xf32> to vector<4x256xf32>
    %422 = arith.mulf %419, %421 : vector<4x256xf32>
    %423 = arith.addf %418, %422 : vector<4x256xf32>
    %c0_123 = arith.constant 0 : index
    %c111 = arith.constant 111 : index
    %424 = vector.load %arg19[%c0_123, %c111] : memref<4x562xf32, #tpu.memory_space<vmem>>, vector<4x256xf32>
    %425 = vector.extract_strided_slice %47 {offsets = [0, 19], sizes = [4, 1], strides = [1, 1]} : vector<4x49xf32> to vector<4x1xf32>
    %426 = vector.broadcast %425 : vector<4x1xf32> to vector<4x256xf32>
    %427 = arith.mulf %424, %426 : vector<4x256xf32>
    %428 = arith.addf %423, %427 : vector<4x256xf32>
    %c0_124 = arith.constant 0 : index
    %c159 = arith.constant 159 : index
    %429 = vector.load %arg19[%c0_124, %c159] : memref<4x562xf32, #tpu.memory_space<vmem>>, vector<4x256xf32>
    %430 = vector.extract_strided_slice %47 {offsets = [0, 26], sizes = [4, 1], strides = [1, 1]} : vector<4x49xf32> to vector<4x1xf32>
    %431 = vector.broadcast %430 : vector<4x1xf32> to vector<4x256xf32>
    %432 = arith.mulf %429, %431 : vector<4x256xf32>
    %433 = arith.addf %428, %432 : vector<4x256xf32>
    %c0_125 = arith.constant 0 : index
    %c207 = arith.constant 207 : index
    %434 = vector.load %arg19[%c0_125, %c207] : memref<4x562xf32, #tpu.memory_space<vmem>>, vector<4x256xf32>
    %435 = vector.extract_strided_slice %47 {offsets = [0, 33], sizes = [4, 1], strides = [1, 1]} : vector<4x49xf32> to vector<4x1xf32>
    %436 = vector.broadcast %435 : vector<4x1xf32> to vector<4x256xf32>
    %437 = arith.mulf %434, %436 : vector<4x256xf32>
    %438 = arith.addf %433, %437 : vector<4x256xf32>
    %c0_126 = arith.constant 0 : index
    %c255 = arith.constant 255 : index
    %439 = vector.load %arg19[%c0_126, %c255] : memref<4x562xf32, #tpu.memory_space<vmem>>, vector<4x256xf32>
    %440 = vector.extract_strided_slice %47 {offsets = [0, 40], sizes = [4, 1], strides = [1, 1]} : vector<4x49xf32> to vector<4x1xf32>
    %441 = vector.broadcast %440 : vector<4x1xf32> to vector<4x256xf32>
    %442 = arith.mulf %439, %441 : vector<4x256xf32>
    %443 = arith.addf %438, %442 : vector<4x256xf32>
    %c0_127 = arith.constant 0 : index
    %c303 = arith.constant 303 : index
    %444 = vector.load %arg19[%c0_127, %c303] : memref<4x562xf32, #tpu.memory_space<vmem>>, vector<4x256xf32>
    %445 = vector.extract_strided_slice %47 {offsets = [0, 47], sizes = [4, 1], strides = [1, 1]} : vector<4x49xf32> to vector<4x1xf32>
    %446 = vector.broadcast %445 : vector<4x1xf32> to vector<4x256xf32>
    %447 = arith.mulf %444, %446 : vector<4x256xf32>
    %448 = arith.addf %443, %447 : vector<4x256xf32>
    %c5 = arith.constant 5 : index
    %c0_128 = arith.constant 0 : index
    %449 = vector.load %arg5[%c5, %c0_128] : memref<7x256xf32, #tpu.memory_space<vmem>>, vector<1x256xf32>
    %450 = vector.broadcast %449 : vector<1x256xf32> to vector<4x256xf32>
    %451 = arith.mulf %448, %450 : vector<4x256xf32>
    %452 = arith.addf %412, %451 : vector<4x256xf32>
    %cst_129 = arith.constant 0.000000e+00 : f32
    %453 = vector.broadcast %cst_129 : f32 to vector<4x256xf32>
    %c0_130 = arith.constant 0 : index
    %c18 = arith.constant 18 : index
    %454 = vector.load %arg19[%c0_130, %c18] : memref<4x562xf32, #tpu.memory_space<vmem>>, vector<4x256xf32>
    %455 = vector.extract_strided_slice %47 {offsets = [0, 6], sizes = [4, 1], strides = [1, 1]} : vector<4x49xf32> to vector<4x1xf32>
    %456 = vector.broadcast %455 : vector<4x1xf32> to vector<4x256xf32>
    %457 = arith.mulf %454, %456 : vector<4x256xf32>
    %458 = arith.addf %453, %457 : vector<4x256xf32>
    %c0_131 = arith.constant 0 : index
    %c66 = arith.constant 66 : index
    %459 = vector.load %arg19[%c0_131, %c66] : memref<4x562xf32, #tpu.memory_space<vmem>>, vector<4x256xf32>
    %460 = vector.extract_strided_slice %47 {offsets = [0, 13], sizes = [4, 1], strides = [1, 1]} : vector<4x49xf32> to vector<4x1xf32>
    %461 = vector.broadcast %460 : vector<4x1xf32> to vector<4x256xf32>
    %462 = arith.mulf %459, %461 : vector<4x256xf32>
    %463 = arith.addf %458, %462 : vector<4x256xf32>
    %c0_132 = arith.constant 0 : index
    %c114 = arith.constant 114 : index
    %464 = vector.load %arg19[%c0_132, %c114] : memref<4x562xf32, #tpu.memory_space<vmem>>, vector<4x256xf32>
    %465 = vector.extract_strided_slice %47 {offsets = [0, 20], sizes = [4, 1], strides = [1, 1]} : vector<4x49xf32> to vector<4x1xf32>
    %466 = vector.broadcast %465 : vector<4x1xf32> to vector<4x256xf32>
    %467 = arith.mulf %464, %466 : vector<4x256xf32>
    %468 = arith.addf %463, %467 : vector<4x256xf32>
    %c0_133 = arith.constant 0 : index
    %c162 = arith.constant 162 : index
    %469 = vector.load %arg19[%c0_133, %c162] : memref<4x562xf32, #tpu.memory_space<vmem>>, vector<4x256xf32>
    %470 = vector.extract_strided_slice %47 {offsets = [0, 27], sizes = [4, 1], strides = [1, 1]} : vector<4x49xf32> to vector<4x1xf32>
    %471 = vector.broadcast %470 : vector<4x1xf32> to vector<4x256xf32>
    %472 = arith.mulf %469, %471 : vector<4x256xf32>
    %473 = arith.addf %468, %472 : vector<4x256xf32>
    %c0_134 = arith.constant 0 : index
    %c210 = arith.constant 210 : index
    %474 = vector.load %arg19[%c0_134, %c210] : memref<4x562xf32, #tpu.memory_space<vmem>>, vector<4x256xf32>
    %475 = vector.extract_strided_slice %47 {offsets = [0, 34], sizes = [4, 1], strides = [1, 1]} : vector<4x49xf32> to vector<4x1xf32>
    %476 = vector.broadcast %475 : vector<4x1xf32> to vector<4x256xf32>
    %477 = arith.mulf %474, %476 : vector<4x256xf32>
    %478 = arith.addf %473, %477 : vector<4x256xf32>
    %c0_135 = arith.constant 0 : index
    %c258 = arith.constant 258 : index
    %479 = vector.load %arg19[%c0_135, %c258] : memref<4x562xf32, #tpu.memory_space<vmem>>, vector<4x256xf32>
    %480 = vector.extract_strided_slice %47 {offsets = [0, 41], sizes = [4, 1], strides = [1, 1]} : vector<4x49xf32> to vector<4x1xf32>
    %481 = vector.broadcast %480 : vector<4x1xf32> to vector<4x256xf32>
    %482 = arith.mulf %479, %481 : vector<4x256xf32>
    %483 = arith.addf %478, %482 : vector<4x256xf32>
    %c0_136 = arith.constant 0 : index
    %c306 = arith.constant 306 : index
    %484 = vector.load %arg19[%c0_136, %c306] : memref<4x562xf32, #tpu.memory_space<vmem>>, vector<4x256xf32>
    %485 = vector.extract_strided_slice %47 {offsets = [0, 48], sizes = [4, 1], strides = [1, 1]} : vector<4x49xf32> to vector<4x1xf32>
    %486 = vector.broadcast %485 : vector<4x1xf32> to vector<4x256xf32>
    %487 = arith.mulf %484, %486 : vector<4x256xf32>
    %488 = arith.addf %483, %487 : vector<4x256xf32>
    %c6_137 = arith.constant 6 : index
    %c0_138 = arith.constant 0 : index
    %489 = vector.load %arg5[%c6_137, %c0_138] : memref<7x256xf32, #tpu.memory_space<vmem>>, vector<1x256xf32>
    %490 = vector.broadcast %489 : vector<1x256xf32> to vector<4x256xf32>
    %491 = arith.mulf %488, %490 : vector<4x256xf32>
    %492 = arith.addf %452, %491 : vector<4x256xf32>
    %493 = vector.extract_strided_slice %49 {offsets = [0, 2], sizes = [4, 1], strides = [1, 1]} : vector<4x8xf32> to vector<4x1xf32>
    %494 = vector.shape_cast %493 : vector<4x1xf32> to vector<4x1xf32>
    %495 = vector.broadcast %494 : vector<4x1xf32> to vector<4x256xf32>
    %496 = vector.extract_strided_slice %492 {offsets = [0, 0], sizes = [1, 256], strides = [1, 1]} : vector<4x256xf32> to vector<1x256xf32>
    %497 = vector.extract_strided_slice %48 {offsets = [0, 0], sizes = [4, 1], strides = [1, 1]} : vector<4x4xf32> to vector<4x1xf32>
    %498 = vector.broadcast %496 : vector<1x256xf32> to vector<4x256xf32>
    %499 = vector.broadcast %497 : vector<4x1xf32> to vector<4x256xf32>
    %500 = arith.mulf %498, %499 : vector<4x256xf32>
    %501 = arith.addf %495, %500 : vector<4x256xf32>
    %502 = vector.extract_strided_slice %492 {offsets = [1, 0], sizes = [1, 256], strides = [1, 1]} : vector<4x256xf32> to vector<1x256xf32>
    %503 = vector.extract_strided_slice %48 {offsets = [0, 1], sizes = [4, 1], strides = [1, 1]} : vector<4x4xf32> to vector<4x1xf32>
    %504 = vector.broadcast %502 : vector<1x256xf32> to vector<4x256xf32>
    %505 = vector.broadcast %503 : vector<4x1xf32> to vector<4x256xf32>
    %506 = arith.mulf %504, %505 : vector<4x256xf32>
    %507 = arith.addf %501, %506 : vector<4x256xf32>
    %508 = vector.extract_strided_slice %492 {offsets = [2, 0], sizes = [1, 256], strides = [1, 1]} : vector<4x256xf32> to vector<1x256xf32>
    %509 = vector.extract_strided_slice %48 {offsets = [0, 2], sizes = [4, 1], strides = [1, 1]} : vector<4x4xf32> to vector<4x1xf32>
    %510 = vector.broadcast %508 : vector<1x256xf32> to vector<4x256xf32>
    %511 = vector.broadcast %509 : vector<4x1xf32> to vector<4x256xf32>
    %512 = arith.mulf %510, %511 : vector<4x256xf32>
    %513 = arith.addf %507, %512 : vector<4x256xf32>
    %514 = vector.extract_strided_slice %492 {offsets = [3, 0], sizes = [1, 256], strides = [1, 1]} : vector<4x256xf32> to vector<1x256xf32>
    %515 = vector.extract_strided_slice %48 {offsets = [0, 3], sizes = [4, 1], strides = [1, 1]} : vector<4x4xf32> to vector<4x1xf32>
    %516 = vector.broadcast %514 : vector<1x256xf32> to vector<4x256xf32>
    %517 = vector.broadcast %515 : vector<4x1xf32> to vector<4x256xf32>
    %518 = arith.mulf %516, %517 : vector<4x256xf32>
    %519 = arith.addf %513, %518 : vector<4x256xf32>
    %520 = arith.mulf %1, %519 : vector<4x256xf32>
    %521 = vector.extract_strided_slice %49 {offsets = [0, 3], sizes = [4, 1], strides = [1, 1]} : vector<4x8xf32> to vector<4x1xf32>
    %522 = vector.broadcast %521 : vector<4x1xf32> to vector<4x256xf32>
    %523 = arith.mulf %520, %522 : vector<4x256xf32>
    %524 = vector.extract_strided_slice %49 {offsets = [0, 4], sizes = [4, 1], strides = [1, 1]} : vector<4x8xf32> to vector<4x1xf32>
    %525 = vector.broadcast %524 : vector<4x1xf32> to vector<4x256xf32>
    %526 = arith.addf %523, %525 : vector<4x256xf32>
    %cst_139 = arith.constant 0.000000e+00 : f32
    %527 = vector.broadcast %cst_139 : f32 to vector<4x256xf32>
    %528 = arith.maximumf %526, %527 : vector<4x256xf32>
    %529 = vector.broadcast %45 : vector<4x1xf32> to vector<4x256xf32>
    %530 = arith.mulf %528, %529 : vector<4x256xf32>
    %c0_140 = arith.constant 0 : index
    %c0_141 = arith.constant 0 : index
    %c0_142 = arith.constant 0 : index
    %531 = vector.load %arg16[%c0_140, %c0_141, %c0_142] : memref<1x4x256xf32, #tpu.memory_space<vmem>>, vector<1x4x256xf32>
    %532 = vector.shape_cast %531 : vector<1x4x256xf32> to vector<4x256xf32>
    %533 = vector.shape_cast %530 : vector<4x256xf32> to vector<1x4x256xf32>
    tpu.vector_store %arg16[%c0_140, %c0_141, %c0_142], %533 {strides = array<i32>} : memref<1x4x256xf32, #tpu.memory_space<vmem>>, vector<1x4x256xf32>,
    %c0_143 = arith.constant 0 : index
    %c0_144 = arith.constant 0 : index
    %534 = vector.load %arg14[%c0_143, %c0_144] : memref<4x4xf32, #tpu.memory_space<vmem>>, vector<4x4xf32>
    %c0_145 = arith.constant 0 : index
    %c0_146 = arith.constant 0 : index
    %535 = vector.load %arg15[%c0_145, %c0_146] : memref<4x8xf32, #tpu.memory_space<vmem>>, vector<4x8xf32>
    %536 = vector.extract_strided_slice %535 {offsets = [0, 5], sizes = [4, 1], strides = [1, 1]} : vector<4x8xf32> to vector<4x1xf32>
    %537 = vector.extract_strided_slice %534 {offsets = [0, 0], sizes = [4, 1], strides = [1, 1]} : vector<4x4xf32> to vector<4x1xf32>
    %538 = vector.extract_strided_slice %7 {offsets = [0, 0], sizes = [1, 1], strides = [1, 1]} : vector<4x1xf32> to vector<1x1xf32>
    %539 = vector.broadcast %538 : vector<1x1xf32> to vector<4x1xf32>
    %540 = arith.mulf %537, %539 : vector<4x1xf32>
    %541 = arith.addf %536, %540 : vector<4x1xf32>
    %542 = vector.extract_strided_slice %534 {offsets = [0, 1], sizes = [4, 1], strides = [1, 1]} : vector<4x4xf32> to vector<4x1xf32>
    %543 = vector.extract_strided_slice %7 {offsets = [1, 0], sizes = [1, 1], strides = [1, 1]} : vector<4x1xf32> to vector<1x1xf32>
    %544 = vector.broadcast %543 : vector<1x1xf32> to vector<4x1xf32>
    %545 = arith.mulf %542, %544 : vector<4x1xf32>
    %546 = arith.addf %541, %545 : vector<4x1xf32>
    %547 = vector.extract_strided_slice %534 {offsets = [0, 2], sizes = [4, 1], strides = [1, 1]} : vector<4x4xf32> to vector<4x1xf32>
    %548 = vector.extract_strided_slice %7 {offsets = [2, 0], sizes = [1, 1], strides = [1, 1]} : vector<4x1xf32> to vector<1x1xf32>
    %549 = vector.broadcast %548 : vector<1x1xf32> to vector<4x1xf32>
    %550 = arith.mulf %547, %549 : vector<4x1xf32>
    %551 = arith.addf %546, %550 : vector<4x1xf32>
    %552 = vector.extract_strided_slice %534 {offsets = [0, 3], sizes = [4, 1], strides = [1, 1]} : vector<4x4xf32> to vector<4x1xf32>
    %553 = vector.extract_strided_slice %7 {offsets = [3, 0], sizes = [1, 1], strides = [1, 1]} : vector<4x1xf32> to vector<1x1xf32>
    %554 = vector.broadcast %553 : vector<1x1xf32> to vector<4x1xf32>
    %555 = arith.mulf %552, %554 : vector<4x1xf32>
    %556 = arith.addf %551, %555 : vector<4x1xf32>
    %557 = vector.extract_strided_slice %535 {offsets = [0, 6], sizes = [4, 1], strides = [1, 1]} : vector<4x8xf32> to vector<4x1xf32>
    %558 = arith.mulf %556, %557 : vector<4x1xf32>
    %559 = vector.extract_strided_slice %535 {offsets = [0, 7], sizes = [4, 1], strides = [1, 1]} : vector<4x8xf32> to vector<4x1xf32>
    %560 = arith.addf %558, %559 : vector<4x1xf32>
    %561 = arith.negf %560 : vector<4x1xf32>
    %562 = math.exp %561 : vector<4x1xf32>
    %cst_147 = arith.constant 1.000000e+00 : f32
    %563 = vector.broadcast %cst_147 : f32 to vector<4x1xf32>
    %564 = arith.addf %563, %562 : vector<4x1xf32>
    %565 = arith.divf %563, %564 : vector<4x1xf32>
    %cst_148 = arith.constant 1.000000e+00 : f32
    %566 = vector.broadcast %cst_148 : f32 to vector<4x1xf32>
    %567 = arith.addf %566, %565 : vector<4x1xf32>
    %c0_149 = arith.constant 0 : index
    %c0_150 = arith.constant 0 : index
    %568 = vector.load %arg11[%c0_149, %c0_150] : memref<4x25xf32, #tpu.memory_space<vmem>>, vector<4x25xf32>
    %c0_151 = arith.constant 0 : index
    %c0_152 = arith.constant 0 : index
    %569 = vector.load %arg12[%c0_151, %c0_152] : memref<4x49xf32, #tpu.memory_space<vmem>>, vector<4x49xf32>
    %c0_153 = arith.constant 0 : index
    %c0_154 = arith.constant 0 : index
    %570 = vector.load %arg13[%c0_153, %c0_154] : memref<4x4xf32, #tpu.memory_space<vmem>>, vector<4x4xf32>
    %c0_155 = arith.constant 0 : index
    %c0_156 = arith.constant 0 : index
    %571 = vector.load %arg15[%c0_155, %c0_156] : memref<4x8xf32, #tpu.memory_space<vmem>>, vector<4x8xf32>
    %cst_157 = arith.constant 0.000000e+00 : f32
    %572 = vector.broadcast %cst_157 : f32 to vector<4x768xf32>
    %c0_158 = arith.constant 0 : index
    %c0_159 = arith.constant 0 : index
    %573 = vector.load %arg18[%c0_158, %c0_159] : memref<4x768xf32, #tpu.memory_space<vmem>>, vector<4x768xf32>
    tpu.vector_store %arg18[%c0_158, %c0_159], %572 {strides = array<i32>} : memref<4x768xf32, #tpu.memory_space<vmem>>, vector<4x768xf32>,
    %c0_160 = arith.constant 0 : index
    %c256_161 = arith.constant 256 : index
    %574 = vector.load %arg18[%c0_160, %c256_161] : memref<4x768xf32, #tpu.memory_space<vmem>>, vector<4x256xf32>
    tpu.vector_store %arg18[%c0_160, %c256_161], %3 {strides = array<i32>} : memref<4x768xf32, #tpu.memory_space<vmem>>, vector<4x256xf32>,
    %575 = vector.extract_strided_slice %571 {offsets = [0, 0], sizes = [4, 1], strides = [1, 1]} : vector<4x8xf32> to vector<4x1xf32>
    %576 = vector.shape_cast %575 : vector<4x1xf32> to vector<4x1xf32>
    %577 = vector.broadcast %576 : vector<4x1xf32> to vector<4x562xf32>
    %cst_162 = arith.constant 0.000000e+00 : f32
    %578 = vector.broadcast %cst_162 : f32 to vector<4x562xf32>
    %c0_163 = arith.constant 0 : index
    %c69_164 = arith.constant 69 : index
    %579 = vector.load %arg18[%c0_163, %c69_164] : memref<4x768xf32, #tpu.memory_space<vmem>>, vector<4x562xf32>
    %580 = vector.extract_strided_slice %568 {offsets = [0, 0], sizes = [4, 1], strides = [1, 1]} : vector<4x25xf32> to vector<4x1xf32>
    %581 = vector.broadcast %580 : vector<4x1xf32> to vector<4x562xf32>
    %582 = arith.mulf %579, %581 : vector<4x562xf32>
    %583 = arith.addf %578, %582 : vector<4x562xf32>
    %c0_165 = arith.constant 0 : index
    %c85_166 = arith.constant 85 : index
    %584 = vector.load %arg18[%c0_165, %c85_166] : memref<4x768xf32, #tpu.memory_space<vmem>>, vector<4x562xf32>
    %585 = vector.extract_strided_slice %568 {offsets = [0, 5], sizes = [4, 1], strides = [1, 1]} : vector<4x25xf32> to vector<4x1xf32>
    %586 = vector.broadcast %585 : vector<4x1xf32> to vector<4x562xf32>
    %587 = arith.mulf %584, %586 : vector<4x562xf32>
    %588 = arith.addf %583, %587 : vector<4x562xf32>
    %c0_167 = arith.constant 0 : index
    %c101_168 = arith.constant 101 : index
    %589 = vector.load %arg18[%c0_167, %c101_168] : memref<4x768xf32, #tpu.memory_space<vmem>>, vector<4x562xf32>
    %590 = vector.extract_strided_slice %568 {offsets = [0, 10], sizes = [4, 1], strides = [1, 1]} : vector<4x25xf32> to vector<4x1xf32>
    %591 = vector.broadcast %590 : vector<4x1xf32> to vector<4x562xf32>
    %592 = arith.mulf %589, %591 : vector<4x562xf32>
    %593 = arith.addf %588, %592 : vector<4x562xf32>
    %c0_169 = arith.constant 0 : index
    %c117_170 = arith.constant 117 : index
    %594 = vector.load %arg18[%c0_169, %c117_170] : memref<4x768xf32, #tpu.memory_space<vmem>>, vector<4x562xf32>
    %595 = vector.extract_strided_slice %568 {offsets = [0, 15], sizes = [4, 1], strides = [1, 1]} : vector<4x25xf32> to vector<4x1xf32>
    %596 = vector.broadcast %595 : vector<4x1xf32> to vector<4x562xf32>
    %597 = arith.mulf %594, %596 : vector<4x562xf32>
    %598 = arith.addf %593, %597 : vector<4x562xf32>
    %c0_171 = arith.constant 0 : index
    %c133_172 = arith.constant 133 : index
    %599 = vector.load %arg18[%c0_171, %c133_172] : memref<4x768xf32, #tpu.memory_space<vmem>>, vector<4x562xf32>
    %600 = vector.extract_strided_slice %568 {offsets = [0, 20], sizes = [4, 1], strides = [1, 1]} : vector<4x25xf32> to vector<4x1xf32>
    %601 = vector.broadcast %600 : vector<4x1xf32> to vector<4x562xf32>
    %602 = arith.mulf %599, %601 : vector<4x562xf32>
    %603 = arith.addf %598, %602 : vector<4x562xf32>
    %c0_173 = arith.constant 0 : index
    %c0_174 = arith.constant 0 : index
    %604 = vector.load %arg4[%c0_173, %c0_174] : memref<5x562xf32, #tpu.memory_space<vmem>>, vector<1x562xf32>
    %605 = vector.broadcast %604 : vector<1x562xf32> to vector<4x562xf32>
    %606 = arith.mulf %603, %605 : vector<4x562xf32>
    %607 = arith.addf %577, %606 : vector<4x562xf32>
    %cst_175 = arith.constant 0.000000e+00 : f32
    %608 = vector.broadcast %cst_175 : f32 to vector<4x562xf32>
    %c0_176 = arith.constant 0 : index
    %c70_177 = arith.constant 70 : index
    %609 = vector.load %arg18[%c0_176, %c70_177] : memref<4x768xf32, #tpu.memory_space<vmem>>, vector<4x562xf32>
    %610 = vector.extract_strided_slice %568 {offsets = [0, 1], sizes = [4, 1], strides = [1, 1]} : vector<4x25xf32> to vector<4x1xf32>
    %611 = vector.broadcast %610 : vector<4x1xf32> to vector<4x562xf32>
    %612 = arith.mulf %609, %611 : vector<4x562xf32>
    %613 = arith.addf %608, %612 : vector<4x562xf32>
    %c0_178 = arith.constant 0 : index
    %c86_179 = arith.constant 86 : index
    %614 = vector.load %arg18[%c0_178, %c86_179] : memref<4x768xf32, #tpu.memory_space<vmem>>, vector<4x562xf32>
    %615 = vector.extract_strided_slice %568 {offsets = [0, 6], sizes = [4, 1], strides = [1, 1]} : vector<4x25xf32> to vector<4x1xf32>
    %616 = vector.broadcast %615 : vector<4x1xf32> to vector<4x562xf32>
    %617 = arith.mulf %614, %616 : vector<4x562xf32>
    %618 = arith.addf %613, %617 : vector<4x562xf32>
    %c0_180 = arith.constant 0 : index
    %c102_181 = arith.constant 102 : index
    %619 = vector.load %arg18[%c0_180, %c102_181] : memref<4x768xf32, #tpu.memory_space<vmem>>, vector<4x562xf32>
    %620 = vector.extract_strided_slice %568 {offsets = [0, 11], sizes = [4, 1], strides = [1, 1]} : vector<4x25xf32> to vector<4x1xf32>
    %621 = vector.broadcast %620 : vector<4x1xf32> to vector<4x562xf32>
    %622 = arith.mulf %619, %621 : vector<4x562xf32>
    %623 = arith.addf %618, %622 : vector<4x562xf32>
    %c0_182 = arith.constant 0 : index
    %c118_183 = arith.constant 118 : index
    %624 = vector.load %arg18[%c0_182, %c118_183] : memref<4x768xf32, #tpu.memory_space<vmem>>, vector<4x562xf32>
    %625 = vector.extract_strided_slice %568 {offsets = [0, 16], sizes = [4, 1], strides = [1, 1]} : vector<4x25xf32> to vector<4x1xf32>
    %626 = vector.broadcast %625 : vector<4x1xf32> to vector<4x562xf32>
    %627 = arith.mulf %624, %626 : vector<4x562xf32>
    %628 = arith.addf %623, %627 : vector<4x562xf32>
    %c0_184 = arith.constant 0 : index
    %c134_185 = arith.constant 134 : index
    %629 = vector.load %arg18[%c0_184, %c134_185] : memref<4x768xf32, #tpu.memory_space<vmem>>, vector<4x562xf32>
    %630 = vector.extract_strided_slice %568 {offsets = [0, 21], sizes = [4, 1], strides = [1, 1]} : vector<4x25xf32> to vector<4x1xf32>
    %631 = vector.broadcast %630 : vector<4x1xf32> to vector<4x562xf32>
    %632 = arith.mulf %629, %631 : vector<4x562xf32>
    %633 = arith.addf %628, %632 : vector<4x562xf32>
    %c1_186 = arith.constant 1 : index
    %c0_187 = arith.constant 0 : index
    %634 = vector.load %arg4[%c1_186, %c0_187] : memref<5x562xf32, #tpu.memory_space<vmem>>, vector<1x562xf32>
    %635 = vector.broadcast %634 : vector<1x562xf32> to vector<4x562xf32>
    %636 = arith.mulf %633, %635 : vector<4x562xf32>
    %637 = arith.addf %607, %636 : vector<4x562xf32>
    %cst_188 = arith.constant 0.000000e+00 : f32
    %638 = vector.broadcast %cst_188 : f32 to vector<4x562xf32>
    %c0_189 = arith.constant 0 : index
    %c71_190 = arith.constant 71 : index
    %639 = vector.load %arg18[%c0_189, %c71_190] : memref<4x768xf32, #tpu.memory_space<vmem>>, vector<4x562xf32>
    %640 = vector.extract_strided_slice %568 {offsets = [0, 2], sizes = [4, 1], strides = [1, 1]} : vector<4x25xf32> to vector<4x1xf32>
    %641 = vector.broadcast %640 : vector<4x1xf32> to vector<4x562xf32>
    %642 = arith.mulf %639, %641 : vector<4x562xf32>
    %643 = arith.addf %638, %642 : vector<4x562xf32>
    %c0_191 = arith.constant 0 : index
    %c87_192 = arith.constant 87 : index
    %644 = vector.load %arg18[%c0_191, %c87_192] : memref<4x768xf32, #tpu.memory_space<vmem>>, vector<4x562xf32>
    %645 = vector.extract_strided_slice %568 {offsets = [0, 7], sizes = [4, 1], strides = [1, 1]} : vector<4x25xf32> to vector<4x1xf32>
    %646 = vector.broadcast %645 : vector<4x1xf32> to vector<4x562xf32>
    %647 = arith.mulf %644, %646 : vector<4x562xf32>
    %648 = arith.addf %643, %647 : vector<4x562xf32>
    %c0_193 = arith.constant 0 : index
    %c103_194 = arith.constant 103 : index
    %649 = vector.load %arg18[%c0_193, %c103_194] : memref<4x768xf32, #tpu.memory_space<vmem>>, vector<4x562xf32>
    %650 = vector.extract_strided_slice %568 {offsets = [0, 12], sizes = [4, 1], strides = [1, 1]} : vector<4x25xf32> to vector<4x1xf32>
    %651 = vector.broadcast %650 : vector<4x1xf32> to vector<4x562xf32>
    %652 = arith.mulf %649, %651 : vector<4x562xf32>
    %653 = arith.addf %648, %652 : vector<4x562xf32>
    %c0_195 = arith.constant 0 : index
    %c119_196 = arith.constant 119 : index
    %654 = vector.load %arg18[%c0_195, %c119_196] : memref<4x768xf32, #tpu.memory_space<vmem>>, vector<4x562xf32>
    %655 = vector.extract_strided_slice %568 {offsets = [0, 17], sizes = [4, 1], strides = [1, 1]} : vector<4x25xf32> to vector<4x1xf32>
    %656 = vector.broadcast %655 : vector<4x1xf32> to vector<4x562xf32>
    %657 = arith.mulf %654, %656 : vector<4x562xf32>
    %658 = arith.addf %653, %657 : vector<4x562xf32>
    %c0_197 = arith.constant 0 : index
    %c135_198 = arith.constant 135 : index
    %659 = vector.load %arg18[%c0_197, %c135_198] : memref<4x768xf32, #tpu.memory_space<vmem>>, vector<4x562xf32>
    %660 = vector.extract_strided_slice %568 {offsets = [0, 22], sizes = [4, 1], strides = [1, 1]} : vector<4x25xf32> to vector<4x1xf32>
    %661 = vector.broadcast %660 : vector<4x1xf32> to vector<4x562xf32>
    %662 = arith.mulf %659, %661 : vector<4x562xf32>
    %663 = arith.addf %658, %662 : vector<4x562xf32>
    %c2_199 = arith.constant 2 : index
    %c0_200 = arith.constant 0 : index
    %664 = vector.load %arg4[%c2_199, %c0_200] : memref<5x562xf32, #tpu.memory_space<vmem>>, vector<1x562xf32>
    %665 = vector.broadcast %664 : vector<1x562xf32> to vector<4x562xf32>
    %666 = arith.mulf %663, %665 : vector<4x562xf32>
    %667 = arith.addf %637, %666 : vector<4x562xf32>
    %cst_201 = arith.constant 0.000000e+00 : f32
    %668 = vector.broadcast %cst_201 : f32 to vector<4x562xf32>
    %c0_202 = arith.constant 0 : index
    %c72_203 = arith.constant 72 : index
    %669 = vector.load %arg18[%c0_202, %c72_203] : memref<4x768xf32, #tpu.memory_space<vmem>>, vector<4x562xf32>
    %670 = vector.extract_strided_slice %568 {offsets = [0, 3], sizes = [4, 1], strides = [1, 1]} : vector<4x25xf32> to vector<4x1xf32>
    %671 = vector.broadcast %670 : vector<4x1xf32> to vector<4x562xf32>
    %672 = arith.mulf %669, %671 : vector<4x562xf32>
    %673 = arith.addf %668, %672 : vector<4x562xf32>
    %c0_204 = arith.constant 0 : index
    %c88_205 = arith.constant 88 : index
    %674 = vector.load %arg18[%c0_204, %c88_205] : memref<4x768xf32, #tpu.memory_space<vmem>>, vector<4x562xf32>
    %675 = vector.extract_strided_slice %568 {offsets = [0, 8], sizes = [4, 1], strides = [1, 1]} : vector<4x25xf32> to vector<4x1xf32>
    %676 = vector.broadcast %675 : vector<4x1xf32> to vector<4x562xf32>
    %677 = arith.mulf %674, %676 : vector<4x562xf32>
    %678 = arith.addf %673, %677 : vector<4x562xf32>
    %c0_206 = arith.constant 0 : index
    %c104_207 = arith.constant 104 : index
    %679 = vector.load %arg18[%c0_206, %c104_207] : memref<4x768xf32, #tpu.memory_space<vmem>>, vector<4x562xf32>
    %680 = vector.extract_strided_slice %568 {offsets = [0, 13], sizes = [4, 1], strides = [1, 1]} : vector<4x25xf32> to vector<4x1xf32>
    %681 = vector.broadcast %680 : vector<4x1xf32> to vector<4x562xf32>
    %682 = arith.mulf %679, %681 : vector<4x562xf32>
    %683 = arith.addf %678, %682 : vector<4x562xf32>
    %c0_208 = arith.constant 0 : index
    %c120_209 = arith.constant 120 : index
    %684 = vector.load %arg18[%c0_208, %c120_209] : memref<4x768xf32, #tpu.memory_space<vmem>>, vector<4x562xf32>
    %685 = vector.extract_strided_slice %568 {offsets = [0, 18], sizes = [4, 1], strides = [1, 1]} : vector<4x25xf32> to vector<4x1xf32>
    %686 = vector.broadcast %685 : vector<4x1xf32> to vector<4x562xf32>
    %687 = arith.mulf %684, %686 : vector<4x562xf32>
    %688 = arith.addf %683, %687 : vector<4x562xf32>
    %c0_210 = arith.constant 0 : index
    %c136_211 = arith.constant 136 : index
    %689 = vector.load %arg18[%c0_210, %c136_211] : memref<4x768xf32, #tpu.memory_space<vmem>>, vector<4x562xf32>
    %690 = vector.extract_strided_slice %568 {offsets = [0, 23], sizes = [4, 1], strides = [1, 1]} : vector<4x25xf32> to vector<4x1xf32>
    %691 = vector.broadcast %690 : vector<4x1xf32> to vector<4x562xf32>
    %692 = arith.mulf %689, %691 : vector<4x562xf32>
    %693 = arith.addf %688, %692 : vector<4x562xf32>
    %c3_212 = arith.constant 3 : index
    %c0_213 = arith.constant 0 : index
    %694 = vector.load %arg4[%c3_212, %c0_213] : memref<5x562xf32, #tpu.memory_space<vmem>>, vector<1x562xf32>
    %695 = vector.broadcast %694 : vector<1x562xf32> to vector<4x562xf32>
    %696 = arith.mulf %693, %695 : vector<4x562xf32>
    %697 = arith.addf %667, %696 : vector<4x562xf32>
    %cst_214 = arith.constant 0.000000e+00 : f32
    %698 = vector.broadcast %cst_214 : f32 to vector<4x562xf32>
    %c0_215 = arith.constant 0 : index
    %c73_216 = arith.constant 73 : index
    %699 = vector.load %arg18[%c0_215, %c73_216] : memref<4x768xf32, #tpu.memory_space<vmem>>, vector<4x562xf32>
    %700 = vector.extract_strided_slice %568 {offsets = [0, 4], sizes = [4, 1], strides = [1, 1]} : vector<4x25xf32> to vector<4x1xf32>
    %701 = vector.broadcast %700 : vector<4x1xf32> to vector<4x562xf32>
    %702 = arith.mulf %699, %701 : vector<4x562xf32>
    %703 = arith.addf %698, %702 : vector<4x562xf32>
    %c0_217 = arith.constant 0 : index
    %c89_218 = arith.constant 89 : index
    %704 = vector.load %arg18[%c0_217, %c89_218] : memref<4x768xf32, #tpu.memory_space<vmem>>, vector<4x562xf32>
    %705 = vector.extract_strided_slice %568 {offsets = [0, 9], sizes = [4, 1], strides = [1, 1]} : vector<4x25xf32> to vector<4x1xf32>
    %706 = vector.broadcast %705 : vector<4x1xf32> to vector<4x562xf32>
    %707 = arith.mulf %704, %706 : vector<4x562xf32>
    %708 = arith.addf %703, %707 : vector<4x562xf32>
    %c0_219 = arith.constant 0 : index
    %c105_220 = arith.constant 105 : index
    %709 = vector.load %arg18[%c0_219, %c105_220] : memref<4x768xf32, #tpu.memory_space<vmem>>, vector<4x562xf32>
    %710 = vector.extract_strided_slice %568 {offsets = [0, 14], sizes = [4, 1], strides = [1, 1]} : vector<4x25xf32> to vector<4x1xf32>
    %711 = vector.broadcast %710 : vector<4x1xf32> to vector<4x562xf32>
    %712 = arith.mulf %709, %711 : vector<4x562xf32>
    %713 = arith.addf %708, %712 : vector<4x562xf32>
    %c0_221 = arith.constant 0 : index
    %c121_222 = arith.constant 121 : index
    %714 = vector.load %arg18[%c0_221, %c121_222] : memref<4x768xf32, #tpu.memory_space<vmem>>, vector<4x562xf32>
    %715 = vector.extract_strided_slice %568 {offsets = [0, 19], sizes = [4, 1], strides = [1, 1]} : vector<4x25xf32> to vector<4x1xf32>
    %716 = vector.broadcast %715 : vector<4x1xf32> to vector<4x562xf32>
    %717 = arith.mulf %714, %716 : vector<4x562xf32>
    %718 = arith.addf %713, %717 : vector<4x562xf32>
    %c0_223 = arith.constant 0 : index
    %c137_224 = arith.constant 137 : index
    %719 = vector.load %arg18[%c0_223, %c137_224] : memref<4x768xf32, #tpu.memory_space<vmem>>, vector<4x562xf32>
    %720 = vector.extract_strided_slice %568 {offsets = [0, 24], sizes = [4, 1], strides = [1, 1]} : vector<4x25xf32> to vector<4x1xf32>
    %721 = vector.broadcast %720 : vector<4x1xf32> to vector<4x562xf32>
    %722 = arith.mulf %719, %721 : vector<4x562xf32>
    %723 = arith.addf %718, %722 : vector<4x562xf32>
    %c4_225 = arith.constant 4 : index
    %c0_226 = arith.constant 0 : index
    %724 = vector.load %arg4[%c4_225, %c0_226] : memref<5x562xf32, #tpu.memory_space<vmem>>, vector<1x562xf32>
    %725 = vector.broadcast %724 : vector<1x562xf32> to vector<4x562xf32>
    %726 = arith.mulf %723, %725 : vector<4x562xf32>
    %727 = arith.addf %697, %726 : vector<4x562xf32>
    %c0_227 = arith.constant 0 : index
    %c0_228 = arith.constant 0 : index
    %728 = vector.load %arg3[%c0_227, %c0_228] : memref<1x562xf32, #tpu.memory_space<vmem>>, vector<1x562xf32>
    %729 = vector.broadcast %728 : vector<1x562xf32> to vector<4x562xf32>
    %730 = arith.mulf %727, %729 : vector<4x562xf32>
    %c0_229 = arith.constant 0 : index
    %c0_230 = arith.constant 0 : index
    %731 = vector.load %arg19[%c0_229, %c0_230] : memref<4x562xf32, #tpu.memory_space<vmem>>, vector<4x562xf32>
    tpu.vector_store %arg19[%c0_229, %c0_230], %730 {strides = array<i32>} : memref<4x562xf32, #tpu.memory_space<vmem>>, vector<4x562xf32>,
    %732 = vector.extract_strided_slice %571 {offsets = [0, 1], sizes = [4, 1], strides = [1, 1]} : vector<4x8xf32> to vector<4x1xf32>
    %733 = vector.shape_cast %732 : vector<4x1xf32> to vector<4x1xf32>
    %734 = vector.broadcast %733 : vector<4x1xf32> to vector<4x256xf32>
    %cst_231 = arith.constant 0.000000e+00 : f32
    %735 = vector.broadcast %cst_231 : f32 to vector<4x256xf32>
    %c0_232 = arith.constant 0 : index
    %c0_233 = arith.constant 0 : index
    %736 = vector.load %arg19[%c0_232, %c0_233] : memref<4x562xf32, #tpu.memory_space<vmem>>, vector<4x256xf32>
    %737 = vector.extract_strided_slice %569 {offsets = [0, 0], sizes = [4, 1], strides = [1, 1]} : vector<4x49xf32> to vector<4x1xf32>
    %738 = vector.broadcast %737 : vector<4x1xf32> to vector<4x256xf32>
    %739 = arith.mulf %736, %738 : vector<4x256xf32>
    %740 = arith.addf %735, %739 : vector<4x256xf32>
    %c0_234 = arith.constant 0 : index
    %c48_235 = arith.constant 48 : index
    %741 = vector.load %arg19[%c0_234, %c48_235] : memref<4x562xf32, #tpu.memory_space<vmem>>, vector<4x256xf32>
    %742 = vector.extract_strided_slice %569 {offsets = [0, 7], sizes = [4, 1], strides = [1, 1]} : vector<4x49xf32> to vector<4x1xf32>
    %743 = vector.broadcast %742 : vector<4x1xf32> to vector<4x256xf32>
    %744 = arith.mulf %741, %743 : vector<4x256xf32>
    %745 = arith.addf %740, %744 : vector<4x256xf32>
    %c0_236 = arith.constant 0 : index
    %c96_237 = arith.constant 96 : index
    %746 = vector.load %arg19[%c0_236, %c96_237] : memref<4x562xf32, #tpu.memory_space<vmem>>, vector<4x256xf32>
    %747 = vector.extract_strided_slice %569 {offsets = [0, 14], sizes = [4, 1], strides = [1, 1]} : vector<4x49xf32> to vector<4x1xf32>
    %748 = vector.broadcast %747 : vector<4x1xf32> to vector<4x256xf32>
    %749 = arith.mulf %746, %748 : vector<4x256xf32>
    %750 = arith.addf %745, %749 : vector<4x256xf32>
    %c0_238 = arith.constant 0 : index
    %c144_239 = arith.constant 144 : index
    %751 = vector.load %arg19[%c0_238, %c144_239] : memref<4x562xf32, #tpu.memory_space<vmem>>, vector<4x256xf32>
    %752 = vector.extract_strided_slice %569 {offsets = [0, 21], sizes = [4, 1], strides = [1, 1]} : vector<4x49xf32> to vector<4x1xf32>
    %753 = vector.broadcast %752 : vector<4x1xf32> to vector<4x256xf32>
    %754 = arith.mulf %751, %753 : vector<4x256xf32>
    %755 = arith.addf %750, %754 : vector<4x256xf32>
    %c0_240 = arith.constant 0 : index
    %c192_241 = arith.constant 192 : index
    %756 = vector.load %arg19[%c0_240, %c192_241] : memref<4x562xf32, #tpu.memory_space<vmem>>, vector<4x256xf32>
    %757 = vector.extract_strided_slice %569 {offsets = [0, 28], sizes = [4, 1], strides = [1, 1]} : vector<4x49xf32> to vector<4x1xf32>
    %758 = vector.broadcast %757 : vector<4x1xf32> to vector<4x256xf32>
    %759 = arith.mulf %756, %758 : vector<4x256xf32>
    %760 = arith.addf %755, %759 : vector<4x256xf32>
    %c0_242 = arith.constant 0 : index
    %c240_243 = arith.constant 240 : index
    %761 = vector.load %arg19[%c0_242, %c240_243] : memref<4x562xf32, #tpu.memory_space<vmem>>, vector<4x256xf32>
    %762 = vector.extract_strided_slice %569 {offsets = [0, 35], sizes = [4, 1], strides = [1, 1]} : vector<4x49xf32> to vector<4x1xf32>
    %763 = vector.broadcast %762 : vector<4x1xf32> to vector<4x256xf32>
    %764 = arith.mulf %761, %763 : vector<4x256xf32>
    %765 = arith.addf %760, %764 : vector<4x256xf32>
    %c0_244 = arith.constant 0 : index
    %c288_245 = arith.constant 288 : index
    %766 = vector.load %arg19[%c0_244, %c288_245] : memref<4x562xf32, #tpu.memory_space<vmem>>, vector<4x256xf32>
    %767 = vector.extract_strided_slice %569 {offsets = [0, 42], sizes = [4, 1], strides = [1, 1]} : vector<4x49xf32> to vector<4x1xf32>
    %768 = vector.broadcast %767 : vector<4x1xf32> to vector<4x256xf32>
    %769 = arith.mulf %766, %768 : vector<4x256xf32>
    %770 = arith.addf %765, %769 : vector<4x256xf32>
    %c0_246 = arith.constant 0 : index
    %c0_247 = arith.constant 0 : index
    %771 = vector.load %arg5[%c0_246, %c0_247] : memref<7x256xf32, #tpu.memory_space<vmem>>, vector<1x256xf32>
    %772 = vector.broadcast %771 : vector<1x256xf32> to vector<4x256xf32>
    %773 = arith.mulf %770, %772 : vector<4x256xf32>
    %774 = arith.addf %734, %773 : vector<4x256xf32>
    %cst_248 = arith.constant 0.000000e+00 : f32
    %775 = vector.broadcast %cst_248 : f32 to vector<4x256xf32>
    %c0_249 = arith.constant 0 : index
    %c3_250 = arith.constant 3 : index
    %776 = vector.load %arg19[%c0_249, %c3_250] : memref<4x562xf32, #tpu.memory_space<vmem>>, vector<4x256xf32>
    %777 = vector.extract_strided_slice %569 {offsets = [0, 1], sizes = [4, 1], strides = [1, 1]} : vector<4x49xf32> to vector<4x1xf32>
    %778 = vector.broadcast %777 : vector<4x1xf32> to vector<4x256xf32>
    %779 = arith.mulf %776, %778 : vector<4x256xf32>
    %780 = arith.addf %775, %779 : vector<4x256xf32>
    %c0_251 = arith.constant 0 : index
    %c51_252 = arith.constant 51 : index
    %781 = vector.load %arg19[%c0_251, %c51_252] : memref<4x562xf32, #tpu.memory_space<vmem>>, vector<4x256xf32>
    %782 = vector.extract_strided_slice %569 {offsets = [0, 8], sizes = [4, 1], strides = [1, 1]} : vector<4x49xf32> to vector<4x1xf32>
    %783 = vector.broadcast %782 : vector<4x1xf32> to vector<4x256xf32>
    %784 = arith.mulf %781, %783 : vector<4x256xf32>
    %785 = arith.addf %780, %784 : vector<4x256xf32>
    %c0_253 = arith.constant 0 : index
    %c99_254 = arith.constant 99 : index
    %786 = vector.load %arg19[%c0_253, %c99_254] : memref<4x562xf32, #tpu.memory_space<vmem>>, vector<4x256xf32>
    %787 = vector.extract_strided_slice %569 {offsets = [0, 15], sizes = [4, 1], strides = [1, 1]} : vector<4x49xf32> to vector<4x1xf32>
    %788 = vector.broadcast %787 : vector<4x1xf32> to vector<4x256xf32>
    %789 = arith.mulf %786, %788 : vector<4x256xf32>
    %790 = arith.addf %785, %789 : vector<4x256xf32>
    %c0_255 = arith.constant 0 : index
    %c147_256 = arith.constant 147 : index
    %791 = vector.load %arg19[%c0_255, %c147_256] : memref<4x562xf32, #tpu.memory_space<vmem>>, vector<4x256xf32>
    %792 = vector.extract_strided_slice %569 {offsets = [0, 22], sizes = [4, 1], strides = [1, 1]} : vector<4x49xf32> to vector<4x1xf32>
    %793 = vector.broadcast %792 : vector<4x1xf32> to vector<4x256xf32>
    %794 = arith.mulf %791, %793 : vector<4x256xf32>
    %795 = arith.addf %790, %794 : vector<4x256xf32>
    %c0_257 = arith.constant 0 : index
    %c195_258 = arith.constant 195 : index
    %796 = vector.load %arg19[%c0_257, %c195_258] : memref<4x562xf32, #tpu.memory_space<vmem>>, vector<4x256xf32>
    %797 = vector.extract_strided_slice %569 {offsets = [0, 29], sizes = [4, 1], strides = [1, 1]} : vector<4x49xf32> to vector<4x1xf32>
    %798 = vector.broadcast %797 : vector<4x1xf32> to vector<4x256xf32>
    %799 = arith.mulf %796, %798 : vector<4x256xf32>
    %800 = arith.addf %795, %799 : vector<4x256xf32>
    %c0_259 = arith.constant 0 : index
    %c243_260 = arith.constant 243 : index
    %801 = vector.load %arg19[%c0_259, %c243_260] : memref<4x562xf32, #tpu.memory_space<vmem>>, vector<4x256xf32>
    %802 = vector.extract_strided_slice %569 {offsets = [0, 36], sizes = [4, 1], strides = [1, 1]} : vector<4x49xf32> to vector<4x1xf32>
    %803 = vector.broadcast %802 : vector<4x1xf32> to vector<4x256xf32>
    %804 = arith.mulf %801, %803 : vector<4x256xf32>
    %805 = arith.addf %800, %804 : vector<4x256xf32>
    %c0_261 = arith.constant 0 : index
    %c291_262 = arith.constant 291 : index
    %806 = vector.load %arg19[%c0_261, %c291_262] : memref<4x562xf32, #tpu.memory_space<vmem>>, vector<4x256xf32>
    %807 = vector.extract_strided_slice %569 {offsets = [0, 43], sizes = [4, 1], strides = [1, 1]} : vector<4x49xf32> to vector<4x1xf32>
    %808 = vector.broadcast %807 : vector<4x1xf32> to vector<4x256xf32>
    %809 = arith.mulf %806, %808 : vector<4x256xf32>
    %810 = arith.addf %805, %809 : vector<4x256xf32>
    %c1_263 = arith.constant 1 : index
    %c0_264 = arith.constant 0 : index
    %811 = vector.load %arg5[%c1_263, %c0_264] : memref<7x256xf32, #tpu.memory_space<vmem>>, vector<1x256xf32>
    %812 = vector.broadcast %811 : vector<1x256xf32> to vector<4x256xf32>
    %813 = arith.mulf %810, %812 : vector<4x256xf32>
    %814 = arith.addf %774, %813 : vector<4x256xf32>
    %cst_265 = arith.constant 0.000000e+00 : f32
    %815 = vector.broadcast %cst_265 : f32 to vector<4x256xf32>
    %c0_266 = arith.constant 0 : index
    %c6_267 = arith.constant 6 : index
    %816 = vector.load %arg19[%c0_266, %c6_267] : memref<4x562xf32, #tpu.memory_space<vmem>>, vector<4x256xf32>
    %817 = vector.extract_strided_slice %569 {offsets = [0, 2], sizes = [4, 1], strides = [1, 1]} : vector<4x49xf32> to vector<4x1xf32>
    %818 = vector.broadcast %817 : vector<4x1xf32> to vector<4x256xf32>
    %819 = arith.mulf %816, %818 : vector<4x256xf32>
    %820 = arith.addf %815, %819 : vector<4x256xf32>
    %c0_268 = arith.constant 0 : index
    %c54_269 = arith.constant 54 : index
    %821 = vector.load %arg19[%c0_268, %c54_269] : memref<4x562xf32, #tpu.memory_space<vmem>>, vector<4x256xf32>
    %822 = vector.extract_strided_slice %569 {offsets = [0, 9], sizes = [4, 1], strides = [1, 1]} : vector<4x49xf32> to vector<4x1xf32>
    %823 = vector.broadcast %822 : vector<4x1xf32> to vector<4x256xf32>
    %824 = arith.mulf %821, %823 : vector<4x256xf32>
    %825 = arith.addf %820, %824 : vector<4x256xf32>
    %c0_270 = arith.constant 0 : index
    %c102_271 = arith.constant 102 : index
    %826 = vector.load %arg19[%c0_270, %c102_271] : memref<4x562xf32, #tpu.memory_space<vmem>>, vector<4x256xf32>
    %827 = vector.extract_strided_slice %569 {offsets = [0, 16], sizes = [4, 1], strides = [1, 1]} : vector<4x49xf32> to vector<4x1xf32>
    %828 = vector.broadcast %827 : vector<4x1xf32> to vector<4x256xf32>
    %829 = arith.mulf %826, %828 : vector<4x256xf32>
    %830 = arith.addf %825, %829 : vector<4x256xf32>
    %c0_272 = arith.constant 0 : index
    %c150_273 = arith.constant 150 : index
    %831 = vector.load %arg19[%c0_272, %c150_273] : memref<4x562xf32, #tpu.memory_space<vmem>>, vector<4x256xf32>
    %832 = vector.extract_strided_slice %569 {offsets = [0, 23], sizes = [4, 1], strides = [1, 1]} : vector<4x49xf32> to vector<4x1xf32>
    %833 = vector.broadcast %832 : vector<4x1xf32> to vector<4x256xf32>
    %834 = arith.mulf %831, %833 : vector<4x256xf32>
    %835 = arith.addf %830, %834 : vector<4x256xf32>
    %c0_274 = arith.constant 0 : index
    %c198_275 = arith.constant 198 : index
    %836 = vector.load %arg19[%c0_274, %c198_275] : memref<4x562xf32, #tpu.memory_space<vmem>>, vector<4x256xf32>
    %837 = vector.extract_strided_slice %569 {offsets = [0, 30], sizes = [4, 1], strides = [1, 1]} : vector<4x49xf32> to vector<4x1xf32>
    %838 = vector.broadcast %837 : vector<4x1xf32> to vector<4x256xf32>
    %839 = arith.mulf %836, %838 : vector<4x256xf32>
    %840 = arith.addf %835, %839 : vector<4x256xf32>
    %c0_276 = arith.constant 0 : index
    %c246_277 = arith.constant 246 : index
    %841 = vector.load %arg19[%c0_276, %c246_277] : memref<4x562xf32, #tpu.memory_space<vmem>>, vector<4x256xf32>
    %842 = vector.extract_strided_slice %569 {offsets = [0, 37], sizes = [4, 1], strides = [1, 1]} : vector<4x49xf32> to vector<4x1xf32>
    %843 = vector.broadcast %842 : vector<4x1xf32> to vector<4x256xf32>
    %844 = arith.mulf %841, %843 : vector<4x256xf32>
    %845 = arith.addf %840, %844 : vector<4x256xf32>
    %c0_278 = arith.constant 0 : index
    %c294_279 = arith.constant 294 : index
    %846 = vector.load %arg19[%c0_278, %c294_279] : memref<4x562xf32, #tpu.memory_space<vmem>>, vector<4x256xf32>
    %847 = vector.extract_strided_slice %569 {offsets = [0, 44], sizes = [4, 1], strides = [1, 1]} : vector<4x49xf32> to vector<4x1xf32>
    %848 = vector.broadcast %847 : vector<4x1xf32> to vector<4x256xf32>
    %849 = arith.mulf %846, %848 : vector<4x256xf32>
    %850 = arith.addf %845, %849 : vector<4x256xf32>
    %c2_280 = arith.constant 2 : index
    %c0_281 = arith.constant 0 : index
    %851 = vector.load %arg5[%c2_280, %c0_281] : memref<7x256xf32, #tpu.memory_space<vmem>>, vector<1x256xf32>
    %852 = vector.broadcast %851 : vector<1x256xf32> to vector<4x256xf32>
    %853 = arith.mulf %850, %852 : vector<4x256xf32>
    %854 = arith.addf %814, %853 : vector<4x256xf32>
    %cst_282 = arith.constant 0.000000e+00 : f32
    %855 = vector.broadcast %cst_282 : f32 to vector<4x256xf32>
    %c0_283 = arith.constant 0 : index
    %c9_284 = arith.constant 9 : index
    %856 = vector.load %arg19[%c0_283, %c9_284] : memref<4x562xf32, #tpu.memory_space<vmem>>, vector<4x256xf32>
    %857 = vector.extract_strided_slice %569 {offsets = [0, 3], sizes = [4, 1], strides = [1, 1]} : vector<4x49xf32> to vector<4x1xf32>
    %858 = vector.broadcast %857 : vector<4x1xf32> to vector<4x256xf32>
    %859 = arith.mulf %856, %858 : vector<4x256xf32>
    %860 = arith.addf %855, %859 : vector<4x256xf32>
    %c0_285 = arith.constant 0 : index
    %c57_286 = arith.constant 57 : index
    %861 = vector.load %arg19[%c0_285, %c57_286] : memref<4x562xf32, #tpu.memory_space<vmem>>, vector<4x256xf32>
    %862 = vector.extract_strided_slice %569 {offsets = [0, 10], sizes = [4, 1], strides = [1, 1]} : vector<4x49xf32> to vector<4x1xf32>
    %863 = vector.broadcast %862 : vector<4x1xf32> to vector<4x256xf32>
    %864 = arith.mulf %861, %863 : vector<4x256xf32>
    %865 = arith.addf %860, %864 : vector<4x256xf32>
    %c0_287 = arith.constant 0 : index
    %c105_288 = arith.constant 105 : index
    %866 = vector.load %arg19[%c0_287, %c105_288] : memref<4x562xf32, #tpu.memory_space<vmem>>, vector<4x256xf32>
    %867 = vector.extract_strided_slice %569 {offsets = [0, 17], sizes = [4, 1], strides = [1, 1]} : vector<4x49xf32> to vector<4x1xf32>
    %868 = vector.broadcast %867 : vector<4x1xf32> to vector<4x256xf32>
    %869 = arith.mulf %866, %868 : vector<4x256xf32>
    %870 = arith.addf %865, %869 : vector<4x256xf32>
    %c0_289 = arith.constant 0 : index
    %c153_290 = arith.constant 153 : index
    %871 = vector.load %arg19[%c0_289, %c153_290] : memref<4x562xf32, #tpu.memory_space<vmem>>, vector<4x256xf32>
    %872 = vector.extract_strided_slice %569 {offsets = [0, 24], sizes = [4, 1], strides = [1, 1]} : vector<4x49xf32> to vector<4x1xf32>
    %873 = vector.broadcast %872 : vector<4x1xf32> to vector<4x256xf32>
    %874 = arith.mulf %871, %873 : vector<4x256xf32>
    %875 = arith.addf %870, %874 : vector<4x256xf32>
    %c0_291 = arith.constant 0 : index
    %c201_292 = arith.constant 201 : index
    %876 = vector.load %arg19[%c0_291, %c201_292] : memref<4x562xf32, #tpu.memory_space<vmem>>, vector<4x256xf32>
    %877 = vector.extract_strided_slice %569 {offsets = [0, 31], sizes = [4, 1], strides = [1, 1]} : vector<4x49xf32> to vector<4x1xf32>
    %878 = vector.broadcast %877 : vector<4x1xf32> to vector<4x256xf32>
    %879 = arith.mulf %876, %878 : vector<4x256xf32>
    %880 = arith.addf %875, %879 : vector<4x256xf32>
    %c0_293 = arith.constant 0 : index
    %c249_294 = arith.constant 249 : index
    %881 = vector.load %arg19[%c0_293, %c249_294] : memref<4x562xf32, #tpu.memory_space<vmem>>, vector<4x256xf32>
    %882 = vector.extract_strided_slice %569 {offsets = [0, 38], sizes = [4, 1], strides = [1, 1]} : vector<4x49xf32> to vector<4x1xf32>
    %883 = vector.broadcast %882 : vector<4x1xf32> to vector<4x256xf32>
    %884 = arith.mulf %881, %883 : vector<4x256xf32>
    %885 = arith.addf %880, %884 : vector<4x256xf32>
    %c0_295 = arith.constant 0 : index
    %c297_296 = arith.constant 297 : index
    %886 = vector.load %arg19[%c0_295, %c297_296] : memref<4x562xf32, #tpu.memory_space<vmem>>, vector<4x256xf32>
    %887 = vector.extract_strided_slice %569 {offsets = [0, 45], sizes = [4, 1], strides = [1, 1]} : vector<4x49xf32> to vector<4x1xf32>
    %888 = vector.broadcast %887 : vector<4x1xf32> to vector<4x256xf32>
    %889 = arith.mulf %886, %888 : vector<4x256xf32>
    %890 = arith.addf %885, %889 : vector<4x256xf32>
    %c3_297 = arith.constant 3 : index
    %c0_298 = arith.constant 0 : index
    %891 = vector.load %arg5[%c3_297, %c0_298] : memref<7x256xf32, #tpu.memory_space<vmem>>, vector<1x256xf32>
    %892 = vector.broadcast %891 : vector<1x256xf32> to vector<4x256xf32>
    %893 = arith.mulf %890, %892 : vector<4x256xf32>
    %894 = arith.addf %854, %893 : vector<4x256xf32>
    %cst_299 = arith.constant 0.000000e+00 : f32
    %895 = vector.broadcast %cst_299 : f32 to vector<4x256xf32>
    %c0_300 = arith.constant 0 : index
    %c12_301 = arith.constant 12 : index
    %896 = vector.load %arg19[%c0_300, %c12_301] : memref<4x562xf32, #tpu.memory_space<vmem>>, vector<4x256xf32>
    %897 = vector.extract_strided_slice %569 {offsets = [0, 4], sizes = [4, 1], strides = [1, 1]} : vector<4x49xf32> to vector<4x1xf32>
    %898 = vector.broadcast %897 : vector<4x1xf32> to vector<4x256xf32>
    %899 = arith.mulf %896, %898 : vector<4x256xf32>
    %900 = arith.addf %895, %899 : vector<4x256xf32>
    %c0_302 = arith.constant 0 : index
    %c60_303 = arith.constant 60 : index
    %901 = vector.load %arg19[%c0_302, %c60_303] : memref<4x562xf32, #tpu.memory_space<vmem>>, vector<4x256xf32>
    %902 = vector.extract_strided_slice %569 {offsets = [0, 11], sizes = [4, 1], strides = [1, 1]} : vector<4x49xf32> to vector<4x1xf32>
    %903 = vector.broadcast %902 : vector<4x1xf32> to vector<4x256xf32>
    %904 = arith.mulf %901, %903 : vector<4x256xf32>
    %905 = arith.addf %900, %904 : vector<4x256xf32>
    %c0_304 = arith.constant 0 : index
    %c108_305 = arith.constant 108 : index
    %906 = vector.load %arg19[%c0_304, %c108_305] : memref<4x562xf32, #tpu.memory_space<vmem>>, vector<4x256xf32>
    %907 = vector.extract_strided_slice %569 {offsets = [0, 18], sizes = [4, 1], strides = [1, 1]} : vector<4x49xf32> to vector<4x1xf32>
    %908 = vector.broadcast %907 : vector<4x1xf32> to vector<4x256xf32>
    %909 = arith.mulf %906, %908 : vector<4x256xf32>
    %910 = arith.addf %905, %909 : vector<4x256xf32>
    %c0_306 = arith.constant 0 : index
    %c156_307 = arith.constant 156 : index
    %911 = vector.load %arg19[%c0_306, %c156_307] : memref<4x562xf32, #tpu.memory_space<vmem>>, vector<4x256xf32>
    %912 = vector.extract_strided_slice %569 {offsets = [0, 25], sizes = [4, 1], strides = [1, 1]} : vector<4x49xf32> to vector<4x1xf32>
    %913 = vector.broadcast %912 : vector<4x1xf32> to vector<4x256xf32>
    %914 = arith.mulf %911, %913 : vector<4x256xf32>
    %915 = arith.addf %910, %914 : vector<4x256xf32>
    %c0_308 = arith.constant 0 : index
    %c204_309 = arith.constant 204 : index
    %916 = vector.load %arg19[%c0_308, %c204_309] : memref<4x562xf32, #tpu.memory_space<vmem>>, vector<4x256xf32>
    %917 = vector.extract_strided_slice %569 {offsets = [0, 32], sizes = [4, 1], strides = [1, 1]} : vector<4x49xf32> to vector<4x1xf32>
    %918 = vector.broadcast %917 : vector<4x1xf32> to vector<4x256xf32>
    %919 = arith.mulf %916, %918 : vector<4x256xf32>
    %920 = arith.addf %915, %919 : vector<4x256xf32>
    %c0_310 = arith.constant 0 : index
    %c252_311 = arith.constant 252 : index
    %921 = vector.load %arg19[%c0_310, %c252_311] : memref<4x562xf32, #tpu.memory_space<vmem>>, vector<4x256xf32>
    %922 = vector.extract_strided_slice %569 {offsets = [0, 39], sizes = [4, 1], strides = [1, 1]} : vector<4x49xf32> to vector<4x1xf32>
    %923 = vector.broadcast %922 : vector<4x1xf32> to vector<4x256xf32>
    %924 = arith.mulf %921, %923 : vector<4x256xf32>
    %925 = arith.addf %920, %924 : vector<4x256xf32>
    %c0_312 = arith.constant 0 : index
    %c300_313 = arith.constant 300 : index
    %926 = vector.load %arg19[%c0_312, %c300_313] : memref<4x562xf32, #tpu.memory_space<vmem>>, vector<4x256xf32>
    %927 = vector.extract_strided_slice %569 {offsets = [0, 46], sizes = [4, 1], strides = [1, 1]} : vector<4x49xf32> to vector<4x1xf32>
    %928 = vector.broadcast %927 : vector<4x1xf32> to vector<4x256xf32>
    %929 = arith.mulf %926, %928 : vector<4x256xf32>
    %930 = arith.addf %925, %929 : vector<4x256xf32>
    %c4_314 = arith.constant 4 : index
    %c0_315 = arith.constant 0 : index
    %931 = vector.load %arg5[%c4_314, %c0_315] : memref<7x256xf32, #tpu.memory_space<vmem>>, vector<1x256xf32>
    %932 = vector.broadcast %931 : vector<1x256xf32> to vector<4x256xf32>
    %933 = arith.mulf %930, %932 : vector<4x256xf32>
    %934 = arith.addf %894, %933 : vector<4x256xf32>
    %cst_316 = arith.constant 0.000000e+00 : f32
    %935 = vector.broadcast %cst_316 : f32 to vector<4x256xf32>
    %c0_317 = arith.constant 0 : index
    %c15_318 = arith.constant 15 : index
    %936 = vector.load %arg19[%c0_317, %c15_318] : memref<4x562xf32, #tpu.memory_space<vmem>>, vector<4x256xf32>
    %937 = vector.extract_strided_slice %569 {offsets = [0, 5], sizes = [4, 1], strides = [1, 1]} : vector<4x49xf32> to vector<4x1xf32>
    %938 = vector.broadcast %937 : vector<4x1xf32> to vector<4x256xf32>
    %939 = arith.mulf %936, %938 : vector<4x256xf32>
    %940 = arith.addf %935, %939 : vector<4x256xf32>
    %c0_319 = arith.constant 0 : index
    %c63_320 = arith.constant 63 : index
    %941 = vector.load %arg19[%c0_319, %c63_320] : memref<4x562xf32, #tpu.memory_space<vmem>>, vector<4x256xf32>
    %942 = vector.extract_strided_slice %569 {offsets = [0, 12], sizes = [4, 1], strides = [1, 1]} : vector<4x49xf32> to vector<4x1xf32>
    %943 = vector.broadcast %942 : vector<4x1xf32> to vector<4x256xf32>
    %944 = arith.mulf %941, %943 : vector<4x256xf32>
    %945 = arith.addf %940, %944 : vector<4x256xf32>
    %c0_321 = arith.constant 0 : index
    %c111_322 = arith.constant 111 : index
    %946 = vector.load %arg19[%c0_321, %c111_322] : memref<4x562xf32, #tpu.memory_space<vmem>>, vector<4x256xf32>
    %947 = vector.extract_strided_slice %569 {offsets = [0, 19], sizes = [4, 1], strides = [1, 1]} : vector<4x49xf32> to vector<4x1xf32>
    %948 = vector.broadcast %947 : vector<4x1xf32> to vector<4x256xf32>
    %949 = arith.mulf %946, %948 : vector<4x256xf32>
    %950 = arith.addf %945, %949 : vector<4x256xf32>
    %c0_323 = arith.constant 0 : index
    %c159_324 = arith.constant 159 : index
    %951 = vector.load %arg19[%c0_323, %c159_324] : memref<4x562xf32, #tpu.memory_space<vmem>>, vector<4x256xf32>
    %952 = vector.extract_strided_slice %569 {offsets = [0, 26], sizes = [4, 1], strides = [1, 1]} : vector<4x49xf32> to vector<4x1xf32>
    %953 = vector.broadcast %952 : vector<4x1xf32> to vector<4x256xf32>
    %954 = arith.mulf %951, %953 : vector<4x256xf32>
    %955 = arith.addf %950, %954 : vector<4x256xf32>
    %c0_325 = arith.constant 0 : index
    %c207_326 = arith.constant 207 : index
    %956 = vector.load %arg19[%c0_325, %c207_326] : memref<4x562xf32, #tpu.memory_space<vmem>>, vector<4x256xf32>
    %957 = vector.extract_strided_slice %569 {offsets = [0, 33], sizes = [4, 1], strides = [1, 1]} : vector<4x49xf32> to vector<4x1xf32>
    %958 = vector.broadcast %957 : vector<4x1xf32> to vector<4x256xf32>
    %959 = arith.mulf %956, %958 : vector<4x256xf32>
    %960 = arith.addf %955, %959 : vector<4x256xf32>
    %c0_327 = arith.constant 0 : index
    %c255_328 = arith.constant 255 : index
    %961 = vector.load %arg19[%c0_327, %c255_328] : memref<4x562xf32, #tpu.memory_space<vmem>>, vector<4x256xf32>
    %962 = vector.extract_strided_slice %569 {offsets = [0, 40], sizes = [4, 1], strides = [1, 1]} : vector<4x49xf32> to vector<4x1xf32>
    %963 = vector.broadcast %962 : vector<4x1xf32> to vector<4x256xf32>
    %964 = arith.mulf %961, %963 : vector<4x256xf32>
    %965 = arith.addf %960, %964 : vector<4x256xf32>
    %c0_329 = arith.constant 0 : index
    %c303_330 = arith.constant 303 : index
    %966 = vector.load %arg19[%c0_329, %c303_330] : memref<4x562xf32, #tpu.memory_space<vmem>>, vector<4x256xf32>
    %967 = vector.extract_strided_slice %569 {offsets = [0, 47], sizes = [4, 1], strides = [1, 1]} : vector<4x49xf32> to vector<4x1xf32>
    %968 = vector.broadcast %967 : vector<4x1xf32> to vector<4x256xf32>
    %969 = arith.mulf %966, %968 : vector<4x256xf32>
    %970 = arith.addf %965, %969 : vector<4x256xf32>
    %c5_331 = arith.constant 5 : index
    %c0_332 = arith.constant 0 : index
    %971 = vector.load %arg5[%c5_331, %c0_332] : memref<7x256xf32, #tpu.memory_space<vmem>>, vector<1x256xf32>
    %972 = vector.broadcast %971 : vector<1x256xf32> to vector<4x256xf32>
    %973 = arith.mulf %970, %972 : vector<4x256xf32>
    %974 = arith.addf %934, %973 : vector<4x256xf32>
    %cst_333 = arith.constant 0.000000e+00 : f32
    %975 = vector.broadcast %cst_333 : f32 to vector<4x256xf32>
    %c0_334 = arith.constant 0 : index
    %c18_335 = arith.constant 18 : index
    %976 = vector.load %arg19[%c0_334, %c18_335] : memref<4x562xf32, #tpu.memory_space<vmem>>, vector<4x256xf32>
    %977 = vector.extract_strided_slice %569 {offsets = [0, 6], sizes = [4, 1], strides = [1, 1]} : vector<4x49xf32> to vector<4x1xf32>
    %978 = vector.broadcast %977 : vector<4x1xf32> to vector<4x256xf32>
    %979 = arith.mulf %976, %978 : vector<4x256xf32>
    %980 = arith.addf %975, %979 : vector<4x256xf32>
    %c0_336 = arith.constant 0 : index
    %c66_337 = arith.constant 66 : index
    %981 = vector.load %arg19[%c0_336, %c66_337] : memref<4x562xf32, #tpu.memory_space<vmem>>, vector<4x256xf32>
    %982 = vector.extract_strided_slice %569 {offsets = [0, 13], sizes = [4, 1], strides = [1, 1]} : vector<4x49xf32> to vector<4x1xf32>
    %983 = vector.broadcast %982 : vector<4x1xf32> to vector<4x256xf32>
    %984 = arith.mulf %981, %983 : vector<4x256xf32>
    %985 = arith.addf %980, %984 : vector<4x256xf32>
    %c0_338 = arith.constant 0 : index
    %c114_339 = arith.constant 114 : index
    %986 = vector.load %arg19[%c0_338, %c114_339] : memref<4x562xf32, #tpu.memory_space<vmem>>, vector<4x256xf32>
    %987 = vector.extract_strided_slice %569 {offsets = [0, 20], sizes = [4, 1], strides = [1, 1]} : vector<4x49xf32> to vector<4x1xf32>
    %988 = vector.broadcast %987 : vector<4x1xf32> to vector<4x256xf32>
    %989 = arith.mulf %986, %988 : vector<4x256xf32>
    %990 = arith.addf %985, %989 : vector<4x256xf32>
    %c0_340 = arith.constant 0 : index
    %c162_341 = arith.constant 162 : index
    %991 = vector.load %arg19[%c0_340, %c162_341] : memref<4x562xf32, #tpu.memory_space<vmem>>, vector<4x256xf32>
    %992 = vector.extract_strided_slice %569 {offsets = [0, 27], sizes = [4, 1], strides = [1, 1]} : vector<4x49xf32> to vector<4x1xf32>
    %993 = vector.broadcast %992 : vector<4x1xf32> to vector<4x256xf32>
    %994 = arith.mulf %991, %993 : vector<4x256xf32>
    %995 = arith.addf %990, %994 : vector<4x256xf32>
    %c0_342 = arith.constant 0 : index
    %c210_343 = arith.constant 210 : index
    %996 = vector.load %arg19[%c0_342, %c210_343] : memref<4x562xf32, #tpu.memory_space<vmem>>, vector<4x256xf32>
    %997 = vector.extract_strided_slice %569 {offsets = [0, 34], sizes = [4, 1], strides = [1, 1]} : vector<4x49xf32> to vector<4x1xf32>
    %998 = vector.broadcast %997 : vector<4x1xf32> to vector<4x256xf32>
    %999 = arith.mulf %996, %998 : vector<4x256xf32>
    %1000 = arith.addf %995, %999 : vector<4x256xf32>
    %c0_344 = arith.constant 0 : index
    %c258_345 = arith.constant 258 : index
    %1001 = vector.load %arg19[%c0_344, %c258_345] : memref<4x562xf32, #tpu.memory_space<vmem>>, vector<4x256xf32>
    %1002 = vector.extract_strided_slice %569 {offsets = [0, 41], sizes = [4, 1], strides = [1, 1]} : vector<4x49xf32> to vector<4x1xf32>
    %1003 = vector.broadcast %1002 : vector<4x1xf32> to vector<4x256xf32>
    %1004 = arith.mulf %1001, %1003 : vector<4x256xf32>
    %1005 = arith.addf %1000, %1004 : vector<4x256xf32>
    %c0_346 = arith.constant 0 : index
    %c306_347 = arith.constant 306 : index
    %1006 = vector.load %arg19[%c0_346, %c306_347] : memref<4x562xf32, #tpu.memory_space<vmem>>, vector<4x256xf32>
    %1007 = vector.extract_strided_slice %569 {offsets = [0, 48], sizes = [4, 1], strides = [1, 1]} : vector<4x49xf32> to vector<4x1xf32>
    %1008 = vector.broadcast %1007 : vector<4x1xf32> to vector<4x256xf32>
    %1009 = arith.mulf %1006, %1008 : vector<4x256xf32>
    %1010 = arith.addf %1005, %1009 : vector<4x256xf32>
    %c6_348 = arith.constant 6 : index
    %c0_349 = arith.constant 0 : index
    %1011 = vector.load %arg5[%c6_348, %c0_349] : memref<7x256xf32, #tpu.memory_space<vmem>>, vector<1x256xf32>
    %1012 = vector.broadcast %1011 : vector<1x256xf32> to vector<4x256xf32>
    %1013 = arith.mulf %1010, %1012 : vector<4x256xf32>
    %1014 = arith.addf %974, %1013 : vector<4x256xf32>
    %1015 = vector.extract_strided_slice %571 {offsets = [0, 2], sizes = [4, 1], strides = [1, 1]} : vector<4x8xf32> to vector<4x1xf32>
    %1016 = vector.shape_cast %1015 : vector<4x1xf32> to vector<4x1xf32>
    %1017 = vector.broadcast %1016 : vector<4x1xf32> to vector<4x256xf32>
    %1018 = vector.extract_strided_slice %1014 {offsets = [0, 0], sizes = [1, 256], strides = [1, 1]} : vector<4x256xf32> to vector<1x256xf32>
    %1019 = vector.extract_strided_slice %570 {offsets = [0, 0], sizes = [4, 1], strides = [1, 1]} : vector<4x4xf32> to vector<4x1xf32>
    %1020 = vector.broadcast %1018 : vector<1x256xf32> to vector<4x256xf32>
    %1021 = vector.broadcast %1019 : vector<4x1xf32> to vector<4x256xf32>
    %1022 = arith.mulf %1020, %1021 : vector<4x256xf32>
    %1023 = arith.addf %1017, %1022 : vector<4x256xf32>
    %1024 = vector.extract_strided_slice %1014 {offsets = [1, 0], sizes = [1, 256], strides = [1, 1]} : vector<4x256xf32> to vector<1x256xf32>
    %1025 = vector.extract_strided_slice %570 {offsets = [0, 1], sizes = [4, 1], strides = [1, 1]} : vector<4x4xf32> to vector<4x1xf32>
    %1026 = vector.broadcast %1024 : vector<1x256xf32> to vector<4x256xf32>
    %1027 = vector.broadcast %1025 : vector<4x1xf32> to vector<4x256xf32>
    %1028 = arith.mulf %1026, %1027 : vector<4x256xf32>
    %1029 = arith.addf %1023, %1028 : vector<4x256xf32>
    %1030 = vector.extract_strided_slice %1014 {offsets = [2, 0], sizes = [1, 256], strides = [1, 1]} : vector<4x256xf32> to vector<1x256xf32>
    %1031 = vector.extract_strided_slice %570 {offsets = [0, 2], sizes = [4, 1], strides = [1, 1]} : vector<4x4xf32> to vector<4x1xf32>
    %1032 = vector.broadcast %1030 : vector<1x256xf32> to vector<4x256xf32>
    %1033 = vector.broadcast %1031 : vector<4x1xf32> to vector<4x256xf32>
    %1034 = arith.mulf %1032, %1033 : vector<4x256xf32>
    %1035 = arith.addf %1029, %1034 : vector<4x256xf32>
    %1036 = vector.extract_strided_slice %1014 {offsets = [3, 0], sizes = [1, 256], strides = [1, 1]} : vector<4x256xf32> to vector<1x256xf32>
    %1037 = vector.extract_strided_slice %570 {offsets = [0, 3], sizes = [4, 1], strides = [1, 1]} : vector<4x4xf32> to vector<4x1xf32>
    %1038 = vector.broadcast %1036 : vector<1x256xf32> to vector<4x256xf32>
    %1039 = vector.broadcast %1037 : vector<4x1xf32> to vector<4x256xf32>
    %1040 = arith.mulf %1038, %1039 : vector<4x256xf32>
    %1041 = arith.addf %1035, %1040 : vector<4x256xf32>
    %1042 = arith.mulf %3, %1041 : vector<4x256xf32>
    %1043 = vector.extract_strided_slice %571 {offsets = [0, 3], sizes = [4, 1], strides = [1, 1]} : vector<4x8xf32> to vector<4x1xf32>
    %1044 = vector.broadcast %1043 : vector<4x1xf32> to vector<4x256xf32>
    %1045 = arith.mulf %1042, %1044 : vector<4x256xf32>
    %1046 = vector.extract_strided_slice %571 {offsets = [0, 4], sizes = [4, 1], strides = [1, 1]} : vector<4x8xf32> to vector<4x1xf32>
    %1047 = vector.broadcast %1046 : vector<4x1xf32> to vector<4x256xf32>
    %1048 = arith.addf %1045, %1047 : vector<4x256xf32>
    %cst_350 = arith.constant 0.000000e+00 : f32
    %1049 = vector.broadcast %cst_350 : f32 to vector<4x256xf32>
    %1050 = arith.maximumf %1048, %1049 : vector<4x256xf32>
    %1051 = vector.broadcast %567 : vector<4x1xf32> to vector<4x256xf32>
    %1052 = arith.mulf %1050, %1051 : vector<4x256xf32>
    %c0_351 = arith.constant 0 : index
    %c0_352 = arith.constant 0 : index
    %c0_353 = arith.constant 0 : index
    %1053 = vector.load %arg17[%c0_351, %c0_352, %c0_353] : memref<1x4x256xf32, #tpu.memory_space<vmem>>, vector<1x4x256xf32>
    %1054 = vector.shape_cast %1053 : vector<1x4x256xf32> to vector<4x256xf32>
    %1055 = vector.shape_cast %1052 : vector<4x256xf32> to vector<1x4x256xf32>
    tpu.vector_store %arg17[%c0_351, %c0_352, %c0_353], %1055 {strides = array<i32>} : memref<1x4x256xf32, #tpu.memory_space<vmem>>, vector<1x4x256xf32>,
    return
  }
  func.func @transform_0(%arg0: i32) -> (i32, i32, i32) {
    %c0_i32 = arith.constant 0 : i32
    %c0_i32_0 = arith.constant 0 : i32
    %c0_i32_1 = arith.constant 0 : i32
    return %arg0, %c0_i32, %c0_i32_0 : i32, i32, i32
  }
  func.func @transform_1(%arg0: i32) -> (i32, i32, i32) {
    %c0_i32 = arith.constant 0 : i32
    %c0_i32_0 = arith.constant 0 : i32
    %c0_i32_1 = arith.constant 0 : i32
    return %arg0, %c0_i32, %c0_i32_0 : i32, i32, i32
  }
  func.func @transform_2(%arg0: i32) -> (i32, i32) {
    %c0_i32 = arith.constant 0 : i32
    %c0_i32_0 = arith.constant 0 : i32
    %c0_i32_1 = arith.constant 0 : i32
    return %c0_i32, %c0_i32_0 : i32, i32
  }
  func.func @transform_3(%arg0: i32) -> (i32, i32) {
    %c0_i32 = arith.constant 0 : i32
    %c0_i32_0 = arith.constant 0 : i32
    %c0_i32_1 = arith.constant 0 : i32
    return %c0_i32, %c0_i32_0 : i32, i32
  }
  func.func @transform_4(%arg0: i32) -> (i32, i32) {
    %c0_i32 = arith.constant 0 : i32
    %c0_i32_0 = arith.constant 0 : i32
    %c0_i32_1 = arith.constant 0 : i32
    return %c0_i32, %c0_i32_0 : i32, i32
  }
  func.func @transform_5(%arg0: i32) -> (i32, i32) {
    %c0_i32 = arith.constant 0 : i32
    %c0_i32_0 = arith.constant 0 : i32
    %c0_i32_1 = arith.constant 0 : i32
    return %c0_i32, %c0_i32_0 : i32, i32
  }
  func.func @transform_6(%arg0: i32) -> (i32, i32) {
    %c0_i32 = arith.constant 0 : i32
    %c0_i32_0 = arith.constant 0 : i32
    %c0_i32_1 = arith.constant 0 : i32
    return %c0_i32, %c0_i32_0 : i32, i32
  }
  func.func @transform_7(%arg0: i32) -> (i32, i32) {
    %c0_i32 = arith.constant 0 : i32
    %c0_i32_0 = arith.constant 0 : i32
    %c0_i32_1 = arith.constant 0 : i32
    return %c0_i32, %c0_i32_0 : i32, i32
  }
  func.func @transform_8(%arg0: i32) -> (i32, i32) {
    %c0_i32 = arith.constant 0 : i32
    %c0_i32_0 = arith.constant 0 : i32
    %c0_i32_1 = arith.constant 0 : i32
    return %c0_i32, %c0_i32_0 : i32, i32
  }
  func.func @transform_9(%arg0: i32) -> (i32, i32) {
    %c0_i32 = arith.constant 0 : i32
    %c0_i32_0 = arith.constant 0 : i32
    %c0_i32_1 = arith.constant 0 : i32
    return %c0_i32, %c0_i32_0 : i32, i32
  }
  func.func @transform_10(%arg0: i32) -> (i32, i32) {
    %c0_i32 = arith.constant 0 : i32
    %c0_i32_0 = arith.constant 0 : i32
    %c0_i32_1 = arith.constant 0 : i32
    return %c0_i32, %c0_i32_0 : i32, i32
  }
  func.func @transform_11(%arg0: i32) -> (i32, i32) {
    %c0_i32 = arith.constant 0 : i32
    %c0_i32_0 = arith.constant 0 : i32
    %c0_i32_1 = arith.constant 0 : i32
    return %c0_i32, %c0_i32_0 : i32, i32
  }
  func.func @transform_12(%arg0: i32) -> (i32, i32) {
    %c0_i32 = arith.constant 0 : i32
    %c0_i32_0 = arith.constant 0 : i32
    %c0_i32_1 = arith.constant 0 : i32
    return %c0_i32, %c0_i32_0 : i32, i32
  }
  func.func @transform_13(%arg0: i32) -> (i32, i32) {
    %c0_i32 = arith.constant 0 : i32
    %c0_i32_0 = arith.constant 0 : i32
    %c0_i32_1 = arith.constant 0 : i32
    return %c0_i32, %c0_i32_0 : i32, i32
  }
  func.func @transform_14(%arg0: i32) -> (i32, i32) {
    %c0_i32 = arith.constant 0 : i32
    %c0_i32_0 = arith.constant 0 : i32
    %c0_i32_1 = arith.constant 0 : i32
    return %c0_i32, %c0_i32_0 : i32, i32
  }
  func.func @transform_15(%arg0: i32) -> (i32, i32, i32) {
    %c0_i32 = arith.constant 0 : i32
    %c0_i32_0 = arith.constant 0 : i32
    %c0_i32_1 = arith.constant 0 : i32
    return %arg0, %c0_i32, %c0_i32_0 : i32, i32, i32
  }
  func.func @transform_16(%arg0: i32) -> (i32, i32, i32) {
    %c0_i32 = arith.constant 0 : i32
    %c0_i32_0 = arith.constant 0 : i32
    %c0_i32_1 = arith.constant 0 : i32
    return %arg0, %c0_i32, %c0_i32_0 : i32, i32, i32
  }
}

</mosaic_0001>

<bundles_post_ra>
// kernel: ciu_forward.1
= control target key start
LH: loop header
LB: loop body
LE: loop exit
PB: predicated region body
PF: predicated region fallthrough
CT: control target
= control target key end

     0   :  { %s7111_s21 = smov 0   ;;  %s10406_s0 = inlined_call_operand.vmem [shape: f32[2,4,256], index: 0, kind: input, shape index: {}]   ;;  %s10407_s1 = inlined_call_operand.vmem [shape: f32[2,4,256], index: 1, kind: input, shape index: {}]   ;;  %s10408_s2 = inlined_call_operand.vmem [shape: f32[1,562], index: 2, kind: input, shape index: {}]   ;;  %s10409_s3 = inlined_call_operand.vmem [shape: f32[5,562], index: 3, kind: input, shape index: {}]   ;;  %s10410_s4 = inlined_call_operand.vmem [shape: f32[7,256], index: 4, kind: input, shape index: {}]   ;;  %s10411_s5 = inlined_call_operand.vmem [shape: f32[4,25], index: 5, kind: input, shape index: {}]   ;;  %s10412_s6 = inlined_call_operand.vmem [shape: f32[4,49], index: 6, kind: input, shape index: {}]   ;;  %s10413_s7 = inlined_call_operand.vmem [shape: f32[4,4], index: 7, kind: input, shape index: {}]   ;;  %s10414_s8 = inlined_call_operand.vmem [shape: f32[4,4], index: 8, kind: input, shape index: {}]   ;;  %s10415_s9 = inlined_call_operand.vmem [shape: f32[4,8], index: 9, kind: input, shape index: {}]   ;;  %s10416_s10 = inlined_call_operand.vmem [shape: f32[4,25], index: 10, kind: input, shape index: {}]   ;;  %s10417_s11 = inlined_call_operand.vmem [shape: f32[4,49], index: 11, kind: input, shape index: {}]   ;;  %s10418_s12 = inlined_call_operand.vmem [shape: f32[4,4], index: 12, kind: input, shape index: {}]   ;;  %s10419_s13 = inlined_call_operand.vmem [shape: f32[4,4], index: 13, kind: input, shape index: {}]   ;;  %s10420_s14 = inlined_call_operand.vmem [shape: f32[4,8], index: 14, kind: input, shape index: {}]   ;;  %s10421_s15 = inlined_call_operand.vmem [shape: f32[2,4,256], index: 15, kind: output, shape index: {0}]   ;;  %s10422_s16 = inlined_call_operand.vmem [shape: f32[2,4,256], index: 16, kind: output, shape index: {1}]  }
   0x1   :  { %10649 = sst [smem:[#allocation69_spill]] %s10406_s0 }
   0x2 LB: > { %s6605_s22 = sadd.s32 4294967295, %s6940_s21   ;;  %p6609_p0 = scmp.ge.s32.totalorder %s6940_s21, 1  ;;  %s6940_s21 = sphi %s7111_s21, %s27_s21  }
   0x3   : > { %p475_p1 = scmp.lt.s32.totalorder %s6940_s21, 3 }
   0x5   : > { %p476_p2 = pnand %p6609_p0, %p475_p1 }
   0x7   : > { %479 = sbr.rel (%p476_p2) target bundleno = 9790 (0x263e), region = 80 }
   0xc   : > { %v577_v0 = vld [vmem:[%s10415_s9] sm:$0xf]  ;;  %v578_v1 = vlaneseq  ;;  %s10523_s25 = smov 127   ;;  %v10425_v3 = vmov 0   ;;  %p535_p3 = scmp.lt.s32.totalorder %s6605_s22, 1  ;;  %v6945_v11 = vmov 0.0  }
   0xd   : > { %619 = vrot.lane.b32.xlu1 %v577_v0, %s10523_s25  ;;  %v822_v2 = vld [vmem:[%s10409_s3] ss:$8 sm:$0xf]  ;;  %s10473_s30 = smov 126   ;;  %637 = vst [vmem:[#allocation2] sm:$0xff] %v6945_v11  ;;  %639 = vst [vmem:[#allocation2 + $0x10] sm:$0xff] %v6945_v11 }
   0xe   : > { %6746 = vset.pattern.permute.xlu1 %v10425_v3  ;;  %v7127_v4 = vshrl.u32 %v578_v1, 7  ;;  %v823_v5 = vld [vmem:[%s10409_s3] ss:$8 sm:$0x10]  ;;  %s11043_s22 = smov (!%p535_p3, %s6605_s22), 1  ;;  %s10652_s19 = sld [smem:[#allocation69_spill]] }
   0xf   : > { %v824_v6 = vor.u32 %v823_v5, %v822_v2  ;;  %s7141_s0 = sshll.u32 %s11043_s22, 3  ;;  %v10423_v14 = vmov 6   ;;  %s10471_s23 = smov 69   ;;  %v7154_v15 = vld [vmem:[%s10411_s5] sm:$0xf]  ;;  %v10429_v16 = vmov 5  }
  0x10   : > { %v7133_v7 = vsub.s32 2, %v7127_v4  ;;  %v7136_v8 = vsub.s32 3, %v7127_v4  ;;  %6752 = vset.pattern.permute.xlu0 %v10423_v14  ;;  %v10443_v17 = vmov 10   ;;  %v7163_v18 = vsub.s32 0, %v7127_v4  ;;  %s544_s28 = scalar_lea.vmem %s10407_s1, %s7141_s0  ;;  %s6963_s24 = smov 112  }
  0x11   : > { %623 = vrot.lane.b32.xlu1 %v577_v0, %s10473_s30  ;;  %v7166_v19 = vsub.s32 1, %v7127_v4  ;;  %v10449_v20 = vmov 15   ;;  %vm560_vm0 = vcmask 1043456   ;;  %v7178_v24 = vld [vmem:[%s544_s28] sm:$0xff]  ;;  %v10427_v25 = vmov 20   ;;  %s6964_s26 = smov 96  }
  0x12   : > { %10650 = vst [vmem:[#allocation4_spill] sm:$0xff] %v7133_v7  ;;  %10651 = vst [vmem:[#allocation5_spill] sm:$0xff] %v7136_v8  ;;  %v837_v9 = vrot.slane %v824_v6, %v7133_v7  ;;  %v841_v10 = vrot.slane %v824_v6, %v7136_v8  ;;  %v829_v21 = vrot.slane %v824_v6, %v7163_v18  ;;  %v7183_v27 = vsub.s32 4, %v7127_v4  ;;  %v6619_v38 = vld [vmem:[%s10409_s3 + $0x1] ss:$8 sm:$0xf] }
  0x13   : > { %10654 = vst [vmem:[#allocation7_spill] sm:$0xff] %v7163_v18  ;;  %10655 = vst [vmem:[#allocation8_spill] sm:$0xff] %v7166_v19  ;;  %v833_v22 = vrot.slane %v824_v6, %v7166_v19  ;;  %v568_v30 = vcombine.high %v7178_v24, %v7178_v24  ;;  %v570_v33 = vsel %vm560_vm0, %v7178_v24, 0.0  ;;  %v10455_v35 = vmov 1   ;;  %s6965_s22 = smov 80   ;;  %s6966_s27 = smov 64  }
  0x14   : > { %v847_v12 = vcombine.low %v837_v9, %v841_v10  ;;  %s539_s20 = scalar_lea.vmem %s10652_s19, %s7141_s0  ;;  %10656 = vst [vmem:[#allocation9_spill] sm:$0xff] %v7178_v24  ;;  %10657 = vst [vmem:[#allocation10_spill] sm:$0xff] %v7183_v27  ;;  %v845_v32 = vrot.slane %v824_v6, %v7183_v27  ;;  %v10435_v37 = vmov 11   ;;  %v6620_v39 = vld [vmem:[%s10409_s3 + $0x1] ss:$8 sm:$0x10] }
  0x15   : > { %642 = vperm.xlu1 %6746, %v577_v0   ;;  %v7147_v13 = vld [vmem:[%s539_s20] sm:$0xff]  ;;  %v846_v26 = vcombine.low %v829_v21, %v833_v22  ;;  %v571_v34 = vsel %vm560_vm0, %v568_v30, 0.0  ;;  %v1072_v40 = vor.u32 %v6620_v39, %v6619_v38  ;;  %v10445_v41 = vmov 16   ;;  %s10469_s20 = smov 70   ;;  %s10467_s19 = smov 71  }
  0x16   : > { %10653 = vst [vmem:[#allocation6_spill] sm:$0xff] %v7147_v13  ;;  %850 = vrot.lane.b32.xlu0 %v847_v12, %s10471_s23  ;;  %640 = vst [vmem:[#allocation2 + $0x8] sm:$0xff] %v7147_v13  ;;  %v558_v23 = vcombine.high %v7147_v13, %v7147_v13  ;;  %v561_v28 = vsel %vm560_vm0, %v7147_v13, 0.0  ;;  %v572_v36 = vadd.f32 %v571_v34, %v570_v33  ;;  %v10457_v44 = vmov 21   ;;  %s10579_s17 = smov 5   ;;  %s10577_s18 = smov 3  }
  0x17   : > { %v1077_v42 = vrot.slane %v1072_v40, %v7163_v18  ;;  %v1081_v43 = vrot.slane %v1072_v40, %v7166_v19  ;;  %v1085_v46 = vrot.slane %v1072_v40, %v7133_v7  ;;  %v1089_v47 = vrot.slane %v1072_v40, %v7136_v8  ;;  %s10522_s28 = smov 4   ;;  %s10521_s29 = smov 2  }
  0x18   : > { %v562_v29 = vsel %vm560_vm0, %v558_v23, 0.0  ;;  %v1093_v48 = vrot.slane %v1072_v40, %v7183_v27  ;;  %v10441_v49 = vmov 2   ;;  %v10453_v51 = vmov 7   ;;  %s10517_s30 = smov 72   ;;  %s10524_s25 = smov 73  }
  0x19   : > { %650 = vperm.xlu1 %6746, %v7154_v15   ;;  %v563_v31 = vadd.f32 %v562_v29, %v561_v28  ;;  %v1094_v45 = vcombine.low %v1077_v42, %v1081_v43  ;;  %v1095_v50 = vcombine.low %v1085_v46, %v1089_v47  ;;  %v10431_v52 = vmov 12  }
  0x1a   : > { %v10437_v53 = vmov 17   ;;  %v10447_v54 = vmov 22   ;;  %v6962_v57 = vmov 839922192   ;;  %v10483_v24 = vmov 4  }
  0x1b   : > { %v653_v58 = vunpack.c.l.s4 %v6962_v57  ;;  %vm856_vm1 = vcmask 564224   ;;  %vm1104_vm2 = vcmask 572416   ;;  %vm696_vm3 = vcmask 916480  }
  0x1c   : > { %vm734_vm4 = vcmask 785408   ;;  %vm772_vm5 = vcmask 654336   ;;  %vm811_vm6 = vcmask 523264   ;;  %vm1352_vm7 = vcmask 580608  }
  0x1d   : > { %6747 = vset.pattern.permute.xlu1 %v10429_v16  ;;  %v654_v60 = vunpack.c.0.s8 %v653_v58  ;;  %v7251_v22 = vld [vmem:[#allocation2 + $0xc] sm:$0xff]  ;;  %v7260_v30 = vld [vmem:[#allocation2 + $0x4] sm:$0xff]  ;;  %vm1600_vm8 = vcmask 588800   ;;  %vm1848_vm9 = vcmask 596992   ;;  %vm882_vm10 = vcmask 482304  }
  0x1e   : > { %670 = vperm.xlu1 %6747, %v7154_v15   ;;  %vm1130_vm11 = vcmask 474112   ;;  %vm10570_vm12 = vcmask 465920   ;;  %vm10569_vm13 = vcmask 457728   ;;  %vm10562_vm14 = vcmask 449536  }
  0x1f   : > { %v7237_v62 = vsub.s32 %v654_v60, %v7127_v4  ;;  %vm10558_vm15 = vcmask 404480  }
  0x21   : > { %10661 = vst [vmem:[#allocation14_spill] sm:$0xff] %v7237_v62 }
  0x22   : > { %6748 = vset.pattern.permute.xlu1 %v10443_v17 }
  0x23   : > { %708 = vperm.xlu1 %6748, %v7154_v15  }
  0x27   : > { %6749 = vset.pattern.permute.xlu1 %v10449_v20 }
  0x28   : > { %746 = vperm.xlu1 %6749, %v7154_v15  }
  0x2c   : > { %6750 = vset.pattern.permute.xlu1 %v10427_v25 }
  0x2d   : > { %787 = vperm.xlu1 %6750, %v7154_v15  }
  0x31   : > { %848 = vrot.lane.b32.xlu1 %v846_v26, %s10471_s23 }
  0x32   : > { %6751 = vset.pattern.permute.xlu1 %v10455_v35 }
  0x35   : > { %564 = vadd.xlane.f32.xlu0 %v563_v31  ;;  %852 = vrot.lane.b32.xlu1 %v845_v32, %s10471_s23  ;;  %v785_v32 = vld [vmem:[#allocation2 + $0x14] sm:$0xf]  ;;  %s10575_s23 = smov 58  }
  0x39   : > { %573 = vadd.xlane.f32.xlu0 %v572_v36  ;;  %901 = vperm.xlu1 %6751, %v7154_v15  }
  0x3d   : > { %6753 = vset.pattern.permute.xlu1 %v10435_v37 }
  0x3e   : > { %958 = vperm.xlu1 %6753, %v7154_v15  }
  0x42   : > { %6754 = vset.pattern.permute.xlu1 %v10445_v41 }
  0x43   : > { %995 = vperm.xlu1 %6754, %v7154_v15  }
  0x47   : > { %6755 = vset.pattern.permute.xlu1 %v10457_v44  ;;  %v10462_v44 = vmov 18  }
  0x48   : > { %1035 = vperm.xlu1 %6755, %v7154_v15  }
  0x4c   : > { %1096 = vrot.lane.b32.xlu1 %v1094_v45, %s10469_s20 }
  0x4d   : > { %6756 = vset.pattern.permute.xlu1 %v10441_v49 }
  0x4f   : > { %921 = vperm.xlu0 %6752, %v7154_v15  }
  0x50   : > { %1100 = vrot.lane.b32.xlu1 %v1093_v48, %s10469_s20 }
  0x53   : > { %1098 = vrot.lane.b32.xlu0 %v1095_v50, %s10469_s20  ;;  %s10573_s20 = smov 57  }
  0x54   : > { %6757 = vset.pattern.permute.xlu0 %v10453_v51  ;;  %1149 = vperm.xlu1 %6756, %v7154_v15  }
  0x57   : > { %1169 = vperm.xlu0 %6757, %v7154_v15  }
  0x58   : > { %6758 = vset.pattern.permute.xlu1 %v10431_v52  ;;  %v1281_v52 = vld [vmem:[#allocation2 + $0x14] sm:$0xf] }
  0x59   : > { %1206 = vperm.xlu1 %6758, %v7154_v15  }
  0x5d   : > { %6759 = vset.pattern.permute.xlu1 %v10437_v53 }
  0x5e   : > { %1243 = vperm.xlu1 %6759, %v7154_v15  }
  0x62   : > { %6760 = vset.pattern.permute.xlu1 %v10447_v54 }
  0x7f   : > { %v7228_v55 = vpop.permute.xlu1 %619 }
  0x80   : > { %10658 = vst [vmem:[#allocation11_spill] sm:$0xff] %v7228_v55 }
  0x83   : > { %v7230_v56 = vpop.permute.xlu1 %623 }
  0x84   : > { %10659 = vst [vmem:[#allocation12_spill] sm:$0xff] %v7230_v56 }
  0x88   : > { %v7270_v38 = vpop.permute.xlu0 %850 }
  0x90   : > { %v7232_v59 = vpop.permute.xlu1 %642 }
  0x91   : > { %10660 = vst [vmem:[#allocation13_spill] sm:$0xff] %v7232_v59 }
  0x94   : > { %v7234_v61 = vpop.permute.xlu1 %650 }
  0x99   : > { %v671_v63 = vpop.permute.xlu1 %670 }
  0x9a   : > { %v678_v0 = vrot.slane %v671_v63, %v7237_v62 }
  0x9c   : > { %v681_v1 = vmul.f32 %v678_v0, %v7147_v13  ;;  %v680_v2 = vmul.f32 0.0, %v678_v0 }
  0x9e   : > { %688 = vrot.lane.b32.xlu1 %v681_v1, %s6963_s24  ;;  %686 = vrot.lane.b32.xlu0 %v680_v2, %s6963_s24  ;;  %v709_v5 = vpop.permute.xlu1 %708 }
  0x9f   : > { %v716_v6 = vrot.slane %v709_v5, %v7237_v62 }
  0xa1   : > { %v719_v9 = vmul.f32 %v716_v6, %v7147_v13  ;;  %v718_v4 = vmul.f32 0.0, %v716_v6 }
  0xa2   : > { %690 = vrot.lane.b32.xlu0 %v680_v2, %s6963_s24 }
  0xa3   : > { %v747_v10 = vpop.permute.xlu1 %746  ;;  %726 = vrot.lane.b32.xlu1 %v719_v9, %s6964_s26 }
  0xa4   : > { %v754_v11 = vrot.slane %v747_v10, %v7237_v62 }
  0xa6   : > { %724 = vrot.lane.b32.xlu0 %v718_v4, %s6964_s26  ;;  %v757_v12 = vmul.f32 %v754_v11, %v7147_v13  ;;  %v756_v26 = vmul.f32 0.0, %v754_v11 }
  0xa8   : > { %v788_v21 = vpop.permute.xlu1 %787  ;;  %764 = vrot.lane.b32.xlu1 %v757_v12, %s6965_s22 }
  0xa9   : > { %v795_v23 = vrot.slane %v788_v21, %v7237_v62 }
  0xaa   : > { %728 = vrot.lane.b32.xlu0 %v718_v4, %s6964_s26 }
  0xab   : > { %v798_v28 = vmul.f32 %v795_v23, %v7251_v22  ;;  %v797_v31 = vmul.f32 %v795_v23, %v7260_v30  ;;  %v799_v34 = vmul.f32 %v795_v23, %v785_v32 }
  0xac   : > { %v7257_v29 = vpop.permute.xlu1 %848 }
  0xad   : > { %805 = vrot.lane.b32.xlu1 %v798_v28, %s6966_s27  ;;  %v1033_v28 = vld [vmem:[#allocation2 + $0x14] sm:$0xf] }
  0xae   : > { %762 = vrot.lane.b32.xlu0 %v756_v26, %s6965_s22 }
  0xb0   : > { %v7264_v33 = vpop.permute.xlu1 %852 }
  0xb2   : > { %766 = vrot.lane.b32.xlu0 %v756_v26, %s6965_s22 }
  0xb4   : > { %v7267_v36 = vpop.permute.xlu1 %901 }
  0xb6   : > { %803 = vrot.lane.b32.xlu0 %v797_v31, %s6966_s27 }
  0xb9   : > { %v959_v39 = vpop.permute.xlu1 %958 }
  0xba   : > { %807 = vrot.lane.b32.xlu0 %v799_v34, %s6966_s27  ;;  %v966_v48 = vrot.slane %v959_v39, %v7237_v62 }
  0xbc   : > { %v968_v58 = vmul.f32 0.0, %v966_v48  ;;  %v969_v2 = vmul.f32 %v966_v48, %v7147_v13 }
  0xbe   : > { %v7272_v40 = vpop.xlane.xlu0 %564  ;;  %v996_v42 = vpop.permute.xlu1 %995 }
  0xbf   : > { %10662 = vst [vmem:[#allocation15_spill] sm:$0xff] %v7272_v40  ;;  %v1003_v1 = vrot.slane %v996_v42, %v7237_v62 }
  0xc1   : > { %v1005_v4 = vmul.f32 0.0, %v1003_v1  ;;  %v1006_v10 = vmul.f32 %v1003_v1, %v7147_v13 }
  0xc2   : > { %v7274_v43 = vpop.xlane.xlu0 %573 }
  0xc3   : > { %v1036_v45 = vpop.permute.xlu1 %1035  ;;  %v575_v16 = vmul.f32 0.00390625, %v7274_v43 }
  0xc4   : > { %v1043_v9 = vrot.slane %v1036_v45, %v7237_v62 }
  0xc6   : > { %v1046_v12 = vmul.f32 %v1043_v9, %v7251_v22  ;;  %v1045_v26 = vmul.f32 %v1043_v9, %v7260_v30  ;;  %v1047_v34 = vmul.f32 %v1043_v9, %v1033_v28  ;;  %v6621_v28 = vld [vmem:[%s10409_s3 + $0x2] ss:$8 sm:$0xf] }
  0xc7   : > { %v7280_v57 = vpop.permute.xlu1 %1096 }
  0xca   : > { %v922_v46 = vpop.permute.xlu0 %921 }
  0xcb   : > { %v929_v47 = vrot.slane %v922_v46, %v7237_v62  ;;  %v7287_v0 = vpop.permute.xlu1 %1100 }
  0xcd   : > { %v933_v50 = vmul.f32 0.0, %v929_v47  ;;  %v932_v60 = vmul.f32 %v929_v47, %v7147_v13 }
  0xce   : > { %v7285_v63 = vpop.permute.xlu0 %1098 }
  0xcf   : > { %941 = vrot.lane.b32.xlu0 %v933_v50, %s6963_s24  ;;  %937 = vrot.lane.b32.xlu1 %v933_v50, %s6963_s24  ;;  %v7293_v6 = vpop.permute.xlu1 %1149  ;;  %v10451_v50 = vmov 8  }
  0xd0   : > { %6762 = vset.pattern.permute.xlu0 %v10451_v50 }
  0xd2   : > { %v1170_v5 = vpop.permute.xlu0 %1169 }
  0xd3   : > { %974 = vrot.lane.b32.xlu0 %v968_v58, %s6964_s26  ;;  %939 = vrot.lane.b32.xlu1 %v932_v60, %s6963_s24  ;;  %v1177_v11 = vrot.slane %v1170_v5, %v7237_v62 }
  0xd4   : > { %v1207_v21 = vpop.permute.xlu1 %1206 }
  0xd5   : > { %v1179_v23 = vmul.f32 0.0, %v1177_v11  ;;  %v1214_v31 = vrot.slane %v1207_v21, %v7237_v62  ;;  %v1180_v39 = vmul.f32 %v1177_v11, %v7147_v13 }
  0xd7   : > { %978 = vrot.lane.b32.xlu0 %v968_v58, %s6964_s26  ;;  %976 = vrot.lane.b32.xlu1 %v969_v2, %s6964_s26  ;;  %v1217_v45 = vmul.f32 %v1214_v31, %v7147_v13  ;;  %v1216_v47 = vmul.f32 0.0, %v1214_v31  ;;  %v10439_v58 = vmov 3   ;;  %v6622_v31 = vld [vmem:[%s10409_s3 + $0x2] ss:$8 sm:$0x10] }
  0xd9   : > { %v1244_v32 = vpop.permute.xlu1 %1243 }
  0xda   : > { %v1251_v42 = vrot.slane %v1244_v32, %v7237_v62 }
  0xdb   : > { %1011 = vrot.lane.b32.xlu0 %v1005_v4, %s6965_s22  ;;  %1013 = vrot.lane.b32.xlu1 %v1006_v10, %s6965_s22 }
  0xdc   : > { %v1254_v46 = vmul.f32 %v1251_v42, %v7147_v13  ;;  %v1253_v48 = vmul.f32 0.0, %v1251_v42 }
  0xdf   : > { %1015 = vrot.lane.b32.xlu0 %v1005_v4, %s6965_s22  ;;  %1053 = vrot.lane.b32.xlu1 %v1046_v12, %s6966_s27 }
  0xe3   : > { %1051 = vrot.lane.b32.xlu0 %v1045_v26, %s6966_s27  ;;  %1185 = vrot.lane.b32.xlu1 %v1179_v23, %s6963_s24 }
  0xe7   : > { %1055 = vrot.lane.b32.xlu0 %v1047_v34, %s6966_s27  ;;  %1187 = vrot.lane.b32.xlu1 %v1180_v39, %s6963_s24  ;;  %v1320_v34 = vor.u32 %v6622_v31, %v6621_v28 }
  0xe9   : > { %v1325_v42 = vrot.slane %v1320_v34, %v7163_v18 }
  0xeb   : > { %1189 = vrot.lane.b32.xlu0 %v1179_v23, %s6963_s24  ;;  %1224 = vrot.lane.b32.xlu1 %v1217_v45, %s6964_s26 }
  0xef   : > { %1222 = vrot.lane.b32.xlu0 %v1216_v47, %s6964_s26  ;;  %1261 = vrot.lane.b32.xlu1 %v1254_v46, %s6965_s22  ;;  %v1329_v46 = vrot.slane %v1320_v34, %v7166_v19 }
  0xf1   : > { %v1342_v28 = vcombine.low %v1325_v42, %v1329_v46  ;;  %v601_v42 = vrot.slane %v575_v16, %v7133_v7 }
  0xf3   : > { %1226 = vrot.lane.b32.xlu0 %v1216_v47, %s6964_s26  ;;  %1283 = vperm.xlu1 %6760, %v7154_v15   ;;  %v1333_v47 = vrot.slane %v1320_v34, %v7133_v7 }
  0xf7   : > { %1259 = vrot.lane.b32.xlu0 %v1253_v48, %s6965_s22  ;;  %6761 = vset.pattern.permute.xlu1 %v10439_v58 }
  0xfb   : > { %1263 = vrot.lane.b32.xlu0 %v1253_v48, %s6965_s22  ;;  %v1337_v48 = vrot.slane %v1320_v34, %v7136_v8 }
  0xfd   : > { %v1343_v31 = vcombine.low %v1333_v47, %v1337_v48  ;;  %v591_v48 = vrot.slane %v575_v16, %v7166_v19 }
 0x110   : > { %v7323_v60 = vpop.permute.xlu1 %688  ;;  %v7367_v25 = vpop.permute.xlu0 %686 }
 0x114   : > { %v7374_v46 = vpop.permute.xlu0 %690 }
 0x115   : > { %v7325_v1 = vpop.permute.xlu1 %726 }
 0x11a   : > { %v7327_v2 = vpop.permute.xlu1 %764 }
 0x11f   : > { %v7329_v5 = vpop.permute.xlu1 %805 }
 0x141   : > { %v7331_v9 = vpop.permute.xlu1 %937 }
 0x145   : > { %v7333_v4 = vpop.permute.xlu1 %939 }
 0x149   : > { %v7335_v10 = vpop.permute.xlu1 %976 }
 0x14d   : > { %v7337_v11 = vpop.permute.xlu1 %1013 }
 0x151   : > { %v7339_v12 = vpop.permute.xlu1 %1053 }
 0x155   : > { %v7341_v21 = vpop.permute.xlu1 %1185 }
 0x159   : > { %v7343_v23 = vpop.permute.xlu1 %1187 }
 0x15d   : > { %v7345_v26 = vpop.permute.xlu1 %1224 }
 0x15e   : > { %10663 = vst [vmem:[#allocation16_spill] sm:$0xff] %v7345_v26 }
 0x161   : > { %v7353_v32 = vpop.permute.xlu1 %1261 }
 0x162   : > { %10664 = vst [vmem:[#allocation17_spill] sm:$0xff] %v7353_v32 }
 0x16e   : > { %v1284_v39 = vpop.permute.xlu1 %1283 }
 0x16f   : > { %v1291_v45 = vrot.slane %v1284_v39, %v7237_v62  ;;  %v1341_v39 = vrot.slane %v1320_v34, %v7183_v27  ;;  %v576_v34 = vld [vmem:[%s10414_s8] sm:$0xf] }
 0x170   : > { %v602_v47 = vmul.f32 %v601_v42, %v576_v34 }
 0x171   : > { %v1294_v14 = vmul.f32 %v1291_v45, %v7251_v22  ;;  %v1293_v3 = vmul.f32 %v1291_v45, %v7260_v30 }
 0x173   : > { %1301 = vrot.lane.b32.xlu1 %v1294_v14, %s6966_s27  ;;  %1299 = vrot.lane.b32.xlu0 %v1293_v3, %s6966_s27  ;;  %v1295_v14 = vmul.f32 %v1291_v45, %v1281_v52  ;;  %v581_v3 = vrot.slane %v575_v16, %v7163_v18  ;;  %v7384_v52 = vpop.permute.xlu0 %724  ;;  %v10433_v45 = vmov 13  }
 0x175   : > { %v582_v43 = vmul.f32 %v581_v3, %v576_v34 }
 0x177   : > { %1344 = vrot.lane.b32.xlu1 %v1342_v28, %s10467_s19  ;;  %1346 = vrot.lane.b32.xlu0 %v1343_v31, %s10467_s19  ;;  %v592_v28 = vmul.f32 %v591_v48, %v576_v34  ;;  %v611_v31 = vrot.slane %v575_v16, %v7136_v8 }
 0x17b   : > { %1348 = vrot.lane.b32.xlu1 %v1341_v39, %s10467_s19  ;;  %1417 = vperm.xlu0 %6762, %v7154_v15   ;;  %v612_v39 = vmul.f32 %v611_v31, %v576_v34  ;;  %s10519_s19 = smov 59  }
 0x17f   : > { %1397 = vperm.xlu1 %6761, %v7154_v15   ;;  %1303 = vrot.lane.b32.xlu0 %v1295_v14, %s6966_s27  ;;  %v7389_v14 = vpop.permute.xlu0 %728 }
 0x183   : > { %584 = vrot.lane.b32.xlu1 %v582_v43, %s10579_s17  ;;  %604 = vrot.lane.b32.xlu0 %v602_v47, %s10577_s18  ;;  %v7392_v3 = vpop.permute.xlu0 %762  ;;  %s10583_s17 = smov 116  }
 0x184   : > { %6763 = vset.pattern.permute.xlu1 %v10433_v45 }
 0x187   : > { %594 = vrot.lane.b32.xlu1 %v592_v28, %s10522_s28  ;;  %v7394_v42 = vpop.permute.xlu0 %766  ;;  %s10546_s28 = smov 55  }
 0x18b   : > { %614 = vrot.lane.b32.xlu1 %v612_v39, %s10521_s29  ;;  %v7396_v43 = vpop.permute.xlu0 %803  ;;  %s10598_s29 = smov 122  }
 0x18f   : > { %v7398_v47 = vpop.permute.xlu0 %807 }
 0x193   : > { %v7400_v48 = vpop.permute.xlu0 %941 }
 0x197   : > { %v7402_v16 = vpop.permute.xlu0 %974 }
 0x19b   : > { %v7404_v45 = vpop.permute.xlu0 %978 }
 0x19f   : > { %v7406_v34 = vpop.permute.xlu0 %1011 }
 0x1a3   : > { %v7408_v28 = vpop.permute.xlu0 %1015 }
 0x1a7   : > { %v7410_v31 = vpop.permute.xlu0 %1051 }
 0x1ab   : > { %v7412_v39 = vpop.permute.xlu0 %1055 }
 0x1af   : > { %v7414_v37 = vpop.permute.xlu0 %1189 }
 0x1b3   : > { %v7416_v53 = vpop.permute.xlu0 %1222 }
 0x1b7   : > { %v7418_v58 = vpop.permute.xlu0 %1226 }
 0x1bb   : > { %v7420_v49 = vpop.permute.xlu0 %1259 }
 0x1bc   : > { %10665 = vst [vmem:[#allocation18_spill] sm:$0xff] %v7420_v49 }
 0x1bf   : > { %v7422_v17 = vpop.permute.xlu0 %1263 }
 0x1c0   : > { %10666 = vst [vmem:[#allocation19_spill] sm:$0xff] %v7422_v17 }
 0x1e5   : > { %v7424_v41 = vpop.permute.xlu0 %1299  ;;  %v7435_v40 = vpop.permute.xlu1 %1301 }
 0x1e6   : > { %10667 = vst [vmem:[#allocation20_spill] sm:$0xff] %v7424_v41  ;;  %10669 = vst [vmem:[#allocation22_spill] sm:$0xff] %v7435_v40 }
 0x1e9   : > { %v7426_v54 = vpop.permute.xlu0 %1346  ;;  %v7437_v56 = vpop.permute.xlu1 %1344 }
 0x1ea   : > { %10668 = vst [vmem:[#allocation21_spill] sm:$0xff] %v7426_v54  ;;  %10670 = vst [vmem:[#allocation23_spill] sm:$0xff] %v7437_v56 }
 0x1ed   : > { %v7439_v55 = vpop.permute.xlu1 %1348 }
 0x1ee   : > { %10671 = vst [vmem:[#allocation24_spill] sm:$0xff] %v7439_v55 }
 0x1f6   : > { %v1418_v20 = vpop.permute.xlu0 %1417 }
 0x1f7   : > { %v1425_v50 = vrot.slane %v1418_v20, %v7237_v62 }
 0x1f9   : > { %v1429_v51 = vmul.f32 0.0, %v1425_v50  ;;  %v1428_v35 = vmul.f32 %v1425_v50, %v7147_v13 }
 0x1fa   : > { %v7441_v20 = vpop.permute.xlu1 %1397 }
 0x1fb   : > { %1437 = vrot.lane.b32.xlu0 %v1429_v51, %s6963_s24  ;;  %1433 = vrot.lane.b32.xlu1 %v1429_v51, %s6963_s24  ;;  %10672 = vst [vmem:[#allocation25_spill] sm:$0xff] %v7441_v20  ;;  %v1529_v20 = vld [vmem:[#allocation2 + $0x14] sm:$0xf] }
 0x1fe   : > { %v7443_v59 = vpop.permute.xlu1 %584 }
 0x1ff   : > { %1435 = vrot.lane.b32.xlu1 %v1428_v35, %s6963_s24  ;;  %10673 = vst [vmem:[#allocation26_spill] sm:$0xff] %v7443_v59 }
 0x202   : > { %v7445_v51 = vpop.permute.xlu1 %594 }
 0x203   : > { %1454 = vperm.xlu1 %6763, %v7154_v15   ;;  %10674 = vst [vmem:[#allocation27_spill] sm:$0xff] %v7445_v51  ;;  %v10474_v51 = vmov 23  }
 0x206   : > { %v7447_v50 = vpop.permute.xlu1 %614 }
 0x207   : > { %6764 = vset.pattern.permute.xlu1 %v10462_v44  ;;  %10675 = vst [vmem:[#allocation28_spill] sm:$0xff] %v7447_v50 }
 0x26d   : > { %v7449_v35 = vpop.permute.xlu1 %1433 }
 0x26e   : > { %10676 = vst [vmem:[#allocation29_spill] sm:$0xff] %v7449_v35 }
 0x271   : > { %v7451_v54 = vpop.permute.xlu1 %1435 }
 0x272   : > { %10677 = vst [vmem:[#allocation30_spill] sm:$0xff] %v7451_v54 }
 0x27e   : > { %v1455_v41 = vpop.permute.xlu1 %1454 }
 0x27f   : > { %v1462_v44 = vrot.slane %v1455_v41, %v7237_v62 }
 0x281   : > { %v1465_v40 = vmul.f32 %v1462_v44, %v7147_v13  ;;  %v1464_v56 = vmul.f32 0.0, %v1462_v44  ;;  %v10477_v44 = vmov 9  }
 0x282   : > { %6767 = vset.pattern.permute.xlu0 %v10477_v44 }
 0x283   : > { %1472 = vrot.lane.b32.xlu1 %v1465_v40, %s6964_s26  ;;  %1470 = vrot.lane.b32.xlu0 %v1464_v56, %s6964_s26 }
 0x287   : > { %1491 = vperm.xlu1 %6764, %v7154_v15   ;;  %1474 = vrot.lane.b32.xlu0 %v1464_v56, %s6964_s26  ;;  %v6623_v56 = vld [vmem:[%s10409_s3 + $0x3] ss:$8 sm:$0xf] }
 0x28b   : > { %6765 = vset.pattern.permute.xlu1 %v10474_v51 }
 0x2f5   : > { %v7460_v50 = vpop.permute.xlu1 %1472 }
 0x2f6   : > { %10678 = vst [vmem:[#allocation31_spill] sm:$0xff] %v7460_v50 }
 0x302   : > { %v1492_v59 = vpop.permute.xlu1 %1491 }
 0x303   : > { %v1499_v55 = vrot.slane %v1492_v59, %v7237_v62  ;;  %v6624_v59 = vld [vmem:[%s10409_s3 + $0x3] ss:$8 sm:$0x10] }
 0x304   : > { %v1568_v40 = vor.u32 %v6624_v59, %v6623_v56 }
 0x305   : > { %v1502_v41 = vmul.f32 %v1499_v55, %v7147_v13  ;;  %v1501_v35 = vmul.f32 0.0, %v1499_v55 }
 0x306   : > { %v1573_v50 = vrot.slane %v1568_v40, %v7163_v18  ;;  %v1581_v59 = vrot.slane %v1568_v40, %v7133_v7 }
 0x307   : > { %1509 = vrot.lane.b32.xlu1 %v1502_v41, %s6965_s22  ;;  %1507 = vrot.lane.b32.xlu0 %v1501_v35, %s6965_s22 }
 0x30b   : > { %1531 = vperm.xlu1 %6765, %v7154_v15   ;;  %1511 = vrot.lane.b32.xlu0 %v1501_v35, %s6965_s22  ;;  %v1577_v35 = vrot.slane %v1568_v40, %v7166_v19 }
 0x30d   : > { %v1590_v56 = vcombine.low %v1573_v50, %v1577_v35  ;;  %v10485_v50 = vmov 14  }
 0x30f   : > { %6766 = vset.pattern.permute.xlu1 %v10483_v24 }
 0x379   : > { %v7475_v55 = vpop.permute.xlu1 %1509 }
 0x37a   : > { %10679 = vst [vmem:[#allocation32_spill] sm:$0xff] %v7475_v55  ;;  %v899_v55 = vld [vmem:[#allocation2 + $0x10] sm:$0xf] }
 0x386   : > { %v1532_v41 = vpop.permute.xlu1 %1531 }
 0x387   : > { %v1539_v51 = vrot.slane %v1532_v41, %v7237_v62  ;;  %v1585_v41 = vrot.slane %v1568_v40, %v7136_v8 }
 0x389   : > { %v1542_v44 = vmul.f32 %v1539_v51, %v7251_v22  ;;  %v1541_v54 = vmul.f32 %v1539_v51, %v7260_v30  ;;  %v1543_v18 = vmul.f32 %v1539_v51, %v1529_v20  ;;  %v1591_v22 = vcombine.low %v1581_v59, %v1585_v41  ;;  %v7496_v20 = vpop.permute.xlu0 %1303 }
 0x38a   : > { %v1589_v30 = vrot.slane %v1568_v40, %v7183_v27  ;;  %10681 = vst [vmem:[#allocation33_spill] sm:$0xff] %v7496_v20  ;;  %v10497_v27 = vmov 19  }
 0x38b   : > { %1549 = vrot.lane.b32.xlu1 %v1542_v44, %s6966_s27  ;;  %1547 = vrot.lane.b32.xlu0 %v1541_v54, %s6966_s27  ;;  %v10680_v54 = vmov 21  }
 0x38d   : > { %v7498_v51 = vpop.permute.xlu0 %604 }
 0x38e   : > { %10682 = vst [vmem:[#allocation34_spill] sm:$0xff] %v7498_v51 }
 0x38f   : > { %1592 = vrot.lane.b32.xlu1 %v1590_v56, %s10517_s30  ;;  %1551 = vrot.lane.b32.xlu0 %v1543_v18, %s6966_s27 }
 0x391   : > { %v7500_v18 = vpop.permute.xlu0 %1437 }
 0x392   : > { %10683 = vst [vmem:[#allocation35_spill] sm:$0xff] %v7500_v18 }
 0x393   : > { %1594 = vrot.lane.b32.xlu0 %v1591_v22, %s10517_s30  ;;  %1596 = vrot.lane.b32.xlu1 %v1589_v30, %s10517_s30  ;;  %s10526_s30 = smov 56  }
 0x395   : > { %v7502_v44 = vpop.permute.xlu0 %1470 }
 0x396   : > { %10684 = vst [vmem:[#allocation36_spill] sm:$0xff] %v7502_v44  ;;  %v730_v44 = vrot.slane %v7384_v52, 4 }
 0x397   : > { %1665 = vperm.xlu0 %6767, %v7154_v15   ;;  %1645 = vperm.xlu1 %6766, %v7154_v15  }
 0x399   : > { %v7504_v40 = vpop.permute.xlu0 %1474 }
 0x39a   : > { %10685 = vst [vmem:[#allocation37_spill] sm:$0xff] %v7504_v40 }
 0x39b   : > { %6774 = vset.pattern.permute.xlu0 %v10680_v54  ;;  %6768 = vset.pattern.permute.xlu1 %v10485_v50  ;;  %v7517_v54 = vld [vmem:[#allocation2 + $0x8] sm:$0xff] }
 0x39c   : > { %10691 = vst [vmem:[#allocation43_spill] sm:$0xff] %v7517_v54 }
 0x39d   : > { %v7506_v35 = vpop.permute.xlu0 %1507 }
 0x39e   : > { %10686 = vst [vmem:[#allocation38_spill] sm:$0xff] %v7506_v35 }
 0x3a1   : > { %v7508_v56 = vpop.permute.xlu0 %1511 }
 0x3a2   : > { %10687 = vst [vmem:[#allocation39_spill] sm:$0xff] %v7508_v56  ;;  %v732_v56 = vrot.slane %v7389_v14, 4 }
 0x3fd   : > { %v7510_v59 = vpop.permute.xlu0 %1547  ;;  %v7525_v8 = vpop.permute.xlu1 %1549 }
 0x3fe   : > { %10688 = vst [vmem:[#allocation40_spill] sm:$0xff] %v7510_v59  ;;  %10692 = vst [vmem:[#allocation44_spill] sm:$0xff] %v7525_v8  ;;  %v731_v8 = vrot.slane %v7325_v1, 4 }
 0x401   : > { %v7512_v41 = vpop.permute.xlu0 %1551  ;;  %v7527_v7 = vpop.permute.xlu1 %1592 }
 0x402   : > { %10689 = vst [vmem:[#allocation41_spill] sm:$0xff] %v7512_v41  ;;  %10693 = vst [vmem:[#allocation45_spill] sm:$0xff] %v7527_v7 }
 0x405   : > { %v7514_v22 = vpop.permute.xlu0 %1594 }
 0x406   : > { %10690 = vst [vmem:[#allocation42_spill] sm:$0xff] %v7514_v22 }
 0x412   : > { %v1666_v30 = vpop.permute.xlu0 %1665 }
 0x413   : > { %v1673_v24 = vrot.slane %v1666_v30, %v7237_v62  ;;  %v7529_v30 = vpop.permute.xlu1 %1596 }
 0x414   : > { %10694 = vst [vmem:[#allocation46_spill] sm:$0xff] %v7529_v30  ;;  %v694_v30 = vrot.slane %v7374_v46, 4 }
 0x415   : > { %v1675_v50 = vmul.f32 0.0, %v1673_v24  ;;  %v1676_v51 = vmul.f32 %v1673_v24, %v7517_v54 }
 0x417   : > { %1685 = vrot.lane.b32.xlu0 %v1675_v50, %s6963_s24  ;;  %1681 = vrot.lane.b32.xlu1 %v1675_v50, %s6963_s24  ;;  %v7531_v19 = vpop.permute.xlu1 %1645 }
 0x418   : > { %10695 = vst [vmem:[#allocation47_spill] sm:$0xff] %v7531_v19  ;;  %v658_v19 = vrot.slane %v7234_v61, %v7237_v62 }
 0x41b   : > { %1683 = vrot.lane.b32.xlu1 %v1676_v51, %s6963_s24 }
 0x41f   : > { %1702 = vperm.xlu1 %6768, %v7154_v15  }
 0x423   : > { %6769 = vset.pattern.permute.xlu1 %v10497_v27  ;;  %v10501_v27 = vmov 24  }
 0x489   : > { %v7533_v59 = vpop.permute.xlu1 %1681 }
 0x48a   : > { %10696 = vst [vmem:[#allocation48_spill] sm:$0xff] %v7533_v59  ;;  %v854_v59 = vrot.slane %v7257_v29, 4 }
 0x48c   : > { %v7561_v20 = vsel %vm856_vm1, %v854_v59, %v7257_v29 }
 0x48d   : > { %v7535_v50 = vpop.permute.xlu1 %1683 }
 0x48e   : > { %10697 = vst [vmem:[#allocation49_spill] sm:$0xff] %v7535_v50  ;;  %v693_v50 = vrot.slane %v7323_v60, 4 }
 0x490   : > { %v698_v17 = vsel %vm560_vm0, %v693_v50, %v694_v30 }
 0x49a   : > { %v1703_v24 = vpop.permute.xlu1 %1702 }
 0x49b   : > { %v1710_v51 = vrot.slane %v1703_v24, %v7237_v62  ;;  %v647_v24 = vld [vmem:[#allocation2 + $0x10] sm:$0xf] }
 0x49c   : > { %v662_v7 = vmul.f32 %v658_v19, %v647_v24 }
 0x49d   : > { %v1713_v41 = vmul.f32 %v1710_v51, %v7517_v54  ;;  %v1712_v35 = vmul.f32 0.0, %v1710_v51  ;;  %v692_v51 = vrot.slane %v7367_v25, 4  ;;  %v1019_v54 = vrot.slane %v7408_v28, 4 }
 0x49f   : > { %1720 = vrot.lane.b32.xlu1 %v1713_v41, %s6964_s26  ;;  %1718 = vrot.lane.b32.xlu0 %v1712_v35, %s6964_s26  ;;  %v855_v41 = vrot.slane %v7270_v38, 4  ;;  %v695_v22 = vsel %vm560_vm0, %v692_v51, %v693_v50 }
 0x4a1   : > { %v858_v61 = vsel %vm560_vm0, %v854_v59, %v855_v41  ;;  %v7571_v51 = vsel %vm856_vm1, %v855_v41, %v7264_v33  ;;  %v697_v59 = vsel %vm696_vm3, %v7367_v25, %v695_v22  ;;  %v736_v33 = vsel %vm560_vm0, %v731_v8, %v732_v56 }
 0x4a2   : > { %v7567_v24 = vsel %vm856_vm1, %v858_v61, %v7270_v38  ;;  %10698 = vst [vmem:[#allocation50_spill] sm:$0xff] %v7571_v51  ;;  %v700_v38 = vsel %vm696_vm3, %v7374_v46, %v694_v30  ;;  %v733_v61 = vsel %vm560_vm0, %v730_v44, %v731_v8  ;;  %v769_v41 = vrot.slane %v7327_v2, 4 }
 0x4a3   : > { %1739 = vperm.xlu1 %6769, %v7154_v15   ;;  %1722 = vrot.lane.b32.xlu0 %v1712_v35, %s6964_s26  ;;  %v660_v15 = vmul.f32 0.0, %v658_v19  ;;  %v661_v35 = vmul.f32 %v658_v19, %v7147_v13  ;;  %v1102_v19 = vrot.slane %v7280_v57, 4  ;;  %v768_v51 = vrot.slane %v7392_v3, 4 }
 0x4a4   : > { %v7594_v25 = vrot.slane %v7293_v6, %v7237_v62  ;;  %v770_v46 = vrot.slane %v7394_v42, 4  ;;  %v699_v22 = vsel %vm696_vm3, %v7323_v60, %v698_v17  ;;  %v944_v30 = vrot.slane %v7333_v4, 4 }
 0x4a5   : > { %v704_v8 = vadd.f32 %v697_v59, %v660_v15  ;;  %v735_v50 = vsel %vm734_vm4, %v7384_v52, %v733_v61  ;;  %v737_v6 = vsel %vm734_vm4, %v7325_v1, %v736_v33  ;;  %v771_v32 = vsel %vm560_vm0, %v768_v51, %v769_v41 }
 0x4a6   : > { %v943_v15 = vrot.slane %v7331_v9, 4  ;;  %v981_v17 = vrot.slane %v7335_v10, 4  ;;  %v774_v60 = vsel %vm560_vm0, %v769_v41, %v770_v46  ;;  %v945_v52 = vrot.slane %v7400_v48, 4 }
 0x4a7   : > { %6770 = vset.pattern.permute.xlu1 %v10501_v27  ;;  %v909_v27 = vrot.slane %v7267_v36, %v7237_v62  ;;  %v1103_v36 = vrot.slane %v7285_v63, 4  ;;  %v1017_v51 = vrot.slane %v7406_v34, 4  ;;  %v742_v61 = vadd.f32 %v735_v50, %v704_v8 }
 0x4a8   : > { %v946_v1 = vsel %vm560_vm0, %v943_v15, %v944_v30  ;;  %v773_v41 = vsel %vm772_vm5, %v7392_v3, %v771_v32  ;;  %v775_v26 = vsel %vm772_vm5, %v7327_v2, %v774_v60  ;;  %v1057_v8 = vrot.slane %v7410_v31, 4 }
 0x4a9   : > { %v911_v40 = vmul.f32 0.0, %v909_v27  ;;  %v7574_v18 = vmul.f32 %v909_v27, %v7147_v13  ;;  %v7576_v29 = vmul.f32 %v909_v27, %v899_v55  ;;  %v7589_v27 = vsel %vm1104_vm2, %v1102_v19, %v7280_v57 }
 0x4aa   : > { %v1106_v55 = vsel %vm560_vm0, %v1102_v19, %v1103_v36  ;;  %v7599_v44 = vsel %vm1104_vm2, %v1103_v36, %v7287_v0  ;;  %v706_v57 = vadd.f32 %v700_v38, %v662_v7  ;;  %v738_v19 = vsel %vm734_vm4, %v7389_v14, %v732_v56 }
 0x4ab   : > { %10699 = vst [vmem:[#allocation51_spill] sm:$0xff] %v7599_v44  ;;  %v810_v0 = vrot.slane %v7329_v5, 4  ;;  %v809_v7 = vrot.slane %v7396_v43, 4  ;;  %v980_v36 = vrot.slane %v7402_v16, 4  ;;  %v982_v14 = vrot.slane %v7404_v45, 4 }
 0x4ac   : > { %v1018_v56 = vrot.slane %v7337_v11, 4  ;;  %v7624_v59 = vsel %vm1104_vm2, %v1106_v55, %v7285_v63  ;;  %v705_v38 = vadd.f32 %v699_v22, %v661_v35  ;;  %v744_v33 = vadd.f32 %v738_v19, %v706_v57 }
 0x4ad   : > { %v948_v44 = vsel %vm560_vm0, %v944_v30, %v945_v52  ;;  %v983_v15 = vsel %vm560_vm0, %v980_v36, %v981_v17  ;;  %v812_v63 = vsel %vm811_vm6, %v809_v7, %v7396_v43  ;;  %v947_v35 = vsel %vm696_vm3, %v7331_v9, %v946_v1 }
 0x4ae   : > { %v743_v49 = vadd.f32 %v737_v6, %v705_v38  ;;  %v813_v55 = vsel %vm560_vm0, %v809_v7, %v810_v0  ;;  %v985_v32 = vsel %vm560_vm0, %v981_v17, %v982_v14  ;;  %v1020_v3 = vsel %vm560_vm0, %v1017_v51, %v1018_v56 }
 0x4af   : > { %v780_v22 = vadd.f32 %v773_v41, %v742_v61  ;;  %v776_v30 = vsel %vm772_vm5, %v7394_v42, %v770_v46  ;;  %v949_v2 = vsel %vm696_vm3, %v7333_v4, %v948_v44  ;;  %v984_v43 = vsel %vm734_vm4, %v7402_v16, %v983_v15 }
 0x4b0   : > { %v781_v57 = vadd.f32 %v775_v26, %v743_v49  ;;  %v954_v9 = vadd.f32 %v947_v35, %v911_v40  ;;  %v1058_v50 = vrot.slane %v7339_v12, 4  ;;  %v1022_v6 = vsel %vm560_vm0, %v1018_v56, %v1019_v54 }
 0x4b1   : > { %v814_v19 = vsel %vm811_vm6, %v813_v55, %v7329_v5  ;;  %v819_v17 = vadd.f32 %v812_v63, %v780_v22  ;;  %v986_v60 = vsel %vm734_vm4, %v7335_v10, %v985_v32  ;;  %v1021_v42 = vsel %vm772_vm5, %v7406_v34, %v1020_v3  ;;  %v10700_v3 = vld [vmem:[#allocation16_spill] sm:$0xff] }
 0x4b2   : > { %v950_v4 = vsel %vm696_vm3, %v7400_v48, %v945_v52  ;;  %v955_v49 = vadd.f32 %v949_v2, %v7574_v18  ;;  %v991_v26 = vadd.f32 %v984_v43, %v954_v9  ;;  %v1060_v16 = vsel %vm560_vm0, %v1057_v8, %v1058_v50  ;;  %v1147_v52 = vld [vmem:[#allocation2 + $0x10] sm:$0xf] }
 0x4b3   : > { %v1159_v40 = vmul.f32 0.0, %v7594_v25  ;;  %v782_v46 = vadd.f32 %v776_v30, %v744_v33  ;;  %v1023_v5 = vsel %vm772_vm5, %v7337_v11, %v1022_v6  ;;  %v1059_v10 = vsel %vm811_vm6, %v1057_v8, %v7410_v31  ;;  %v10701_v30 = vld [vmem:[#allocation18_spill] sm:$0xff]  ;;  %v1395_v43 = vld [vmem:[#allocation2 + $0x10] sm:$0xf] }
 0x4b4   : > { %v820_v44 = vadd.f32 %v814_v19, %v781_v57  ;;  %v987_v34 = vsel %vm734_vm4, %v7404_v45, %v982_v14  ;;  %v992_v7 = vadd.f32 %v986_v60, %v955_v49  ;;  %v1028_v48 = vadd.f32 %v1021_v42, %v991_v26  ;;  %v10702_v57 = vld [vmem:[#allocation43_spill] sm:$0xff] }
 0x4b5   : > { %v815_v18 = vsel %vm811_vm6, %v810_v0, %v7398_v47  ;;  %v956_v36 = vadd.f32 %v950_v4, %v7576_v29  ;;  %v1061_v1 = vsel %vm811_vm6, %v1060_v16, %v7339_v12  ;;  %v1192_v11 = vrot.slane %v7343_v23, 4  ;;  %v10705_v4 = vld [vmem:[#allocation50_spill] sm:$0xff]  ;;  %v7717_v26 = vld [vmem:[#allocation2 + $0x4] sm:$0xff]  ;;  %v7719_v16 = vld [vmem:[#allocation2 + $0xc] sm:$0xff] }
 0x4b6   : > { %v7675_v31 = vmul.f32 %v7561_v20, %v819_v17  ;;  %v1024_v45 = vsel %vm772_vm5, %v7408_v28, %v1019_v54  ;;  %v1029_v14 = vadd.f32 %v1023_v5, %v992_v7  ;;  %v1066_v51 = vadd.f32 %v1059_v10, %v1028_v48  ;;  %v10704_v17 = vld [vmem:[#allocation17_spill] sm:$0xff] }
 0x4b7   : > { %v1160_v47 = vmul.f32 %v7594_v25, %v7147_v13  ;;  %v993_v0 = vadd.f32 %v987_v34, %v956_v36  ;;  %v1191_v29 = vrot.slane %v7341_v21, 4  ;;  %v1193_v12 = vrot.slane %v7414_v37, 4  ;;  %v10707_v7 = vld [vmem:[#allocation9_spill] sm:$0xff] }
 0x4b8   : > { %v1161_v38 = vmul.f32 %v7594_v25, %v1147_v52  ;;  %v821_v61 = vadd.f32 %v815_v18, %v782_v46  ;;  %v1067_v33 = vadd.f32 %v1061_v1, %v1029_v14  ;;  %v1062_v20 = vsel %vm811_vm6, %v1058_v50, %v7412_v39  ;;  %v7706_v50 = vld [vmem:[#allocation2] sm:$0xff]  ;;  %v7721_v46 = vld [vmem:[#allocation2 + $0x14] sm:$0xf]  ;;  %3624 = vst [vmem:[#allocation2 + $0x8] sm:$0xff] %v10707_v7 }
 0x4b9   : > { %v1030_v41 = vadd.f32 %v1024_v45, %v993_v0  ;;  %v1194_v28 = vsel %vm560_vm0, %v1191_v29, %v1192_v11  ;;  %v1228_v54 = vrot.slane %v7416_v53, 4  ;;  %v7689_v63 = vmul.f32 %v7567_v24, %v820_v44  ;;  %10703 = vst [vmem:[#allocation16_spill] sm:$0xff] %v7706_v50  ;;  %v10706_v44 = vld [vmem:[#allocation19_spill] sm:$0xff]  ;;  %3621 = vst [vmem:[#allocation2] sm:$0xff] %v7706_v50 }
 0x4ba   : > { %v7692_v35 = vmul.f32 %v7589_v27, %v1066_v51  ;;  %v1230_v55 = vrot.slane %v7418_v58, 4  ;;  %v870_v32 = vcombine.high %v7675_v31, %v7675_v31  ;;  %v1229_v8 = vrot.slane %v10700_v3, 4  ;;  %v7703_v27 = vld [vmem:[#allocation2 + $0x10] sm:$0xf]  ;;  %v10708_v52 = vld [vmem:[#allocation51_spill] sm:$0xff] }
 0x4bb   : > { %v1068_v39 = vadd.f32 %v1062_v20, %v1030_v41  ;;  %v1196_v22 = vsel %vm560_vm0, %v1192_v11, %v1193_v12  ;;  %v1265_v2 = vrot.slane %v10701_v30, 4  ;;  %v1195_v24 = vsel %vm696_vm3, %v7341_v21, %v1194_v28  ;;  %3623 = vst [vmem:[#allocation2 + $0x10] sm:$0xff] %v7706_v50  ;;  %v10709_v11 = vld [vmem:[#allocation20_spill] sm:$0xff]  ;;  %v10710_v29 = vld [vmem:[#allocation35_spill] sm:$0xff]  ;;  %v10712_v20 = vld [vmem:[#allocation25_spill] sm:$0xff] }
 0x4bc   : > { %v7710_v19 = vmul.f32 %v7624_v59, %v1067_v33  ;;  %v1266_v60 = vrot.slane %v10704_v17, 4  ;;  %v1231_v42 = vsel %vm560_vm0, %v1228_v54, %v1229_v8  ;;  %v866_v49 = vmul.f32 %v10705_v4, %v821_v61  ;;  %v10711_v33 = vld [vmem:[#allocation22_spill] sm:$0xff] }
 0x4bd   : > { %v871_v21 = vcombine.high %v7689_v63, %v7689_v63  ;;  %v1197_v5 = vsel %vm696_vm3, %v7343_v23, %v1196_v22  ;;  %v1198_v59 = vsel %vm696_vm3, %v7414_v37, %v1193_v12  ;;  %v1233_v10 = vsel %vm560_vm0, %v1229_v8, %v1230_v55  ;;  %v10716_v4 = vld [vmem:[#allocation30_spill] sm:$0xff] }
 0x4be   : > { %v1267_v34 = vrot.slane %v10706_v44, 4  ;;  %v1202_v48 = vadd.f32 %v1195_v24, %v1159_v40  ;;  %v1268_v23 = vsel %vm560_vm0, %v1265_v2, %v1266_v60  ;;  %v1114_v18 = vmul.f32 %v10708_v52, %v1068_v39  ;;  %v10715_v24 = vld [vmem:[#allocation39_spill] sm:$0xff] }
 0x4bf   : > { %v1118_v37 = vcombine.high %v7692_v35, %v7692_v35  ;;  %v1232_v36 = vsel %vm734_vm4, %v7416_v53, %v1231_v42  ;;  %v1235_v1 = vsel %vm734_vm4, %v7418_v58, %v1230_v55  ;;  %v1305_v45 = vrot.slane %v10709_v11, 4  ;;  %v10720_v52 = vld [vmem:[#allocation31_spill] sm:$0xff] }
 0x4c0   : > { %v1119_v14 = vcombine.high %v7710_v19, %v7710_v19  ;;  %v1203_v51 = vadd.f32 %v1197_v5, %v1160_v47  ;;  %v1204_v40 = vadd.f32 %v1198_v59, %v1161_v38  ;;  %v1234_v0 = vsel %vm734_vm4, %v10700_v3, %v1233_v10  ;;  %v6918_v47 = vld [vmem:[%s10411_s5] sm:$0xf]  ;;  %v10714_v3 = vld [vmem:[#allocation33_spill] sm:$0xff]  ;;  %v10717_v10 = vld [vmem:[#allocation23_spill] sm:$0xff] }
 0x4c1   : > { %v1441_v12 = vrot.slane %v10710_v29, 4  ;;  %v1269_v61 = vsel %vm772_vm5, %v10701_v30, %v1268_v23  ;;  %v1272_v53 = vsel %vm772_vm5, %v10706_v44, %v1267_v34  ;;  %v1306_v58 = vrot.slane %v10711_v33, 4 }
 0x4c2   : > { %v7755_v41 = vrot.slane %v10712_v20, %v7237_v62  ;;  %v1239_v38 = vadd.f32 %v1232_v36, %v1202_v48  ;;  %v1241_v28 = vadd.f32 %v1235_v1, %v1204_v40  ;;  %v1270_v54 = vsel %vm560_vm0, %v1266_v60, %v1267_v34  ;;  %v10721_v1 = vld [vmem:[#allocation36_spill] sm:$0xff] }
 0x4c3   : > { %v1240_v39 = vadd.f32 %v1234_v0, %v1203_v51  ;;  %v1310_v8 = vsel %vm811_vm6, %v1306_v58, %v10714_v3  ;;  %v1446_v2 = vsel %vm696_vm3, %v10710_v29, %v1441_v12  ;;  %v1271_v60 = vsel %vm772_vm5, %v10704_v17, %v1270_v54  ;;  %v10723_v51 = vld [vmem:[#allocation44_spill] sm:$0xff]  ;;  %v10724_v0 = vld [vmem:[#allocation42_spill] sm:$0xff]  ;;  %v10728_v3 = vld [vmem:[#allocation41_spill] sm:$0xff] }
 0x4c4   : > { %v1276_v22 = vadd.f32 %v1269_v61, %v1239_v38  ;;  %v1278_v30 = vadd.f32 %v1272_v53, %v1241_v28  ;;  %v1409_v42 = vmul.f32 %v7755_v41, %v1395_v43  ;;  %v1440_v5 = vrot.slane %v10716_v4, 4  ;;  %v10719_v43 = vld [vmem:[#allocation29_spill] sm:$0xff] }
 0x4c5   : > { %v1350_v44 = vrot.slane %v10717_v10, 4  ;;  %v10718_v17 = vmov 1   ;;  %v1439_v48 = vrot.slane %v10719_v43, 4  ;;  %v1477_v36 = vrot.slane %v10720_v52, 4 }
 0x4c6   : > { %v1316_v34 = vadd.f32 %v1310_v8, %v1278_v30  ;;  %v1452_v23 = vadd.f32 %v1446_v2, %v1409_v42  ;;  %v1554_v40 = vrot.slane %v10723_v51, 4  ;;  %v1599_v29 = vrot.slane %v10724_v0, 4 }
 0x4c7   : > { %v1442_v61 = vsel %vm560_vm0, %v1439_v48, %v1440_v5  ;;  %v1353_v28 = vsel %vm1352_vm7, %v1350_v44, %v10717_v10  ;;  %v1444_v42 = vsel %vm560_vm0, %v1440_v5, %v1441_v12  ;;  %v10730_v48 = vld [vmem:[#allocation40_spill] sm:$0xff] }
 0x4c8   : > { %v1558_v8 = vsel %vm811_vm6, %v1554_v40, %v10728_v3 }
 0x511   : > { %v7672_v56 = vpop.permute.xlu1 %1720 }
 0x51e   : > { %v1740_v15 = vpop.permute.xlu1 %1739 }
 0x51f   : > { %v1747_v25 = vrot.slane %v1740_v15, %v7237_v62  ;;  %v10713_v15 = vld [vmem:[#allocation37_spill] sm:$0xff] }
 0x520   : > { %v1478_v55 = vrot.slane %v10713_v15, 4 }
 0x521   : > { %v1750_v9 = vmul.f32 %v1747_v25, %v10702_v57  ;;  %v1749_v6 = vmul.f32 %v7706_v50, %v1747_v25  ;;  %v1307_v25 = vsel %vm811_vm6, %v1305_v45, %v10709_v11  ;;  %v1476_v11 = vrot.slane %v10721_v1, 4 }
 0x522   : > { %v1314_v59 = vadd.f32 %v1307_v25, %v1276_v22  ;;  %v1483_v7 = vsel %vm734_vm4, %v10713_v15, %v1478_v55  ;;  %v10727_v15 = vld [vmem:[#allocation24_spill] sm:$0xff] }
 0x523   : > { %1757 = vrot.lane.b32.xlu1 %v1750_v9, %s6965_s22  ;;  %1755 = vrot.lane.b32.xlu0 %v1749_v6, %s6965_s22  ;;  %v1515_v9 = vrot.slane %v10715_v24, 4  ;;  %v1489_v53 = vadd.f32 %v1483_v7, %v1452_v23  ;;  %v1479_v22 = vsel %vm560_vm0, %v1476_v11, %v1477_v36  ;;  %v1553_v23 = vrot.slane %v10730_v48, 4 }
 0x524   : > { %v1481_v11 = vsel %vm560_vm0, %v1477_v36, %v1478_v55 }
 0x525   : > { %v1555_v36 = vsel %vm811_vm6, %v1553_v23, %v10730_v48 }
 0x527   : > { %1779 = vperm.xlu1 %6770, %v6918_v47   ;;  %1759 = vrot.lane.b32.xlu0 %v1749_v6, %s6965_s22  ;;  %v1308_v6 = vsel %vm560_vm0, %v1305_v45, %v1306_v58  ;;  %v10722_v45 = vld [vmem:[#allocation21_spill] sm:$0xff]  ;;  %v10725_v58 = vld [vmem:[#allocation32_spill] sm:$0xff]  ;;  %v10726_v47 = vld [vmem:[#allocation38_spill] sm:$0xff] }
 0x528   : > { %v1514_v20 = vrot.slane %v10725_v58, 4  ;;  %v1513_v38 = vrot.slane %v10726_v47, 4  ;;  %v1309_v54 = vsel %vm811_vm6, %v1308_v6, %v10711_v33  ;;  %v10729_v33 = vld [vmem:[#allocation46_spill] sm:$0xff] }
 0x529   : > { %v1604_v6 = vsel %vm1600_vm8, %v1599_v29, %v10729_v33 }
 0x52a   : > { %v1516_v10 = vsel %vm560_vm0, %v1513_v38, %v1514_v20 }
 0x52b   : > { %874 = vrot.lane.b32.xlu1 %v870_v32, %s10519_s19  ;;  %880 = vrot.lane.b32.xlu0 %v866_v49, %s10519_s19  ;;  %v1351_v32 = vrot.slane %v10722_v45, 4  ;;  %v1520_v49 = vsel %vm772_vm5, %v10715_v24, %v1515_v9  ;;  %v1443_v24 = vsel %vm696_vm3, %v10719_v43, %v1442_v61  ;;  %v1480_v43 = vsel %vm734_vm4, %v10721_v1, %v1479_v22 }
 0x52c   : > { %6771 = vset.pattern.permute.xlu1 %v10718_v17  ;;  %v1526_v30 = vadd.f32 %v1520_v49, %v1489_v53  ;;  %v1408_v1 = vmul.f32 %v7755_v41, %v7147_v13  ;;  %v1518_v53 = vsel %vm560_vm0, %v1514_v20, %v1515_v9  ;;  %v1556_v9 = vsel %vm560_vm0, %v1553_v23, %v1554_v40 }
 0x52d   : > { %v1356_v25 = vsel %vm1352_vm7, %v1351_v32, %v10727_v15  ;;  %v1354_v2 = vsel %vm560_vm0, %v1350_v44, %v1351_v32  ;;  %v1360_v44 = vmul.f32 %v1353_v28, %v1314_v59  ;;  %v1517_v59 = vsel %vm772_vm5, %v10726_v47, %v1516_v10 }
 0x52e   : > { %v1564_v7 = vadd.f32 %v1558_v8, %v1526_v30  ;;  %v1355_v12 = vsel %vm1352_vm7, %v1354_v2, %v10722_v45  ;;  %v10732_v30 = vld [vmem:[#allocation7_spill] sm:$0xff]  ;;  %v10733_v2 = vld [vmem:[#allocation8_spill] sm:$0xff] }
 0x52f   : > { %878 = vrot.lane.b32.xlu1 %v871_v21, %s10519_s19  ;;  %1128 = vrot.lane.b32.xlu0 %v1114_v18, %s10575_s23  ;;  %v1362_v21 = vmul.f32 %v1356_v25, %v1316_v34  ;;  %v1407_v18 = vmul.f32 %v7706_v50, %v7755_v41  ;;  %v1277_v34 = vadd.f32 %v1271_v60, %v1240_v39  ;;  %v10731_v39 = vld [vmem:[#allocation45_spill] sm:$0xff] }
 0x530   : > { %v1610_v32 = vmul.f32 %v1604_v6, %v1564_v7  ;;  %v1598_v60 = vrot.slane %v10731_v39, 4  ;;  %v1366_v45 = vcombine.high %v1360_v44, %v1360_v44  ;;  %v10735_v7 = vld [vmem:[#allocation5_spill] sm:$0xff] }
 0x531   : > { %v1450_v5 = vadd.f32 %v1443_v24, %v1407_v18  ;;  %v1315_v49 = vadd.f32 %v1309_v54, %v1277_v34 }
 0x532   : > { %v1601_v20 = vsel %vm1600_vm8, %v1598_v60, %v10731_v39  ;;  %v1602_v54 = vsel %vm560_vm0, %v1598_v60, %v1599_v29 }
 0x533   : > { %1122 = vrot.lane.b32.xlu1 %v1118_v37, %s10575_s23  ;;  %1376 = vrot.lane.b32.xlu0 %v1362_v21, %s10573_s20  ;;  %v1445_v37 = vsel %vm696_vm3, %v10716_v4, %v1444_v42  ;;  %v1487_v61 = vadd.f32 %v1480_v43, %v1450_v5  ;;  %v1361_v55 = vmul.f32 %v1355_v12, %v1315_v49  ;;  %v10734_v42 = vld [vmem:[#allocation4_spill] sm:$0xff] }
 0x534   : > { %v1482_v4 = vsel %vm734_vm4, %v10720_v52, %v1481_v11  ;;  %v1451_v41 = vadd.f32 %v1445_v37, %v1408_v1  ;;  %v1557_v52 = vsel %vm811_vm6, %v1556_v9, %v10723_v51  ;;  %v1603_v3 = vsel %vm1600_vm8, %v1602_v54, %v10724_v0  ;;  %v10737_v9 = vld [vmem:[#allocation49_spill] sm:$0xff] }
 0x535   : > { %v1524_v47 = vadd.f32 %v1517_v59, %v1487_v61  ;;  %v1367_v15 = vcombine.high %v1361_v55, %v1361_v55 }
 0x536   : > { %v1488_v28 = vadd.f32 %v1482_v4, %v1451_v41 }
 0x537   : > { %1126 = vrot.lane.b32.xlu1 %v1119_v14, %s10575_s23  ;;  %1624 = vrot.lane.b32.xlu0 %v1610_v32, %s10526_s30  ;;  %v1519_v14 = vsel %vm772_vm5, %v10725_v58, %v1518_v53  ;;  %v1562_v38 = vadd.f32 %v1555_v36, %v1524_v47 }
 0x538   : > { %v1525_v25 = vadd.f32 %v1519_v14, %v1488_v28  ;;  %v10738_v28 = vld [vmem:[#allocation48_spill] sm:$0xff] }
 0x539   : > { %v1608_v40 = vmul.f32 %v1601_v20, %v1562_v38  ;;  %v1688_v20 = vrot.slane %v10737_v9, 4  ;;  %v1687_v54 = vrot.slane %v10738_v28, 4 }
 0x53a   : > { %v1563_v8 = vadd.f32 %v1557_v52, %v1525_v25  ;;  %v1725_v52 = vrot.slane %v7672_v56, 4 }
 0x53b   : > { %1370 = vrot.lane.b32.xlu1 %v1366_v45, %s10573_s20  ;;  %872 = vrot.lane.b32.xlu0 %v7675_v31, %s10519_s19  ;;  %v1614_v29 = vcombine.high %v1608_v40, %v1608_v40 }
 0x53c   : > { %v1609_v58 = vmul.f32 %v1603_v3, %v1563_v8  ;;  %v1690_v3 = vsel %vm560_vm0, %v1687_v54, %v1688_v20 }
 0x53e   : > { %v1615_v31 = vcombine.high %v1609_v58, %v1609_v58 }
 0x53f   : > { %1374 = vrot.lane.b32.xlu1 %v1367_v15, %s10573_s20  ;;  %876 = vrot.lane.b32.xlu0 %v7689_v63, %s10519_s19  ;;  %v6625_v63 = vld [vmem:[%s10409_s3 + $0x4] ss:$8 sm:$0xf]  ;;  %s10545_s19 = smov 6  }
 0x543   : > { %1618 = vrot.lane.b32.xlu1 %v1614_v29, %s10526_s30  ;;  %1120 = vrot.lane.b32.xlu0 %v7692_v35, %s10575_s23  ;;  %v6626_v35 = vld [vmem:[%s10409_s3 + $0x4] ss:$8 sm:$0x10] }
 0x544   : > { %v1816_v0 = vor.u32 %v6626_v35, %v6625_v63 }
 0x546   : > { %v1821_v21 = vrot.slane %v1816_v0, %v10732_v30  ;;  %v1825_v18 = vrot.slane %v1816_v0, %v10733_v2  ;;  %v1829_v10 = vrot.slane %v1816_v0, %v10734_v42 }
 0x547   : > { %1622 = vrot.lane.b32.xlu1 %v1615_v31, %s10526_s30  ;;  %1124 = vrot.lane.b32.xlu0 %v7710_v19, %s10575_s23  ;;  %s10586_s23 = smov 113  }
 0x548   : > { %v1838_v6 = vcombine.low %v1821_v21, %v1825_v18 }
 0x54b   : > { %1368 = vrot.lane.b32.xlu0 %v1360_v44, %s10573_s20  ;;  %v1833_v44 = vrot.slane %v1816_v0, %v10735_v7 }
 0x54d   : > { %v1839_v43 = vcombine.low %v1829_v10, %v1833_v44 }
 0x54f   : > { %1372 = vrot.lane.b32.xlu0 %v1361_v55, %s10573_s20  ;;  %s10998_s20 = smov 9  }
 0x553   : > { %1616 = vrot.lane.b32.xlu0 %v1608_v40, %s10526_s30  ;;  %v10739_v40 = vld [vmem:[#allocation47_spill] sm:$0xff] }
 0x554   : > { %v1653_v25 = vrot.slane %v10739_v40, %v7237_v62 }
 0x557   : > { %1620 = vrot.lane.b32.xlu0 %v1609_v58, %s10526_s30  ;;  %v1655_v58 = vmul.f32 %v7706_v50, %v1653_v25  ;;  %s10580_s30 = smov 32   ;;  %v10778_v50 = vmov 12  }
 0x595   : > { %v7878_v51 = vpop.permute.xlu1 %1757 }
 0x596   : > { %v1762_v8 = vrot.slane %v7878_v51, 4 }
 0x5a2   : > { %v1780_v19 = vpop.permute.xlu1 %1779 }
 0x5a3   : > { %v1787_v22 = vrot.slane %v1780_v19, %v7237_v62  ;;  %v1691_v19 = vsel %vm696_vm3, %v10738_v28, %v1690_v3 }
 0x5a4   : > { %v1698_v10 = vadd.f32 %v1691_v19, %v1655_v58 }
 0x5a5   : > { %v1789_v24 = vmul.f32 %v1787_v22, %v7717_v26  ;;  %v1790_v33 = vmul.f32 %v1787_v22, %v7719_v16  ;;  %v1791_v34 = vmul.f32 %v1787_v22, %v7721_v46  ;;  %v10736_v26 = vld [vmem:[#allocation10_spill] sm:$0xff]  ;;  %v7895_v16 = vpop.permute.xlu0 %1685 }
 0x5a6   : > { %v1837_v48 = vrot.slane %v1816_v0, %v10736_v26  ;;  %v7909_v59 = vpop.permute.xlu1 %874  ;;  %v1689_v0 = vrot.slane %v7895_v16, 4 }
 0x5a7   : > { %1797 = vrot.lane.b32.xlu1 %v1790_v33, %s6966_s27  ;;  %1795 = vrot.lane.b32.xlu0 %v1789_v24, %s6966_s27 }
 0x5a8   : > { %v1692_v18 = vsel %vm560_vm0, %v1688_v20, %v1689_v0 }
 0x5a9   : > { %v1719_v23 = vpop.permute.xlu0 %1718 }
 0x5aa   : > { %v7913_v60 = vpop.permute.xlu1 %878  ;;  %v1724_v15 = vrot.slane %v1719_v23, 4 }
 0x5ab   : > { %1840 = vrot.lane.b32.xlu1 %v1838_v6, %s10524_s25  ;;  %1799 = vrot.lane.b32.xlu0 %v1791_v34, %s6966_s27  ;;  %v1656_v6 = vmul.f32 %v10702_v57, %v1653_v25 }
 0x5ac   : > { %v1727_v31 = vsel %vm560_vm0, %v1724_v15, %v1725_v52  ;;  %v1693_v15 = vsel %vm696_vm3, %v10737_v9, %v1692_v18  ;;  %v1694_v9 = vsel %vm696_vm3, %v7895_v16, %v1689_v0 }
 0x5ad   : > { %v7897_v12 = vpop.permute.xlu0 %1722  ;;  %v1728_v24 = vsel %vm734_vm4, %v1719_v23, %v1727_v31 }
 0x5ae   : > { %v7917_v61 = vpop.permute.xlu1 %1122  ;;  %v1726_v22 = vrot.slane %v7897_v12, 4  ;;  %v1735_v40 = vadd.f32 %v1728_v24, %v1698_v10 }
 0x5af   : > { %1842 = vrot.lane.b32.xlu0 %v1839_v43, %s10524_s25  ;;  %1844 = vrot.lane.b32.xlu1 %v1837_v48, %s10524_s25  ;;  %s10625_s25 = smov 16  }
 0x5b0   : > { %v1729_v43 = vsel %vm560_vm0, %v1725_v52, %v1726_v22  ;;  %v1657_v52 = vmul.f32 %v1653_v25, %v7703_v27  ;;  %v1731_v24 = vsel %vm734_vm4, %v7897_v12, %v1726_v22 }
 0x5b1   : > { %v1756_v5 = vpop.permute.xlu0 %1755  ;;  %v1730_v57 = vsel %vm734_vm4, %v7672_v56, %v1729_v43 }
 0x5b2   : > { %v7921_v55 = vpop.permute.xlu1 %1126  ;;  %v1761_v29 = vrot.slane %v1756_v5, 4 }
 0x5b4   : > { %v1764_v21 = vsel %vm560_vm0, %v1761_v29, %v1762_v8 }
 0x5b5   : > { %v7899_v11 = vpop.permute.xlu0 %1759  ;;  %v1765_v48 = vsel %vm772_vm5, %v1756_v5, %v1764_v21  ;;  %v1699_v5 = vadd.f32 %v1693_v15, %v1656_v6  ;;  %v1700_v6 = vadd.f32 %v1694_v9, %v1657_v52  ;;  %v10535_v52 = vmov 35  }
 0x5b6   : > { %v7925_v36 = vpop.permute.xlu1 %1370  ;;  %v1763_v33 = vrot.slane %v7899_v11, 4  ;;  %v1772_v3 = vadd.f32 %v1765_v48, %v1735_v40  ;;  %v10744_v9 = vmov 9  }
 0x5b7   : > { %v1736_v56 = vadd.f32 %v1730_v57, %v1699_v5  ;;  %v6919_v57 = vld [vmem:[%s10415_s9] sm:$0xf]  ;;  %v10742_v5 = vmov 8  }
 0x5b8   : > { %v1766_v20 = vsel %vm560_vm0, %v1762_v8, %v1763_v33  ;;  %v1768_v16 = vsel %vm772_vm5, %v7899_v11, %v1763_v33 }
 0x5b9   : > { %v7901_v46 = vpop.permute.xlu0 %880  ;;  %v1767_v8 = vsel %vm772_vm5, %v7878_v51, %v1766_v20  ;;  %v1737_v51 = vadd.f32 %v1731_v24, %v1700_v6  ;;  %v6627_v24 = vld [vmem:[%s10410_s4 + $0x1] ss:$8 sm:$0x3]  ;;  %v10531_v6 = vmov 43  }
 0x5ba   : > { %v7929_v41 = vpop.permute.xlu1 %1374 }
 0x5bd   : > { %v7903_v32 = vpop.permute.xlu0 %1128 }
 0x5be   : > { %v7934_v14 = vpop.permute.xlu1 %1618 }
 0x5c1   : > { %v7905_v49 = vpop.permute.xlu0 %1376 }
 0x5c2   : > { %v7946_v63 = vpop.permute.xlu1 %1622 }
 0x5c5   : > { %v7907_v37 = vpop.permute.xlu0 %1624 }
 0x5c9   : > { %v7911_v39 = vpop.permute.xlu0 %872 }
 0x5cd   : > { %v7915_v1 = vpop.permute.xlu0 %876 }
 0x5d1   : > { %v7919_v53 = vpop.permute.xlu0 %1120 }
 0x5d5   : > { %v7923_v4 = vpop.permute.xlu0 %1124 }
 0x5d9   : > { %v7927_v45 = vpop.permute.xlu0 %1368 }
 0x5dd   : > { %v7931_v47 = vpop.permute.xlu0 %1372 }
 0x5e1   : > { %v7936_v38 = vpop.permute.xlu0 %1616 }
 0x5e5   : > { %v7948_v35 = vpop.permute.xlu0 %1620 }
 0x619   : > { %v1798_v44 = vpop.permute.xlu1 %1797  ;;  %v1796_v34 = vpop.permute.xlu0 %1795 }
 0x61a   : > { %v1802_v28 = vrot.slane %v1798_v44, 4  ;;  %v1801_v54 = vrot.slane %v1796_v34, 4 }
 0x61c   : > { %v1803_v23 = vsel %vm811_vm6, %v1801_v54, %v1796_v34  ;;  %v1804_v31 = vsel %vm560_vm0, %v1801_v54, %v1802_v28  ;;  %v1773_v34 = vadd.f32 %v1767_v8, %v1736_v56  ;;  %v10746_v8 = vmov 16  }
 0x61d   : > { %v1841_v29 = vpop.permute.xlu1 %1840  ;;  %v1800_v58 = vpop.permute.xlu0 %1799  ;;  %v1810_v21 = vadd.f32 %v1803_v23, %v1772_v3  ;;  %v1805_v27 = vsel %vm811_vm6, %v1804_v31, %v1798_v44  ;;  %v1774_v44 = vadd.f32 %v1768_v16, %v1737_v51  ;;  %v10740_v3 = vmov 7  }
 0x61e   : > { %v1846_v19 = vrot.slane %v1841_v29, 4  ;;  %v1811_v48 = vadd.f32 %v1805_v27, %v1773_v34  ;;  %v1806_v12 = vsel %vm811_vm6, %v1802_v28, %v1800_v58  ;;  %v7991_v28 = vld [vmem:[%s10412_s6] sm:$0xf]  ;;  %v10741_v58 = vmov 14  }
 0x61f   : > { %v1812_v11 = vadd.f32 %v1806_v12, %v1774_v44  ;;  %v10534_v31 = vmov 42   ;;  %v10747_v56 = vmov 10   ;;  %v2317_v27 = vrot.slane %v6627_v24, %v10732_v30 }
 0x620   : > { %v1849_v18 = vsel %vm1848_vm9, %v1846_v19, %v1841_v29  ;;  %v10536_v29 = vmov 28   ;;  %v10749_v16 = vmov 23   ;;  %v883_v51 = vsel %vm882_vm10, %v7911_v39, %v7909_v59 }
 0x621   : > { %v1856_v10 = vmul.f32 %v1849_v18, %v1810_v21  ;;  %v1843_v25 = vpop.permute.xlu0 %1842  ;;  %v1845_v15 = vpop.permute.xlu1 %1844  ;;  %v10745_v21 = vmov 22   ;;  %v10533_v18 = vmov 29   ;;  %v1131_v12 = vsel %vm1130_vm11, %v7919_v53, %v7917_v61 }
 0x622   : > { %v1847_v43 = vrot.slane %v1843_v25, 4  ;;  %v885_v44 = vsel %vm882_vm10, %v7915_v1, %v7913_v60  ;;  %v886_v53 = vsel %vm882_vm10, %v7913_v60, %v7901_v46 }
 0x623   : > { %v1862_v0 = vcombine.high %v1856_v10, %v1856_v10  ;;  %1864 = vrot.lane.b32.xlu0 %v1856_v10, %s10546_s28  ;;  %v10532_v10 = vmov 36  }
 0x624   : > { %v1850_v54 = vsel %vm560_vm0, %v1846_v19, %v1847_v43  ;;  %v1852_v20 = vsel %vm1848_vm9, %v1847_v43, %v1845_v15  ;;  %v10743_v19 = vmov 15   ;;  %v10748_v43 = vmov 2  }
 0x625   : > { %v1851_v22 = vsel %vm1848_vm9, %v1850_v54, %v1843_v25  ;;  %1866 = vrot.lane.b32.xlu1 %v1862_v0, %s10546_s28  ;;  %v1858_v23 = vmul.f32 %v1852_v20, %v1812_v11  ;;  %v2321_v25 = vrot.slane %v6627_v24, %v10733_v2  ;;  %v10530_v0 = vmov 30  }
 0x626   : > { %v1857_v40 = vmul.f32 %v1851_v22, %v1811_v48  ;;  %v10750_v48 = vld [vmem:[#allocation13_spill] sm:$0xff]  ;;  %v884_v15 = vsel %vm882_vm10, %v7909_v59, %v7915_v1  ;;  %v1379_v59 = vsel %vm10570_vm12, %v7927_v45, %v7925_v36  ;;  %v1133_v1 = vsel %vm1130_vm11, %v7923_v4, %v7921_v55 }
 0x627   : > { %v2322_v34 = vcombine.low %v2317_v27, %v2321_v25  ;;  %v896_v54 = vadd.f32 %v7901_v46, %v10750_v48  ;;  %v892_v22 = vadd.f32 %v883_v51, %v10750_v48  ;;  %v893_v20 = vadd.f32 %v884_v15, %v10750_v48  ;;  %v1889_v25 = vld [vmem:[%s10408_s2] sm:$0x1f] }
 0x628   : > { %v1863_v33 = vcombine.high %v1857_v40, %v1857_v40  ;;  %1868 = vrot.lane.b32.xlu0 %v1857_v40, %s10546_s28  ;;  %v1132_v40 = vsel %vm1130_vm11, %v7917_v61, %v7923_v4  ;;  %v1380_v61 = vsel %vm10570_vm12, %v7925_v36, %v7931_v47  ;;  %v1627_v45 = vsel %vm10569_vm13, %v7936_v38, %v7934_v14 }
 0x629   : > { %v1144_v39 = vadd.f32 %v7903_v32, %v896_v54  ;;  %v1140_v11 = vadd.f32 %v1131_v12, %v892_v22  ;;  %v1134_v46 = vsel %vm1130_vm11, %v7921_v55, %v7903_v32  ;;  %v1141_v60 = vadd.f32 %v1132_v40, %v893_v20 }
 0x62a   : > { %1870 = vrot.lane.b32.xlu1 %v1863_v33, %s10546_s28  ;;  %v894_v33 = vadd.f32 %v885_v44, %v10750_v48  ;;  %v1381_v4 = vsel %vm10570_vm12, %v7931_v47, %v7929_v41  ;;  %v895_v36 = vadd.f32 %v886_v53, %v10750_v48  ;;  %v1628_v38 = vsel %vm10569_vm13, %v7934_v14, %v7948_v35 }
 0x62b   : > { %v1392_v24 = vadd.f32 %v7905_v49, %v1144_v39  ;;  %v1382_v55 = vsel %vm10570_vm12, %v7929_v41, %v7905_v49  ;;  %v1630_v15 = vsel %vm10569_vm13, %v7946_v63, %v7907_v37  ;;  %v1629_v14 = vsel %vm10569_vm13, %v7948_v35, %v7946_v63 }
 0x62c   : > { %1872 = vrot.lane.b32.xlu0 %v1858_v23, %s10546_s28  ;;  %v1142_v27 = vadd.f32 %v1133_v1, %v894_v33  ;;  %v1143_v54 = vadd.f32 %v1134_v46, %v895_v36  ;;  %v1894_v22 = vrot.slane %v1889_v25, %v10732_v30  ;;  %v1898_v49 = vrot.slane %v1889_v25, %v10733_v2  ;;  %s10572_s28 = smov 9  }
 0x62d   : > { %v1902_v33 = vrot.slane %v1889_v25, %v10734_v42  ;;  %v1910_v35 = vrot.slane %v1889_v25, %v10736_v26  ;;  %v1906_v46 = vrot.slane %v1889_v25, %v10735_v7  ;;  %vm10571_vm13 = vcmask 23552  }
 0x62e   : > { %1934 = vperm.xlu1 %6771, %v6919_v57   ;;  %v1388_v57 = vadd.f32 %v1379_v59, %v1140_v11  ;;  %v1390_v48 = vadd.f32 %v1381_v4, %v1142_v27  ;;  %v1391_v39 = vadd.f32 %v1382_v55, %v1143_v54  ;;  %v1640_v59 = vadd.f32 %v7907_v37, %v1392_v24 }
 0x62f   : > { %vm2546_vm12 = vcmask 48128  }
 0x630   : > { %2008 = vperm.xlu0 %6774, %v7991_v28   ;;  %v1636_v47 = vadd.f32 %v1627_v45, %v1388_v57  ;;  %v1638_v53 = vadd.f32 %v1629_v14, %v1390_v48  ;;  %v1639_v1 = vadd.f32 %v1630_v15, %v1391_v39 }
 0x632   : > { %6772 = vset.pattern.permute.xlu1 %v10740_v3 }
 0x633   : > { %1955 = vperm.xlu1 %6772, %v7991_v28  }
 0x634   : > { %6775 = vset.pattern.permute.xlu0 %v10536_v29 }
 0x635   : > { %2033 = vperm.xlu0 %6775, %v7991_v28  }
 0x637   : > { %6773 = vset.pattern.permute.xlu1 %v10741_v58 }
 0x638   : > { %1980 = vperm.xlu1 %6773, %v7991_v28  }
 0x639   : > { %6776 = vset.pattern.permute.xlu0 %v10535_v52 }
 0x63a   : > { %2058 = vperm.xlu0 %6776, %v7991_v28  }
 0x63c   : > { %6779 = vset.pattern.permute.xlu1 %v10742_v5 }
 0x63d   : > { %2146 = vperm.xlu1 %6779, %v7991_v28  }
 0x63e   : > { %6777 = vset.pattern.permute.xlu0 %v10534_v31 }
 0x63f   : > { %2086 = vperm.xlu0 %6777, %v7991_v28  }
 0x641   : > { %6780 = vset.pattern.permute.xlu1 %v10743_v19  ;;  %v10555_v19 = vmov 25  }
 0x642   : > { %2173 = vperm.xlu1 %6780, %v7991_v28  }
 0x643   : > { %6778 = vset.pattern.permute.xlu0 %v10718_v17 }
 0x644   : > { %2131 = vperm.xlu0 %6778, %v7991_v28  }
 0x646   : > { %6786 = vset.pattern.permute.xlu1 %v10744_v9 }
 0x647   : > { %2366 = vperm.xlu1 %6786, %v7991_v28  }
 0x648   : > { %6781 = vset.pattern.permute.xlu0 %v10745_v21 }
 0x649   : > { %2202 = vperm.xlu0 %6781, %v7991_v28  }
 0x64b   : > { %6787 = vset.pattern.permute.xlu1 %v10746_v8 }
 0x64c   : > { %2393 = vperm.xlu1 %6787, %v7991_v28  }
 0x64d   : > { %6782 = vset.pattern.permute.xlu0 %v10533_v18 }
 0x64e   : > { %2229 = vperm.xlu0 %6782, %v7991_v28  }
 0x650   : > { %6793 = vset.pattern.permute.xlu1 %v10747_v56 }
 0x652   : > { %6783 = vset.pattern.permute.xlu0 %v10532_v10 }
 0x653   : > { %2256 = vperm.xlu0 %6783, %v7991_v28  }
 0x657   : > { %6784 = vset.pattern.permute.xlu0 %v10531_v6 }
 0x658   : > { %2285 = vperm.xlu0 %6784, %v7991_v28  }
 0x65c   : > { %2323 = vrot.lane.b32.xlu0 %v2322_v34, %s10577_s18  ;;  %v1389_v34 = vadd.f32 %v1380_v61, %v1141_v60  ;;  %s10803_s18 = smov 32  }
 0x65d   : > { %6785 = vset.pattern.permute.xlu0 %v10748_v43 }
 0x65e   : > { %v1637_v12 = vadd.f32 %v1628_v38, %v1389_v34 }
 0x660   : > { %2351 = vperm.xlu0 %6785, %v7991_v28  }
 0x664   : > { %6788 = vset.pattern.permute.xlu0 %v10749_v16 }
 0x665   : > { %2422 = vperm.xlu0 %6788, %v7991_v28  }
 0x669   : > { %6789 = vset.pattern.permute.xlu0 %v10530_v0 }
 0x695   : > { %v1865_v23 = vpop.permute.xlu0 %1864 }
 0x697   : > { %v1867_v32 = vpop.permute.xlu1 %1866 }
 0x698   : > { %v1875_v51 = vsel %vm10562_vm14, %v1865_v23, %v1867_v32 }
 0x699   : > { %v1884_v44 = vadd.f32 %v1875_v51, %v1636_v47 }
 0x69a   : > { %v1869_v41 = vpop.permute.xlu0 %1868 }
 0x69b   : > { %v1876_v40 = vsel %vm10562_vm14, %v1867_v32, %v1869_v41  ;;  %v1916_v61 = vmul.f32 %v1894_v22, %v1884_v44 }
 0x69c   : > { %v1885_v20 = vadd.f32 %v1876_v40, %v1637_v12  ;;  %v1871_v11 = vpop.permute.xlu1 %1870 }
 0x69d   : > { %v1877_v63 = vsel %vm10562_vm14, %v1869_v41, %v1871_v11 }
 0x69e   : > { %v1917_v45 = vmul.f32 %v1898_v49, %v1885_v20  ;;  %v1886_v23 = vadd.f32 %v1877_v63, %v1638_v53  ;;  %v1873_v60 = vpop.permute.xlu0 %1872 }
 0x69f   : > { %v1878_v57 = vsel %vm10562_vm14, %v1871_v11, %v1873_v60  ;;  %v1888_v4 = vadd.f32 %v1873_v60, %v1640_v59  ;;  %vm2079_vm14 = vcmask 130048  }
 0x6a0   : > { %v8106_v37 = vcombine.low %v1916_v61, %v1917_v45  ;;  %v1887_v24 = vadd.f32 %v1878_v57, %v1639_v1  ;;  %v1918_v27 = vmul.f32 %v1902_v33, %v1886_v23 }
 0x6a1   : > { %v1920_v36 = vmul.f32 %v1910_v35, %v1888_v4 }
 0x6a2   : > { %1929 = vst [vmem:[#allocation3] sm:$0xff] %v8106_v37  ;;  %v1919_v38 = vmul.f32 %v1906_v46, %v1887_v24 }
 0x6a3   : > { %1932 = vst.msk [vmem:[#allocation3 + $0x10] sm:$0xf] %vm10558_vm15, %v1920_v36  ;;  %vm2001_vm15 = vcmask 261120  }
 0x6a4   : > { %v8110_v32 = vcombine.low %v1918_v27, %v1919_v38  ;;  %v6628_v38 = vld [vmem:[%s10410_s4 + $0x2] ss:$8 sm:$0x3] }
 0x6a6   : > { %10751 = vst [vmem:[#allocation18_spill] sm:$0xff] %v8110_v32  ;;  %1930 = vst [vmem:[#allocation3 + $0x8] sm:$0xff] %v8110_v32 }
 0x6a9   : > { %v8113_v25 = vpop.permute.xlu1 %1934 }
 0x6aa   : > { %10752 = vst [vmem:[#allocation43_spill] sm:$0xff] %v8113_v25  ;;  %v2084_v53 = vld [vmem:[#allocation3 + $0x10] sm:$0xf] }
 0x6ab   : > { %v2009_v55 = vpop.permute.xlu0 %2008 }
 0x6ad   : > { %v1953_v51 = vld [vmem:[#allocation3 + $0x8] sm:$0xf] }
 0x6ae   : > { %v1956_v34 = vpop.permute.xlu1 %1955  ;;  %v8127_v41 = vld [vmem:[#allocation3 + $0x8] sm:$0xf] }
 0x6af   : > { %v1963_v47 = vrot.slane %v1956_v34, %v7237_v62  ;;  %v8148_v45 = vld [vmem:[#allocation3 + $0x8] sm:$0xf] }
 0x6b0   : > { %v8116_v54 = vpop.permute.xlu0 %2033  ;;  %v8397_v3 = vld [vmem:[#allocation3 + $0x8] sm:$0xf] }
 0x6b1   : > { %v1966_v48 = vmul.f32 %v1963_v47, %v1953_v51 }
 0x6b3   : > { %v1981_v15 = vpop.permute.xlu1 %1980  ;;  %1971 = vrot.lane.b32.xlu0 %v1966_v48, %s6965_s22  ;;  %v10529_v48 = vmov 37  }
 0x6b4   : > { %v1988_v14 = vrot.slane %v1981_v15, %v7237_v62  ;;  %v2283_v15 = vld [vmem:[#allocation3 + $0x10] sm:$0xf] }
 0x6b5   : > { %v8120_v12 = vpop.permute.xlu0 %2058 }
 0x6b6   : > { %v1990_v22 = vmul.f32 %v1988_v14, %v8106_v37 }
 0x6b8   : > { %v2147_v44 = vpop.permute.xlu1 %2146  ;;  %1994 = vrot.lane.b32.xlu0 %v1990_v22, %s10580_s30 }
 0x6b9   : > { %v8125_v49 = vrot.slane %v2147_v44, %v7237_v62  ;;  %v2537_v44 = vrot.slane %v6628_v38, %v10732_v30 }
 0x6ba   : > { %v2087_v39 = vpop.permute.xlu0 %2086 }
 0x6bb   : > { %v2157_v40 = vmul.f32 %v8125_v49, %v8127_v41  ;;  %v8132_v59 = vrot.slane %v2087_v39, %v7237_v62  ;;  %v2541_v39 = vrot.slane %v6628_v38, %v10733_v2  ;;  %v2066_v38 = vrot.slane %v8120_v12, %v7237_v62 }
 0x6bd   : > { %v2097_v20 = vmul.f32 %v8132_v59, %v2084_v53  ;;  %v2174_v11 = vpop.permute.xlu1 %2173  ;;  %2162 = vrot.lane.b32.xlu0 %v2157_v40, %s6965_s22  ;;  %v10528_v40 = vmov 44   ;;  %v1965_v53 = vmul.f32 %v1963_v47, %v8106_v37  ;;  %v2006_v47 = vld [vmem:[#allocation3 + $0xc] sm:$0xf] }
 0x6be   : > { %v8137_v1 = vrot.slane %v2174_v11, %v7237_v62  ;;  %v2016_v11 = vrot.slane %v2009_v55, %v7237_v62  ;;  %v2041_v55 = vrot.slane %v8116_v54, %v7237_v62  ;;  %v2069_v54 = vmul.f32 %v2066_v38, %v2006_v47 }
 0x6bf   : > { %2102 = vrot.lane.b32.xlu1 %v2097_v20, %s6964_s26  ;;  %v8140_v33 = vpop.permute.xlu0 %2131  ;;  %v2542_v20 = vcombine.low %v2537_v44, %v2541_v39  ;;  %v2156_v44 = vmul.f32 %v8125_v49, %v8106_v37 }
 0x6c0   : > { %v2183_v63 = vmul.f32 %v8137_v1, %v8106_v37  ;;  %v2184_v12 = vmul.f32 %v8137_v1, %v8127_v41 }
 0x6c2   : > { %v2367_v35 = vpop.permute.xlu1 %2366  ;;  %2187 = vrot.lane.b32.xlu0 %v2183_v63, %s10580_s30  ;;  %v1991_v63 = vmul.f32 %v1988_v14, %v1953_v51  ;;  %v10754_v51 = vmov 24  }
 0x6c3   : > { %v8146_v61 = vrot.slane %v2367_v35, %v7237_v62  ;;  %v8178_v35 = vld [vmem:[#allocation3 + $0x4] sm:$0xff] }
 0x6c4   : > { %v2203_v23 = vpop.permute.xlu0 %2202  ;;  %v2043_v14 = vmul.f32 %v2041_v55, %v8178_v35 }
 0x6c5   : > { %v2377_v46 = vmul.f32 %v8146_v61, %v8148_v45  ;;  %v2210_v39 = vrot.slane %v2203_v23, %v7237_v62 }
 0x6c7   : > { %v2394_v60 = vpop.permute.xlu1 %2393  ;;  %2382 = vrot.lane.b32.xlu0 %v2377_v46, %s6965_s22  ;;  %v10753_v46 = vmov 3  }
 0x6c8   : > { %v8154_v57 = vrot.slane %v2394_v60, %v7237_v62  ;;  %v2018_v60 = vmul.f32 %v2016_v11, %v8178_v35 }
 0x6c9   : > { %v2230_v4 = vpop.permute.xlu0 %2229 }
 0x6ca   : > { %v2403_v24 = vmul.f32 %v8154_v57, %v8106_v37 }
 0x6cc   : > { %2407 = vrot.lane.b32.xlu0 %v2403_v24, %s10580_s30  ;;  %v2019_v24 = vmul.f32 %v2016_v11, %v2006_v47  ;;  %v2237_v11 = vrot.slane %v2230_v4, %v7237_v62 }
 0x6ce   : > { %v2257_v36 = vpop.permute.xlu0 %2256  ;;  %v2239_v49 = vmul.f32 %v2237_v11, %v8178_v35 }
 0x6cf   : > { %v2264_v1 = vrot.slane %v2257_v36, %v7237_v62  ;;  %v2376_v36 = vmul.f32 %v8146_v61, %v8106_v37 }
 0x6d0   : > { %2449 = vperm.xlu0 %6789, %v7991_v28  }
 0x6d1   : > { %v2266_v23 = vmul.f32 %v2264_v1, %v8178_v35 }
 0x6d3   : > { %v2286_v27 = vpop.permute.xlu0 %2285 }
 0x6d4   : > { %v8164_v34 = vrot.slane %v2286_v27, %v7237_v62  ;;  %6790 = vset.pattern.permute.xlu0 %v10529_v48  ;;  %v2044_v27 = vmul.f32 %v2041_v55, %v2006_v47 }
 0x6d5   : > { %2476 = vperm.xlu0 %6790, %v7991_v28  }
 0x6d6   : > { %v2296_v22 = vmul.f32 %v8164_v34, %v2283_v15  ;;  %v2068_v15 = vmul.f32 %v2066_v38, %v8178_v35 }
 0x6d8   : > { %2301 = vrot.lane.b32.xlu1 %v2296_v22, %s6964_s26  ;;  %v2096_v22 = vmul.f32 %v8132_v59, %v8110_v32 }
 0x6d9   : > { %6791 = vset.pattern.permute.xlu0 %v10528_v40 }
 0x6da   : > { %2505 = vperm.xlu0 %6791, %v7991_v28  }
 0x6dc   : > { %1969 = vrot.lane.b32.xlu1 %v1965_v53, %s6965_s22  ;;  %v2212_v53 = vmul.f32 %v2210_v39, %v8178_v35 }
 0x6de   : > { %2543 = vrot.lane.b32.xlu0 %v2542_v20, %s10545_s19  ;;  %v2200_v20 = vld [vmem:[#allocation3 + $0xc] sm:$0xf]  ;;  %s10602_s19 = smov 125  }
 0x6df   : > { %6792 = vset.pattern.permute.xlu0 %v10753_v46  ;;  %v2213_v59 = vmul.f32 %v2210_v39, %v2200_v20  ;;  %v2267_v47 = vmul.f32 %v2264_v1, %v2200_v20 }
 0x6e0   : > { %1996 = vrot.lane.b32.xlu1 %v1991_v63, %s10580_s30  ;;  %v2240_v63 = vmul.f32 %v2237_v11, %v2200_v20 }
 0x6e2   : > { %2571 = vperm.xlu0 %6792, %v7991_v28  }
 0x6e4   : > { %2022 = vrot.lane.b32.xlu1 %v2018_v60, %s6963_s24  ;;  %v8216_v60 = vpop.permute.xlu0 %2323 }
 0x6e6   : > { %6795 = vset.pattern.permute.xlu0 %v10754_v51 }
 0x6e8   : > { %2024 = vrot.lane.b32.xlu1 %v2019_v24, %s6963_s24  ;;  %v8220_v4 = vpop.permute.xlu0 %2351  ;;  %v2295_v24 = vmul.f32 %v8164_v34, %v8110_v32  ;;  %v2420_v34 = vld [vmem:[#allocation3 + $0xc] sm:$0xf] }
 0x6ec   : > { %2047 = vrot.lane.b32.xlu1 %v2043_v14, %s6966_s27  ;;  %v2423_v55 = vpop.permute.xlu0 %2422  ;;  %v2404_v14 = vmul.f32 %v8154_v57, %v8148_v45 }
 0x6f0   : > { %2049 = vrot.lane.b32.xlu1 %v2044_v27, %s6966_s27  ;;  %v2430_v27 = vrot.slane %v2423_v55, %v7237_v62 }
 0x6f4   : > { %2072 = vrot.lane.b32.xlu1 %v2068_v15, %s10625_s25  ;;  %v2432_v15 = vmul.f32 %v2430_v27, %v8178_v35 }
 0x6f8   : > { %2074 = vrot.lane.b32.xlu1 %v2069_v54, %s10625_s25  ;;  %v2433_v54 = vmul.f32 %v2430_v27, %v2420_v34 }
 0x6fc   : > { %2100 = vrot.lane.b32.xlu1 %v2096_v22, %s6964_s26 }
 0x700   : > { %2160 = vrot.lane.b32.xlu1 %v2156_v44, %s6965_s22 }
 0x704   : > { %2189 = vrot.lane.b32.xlu1 %v2184_v12, %s10580_s30 }
 0x708   : > { %2216 = vrot.lane.b32.xlu1 %v2212_v53, %s6963_s24 }
 0x70c   : > { %2218 = vrot.lane.b32.xlu1 %v2213_v59, %s6963_s24 }
 0x710   : > { %2243 = vrot.lane.b32.xlu1 %v2239_v49, %s6966_s27 }
 0x714   : > { %2245 = vrot.lane.b32.xlu1 %v2240_v63, %s6966_s27 }
 0x718   : > { %2270 = vrot.lane.b32.xlu1 %v2266_v23, %s10625_s25 }
 0x71c   : > { %2272 = vrot.lane.b32.xlu1 %v2267_v47, %s10625_s25 }
 0x720   : > { %2299 = vrot.lane.b32.xlu1 %v2295_v24, %s6964_s26 }
 0x724   : > { %2380 = vrot.lane.b32.xlu1 %v2376_v36, %s6965_s22 }
 0x725   : > { %v8232_v38 = vpop.permute.xlu0 %1971 }
 0x726   : > { %10755 = vst [vmem:[#allocation17_spill] sm:$0xff] %v8232_v38 }
 0x728   : > { %2409 = vrot.lane.b32.xlu1 %v2404_v14, %s10580_s30 }
 0x72a   : > { %v8236_v22 = vpop.permute.xlu0 %1994 }
 0x72b   : > { %10756 = vst [vmem:[#allocation50_spill] sm:$0xff] %v8236_v22 }
 0x72c   : > { %2436 = vrot.lane.b32.xlu1 %v2432_v15, %s6963_s24 }
 0x72f   : > { %v8239_v61 = vpop.permute.xlu0 %2162 }
 0x730   : > { %2438 = vrot.lane.b32.xlu1 %v2433_v54, %s6963_s24 }
 0x731   : > { %v8245_v12 = vpop.permute.xlu1 %2102 }
 0x732   : > { %10758 = vst [vmem:[#allocation9_spill] sm:$0xff] %v8245_v12 }
 0x734   : > { %v8241_v44 = vpop.permute.xlu0 %2187 }
 0x739   : > { %v8243_v57 = vpop.permute.xlu0 %2382 }
 0x73a   : > { %10757 = vst [vmem:[#allocation19_spill] sm:$0xff] %v8243_v57 }
 0x73e   : > { %v8247_v39 = vpop.permute.xlu0 %2407 }
 0x74a   : > { %v8249_v53 = vpop.permute.xlu1 %2301 }
 0x74b   : > { %10759 = vst [vmem:[#allocation51_spill] sm:$0xff] %v8249_v53  ;;  %v2450_v20 = vpop.permute.xlu0 %2449 }
 0x74c   : > { %v2457_v59 = vrot.slane %v2450_v20, %v7237_v62 }
 0x74e   : > { %v2459_v11 = vmul.f32 %v2457_v59, %v8178_v35  ;;  %v8253_v49 = vpop.permute.xlu1 %1969  ;;  %v2460_v1 = vmul.f32 %v2457_v59, %v2420_v34  ;;  %v2503_v59 = vld [vmem:[#allocation3 + $0x10] sm:$0xf] }
 0x74f   : > { %10760 = vst [vmem:[#allocation20_spill] sm:$0xff] %v8253_v49 }
 0x750   : > { %2463 = vrot.lane.b32.xlu1 %v2459_v11, %s6966_s27  ;;  %v2477_v63 = vpop.permute.xlu0 %2476 }
 0x751   : > { %v2484_v23 = vrot.slane %v2477_v63, %v7237_v62 }
 0x752   : > { %v8257_v47 = vpop.permute.xlu1 %1996 }
 0x753   : > { %10761 = vst [vmem:[#allocation35_spill] sm:$0xff] %v8257_v47  ;;  %v2486_v24 = vmul.f32 %v2484_v23, %v8178_v35  ;;  %v2487_v14 = vmul.f32 %v2484_v23, %v2420_v34  ;;  %v10768_v23 = vmov 17  }
 0x754   : > { %2465 = vrot.lane.b32.xlu1 %v2460_v1, %s6966_s27 }
 0x755   : > { %v2506_v55 = vpop.permute.xlu0 %2505 }
 0x756   : > { %v8261_v36 = vpop.permute.xlu1 %2022  ;;  %v2513_v27 = vrot.slane %v2506_v55, %v7237_v62 }
 0x757   : > { %10762 = vst [vmem:[#allocation22_spill] sm:$0xff] %v8261_v36 }
 0x758   : > { %2490 = vrot.lane.b32.xlu1 %v2486_v24, %s10625_s25  ;;  %v2515_v54 = vmul.f32 %v2513_v27, %v8110_v32  ;;  %v2516_v11 = vmul.f32 %v2513_v27, %v2503_v59 }
 0x75a   : > { %v8265_v15 = vpop.permute.xlu1 %2024 }
 0x75b   : > { %10763 = vst [vmem:[#allocation25_spill] sm:$0xff] %v8265_v15  ;;  %v10775_v15 = vmov 11  }
 0x75c   : > { %2492 = vrot.lane.b32.xlu1 %v2487_v14, %s10625_s25 }
 0x75e   : > { %v8269_v20 = vpop.permute.xlu1 %2047 }
 0x75f   : > { %10764 = vst [vmem:[#allocation37_spill] sm:$0xff] %v8269_v20  ;;  %v8322_v20 = vld [vmem:[#allocation3 + $0x8] sm:$0xf] }
 0x760   : > { %2519 = vrot.lane.b32.xlu1 %v2515_v54, %s6964_s26  ;;  %10774 = vst [vmem:[#allocation44_spill] sm:$0xff] %v8322_v20 }
 0x762   : > { %v8272_v63 = vpop.permute.xlu1 %2049 }
 0x763   : > { %10765 = vst [vmem:[#allocation33_spill] sm:$0xff] %v8272_v63 }
 0x764   : > { %2521 = vrot.lane.b32.xlu1 %v2516_v11, %s6964_s26 }
 0x766   : > { %v8275_v1 = vpop.permute.xlu1 %2072 }
 0x767   : > { %10766 = vst [vmem:[#allocation39_spill] sm:$0xff] %v8275_v1 }
 0x768   : > { %2586 = vperm.xlu1 %6793, %v7991_v28  }
 0x76a   : > { %v8278_v34 = vpop.permute.xlu1 %2074 }
 0x76b   : > { %10767 = vst [vmem:[#allocation30_spill] sm:$0xff] %v8278_v34 }
 0x76c   : > { %6794 = vset.pattern.permute.xlu1 %v10768_v23 }
 0x76e   : > { %v8281_v24 = vpop.permute.xlu1 %2100 }
 0x76f   : > { %10769 = vst [vmem:[#allocation23_spill] sm:$0xff] %v8281_v24 }
 0x772   : > { %v8283_v55 = vpop.permute.xlu1 %2160 }
 0x773   : > { %v2164_v56 = vrot.slane %v8283_v55, 4 }
 0x776   : > { %v8285_v14 = vpop.permute.xlu1 %2189 }
 0x777   : > { %v2192_v7 = vrot.slane %v8285_v14, 4 }
 0x77a   : > { %v8287_v54 = vpop.permute.xlu1 %2216 }
 0x77b   : > { %v2220_v46 = vrot.slane %v8287_v54, 4 }
 0x77e   : > { %v8289_v27 = vpop.permute.xlu1 %2218 }
 0x77f   : > { %10770 = vst [vmem:[#allocation29_spill] sm:$0xff] %v8289_v27 }
 0x782   : > { %v8291_v59 = vpop.permute.xlu1 %2243 }
 0x786   : > { %v8293_v11 = vpop.permute.xlu1 %2245 }
 0x787   : > { %10771 = vst [vmem:[#allocation31_spill] sm:$0xff] %v8293_v11  ;;  %v2248_v42 = vrot.slane %v8293_v11, 4 }
 0x78a   : > { %v8295_v40 = vpop.permute.xlu1 %2270 }
 0x78e   : > { %v8297_v48 = vpop.permute.xlu1 %2272 }
 0x78f   : > { %10772 = vst [vmem:[#allocation36_spill] sm:$0xff] %v8297_v48 }
 0x792   : > { %v8299_v0 = vpop.permute.xlu1 %2299 }
 0x796   : > { %v8301_v6 = vpop.permute.xlu1 %2380 }
 0x79a   : > { %v8303_v10 = vpop.permute.xlu1 %2409 }
 0x79b   : > { %10773 = vst [vmem:[#allocation21_spill] sm:$0xff] %v8303_v10 }
 0x79e   : > { %v8305_v18 = vpop.permute.xlu1 %2436 }
 0x7a2   : > { %v8307_v31 = vpop.permute.xlu1 %2438 }
 0x7c2   : > { %v8309_v52 = vpop.permute.xlu1 %2463 }
 0x7c6   : > { %v8311_v29 = vpop.permute.xlu1 %2465 }
 0x7ca   : > { %v8313_v13 = vpop.permute.xlu1 %2490 }
 0x7ce   : > { %v8315_v25 = vpop.permute.xlu1 %2492 }
 0x7d2   : > { %v8317_v12 = vpop.permute.xlu1 %2519 }
 0x7d6   : > { %v8319_v24 = vpop.permute.xlu1 %2521 }
 0x7e3   : > { %v2587_v1 = vpop.permute.xlu1 %2586 }
 0x7e4   : > { %v2594_v34 = vrot.slane %v2587_v1, %v7237_v62 }
 0x7e6   : > { %v2596_v63 = vmul.f32 %v2594_v34, %v8106_v37  ;;  %v2597_v36 = vmul.f32 %v2594_v34, %v8322_v20  ;;  %v10550_v34 = vmov 45  }
 0x7e8   : > { %2602 = vrot.lane.b32.xlu0 %v2597_v36, %s6965_s22  ;;  %2600 = vrot.lane.b32.xlu1 %v2596_v63, %s6965_s22  ;;  %v10548_v36 = vmov 31   ;;  %v6629_v63 = vld [vmem:[%s10410_s4 + $0x3] ss:$8 sm:$0x3] }
 0x7ec   : > { %2613 = vperm.xlu1 %6794, %v7991_v28  }
 0x7f0   : > { %6800 = vset.pattern.permute.xlu1 %v10775_v15 }
 0x85a   : > { %v8330_v22 = vpop.permute.xlu1 %2600 }
 0x867   : > { %v2614_v47 = vpop.permute.xlu1 %2613 }
 0x868   : > { %v2621_v38 = vrot.slane %v2614_v47, %v7237_v62  ;;  %v10549_v47 = vmov 38  }
 0x86a   : > { %v2623_v1 = vmul.f32 %v2621_v38, %v8106_v37  ;;  %v2624_v49 = vmul.f32 %v2621_v38, %v8322_v20  ;;  %v2757_v38 = vrot.slane %v6629_v63, %v10732_v30  ;;  %v2385_v20 = vrot.slane %v8243_v57, 4 }
 0x86b   : > { %v2304_v57 = vrot.slane %v8249_v53, 4 }
 0x86c   : > { %2629 = vrot.lane.b32.xlu1 %v2624_v49, %s10580_s30  ;;  %2627 = vrot.lane.b32.xlu0 %v2623_v1, %s10580_s30  ;;  %v2761_v49 = vrot.slane %v6629_v63, %v10733_v2 }
 0x86e   : > { %v2762_v1 = vcombine.low %v2757_v38, %v2761_v49 }
 0x870   : > { %2642 = vperm.xlu0 %6795, %v7991_v28  }
 0x874   : > { %6796 = vset.pattern.permute.xlu0 %v10548_v36  ;;  %v10776_v36 = vmov 4  }
 0x875   : > { %2669 = vperm.xlu0 %6796, %v7991_v28  }
 0x879   : > { %6797 = vset.pattern.permute.xlu0 %v10549_v47  ;;  %v8352_v47 = vpop.permute.xlu0 %2543 }
 0x87a   : > { %2696 = vperm.xlu0 %6797, %v7991_v28  }
 0x87d   : > { %v8354_v51 = vpop.permute.xlu0 %2571 }
 0x87e   : > { %6798 = vset.pattern.permute.xlu0 %v10550_v34 }
 0x87f   : > { %2725 = vperm.xlu0 %6798, %v7991_v28  }
 0x881   : > { %v8356_v58 = vpop.permute.xlu0 %2602 }
 0x883   : > { %2763 = vrot.lane.b32.xlu0 %v2762_v1, %s10572_s28  ;;  %v2640_v1 = vld [vmem:[#allocation3 + $0xc] sm:$0xf]  ;;  %s10588_s28 = smov 119  }
 0x884   : > { %6799 = vset.pattern.permute.xlu0 %v10776_v36  ;;  %v2221_v36 = vrot.slane %v8289_v27, 4  ;;  %v2441_v27 = vrot.slane %v8307_v31, 4 }
 0x887   : > { %2791 = vperm.xlu0 %6799, %v7991_v28  }
 0x88b   : > { %6802 = vset.pattern.permute.xlu0 %v10555_v19  ;;  %v8418_v19 = vrot.slane %v8220_v4, %v7237_v62  ;;  %v2222_v4 = vsel %vm560_vm0, %v2220_v46, %v2221_v36  ;;  %v2411_v46 = vrot.slane %v8247_v39, 4 }
 0x88c   : > { %v2223_v36 = vsel %vm696_vm3, %v8287_v54, %v2222_v4  ;;  %v2303_v4 = vrot.slane %v8299_v0, 4 }
 0x8de   : > { %v8358_v63 = vpop.permute.xlu0 %2627 }
 0x8eb   : > { %v2643_v16 = vpop.permute.xlu0 %2642 }
 0x8ec   : > { %v2650_v34 = vrot.slane %v2643_v16, %v7237_v62 }
 0x8ee   : > { %v2652_v38 = vmul.f32 %v2650_v34, %v8178_v35  ;;  %v2653_v9 = vmul.f32 %v2650_v34, %v2640_v1 }
 0x8f0   : > { %2656 = vrot.lane.b32.xlu1 %v2652_v38, %s6963_s24  ;;  %v2670_v49 = vpop.permute.xlu0 %2669 }
 0x8f1   : > { %v2677_v21 = vrot.slane %v2670_v49, %v7237_v62 }
 0x8f3   : > { %v2679_v23 = vmul.f32 %v2677_v21, %v8178_v35  ;;  %v2680_v43 = vmul.f32 %v2677_v21, %v2640_v1 }
 0x8f4   : > { %2658 = vrot.lane.b32.xlu1 %v2653_v9, %s6963_s24 }
 0x8f5   : > { %v2697_v5 = vpop.permute.xlu0 %2696 }
 0x8f6   : > { %v2704_v8 = vrot.slane %v2697_v5, %v7237_v62  ;;  %v10777_v5 = vmov 18  }
 0x8f8   : > { %2683 = vrot.lane.b32.xlu1 %v2679_v23, %s6966_s27  ;;  %v2706_v16 = vmul.f32 %v2704_v8, %v8178_v35  ;;  %v2707_v34 = vmul.f32 %v2704_v8, %v2640_v1  ;;  %v2723_v23 = vld [vmem:[#allocation3 + $0x10] sm:$0xf] }
 0x8fa   : > { %v2726_v38 = vpop.permute.xlu0 %2725 }
 0x8fb   : > { %v2733_v49 = vrot.slane %v2726_v38, %v7237_v62 }
 0x8fc   : > { %2685 = vrot.lane.b32.xlu1 %v2680_v43, %s6966_s27  ;;  %v8378_v43 = vpop.permute.xlu1 %2629 }
 0x8fd   : > { %v2735_v9 = vmul.f32 %v2733_v49, %v8110_v32  ;;  %v2736_v21 = vmul.f32 %v2733_v49, %v2723_v23  ;;  %v2275_v32 = vrot.slane %v8297_v48, 4 }
 0x900   : > { %2710 = vrot.lane.b32.xlu1 %v2706_v16, %s10625_s25 }
 0x904   : > { %2712 = vrot.lane.b32.xlu1 %v2707_v34, %s10625_s25 }
 0x908   : > { %2739 = vrot.lane.b32.xlu1 %v2735_v9, %s6964_s26 }
 0x90c   : > { %2741 = vrot.lane.b32.xlu1 %v2736_v21, %s6964_s26 }
 0x910   : > { %2806 = vperm.xlu1 %6800, %v7991_v28  }
 0x914   : > { %6801 = vset.pattern.permute.xlu1 %v10777_v5 }
 0x962   : > { %v8380_v16 = vpop.permute.xlu1 %2656 }
 0x966   : > { %v8382_v8 = vpop.permute.xlu1 %2658 }
 0x96a   : > { %v8384_v1 = vpop.permute.xlu1 %2683 }
 0x96e   : > { %v8386_v38 = vpop.permute.xlu1 %2685 }
 0x972   : > { %v8388_v34 = vpop.permute.xlu1 %2710 }
 0x976   : > { %v8390_v9 = vpop.permute.xlu1 %2712 }
 0x97a   : > { %v8392_v49 = vpop.permute.xlu1 %2739 }
 0x97e   : > { %v8394_v23 = vpop.permute.xlu1 %2741 }
 0x98b   : > { %v2807_v21 = vpop.permute.xlu1 %2806 }
 0x98c   : > { %v2814_v5 = vrot.slane %v2807_v21, %v7237_v62  ;;  %v2165_v21 = vrot.slane %v8239_v61, 4 }
 0x98e   : > { %v2816_v15 = vmul.f32 %v2814_v5, %v8106_v37  ;;  %v2817_v26 = vmul.f32 %v2814_v5, %v8397_v3  ;;  %v8411_v5 = vrot.slane %v8140_v33, %v7237_v62 }
 0x990   : > { %2822 = vrot.lane.b32.xlu0 %v2817_v26, %s6965_s22  ;;  %2820 = vrot.lane.b32.xlu1 %v2816_v15, %s6965_s22  ;;  %v2191_v26 = vrot.slane %v8241_v44, 4  ;;  %v2166_v15 = vsel %vm560_vm0, %v2164_v56, %v2165_v21  ;;  %v2141_v17 = vmul.f32 %v8411_v5, %v8106_v37  ;;  %v8429_v56 = vrot.slane %v8354_v51, %v7237_v62 }
 0x991   : > { %v2167_v33 = vsel %vm772_vm5, %v8283_v55, %v2166_v15  ;;  %v2384_v21 = vrot.slane %v8301_v6, 4  ;;  %v2412_v55 = vrot.slane %v8303_v10, 4  ;;  %v2361_v15 = vmul.f32 %v8418_v19, %v8106_v37 }
 0x992   : > { %v2170_v51 = vadd.f32 %v2167_v33, %v2141_v17  ;;  %v2581_v17 = vmul.f32 %v8429_v56, %v8106_v37 }
 0x993   : > { %v2386_v10 = vsel %vm560_vm0, %v2384_v21, %v2385_v20 }
 0x994   : > { %2833 = vperm.xlu1 %6801, %v7991_v28   ;;  %v2387_v21 = vsel %vm772_vm5, %v8301_v6, %v2386_v10  ;;  %v2631_v10 = vrot.slane %v8358_v63, 4 }
 0x995   : > { %v2390_v53 = vadd.f32 %v2387_v21, %v2361_v15  ;;  %v2524_v15 = vrot.slane %v8319_v24, 4  ;;  %v2688_v21 = vrot.slane %v8386_v38, 4 }
 0x998   : > { %6807 = vset.pattern.permute.xlu1 %v10778_v50  ;;  %v2193_v50 = vsel %vm560_vm0, %v2191_v26, %v2192_v7  ;;  %v2247_v26 = vrot.slane %v8291_v59, 4 }
 0x999   : > { %v2194_v7 = vsel %vm2001_vm15, %v8241_v44, %v2193_v50  ;;  %v2274_v44 = vrot.slane %v8295_v40, 4 }
 0x99a   : > { %v2249_v50 = vsel %vm560_vm0, %v2247_v26, %v2248_v42  ;;  %v2197_v48 = vadd.f32 %v2194_v7, %v2170_v51  ;;  %v2440_v7 = vrot.slane %v8305_v18, 4  ;;  %v2604_v26 = vrot.slane %v8330_v22, 4 }
 0x99b   : > { %v2276_v33 = vsel %vm560_vm0, %v2274_v44, %v2275_v32  ;;  %v2250_v42 = vsel %vm811_vm6, %v8291_v59, %v2249_v50  ;;  %v2605_v51 = vrot.slane %v8356_v58, 4 }
 0x99c   : > { %v2226_v54 = vadd.f32 %v2223_v36, %v2197_v48  ;;  %v2442_v59 = vsel %vm560_vm0, %v2440_v7, %v2441_v27  ;;  %v2632_v36 = vrot.slane %v8378_v43, 4  ;;  %v2495_v27 = vrot.slane %v8315_v25, 4 }
 0x99d   : > { %v2660_v7 = vrot.slane %v8380_v16, 4 }
 0x99e   : > { %v2253_v44 = vadd.f32 %v2250_v42, %v2226_v54 }
 0xa02   : > { %v8441_v11 = vpop.permute.xlu1 %2820 }
 0xa03   : > { %10779 = vst [vmem:[#allocation42_spill] sm:$0xff] %v8441_v11  ;;  %v2413_v11 = vsel %vm560_vm0, %v2411_v46, %v2412_v55  ;;  %v2277_v55 = vsel %vm2079_vm14, %v8295_v40, %v2276_v33  ;;  %v2468_v46 = vrot.slane %v8311_v29, 4  ;;  %v2467_v40 = vrot.slane %v8309_v52, 4 }
 0xa04   : > { %v2414_v48 = vsel %vm2001_vm15, %v8247_v39, %v2413_v11  ;;  %v2443_v39 = vsel %vm696_vm3, %v8305_v18, %v2442_v59  ;;  %v2606_v11 = vsel %vm560_vm0, %v2604_v26, %v2605_v51  ;;  %v2661_v33 = vrot.slane %v8382_v8, 4 }
 0xa05   : > { %v2280_v42 = vadd.f32 %v2277_v55, %v2253_v44  ;;  %v2417_v54 = vadd.f32 %v2414_v48, %v2390_v53  ;;  %v2633_v18 = vsel %vm560_vm0, %v2631_v10, %v2632_v36  ;;  %v2607_v53 = vsel %vm772_vm5, %v8330_v22, %v2606_v11 }
 0xa06   : > { %v2662_v48 = vsel %vm560_vm0, %v2660_v7, %v2661_v33  ;;  %v2687_v59 = vrot.slane %v8384_v1, 4  ;;  %v2634_v10 = vsel %vm2001_vm15, %v8358_v63, %v2633_v18  ;;  %v2744_v44 = vrot.slane %v8394_v23, 4 }
 0xa07   : > { %v2446_v51 = vadd.f32 %v2443_v39, %v2417_v54  ;;  %v10607_v33 = vmov 32  }
 0xa08   : > { %v2689_v22 = vsel %vm560_vm0, %v2687_v59, %v2688_v21 }
 0xa0f   : > { %v2834_v20 = vpop.permute.xlu1 %2833 }
 0xa10   : > { %v2841_v32 = vrot.slane %v2834_v20, %v7237_v62  ;;  %v2305_v20 = vsel %vm560_vm0, %v2303_v4, %v2304_v57  ;;  %v2469_v57 = vsel %vm560_vm0, %v2467_v40, %v2468_v46  ;;  %v2494_v4 = vrot.slane %v8313_v13, 4 }
 0xa11   : > { %v2306_v26 = vsel %vm734_vm4, %v8299_v0, %v2305_v20  ;;  %v2715_v46 = vrot.slane %v8390_v9, 4  ;;  %v2470_v36 = vsel %vm811_vm6, %v8309_v52, %v2469_v57  ;;  %v2325_v20 = vrot.slane %v8216_v60, 4 }
 0xa12   : > { %v2843_v6 = vmul.f32 %v2841_v32, %v8106_v37  ;;  %v2844_v50 = vmul.f32 %v2841_v32, %v8397_v3  ;;  %v2523_v32 = vrot.slane %v8317_v12, 4  ;;  %v2496_v55 = vsel %vm560_vm0, %v2494_v4, %v2495_v27 }
 0xa13   : > { %v2309_v40 = vadd.f32 %v2306_v26, %v2280_v42  ;;  %v2497_v39 = vsel %vm2079_vm14, %v8313_v13, %v2496_v55  ;;  %v2663_v52 = vsel %vm696_vm3, %v8380_v16, %v2662_v48  ;;  %v2473_v27 = vadd.f32 %v2470_v36, %v2446_v51 }
 0xa14   : > { %2849 = vrot.lane.b32.xlu1 %v2844_v50, %s10580_s30  ;;  %2847 = vrot.lane.b32.xlu0 %v2843_v6, %s10580_s30  ;;  %v2525_v0 = vsel %vm560_vm0, %v2523_v32, %v2524_v15  ;;  %v2610_v6 = vadd.f32 %v2607_v53, %v2581_v17  ;;  %v2714_v50 = vrot.slane %v8388_v34, 4  ;;  %v2743_v17 = vrot.slane %v8392_v49, 4  ;;  %v8537_v32 = vpop.permute.xlu0 %2763  ;;  %s10597_s30 = smov 12  }
 0xa15   : > { %v2526_v54 = vsel %vm734_vm4, %v8317_v12, %v2525_v0  ;;  %v2690_v42 = vsel %vm811_vm6, %v8384_v1, %v2689_v22  ;;  %v2500_v13 = vadd.f32 %v2497_v39, %v2473_v27  ;;  %v2327_v15 = vsel %vm10571_vm13, %v2325_v20, %v8216_v60  ;;  %v6630_v22 = vld [vmem:[%s10410_s4 + $0x4] ss:$8 sm:$0x3] }
 0xa16   : > { %v2637_v11 = vadd.f32 %v2634_v10, %v2610_v6  ;;  %v2716_v63 = vsel %vm560_vm0, %v2714_v50, %v2715_v46  ;;  %v2745_v57 = vsel %vm560_vm0, %v2743_v17, %v2744_v44  ;;  %v2545_v4 = vrot.slane %v8352_v47, 4  ;;  %v8562_v10 = vld [vmem:[%s10412_s6] sm:$0xf] }
 0xa17   : > { %v2717_v18 = vsel %vm2079_vm14, %v8388_v34, %v2716_v63  ;;  %v8528_v12 = vmul.f32 %v2327_v15, %v2309_v40  ;;  %v2529_v7 = vadd.f32 %v2526_v54, %v2500_v13  ;;  %v2746_v26 = vsel %vm734_vm4, %v8392_v49, %v2745_v57  ;;  %v2860_v57 = vld [vmem:[#allocation3 + $0xc] sm:$0xf] }
 0xa18   : > { %2862 = vperm.xlu0 %6802, %v7991_v28   ;;  %v2666_v16 = vadd.f32 %v2663_v52, %v2637_v11  ;;  %v2547_v21 = vsel %vm2546_vm12, %v2545_v4, %v8352_v47  ;;  %v10605_v51 = vmov 39   ;;  %vm10582_vm13 = vcmask 72704   ;;  %v8572_v39 = vpop.permute.xlu0 %2791 }
 0xa19   : > { %v2765_v34 = vrot.slane %v8537_v32, 4  ;;  %v2334_v48 = vcombine.high %v8528_v12, %v8528_v12  ;;  %v8543_v59 = vmul.f32 %v2547_v21, %v2529_v7  ;;  %v10593_v46 = vmov 46  }
 0xa1a   : > { %v2693_v1 = vadd.f32 %v2690_v42, %v2666_v16  ;;  %v10780_v6 = vmov 5   ;;  %v2977_v50 = vrot.slane %v6630_v22, %v10732_v30  ;;  %v2981_v44 = vrot.slane %v6630_v22, %v10733_v2  ;;  %v10787_v22 = vld [vmem:[#allocation51_spill] sm:$0xff] }
 0xa1b   : > { %v2767_v49 = vsel %vm10582_vm13, %v2765_v34, %v8537_v32  ;;  %v2142_v63 = vmul.f32 %v8411_v5, %v8127_v41  ;;  %v2362_v15 = vmul.f32 %v8418_v19, %v8148_v45  ;;  %v10782_v5 = vld [vmem:[#allocation19_spill] sm:$0xff]  ;;  %vm10585_vm13 = vcmask 97280  }
 0xa1c   : > { %6803 = vset.pattern.permute.xlu0 %v10607_v33  ;;  %v2720_v53 = vadd.f32 %v2717_v18, %v2693_v1  ;;  %v2982_v40 = vcombine.low %v2977_v50, %v2981_v44  ;;  %v8574_v52 = vpop.permute.xlu0 %2822  ;;  %v10781_v18 = vld [vmem:[#allocation29_spill] sm:$0xff]  ;;  %v2943_v32 = vld [vmem:[#allocation3 + $0x10] sm:$0xf] }
 0xa1d   : > { %2889 = vperm.xlu0 %6803, %v7991_v28   ;;  %v2171_v54 = vadd.f32 %v8239_v61, %v2142_v63  ;;  %v2391_v21 = vadd.f32 %v10782_v5, %v2362_v15  ;;  %v10798_v5 = vld [vmem:[#allocation42_spill] sm:$0xff] }
 0xa1e   : > { %v2749_v55 = vadd.f32 %v2746_v26, %v2720_v53  ;;  %v10783_v26 = vld [vmem:[#allocation31_spill] sm:$0xff]  ;;  %v10784_v53 = vld [vmem:[#allocation44_spill] sm:$0xff] }
 0xa1f   : > { %v2198_v13 = vadd.f32 %v8285_v14, %v2171_v54  ;;  %v2582_v14 = vmul.f32 %v8429_v56, %v10784_v53 }
 0xa20   : > { %v8553_v36 = vmul.f32 %v2767_v49, %v2749_v55  ;;  %v10785_v55 = vld [vmem:[#allocation36_spill] sm:$0xff]  ;;  %v10786_v49 = vld [vmem:[#allocation21_spill] sm:$0xff] }
 0xa21   : > { %6804 = vset.pattern.permute.xlu0 %v10605_v51  ;;  %v2227_v7 = vadd.f32 %v10781_v18, %v2198_v13 }
 0xa22   : > { %2916 = vperm.xlu0 %6804, %v7991_v28   ;;  %v2554_v28 = vcombine.high %v8543_v59, %v8543_v59  ;;  %v2774_v0 = vcombine.high %v8553_v36, %v8553_v36 }
 0xa23   : > { %v2254_v61 = vadd.f32 %v10783_v26, %v2227_v7  ;;  %v2825_v26 = vrot.slane %v8574_v52, 4 }
 0xa26   : > { %2337 = vrot.lane.b32.xlu0 %v2334_v48, %s10602_s19  ;;  %v2281_v48 = vadd.f32 %v10785_v55, %v2254_v61  ;;  %v2799_v55 = vrot.slane %v8572_v39, %v7237_v62 }
 0xa27   : > { %6805 = vset.pattern.permute.xlu0 %v10593_v46 }
 0xa28   : > { %v2310_v50 = vadd.f32 %v10787_v22, %v2281_v48 }
 0xa2a   : > { %2557 = vrot.lane.b32.xlu0 %v2554_v28, %s10598_s29  ;;  %v2418_v28 = vadd.f32 %v10786_v49, %v2391_v21  ;;  %v2824_v21 = vrot.slane %v10798_v5, 4 }
 0xa2c   : > { %v2447_v45 = vadd.f32 %v8307_v31, %v2418_v28  ;;  %v2826_v48 = vsel %vm560_vm0, %v2824_v21, %v2825_v26 }
 0xa2e   : > { %2777 = vrot.lane.b32.xlu0 %v2774_v0, %s10588_s28  ;;  %v2611_v0 = vadd.f32 %v8356_v58, %v2582_v14  ;;  %v2474_v44 = vadd.f32 %v8311_v29, %v2447_v45  ;;  %v2331_v58 = vmul.f32 %v2325_v20, %v2310_v50  ;;  %v2801_v50 = vmul.f32 %v2799_v55, %v8106_v37 }
 0xa30   : > { %v2501_v56 = vadd.f32 %v8315_v25, %v2474_v44 }
 0xa32   : > { %2945 = vperm.xlu0 %6805, %v8562_v10  }
 0xa36   : > { %6806 = vset.pattern.permute.xlu0 %v10780_v6 }
 0xa37   : > { %2983 = vrot.lane.b32.xlu0 %v2982_v40, %s10597_s30  ;;  %v2638_v40 = vadd.f32 %v8378_v43, %v2611_v0  ;;  %v2827_v0 = vsel %vm772_vm5, %v10798_v5, %v2826_v48  ;;  %s10826_s30 = smov 4  }
 0xa39   : > { %v2667_v63 = vadd.f32 %v8382_v8, %v2638_v40 }
 0xa3b   : > { %v2694_v31 = vadd.f32 %v8386_v38, %v2667_v63  ;;  %v2830_v63 = vadd.f32 %v2827_v0, %v2801_v50  ;;  %v10606_v0 = vmov 26  }
 0xa86   : > { %v8576_v27 = vpop.permute.xlu0 %2847 }
 0xa87   : > { %v2851_v53 = vrot.slane %v8576_v27, 4 }
 0xa93   : > { %v2863_v11 = vpop.permute.xlu0 %2862 }
 0xa94   : > { %v2870_v17 = vrot.slane %v2863_v11, %v7237_v62 }
 0xa96   : > { %v2872_v42 = vmul.f32 %v2870_v17, %v8178_v35  ;;  %v2873_v1 = vmul.f32 %v2870_v17, %v2860_v57  ;;  %v2530_v17 = vadd.f32 %v8319_v24, %v2501_v56  ;;  %v2802_v56 = vmul.f32 %v2799_v55, %v8397_v3 }
 0xa98   : > { %2876 = vrot.lane.b32.xlu1 %v2872_v42, %s6963_s24  ;;  %v2890_v16 = vpop.permute.xlu0 %2889  ;;  %v2721_v42 = vadd.f32 %v8390_v9, %v2694_v31  ;;  %v2551_v29 = vmul.f32 %v2545_v4, %v2530_v17  ;;  %v10791_v4 = vld [vmem:[#allocation18_spill] sm:$0xff] }
 0xa99   : > { %v2897_v41 = vrot.slane %v2890_v16, %v7237_v62 }
 0xa9a   : > { %v2750_v25 = vadd.f32 %v8394_v23, %v2721_v42  ;;  %v2831_v42 = vadd.f32 %v8574_v52, %v2802_v56  ;;  %v10610_v56 = vmov 33  }
 0xa9b   : > { %v2899_v19 = vmul.f32 %v2897_v41, %v8178_v35  ;;  %v2900_v11 = vmul.f32 %v2897_v41, %v2860_v57 }
 0xa9c   : > { %2878 = vrot.lane.b32.xlu1 %v2873_v1, %s6963_s24  ;;  %v2771_v24 = vmul.f32 %v2765_v34, %v2750_v25 }
 0xa9d   : > { %v2917_v54 = vpop.permute.xlu0 %2916 }
 0xa9e   : > { %v2924_v8 = vrot.slane %v2917_v54, %v7237_v62 }
 0xaa0   : > { %2903 = vrot.lane.b32.xlu1 %v2899_v19, %s6966_s27  ;;  %v2926_v38 = vmul.f32 %v2924_v8, %v8178_v35  ;;  %v2927_v23 = vmul.f32 %v2924_v8, %v2860_v57 }
 0xaa1   : > { %v8616_v43 = vpop.permute.xlu0 %2337 }
 0xaa2   : > { %10788 = vst [vmem:[#allocation32_spill] sm:$0xff] %v8616_v43 }
 0xaa4   : > { %2905 = vrot.lane.b32.xlu1 %v2900_v11, %s6966_s27 }
 0xaa5   : > { %v8621_v60 = vpop.permute.xlu0 %2557 }
 0xaa6   : > { %10789 = vst [vmem:[#allocation38_spill] sm:$0xff] %v8621_v60 }
 0xaa8   : > { %2339 = vrot.lane.b32.xlu1 %v2331_v58, %s10602_s19 }
 0xaa9   : > { %v8627_v47 = vpop.permute.xlu0 %2777 }
 0xaaa   : > { %10790 = vst [vmem:[#allocation24_spill] sm:$0xff] %v8627_v47 }
 0xaac   : > { %2559 = vrot.lane.b32.xlu1 %v2551_v29, %s10598_s29 }
 0xaad   : > { %v2946_v9 = vpop.permute.xlu0 %2945 }
 0xaae   : > { %v2953_v20 = vrot.slane %v2946_v9, %v7237_v62 }
 0xab0   : > { %2779 = vrot.lane.b32.xlu1 %v2771_v24, %s10588_s28  ;;  %v2956_v34 = vmul.f32 %v2953_v20, %v2943_v32 }
 0xab4   : > { %2335 = vrot.lane.b32.xlu1 %v8528_v12, %s10602_s19  ;;  %v2955_v12 = vmul.f32 %v2953_v20, %v10791_v4  ;;  %s10822_s19 = smov 127  }
 0xab8   : > { %2555 = vrot.lane.b32.xlu1 %v8543_v59, %s10598_s29  ;;  %v2850_v59 = vpop.permute.xlu1 %2849  ;;  %s10819_s29 = smov 5  }
 0xab9   : > { %v2852_v61 = vrot.slane %v2850_v59, 4  ;;  %v2858_v24 = vadd.f32 %v2850_v59, %v2831_v42 }
 0xabb   : > { %v2853_v28 = vsel %vm560_vm0, %v2851_v53, %v2852_v61 }
 0xabc   : > { %2775 = vrot.lane.b32.xlu1 %v8553_v36, %s10588_s28  ;;  %v2854_v39 = vsel %vm2001_vm15, %v8576_v27, %v2853_v28  ;;  %v8687_v28 = vld [vmem:[#allocation3 + $0x8] sm:$0xf]  ;;  %s10595_s28 = smov 18  }
 0xabd   : > { %v2857_v29 = vadd.f32 %v2854_v39, %v2830_v63  ;;  %v10609_v63 = vmov 40  }
 0xac0   : > { %2930 = vrot.lane.b32.xlu1 %v2926_v38, %s10625_s25  ;;  %v2984_v38 = vpop.permute.xlu0 %2983 }
 0xac4   : > { %2932 = vrot.lane.b32.xlu1 %v2927_v23, %s10625_s25 }
 0xac8   : > { %2959 = vrot.lane.b32.xlu1 %v2955_v12, %s6964_s26  ;;  %v2985_v12 = vrot.slane %v2984_v38, 4 }
 0xaca   : > { %v2987_v59 = vsel %vm10585_vm13, %v2985_v12, %v2984_v38  ;;  %vm10594_vm13 = vcmask 121856  }
 0xacc   : > { %2961 = vrot.lane.b32.xlu1 %v2956_v34, %s6964_s26 }
 0xb0a   : > { %v2877_v36 = vpop.permute.xlu1 %2876 }
 0xb0b   : > { %v2880_v19 = vrot.slane %v2877_v36, 4 }
 0xb0e   : > { %v2879_v13 = vpop.permute.xlu1 %2878 }
 0xb0f   : > { %v2881_v49 = vrot.slane %v2879_v13, 4  ;;  %v2887_v9 = vadd.f32 %v2879_v13, %v2858_v24 }
 0xb11   : > { %v2882_v44 = vsel %vm560_vm0, %v2880_v19, %v2881_v49  ;;  %v8685_v49 = vld [vmem:[#allocation3] sm:$0xff] }
 0xb12   : > { %v2904_v35 = vpop.permute.xlu1 %2903  ;;  %v2883_v58 = vsel %vm696_vm3, %v2877_v36, %v2882_v44 }
 0xb13   : > { %v2907_v40 = vrot.slane %v2904_v35, 4  ;;  %v2886_v8 = vadd.f32 %v2883_v58, %v2857_v29 }
 0xb16   : > { %v2906_v16 = vpop.permute.xlu1 %2905 }
 0xb17   : > { %v2908_v45 = vrot.slane %v2906_v16, 4  ;;  %v2914_v32 = vadd.f32 %v2906_v16, %v2887_v9  ;;  %v10799_v16 = vmov 19  }
 0xb19   : > { %v2909_v17 = vsel %vm560_vm0, %v2907_v40, %v2908_v45 }
 0xb1a   : > { %v8639_v15 = vpop.permute.xlu1 %2339  ;;  %v2910_v25 = vsel %vm811_vm6, %v2904_v35, %v2909_v17  ;;  %v10591_v17 = vmov 47  }
 0xb1b   : > { %10792 = vst [vmem:[#allocation41_spill] sm:$0xff] %v8639_v15  ;;  %v2913_v4 = vadd.f32 %v2910_v25, %v2886_v8 }
 0xb1e   : > { %v8641_v57 = vpop.permute.xlu1 %2559 }
 0xb1f   : > { %10793 = vst [vmem:[#allocation46_spill] sm:$0xff] %v8641_v57 }
 0xb22   : > { %v8643_v18 = vpop.permute.xlu1 %2779 }
 0xb23   : > { %10794 = vst [vmem:[#allocation40_spill] sm:$0xff] %v8643_v18 }
 0xb26   : > { %v8645_v7 = vpop.permute.xlu1 %2335 }
 0xb27   : > { %10795 = vst [vmem:[#allocation45_spill] sm:$0xff] %v8645_v7 }
 0xb2a   : > { %v8647_v1 = vpop.permute.xlu1 %2555 }
 0xb2b   : > { %10796 = vst [vmem:[#allocation49_spill] sm:$0xff] %v8647_v1 }
 0xb2e   : > { %v8649_v41 = vpop.permute.xlu1 %2775 }
 0xb2f   : > { %10797 = vst [vmem:[#allocation48_spill] sm:$0xff] %v8649_v41 }
 0xb32   : > { %v2931_v14 = vpop.permute.xlu1 %2930 }
 0xb33   : > { %v2934_v31 = vrot.slane %v2931_v14, 4 }
 0xb36   : > { %v2933_v22 = vpop.permute.xlu1 %2932 }
 0xb37   : > { %v2935_v11 = vrot.slane %v2933_v22, 4  ;;  %v2941_v5 = vadd.f32 %v2933_v22, %v2914_v32  ;;  %v10802_v22 = vmov 13  }
 0xb39   : > { %v2936_v37 = vsel %vm560_vm0, %v2934_v31, %v2935_v11  ;;  %v6631_v31 = vld [vmem:[%s10410_s4 + $0x5] ss:$8 sm:$0x3] }
 0xb3a   : > { %v2960_v54 = vpop.permute.xlu1 %2959  ;;  %v2937_v3 = vsel %vm2079_vm14, %v2931_v14, %v2936_v37  ;;  %v3197_v58 = vrot.slane %v6631_v31, %v10732_v30 }
 0xb3b   : > { %v2963_v23 = vrot.slane %v2960_v54, 4  ;;  %v2940_v52 = vadd.f32 %v2937_v3, %v2913_v4 }
 0xb3e   : > { %v2962_v27 = vpop.permute.xlu1 %2961 }
 0xb3f   : > { %v2964_v20 = vrot.slane %v2962_v27, 4  ;;  %v2970_v21 = vadd.f32 %v2962_v27, %v2941_v5  ;;  %v8719_v27 = vld [vmem:[#allocation3 + $0x4] sm:$0xff] }
 0xb41   : > { %v2965_v34 = vsel %vm560_vm0, %v2963_v23, %v2964_v20  ;;  %v2991_v13 = vmul.f32 %v2985_v12, %v2970_v21  ;;  %v3080_v23 = vld [vmem:[#allocation3 + $0xc] sm:$0xf] }
 0xb42   : > { %v2966_v36 = vsel %vm734_vm4, %v2960_v54, %v2965_v34  ;;  %v3201_v54 = vrot.slane %v6631_v31, %v10733_v2  ;;  %v8733_v21 = vld [vmem:[#allocation3 + $0x8] sm:$0xff] }
 0xb43   : > { %v2969_v35 = vadd.f32 %v2966_v36, %v2940_v52 }
 0xb44   : > { %v3202_v42 = vcombine.low %v3197_v58, %v3201_v54 }
 0xb45   : > { %v2990_v26 = vmul.f32 %v2987_v59, %v2969_v35 }
 0xb47   : > { %v2994_v61 = vcombine.high %v2990_v26, %v2990_v26  ;;  %2995 = vrot.lane.b32.xlu1 %v2990_v26, %s10583_s17 }
 0xb49   : > { %2997 = vrot.lane.b32.xlu0 %v2994_v61, %s10583_s17  ;;  %v3163_v61 = vld [vmem:[#allocation3 + $0x10] sm:$0xf] }
 0xb4b   : > { %2999 = vrot.lane.b32.xlu1 %v2991_v13, %s10583_s17  ;;  %s10596_s17 = smov 15  }
 0xb4d   : > { %3011 = vperm.xlu0 %6806, %v8562_v10  }
 0xb4f   : > { %3026 = vperm.xlu1 %6807, %v8562_v10  }
 0xb51   : > { %6809 = vset.pattern.permute.xlu0 %v10606_v0  ;;  %v3766_v0 = vld [vmem:[#allocation2 + $0x14] sm:$0xf] }
 0xb53   : > { %6808 = vset.pattern.permute.xlu1 %v10799_v16 }
 0xbb9   : > { %v8680_v53 = vpop.permute.xlu1 %2995 }
 0xbba   : > { %10800 = vst [vmem:[#allocation47_spill] sm:$0xff] %v8680_v53 }
 0xbbb   : > { %v8716_v29 = vpop.permute.xlu0 %2997 }
 0xbbc   : > { %10804 = vst [vmem:[#allocation29_spill] sm:$0xff] %v8716_v29 }
 0xbbd   : > { %v8682_v14 = vpop.permute.xlu1 %2999 }
 0xbbe   : > { %10801 = vst [vmem:[#allocation13_spill] sm:$0xff] %v8682_v14 }
 0xbc8   : > { %v3012_v37 = vpop.permute.xlu0 %3011 }
 0xbc9   : > { %v3019_v54 = vrot.slane %v3012_v37, %v7237_v62 }
 0xbca   : > { %v3027_v55 = vpop.permute.xlu1 %3026 }
 0xbcb   : > { %v3034_v48 = vrot.slane %v3027_v55, %v7237_v62  ;;  %v3022_v37 = vmul.f32 %v3019_v54, %v8687_v28 }
 0xbcd   : > { %v3036_v19 = vmul.f32 %v3034_v48, %v8685_v49  ;;  %v3037_v45 = vmul.f32 %v3034_v48, %v8687_v28 }
 0xbcf   : > { %3040 = vrot.lane.b32.xlu1 %v3036_v19, %s6965_s22  ;;  %3042 = vrot.lane.b32.xlu0 %v3037_v45, %s6965_s22 }
 0xbd3   : > { %3053 = vperm.xlu1 %6808, %v8562_v10  }
 0xbd7   : > { %6813 = vset.pattern.permute.xlu1 %v10802_v22 }
 0xc41   : > { %v8696_v50 = vpop.permute.xlu1 %3040  ;;  %v3043_v25 = vpop.permute.xlu0 %3042 }
 0xc4e   : > { %v3054_v44 = vpop.permute.xlu1 %3053 }
 0xc4f   : > { %v3061_v40 = vrot.slane %v3054_v44, %v7237_v62 }
 0xc51   : > { %v3063_v11 = vmul.f32 %v3061_v40, %v8685_v49  ;;  %v3064_v39 = vmul.f32 %v3061_v40, %v8687_v28  ;;  %v3044_v40 = vrot.slane %v8696_v50, 4 }
 0xc53   : > { %3069 = vrot.lane.b32.xlu1 %v3064_v39, %s10803_s18  ;;  %3067 = vrot.lane.b32.xlu0 %v3063_v11, %s10803_s18  ;;  %v3045_v11 = vrot.slane %v3043_v25, 4 }
 0xc57   : > { %3082 = vperm.xlu0 %6809, %v8562_v10  }
 0xc5b   : > { %6810 = vset.pattern.permute.xlu0 %v10610_v56 }
 0xc5c   : > { %3109 = vperm.xlu0 %6810, %v8562_v10  }
 0xc60   : > { %6811 = vset.pattern.permute.xlu0 %v10609_v63  ;;  %v10843_v63 = vld [vmem:[#allocation10_spill] sm:$0xff] }
 0xc61   : > { %3136 = vperm.xlu0 %6811, %v8562_v10  }
 0xc65   : > { %6812 = vset.pattern.permute.xlu0 %v10591_v17 }
 0xc66   : > { %3165 = vperm.xlu0 %6812, %v8562_v10  }
 0xc6a   : > { %3203 = vrot.lane.b32.xlu0 %v3202_v42, %s10596_s17  ;;  %v3046_v42 = vsel %vm560_vm0, %v3044_v40, %v3045_v11  ;;  %s10842_s17 = smov 69  }
 0xcc5   : > { %v3068_v24 = vpop.permute.xlu0 %3067  ;;  %v3070_v55 = vpop.permute.xlu1 %3069 }
 0xcc6   : > { %v3072_v39 = vrot.slane %v3070_v55, 4  ;;  %v3071_v31 = vrot.slane %v3068_v24, 4 }
 0xcd2   : > { %v3083_v8 = vpop.permute.xlu0 %3082 }
 0xcd3   : > { %v3090_v38 = vrot.slane %v3083_v8, %v7237_v62 }
 0xcd5   : > { %v3092_v3 = vmul.f32 %v3090_v38, %v8719_v27  ;;  %v3093_v20 = vmul.f32 %v3090_v38, %v3080_v23  ;;  %v3073_v38 = vsel %vm560_vm0, %v3071_v31, %v3072_v39 }
 0xcd7   : > { %3096 = vrot.lane.b32.xlu1 %v3092_v3, %s6963_s24  ;;  %v3110_v9 = vpop.permute.xlu0 %3109 }
 0xcd8   : > { %v3117_v4 = vrot.slane %v3110_v9, %v7237_v62 }
 0xcda   : > { %v3119_v12 = vmul.f32 %v3117_v4, %v8719_v27  ;;  %v3120_v34 = vmul.f32 %v3117_v4, %v3080_v23  ;;  %v3021_v4 = vmul.f32 %v3019_v54, %v8685_v49 }
 0xcdb   : > { %3098 = vrot.lane.b32.xlu1 %v3093_v20, %s6963_s24 }
 0xcdc   : > { %v3137_v32 = vpop.permute.xlu0 %3136 }
 0xcdd   : > { %v3144_v52 = vrot.slane %v3137_v32, %v7237_v62 }
 0xcdf   : > { %3123 = vrot.lane.b32.xlu1 %v3119_v12, %s6966_s27  ;;  %v3146_v36 = vmul.f32 %v3144_v52, %v8719_v27  ;;  %v3147_v35 = vmul.f32 %v3144_v52, %v3080_v23  ;;  %v3047_v23 = vsel %vm772_vm5, %v8696_v50, %v3046_v42  ;;  %v3074_v52 = vsel %vm2001_vm15, %v3068_v24, %v3073_v38 }
 0xce1   : > { %v3166_v5 = vpop.permute.xlu0 %3165 }
 0xce2   : > { %v3173_v59 = vrot.slane %v3166_v5, %v7237_v62 }
 0xce3   : > { %3125 = vrot.lane.b32.xlu1 %v3120_v34, %s6966_s27 }
 0xce4   : > { %v3175_v26 = vmul.f32 %v3173_v59, %v8733_v21  ;;  %v3176_v13 = vmul.f32 %v3173_v59, %v3163_v61  ;;  %v3051_v61 = vadd.f32 %v3043_v25, %v3022_v37 }
 0xce5   : > { %v3204_v31 = vpop.permute.xlu0 %3203 }
 0xce6   : > { %v3078_v11 = vadd.f32 %v3070_v55, %v3051_v61 }
 0xce7   : > { %3150 = vrot.lane.b32.xlu1 %v3146_v36, %s10625_s25  ;;  %v3050_v36 = vadd.f32 %v3047_v23, %v3021_v4 }
 0xce9   : > { %v3077_v50 = vadd.f32 %v3074_v52, %v3050_v36  ;;  %v8766_v36 = vld [vmem:[#allocation3 + $0x8] sm:$0xf] }
 0xceb   : > { %3152 = vrot.lane.b32.xlu1 %v3147_v35, %s10625_s25 }
 0xcef   : > { %3179 = vrot.lane.b32.xlu1 %v3175_v26, %s6964_s26 }
 0xcf3   : > { %3181 = vrot.lane.b32.xlu1 %v3176_v13, %s6964_s26 }
 0xd49   : > { %v3097_v48 = vpop.permute.xlu1 %3096 }
 0xd4a   : > { %v3100_v3 = vrot.slane %v3097_v48, 4 }
 0xd4d   : > { %v3099_v19 = vpop.permute.xlu1 %3098 }
 0xd4e   : > { %v3101_v8 = vrot.slane %v3099_v19, 4  ;;  %v3107_v28 = vadd.f32 %v3099_v19, %v3078_v11 }
 0xd50   : > { %v3102_v12 = vsel %vm560_vm0, %v3100_v3, %v3101_v8  ;;  %v3205_v3 = vrot.slane %v3204_v31, 4 }
 0xd51   : > { %v3124_v45 = vpop.permute.xlu1 %3123  ;;  %v3103_v59 = vsel %vm696_vm3, %v3097_v48, %v3102_v12 }
 0xd52   : > { %v3127_v32 = vrot.slane %v3124_v45, 4  ;;  %v3106_v39 = vadd.f32 %v3103_v59, %v3077_v50  ;;  %v3207_v55 = vsel %vm10594_vm13, %v3205_v3, %v3204_v31  ;;  %v10604_v59 = vmov 27  }
 0xd53   : > { %6815 = vset.pattern.permute.xlu0 %v10604_v59  ;;  %v10608_v31 = vmov 41   ;;  %vm3425_vm13 = vcmask 146432  }
 0xd55   : > { %v3126_v44 = vpop.permute.xlu1 %3125 }
 0xd56   : > { %v3128_v9 = vrot.slane %v3126_v44, 4 }
 0xd58   : > { %v3129_v5 = vsel %vm560_vm0, %v3127_v32, %v3128_v9  ;;  %v3134_v9 = vadd.f32 %v3126_v44, %v3107_v28  ;;  %v10805_v44 = vmov 20   ;;  %v6632_v28 = vld [vmem:[%s10410_s4 + $0x6] ss:$8 sm:$0x3] }
 0xd59   : > { %v3151_v58 = vpop.permute.xlu1 %3150  ;;  %v3130_v40 = vsel %vm811_vm6, %v3124_v45, %v3129_v5 }
 0xd5a   : > { %v3154_v35 = vrot.slane %v3151_v58, 4  ;;  %v3133_v38 = vadd.f32 %v3130_v40, %v3106_v39  ;;  %v10592_v39 = vmov 34  }
 0xd5d   : > { %v3153_v20 = vpop.permute.xlu1 %3152 }
 0xd5e   : > { %v3155_v34 = vrot.slane %v3153_v20, 4  ;;  %v3161_v4 = vadd.f32 %v3153_v20, %v3134_v9 }
 0xd60   : > { %v3156_v13 = vsel %vm560_vm0, %v3154_v35, %v3155_v34 }
 0xd61   : > { %v3180_v26 = vpop.permute.xlu1 %3179  ;;  %v3157_v24 = vsel %vm2079_vm14, %v3151_v58, %v3156_v13 }
 0xd62   : > { %v3183_v54 = vrot.slane %v3180_v26, 4  ;;  %v3160_v25 = vadd.f32 %v3157_v24, %v3133_v38  ;;  %v10809_v24 = vmov 6  }
 0xd65   : > { %v3182_v42 = vpop.permute.xlu1 %3181 }
 0xd66   : > { %v3184_v8 = vrot.slane %v3182_v42, 4  ;;  %v3190_v12 = vadd.f32 %v3182_v42, %v3161_v4  ;;  %v10590_v42 = vmov 48  }
 0xd68   : > { %v3185_v48 = vsel %vm560_vm0, %v3183_v54, %v3184_v8  ;;  %v3211_v19 = vmul.f32 %v3205_v3, %v3190_v12  ;;  %v3416_v54 = vrot.slane %v6632_v28, %v10732_v30  ;;  %v3420_v8 = vrot.slane %v6632_v28, %v10733_v2  ;;  %v8820_v28 = vld [vmem:[%s10415_s9] sm:$0xf] }
 0xd69   : > { %v3186_v23 = vsel %vm734_vm4, %v3180_v26, %v3185_v48  ;;  %v10808_v26 = vmov 0  }
 0xd6a   : > { %v3189_v45 = vadd.f32 %v3186_v23, %v3160_v25  ;;  %v3421_v38 = vcombine.low %v3416_v54, %v3420_v8  ;;  %v10811_v54 = vld [vmem:[#allocation26_spill] sm:$0xff] }
 0xd6b   : > { %v587_v8 = vadd.f32 %v8820_v28, %v10811_v54 }
 0xd6c   : > { %v3210_v32 = vmul.f32 %v3207_v55, %v3189_v45  ;;  %v3300_v45 = vld [vmem:[#allocation3 + $0xc] sm:$0xf] }
 0xd6e   : > { %v3214_v34 = vcombine.high %v3210_v32, %v3210_v32  ;;  %3215 = vrot.lane.b32.xlu1 %v3210_v32, %s10586_s23 }
 0xd70   : > { %3217 = vrot.lane.b32.xlu0 %v3214_v34, %s10586_s23 }
 0xd72   : > { %3219 = vrot.lane.b32.xlu1 %v3211_v19, %s10586_s23  ;;  %s10600_s23 = smov 110  }
 0xd76   : > { %3246 = vperm.xlu1 %6813, %v8562_v10  }
 0xd7a   : > { %6814 = vset.pattern.permute.xlu1 %v10805_v44 }
 0xde0   : > { %v8761_v58 = vpop.permute.xlu1 %3215 }
 0xde1   : > { %10806 = vst [vmem:[#allocation19_spill] sm:$0xff] %v8761_v58 }
 0xde2   : > { %v8797_v3 = vpop.permute.xlu0 %3217 }
 0xde3   : > { %10810 = vst [vmem:[#allocation44_spill] sm:$0xff] %v8797_v3 }
 0xde4   : > { %v8763_v20 = vpop.permute.xlu1 %3219 }
 0xde5   : > { %10807 = vst [vmem:[#allocation31_spill] sm:$0xff] %v8763_v20 }
 0xdf1   : > { %v3247_v52 = vpop.permute.xlu1 %3246 }
 0xdf2   : > { %v3254_v37 = vrot.slane %v3247_v52, %v7237_v62 }
 0xdf4   : > { %v3256_v5 = vmul.f32 %v3254_v37, %v8685_v49  ;;  %v3257_v35 = vmul.f32 %v3254_v37, %v8766_v36 }
 0xdf6   : > { %3260 = vrot.lane.b32.xlu1 %v3256_v5, %s6965_s22  ;;  %3262 = vrot.lane.b32.xlu0 %v3257_v35, %s6965_s22  ;;  %v3356_v35 = vld [vmem:[#allocation3 + $0x10] sm:$0xf] }
 0xdfa   : > { %3273 = vperm.xlu1 %6814, %v8562_v10  }
 0xdfe   : > { %6820 = vset.pattern.permute.xlu1 %v10808_v26 }
 0xe68   : > { %v8775_v61 = vpop.permute.xlu1 %3260  ;;  %v8799_v9 = vpop.permute.xlu0 %3262 }
 0xe75   : > { %v3274_v50 = vpop.permute.xlu1 %3273 }
 0xe76   : > { %v3281_v13 = vrot.slane %v3274_v50, %v7237_v62 }
 0xe78   : > { %v3283_v40 = vmul.f32 %v3281_v13, %v8685_v49  ;;  %v3284_v11 = vmul.f32 %v3281_v13, %v8766_v36 }
 0xe7a   : > { %3289 = vrot.lane.b32.xlu1 %v3284_v11, %s10803_s18  ;;  %3287 = vrot.lane.b32.xlu0 %v3283_v40, %s10803_s18 }
 0xe7e   : > { %3302 = vperm.xlu0 %6815, %v8562_v10  }
 0xe82   : > { %6816 = vset.pattern.permute.xlu0 %v10592_v39 }
 0xe83   : > { %3329 = vperm.xlu0 %6816, %v8562_v10  }
 0xe87   : > { %6817 = vset.pattern.permute.xlu0 %v10608_v31 }
 0xe88   : > { %3358 = vperm.xlu0 %6817, %v8562_v10  }
 0xe8c   : > { %6818 = vset.pattern.permute.xlu0 %v10590_v42 }
 0xe8d   : > { %3384 = vperm.xlu0 %6818, %v8562_v10  }
 0xe91   : > { %6819 = vset.pattern.permute.xlu0 %v10809_v24 }
 0xe92   : > { %3231 = vperm.xlu0 %6819, %v8562_v10  }
 0xe96   : > { %3422 = vrot.lane.b32.xlu0 %v3421_v38, %s10595_s28  ;;  %s10820_s28 = smov 3  }
 0xeec   : > { %v3288_v48 = vpop.permute.xlu0 %3287  ;;  %v3290_v11 = vpop.permute.xlu1 %3289 }
 0xef9   : > { %v3303_v25 = vpop.permute.xlu0 %3302 }
 0xefa   : > { %v3310_v10 = vrot.slane %v3303_v25, %v7237_v62  ;;  %v10812_v25 = vld [vmem:[#allocation27_spill] sm:$0xff] }
 0xefc   : > { %v3312_v23 = vmul.f32 %v3310_v10, %v8719_v27  ;;  %v3313_v55 = vmul.f32 %v3310_v10, %v3300_v45  ;;  %v597_v10 = vadd.f32 %v10812_v25, %v587_v8 }
 0xefe   : > { %3316 = vrot.lane.b32.xlu1 %v3312_v23, %s6963_s24  ;;  %v3330_v4 = vpop.permute.xlu0 %3329 }
 0xeff   : > { %v3337_v12 = vrot.slane %v3330_v4, %v7237_v62  ;;  %v10813_v4 = vld [vmem:[#allocation34_spill] sm:$0xff] }
 0xf01   : > { %v3339_v32 = vmul.f32 %v3337_v12, %v8719_v27  ;;  %v3340_v19 = vmul.f32 %v3337_v12, %v3300_v45  ;;  %v10814_v12 = vld [vmem:[#allocation28_spill] sm:$0xff] }
 0xf02   : > { %3318 = vrot.lane.b32.xlu1 %v3313_v55, %s6963_s24 }
 0xf03   : > { %v3359_v34 = vpop.permute.xlu0 %3358 }
 0xf04   : > { %v3366_v52 = vrot.slane %v3359_v34, %v7237_v62  ;;  %v3264_v34 = vrot.slane %v8775_v61, 4 }
 0xf06   : > { %3343 = vrot.lane.b32.xlu1 %v3339_v32, %s6966_s27  ;;  %v3368_v37 = vmul.f32 %v3366_v52, %v8733_v21  ;;  %v3369_v50 = vmul.f32 %v3366_v52, %v3356_v35 }
 0xf08   : > { %v3385_v5 = vpop.permute.xlu0 %3384 }
 0xf09   : > { %v3392_v13 = vrot.slane %v3385_v5, %v7237_v62  ;;  %v10815_v5 = vld [vmem:[#allocation11_spill] sm:$0xff] }
 0xf0a   : > { %3345 = vrot.lane.b32.xlu1 %v3340_v19, %s6966_s27  ;;  %v3265_v19 = vrot.slane %v8799_v9, 4 }
 0xf0b   : > { %v3394_v27 = vmul.f32 %v3392_v13, %v8733_v21  ;;  %v3395_v40 = vmul.f32 %v3392_v13, %v3356_v35  ;;  %v607_v21 = vadd.f32 %v10813_v4, %v597_v10  ;;  %v3291_v13 = vrot.slane %v3288_v48, 4  ;;  %v10816_v4 = vld [vmem:[#allocation12_spill] sm:$0xff] }
 0xf0d   : > { %v3232_v45 = vpop.permute.xlu0 %3231  ;;  %v617_v32 = vadd.f32 %v10814_v12, %v607_v21 }
 0xf0e   : > { %3372 = vrot.lane.b32.xlu1 %v3368_v37, %s10625_s25  ;;  %v3239_v52 = vrot.slane %v3232_v45, %v7237_v62 }
 0xf0f   : > { %v622_v35 = vmul.f32 %v10815_v5, %v617_v32 }
 0xf10   : > { %v3242_v42 = vmul.f32 %v3239_v52, %v8766_v36 }
 0xf11   : > { %v626_v21 = vadd.f32 %v10816_v4, %v622_v35 }
 0xf12   : > { %3374 = vrot.lane.b32.xlu1 %v3369_v50, %s10625_s25  ;;  %v3292_v50 = vrot.slane %v3290_v11, 4  ;;  %v3271_v35 = vadd.f32 %v8799_v9, %v3242_v42  ;;  %s11000_s25 = smov 15  }
 0xf13   : > { %v6618_v46 = vmul.f32 -1.442695, %v626_v21 }
 0xf14   : > { %v3293_v12 = vsel %vm560_vm0, %v3291_v13, %v3292_v50 }
 0xf15   : > { %6909 = vpow2.f32 %v6618_v46  ;;  %v10817_v46 = vld [vmem:[#allocation15_spill] sm:$0xff] }
 0xf16   : > { %3398 = vrot.lane.b32.xlu1 %v3394_v27, %s6964_s26  ;;  %v3266_v27 = vsel %vm560_vm0, %v3264_v34, %v3265_v19  ;;  %v3294_v19 = vsel %vm2001_vm15, %v3288_v48, %v3293_v12 }
 0xf17   : > { %v3267_v45 = vsel %vm772_vm5, %v8775_v61, %v3266_v27 }
 0xf1a   : > { %3400 = vrot.lane.b32.xlu1 %v3395_v40, %s6964_s26  ;;  %v3241_v40 = vmul.f32 %v3239_v52, %v8685_v49  ;;  %v3298_v52 = vadd.f32 %v3290_v11, %v3271_v35  ;;  %v566_v11 = vmul.f32 0.00390625, %v10817_v46 }
 0xf1c   : > { %v3270_v32 = vadd.f32 %v3267_v45, %v3241_v40 }
 0xf1e   : > { %v3297_v50 = vadd.f32 %v3294_v19, %v3270_v32 }
 0xf22   : > { %v6910_v19 = vpop.eup %6909 }
 0xf70   : > { %v3317_v38 = vpop.permute.xlu1 %3316 }
 0xf71   : > { %v3320_v25 = vrot.slane %v3317_v38, 4 }
 0xf74   : > { %v3319_v23 = vpop.permute.xlu1 %3318 }
 0xf75   : > { %v3321_v54 = vrot.slane %v3319_v23, 4 }
 0xf77   : > { %v3322_v5 = vsel %vm560_vm0, %v3320_v25, %v3321_v54  ;;  %v3423_v54 = vpop.permute.xlu0 %3422 }
 0xf78   : > { %v3344_v55 = vpop.permute.xlu1 %3343  ;;  %v3323_v39 = vsel %vm696_vm3, %v3317_v38, %v3322_v5  ;;  %v3424_v21 = vrot.slane %v3423_v54, 4 }
 0xf79   : > { %v3347_v17 = vrot.slane %v3344_v55, 4  ;;  %v3326_v36 = vadd.f32 %v3323_v39, %v3297_v50  ;;  %v10818_v50 = vld [vmem:[#allocation4_spill] sm:$0xff] }
 0xf7c   : > { %v3346_v37 = vpop.permute.xlu1 %3345 }
 0xf7d   : > { %v3348_v10 = vrot.slane %v3346_v37, 4 }
 0xf7f   : > { %v3349_v49 = vsel %vm560_vm0, %v3347_v17, %v3348_v10  ;;  %v3327_v10 = vadd.f32 %v3319_v23, %v3298_v52  ;;  %v10821_v52 = vmov 1  }
 0xf80   : > { %v3373_v8 = vpop.permute.xlu1 %3372  ;;  %v3350_v13 = vsel %vm811_vm6, %v3344_v55, %v3349_v49 }
 0xf81   : > { %v3376_v61 = vrot.slane %v3373_v8, 4  ;;  %v3353_v40 = vadd.f32 %v3350_v13, %v3326_v36  ;;  %v3354_v42 = vadd.f32 %v3346_v37, %v3327_v10  ;;  %v3565_v37 = vrot.slane %v566_v11, %v10732_v30 }
 0xf82   : > { %v3585_v13 = vrot.slane %v566_v11, %v10818_v50 }
 0xf83   : > { %v3377_v25 = vsel %vm2079_vm14, %v3376_v61, %v3373_v8  ;;  %v3426_v8 = vsel %vm3425_vm13, %v3424_v21, %v3423_v54  ;;  %v10823_v54 = vmov 3  }
 0xf84   : > { %v3375_v34 = vpop.permute.xlu1 %3374  ;;  %v3381_v9 = vadd.f32 %v3377_v25, %v3353_v40  ;;  %v3561_v40 = vld [vmem:[%s10420_s14] sm:$0xf]  ;;  %v10824_v25 = vmov 4  }
 0xf85   : > { %v3378_v38 = vsel %vm2079_vm14, %v3376_v61, %v3375_v34  ;;  %v3560_v34 = vld [vmem:[%s10419_s13] sm:$0xf] }
 0xf86   : > { %v3382_v12 = vadd.f32 %v3378_v38, %v3354_v42  ;;  %v3566_v35 = vmul.f32 %v3565_v37, %v3560_v34  ;;  %v636_v61 = vld [vmem:[%s10413_s7] sm:$0xf]  ;;  %v3586_v36 = vmul.f32 %v3585_v13, %v3560_v34  ;;  %v10825_v38 = vld [vmem:[#allocation5_spill] sm:$0xff] }
 0xf88   : > { %v3399_v27 = vpop.permute.xlu1 %3398 }
 0xf89   : > { %v3402_v48 = vrot.slane %v3399_v27, 4 }
 0xf8c   : > { %v3401_v17 = vpop.permute.xlu1 %3400 }
 0xf8d   : > { %v3403_v4 = vrot.slane %v3401_v17, 4  ;;  %v3409_v32 = vadd.f32 %v3401_v17, %v3382_v12 }
 0xf8f   : > { %v3404_v55 = vsel %vm560_vm0, %v3402_v48, %v3403_v4  ;;  %v3430_v49 = vmul.f32 %v3424_v21, %v3409_v32  ;;  %v3575_v48 = vrot.slane %v566_v11, %v10733_v2  ;;  %v3595_v21 = vrot.slane %v566_v11, %v10825_v38 }
 0xf90   : > { %v3405_v39 = vsel %vm734_vm4, %v3399_v27, %v3404_v55  ;;  %v630_v27 = vadd.f32 1.0, %v6910_v19  ;;  %v8910_v19 = vld [vmem:[#allocation2 + $0x8] sm:$0xff] }
 0xf91   : > { %v3408_v45 = vadd.f32 %v3405_v39, %v3381_v9  ;;  %v3576_v4 = vmul.f32 %v3575_v48, %v3560_v34  ;;  %v3596_v42 = vmul.f32 %v3595_v21, %v3560_v34  ;;  %v10829_v9 = vmov 10  }
 0xf92   : > { %6911 = vrcp.f32 %v630_v27  ;;  %v10841_v27 = vmov 15  }
 0xf93   : > { %v3429_v23 = vmul.f32 %v3426_v8, %v3408_v45 }
 0xf95   : > { %v3433_v5 = vcombine.high %v3429_v23, %v3429_v23  ;;  %3434 = vrot.lane.b32.xlu1 %v3429_v23, %s10600_s23 }
 0xf97   : > { %3436 = vrot.lane.b32.xlu0 %v3433_v5, %s10600_s23 }
 0xf99   : > { %3438 = vrot.lane.b32.xlu1 %v3430_v49, %s10600_s23  ;;  %s10848_s23 = smov 59  }
 0xf9b   : > { %3568 = vrot.lane.b32.xlu0 %v3566_v35, %s10819_s29  ;;  %s10828_s29 = smov 126   ;;  %v10840_v35 = vld [vmem:[#allocation16_spill] sm:$0xff] }
 0xf9d   : > { %3461 = vperm.xlu1 %6820, %v636_v61  }
 0xf9f   : > { %3588 = vrot.lane.b32.xlu0 %v3586_v36, %s10820_s28  ;;  %v6912_v17 = vpop.eup %6911 }
 0xfa0   : > { %v633_v10 = vadd.f32 1.0, %v6912_v17 }
 0xfa1   : > { %6821 = vset.pattern.permute.xlu1 %v10821_v52 }
 0xfa2   : > { %3477 = vperm.xlu1 %6821, %v636_v61  }
 0xfa3   : > { %3603 = vrot.lane.b32.xlu0 %v3561_v40, %s10822_s19  ;;  %s10827_s19 = smov 2  }
 0xfa6   : > { %6822 = vset.pattern.permute.xlu1 %v10823_v54 }
 0xfa7   : > { %3509 = vperm.xlu1 %6822, %v636_v61  }
 0xfab   : > { %6823 = vset.pattern.permute.xlu1 %v10824_v25 }
 0xfac   : > { %3534 = vperm.xlu1 %6823, %v8820_v28   ;;  %v8881_v28 = vld [vmem:[%s10416_s10] sm:$0xf] }
 0xfb0   : > { %6824 = vset.pattern.permute.xlu1 %v10780_v6 }
 0xfb1   : > { %3548 = vperm.xlu1 %6824, %v633_v10  }
 0xfb5   : > { %3578 = vrot.lane.b32.xlu1 %v3576_v4, %s10826_s30  ;;  %s10899_s30 = smov 16  }
 0xfb6   : > { %6825 = vset.pattern.permute.xlu1 %v10808_v26 }
 0xfb9   : > { %3598 = vrot.lane.b32.xlu1 %v3596_v42, %s10827_s19  ;;  %s10869_s19 = smov 73  }
 0xfbd   : > { %3607 = vrot.lane.b32.xlu1 %v3561_v40, %s10828_s29  ;;  %s10871_s29 = smov 55  }
 0xfc1   : > { %3634 = vperm.xlu1 %6825, %v8881_v28  }
 0xfc5   : > { %6826 = vset.pattern.permute.xlu1 %v10780_v6 }
 0xfc6   : > { %3654 = vperm.xlu1 %6826, %v8881_v28  }
 0xfca   : > { %6827 = vset.pattern.permute.xlu1 %v10829_v9 }
0x1007   : > { %v8887_v55 = vpop.permute.xlu1 %3434 }
0x1008   : > { %10830 = vst [vmem:[#allocation36_spill] sm:$0xff] %v8887_v55 }
0x100b   : > { %v8889_v39 = vpop.permute.xlu1 %3438 }
0x100c   : > { %10831 = vst [vmem:[#allocation21_spill] sm:$0xff] %v8889_v39 }
0x1018   : > { %v8891_v46 = vpop.permute.xlu1 %3461 }
0x1019   : > { %10832 = vst [vmem:[#allocation51_spill] sm:$0xff] %v8891_v46 }
0x101d   : > { %v8893_v11 = vpop.permute.xlu1 %3477 }
0x101e   : > { %10833 = vst [vmem:[#allocation18_spill] sm:$0xff] %v8893_v11 }
0x1022   : > { %v8895_v12 = vpop.permute.xlu1 %3509 }
0x1023   : > { %10834 = vst [vmem:[#allocation42_spill] sm:$0xff] %v8895_v12 }
0x1027   : > { %v8897_v45 = vpop.permute.xlu1 %3534 }
0x1028   : > { %10835 = vst [vmem:[#allocation26_spill] sm:$0xff] %v8897_v45 }
0x102c   : > { %v8899_v8 = vpop.permute.xlu1 %3548 }
0x102d   : > { %10836 = vst [vmem:[#allocation27_spill] sm:$0xff] %v8899_v8 }
0x1030   : > { %v8901_v32 = vpop.permute.xlu1 %3578 }
0x1031   : > { %10837 = vst [vmem:[#allocation34_spill] sm:$0xff] %v8901_v32 }
0x1034   : > { %v8903_v23 = vpop.permute.xlu1 %3598 }
0x1035   : > { %10838 = vst [vmem:[#allocation28_spill] sm:$0xff] %v8903_v23 }
0x1038   : > { %v8905_v5 = vpop.permute.xlu1 %3607 }
0x1039   : > { %10839 = vst [vmem:[#allocation11_spill] sm:$0xff] %v8905_v5 }
0x103c   : > { %v8907_v37 = vpop.permute.xlu1 %3634 }
0x1041   : > { %v3655_v34 = vpop.permute.xlu1 %3654 }
0x1042   : > { %v3662_v49 = vrot.slane %v3655_v34, %v7237_v62 }
0x1044   : > { %v3664_v13 = vmul.f32 %v10840_v35, %v3662_v49  ;;  %v3665_v61 = vmul.f32 %v3662_v49, %v8910_v19 }
0x1046   : > { %3672 = vrot.lane.b32.xlu1 %v3665_v61, %s6963_s24  ;;  %3670 = vrot.lane.b32.xlu0 %v3664_v13, %s6963_s24  ;;  %v3803_v61 = vld [vmem:[%s10409_s3] ss:$8 sm:$0x10] }
0x104a   : > { %3691 = vperm.xlu1 %6827, %v8881_v28   ;;  %3674 = vrot.lane.b32.xlu0 %v3664_v13, %s6963_s24  ;;  %v3802_v13 = vld [vmem:[%s10409_s3] ss:$8 sm:$0xf] }
0x104e   : > { %6828 = vset.pattern.permute.xlu1 %v10841_v27 }
0x10b8   : > { %v8919_v36 = vpop.permute.xlu1 %3672 }
0x10c5   : > { %v3692_v40 = vpop.permute.xlu1 %3691 }
0x10c6   : > { %v3699_v17 = vrot.slane %v3692_v40, %v7237_v62 }
0x10c8   : > { %v3701_v10 = vmul.f32 %v10840_v35, %v3699_v17  ;;  %v3702_v48 = vmul.f32 %v3699_v17, %v8910_v19  ;;  %v3804_v17 = vor.u32 %v3803_v61, %v3802_v13 }
0x10ca   : > { %3709 = vrot.lane.b32.xlu1 %v3702_v48, %s6964_s26  ;;  %3707 = vrot.lane.b32.xlu0 %v3701_v10, %s6964_s26  ;;  %v8949_v48 = vld [vmem:[#allocation2 + $0xc] sm:$0xff]  ;;  %v3817_v61 = vrot.slane %v3804_v17, %v10818_v50  ;;  %v3821_v33 = vrot.slane %v3804_v17, %v10825_v38  ;;  %v3825_v56 = vrot.slane %v3804_v17, %v10843_v63 }
0x10ce   : > { %3728 = vperm.xlu1 %6828, %v8881_v28   ;;  %3711 = vrot.lane.b32.xlu0 %v3701_v10, %s6964_s26  ;;  %v8947_v10 = vld [vmem:[#allocation2 + $0x4] sm:$0xff] }
0x10d2   : > { %6829 = vset.pattern.permute.xlu1 %v10805_v44 }
0x113c   : > { %v8929_v4 = vpop.permute.xlu1 %3709 }
0x1149   : > { %v3729_v21 = vpop.permute.xlu1 %3728 }
0x114a   : > { %v3736_v42 = vrot.slane %v3729_v21, %v7237_v62 }
0x114c   : > { %v3738_v34 = vmul.f32 %v10840_v35, %v3736_v42  ;;  %v3739_v49 = vmul.f32 %v3736_v42, %v8910_v19 }
0x114e   : > { %3746 = vrot.lane.b32.xlu1 %v3739_v49, %s6965_s22  ;;  %3744 = vrot.lane.b32.xlu0 %v3738_v34, %s6965_s22  ;;  %v3813_v49 = vrot.slane %v3804_v17, %v10733_v2 }
0x1152   : > { %3768 = vperm.xlu1 %6829, %v8881_v28   ;;  %3748 = vrot.lane.b32.xlu0 %v3738_v34, %s6965_s22  ;;  %v3809_v34 = vrot.slane %v3804_v17, %v10732_v30 }
0x1154   : > { %v3826_v13 = vcombine.low %v3809_v34, %v3813_v49 }
0x1156   : > { %6830 = vset.pattern.permute.xlu1 %v10821_v52 }
0x11c0   : > { %v8945_v40 = vpop.permute.xlu1 %3746 }
0x11cd   : > { %v3769_v21 = vpop.permute.xlu1 %3768 }
0x11ce   : > { %v3776_v42 = vrot.slane %v3769_v21, %v7237_v62  ;;  %v3827_v21 = vcombine.low %v3817_v61, %v3821_v33  ;;  %v3677_v33 = vrot.slane %v8919_v36, 4  ;;  %v3714_v61 = vrot.slane %v8929_v4, 4 }
0x11d0   : > { %v3778_v59 = vmul.f32 %v3776_v42, %v8947_v10  ;;  %v3779_v51 = vmul.f32 %v3776_v42, %v8949_v48  ;;  %v3780_v31 = vmul.f32 %v3776_v42, %v3766_v0 }
0x11d2   : > { %3786 = vrot.lane.b32.xlu1 %v3779_v51, %s6966_s27  ;;  %3784 = vrot.lane.b32.xlu0 %v3778_v59, %s6966_s27  ;;  %v8965_v51 = vpop.permute.xlu0 %3436 }
0x11d3   : > { %10844 = vst [vmem:[#allocation12_spill] sm:$0xff] %v8965_v51 }
0x11d6   : > { %3828 = vrot.lane.b32.xlu1 %v3826_v13, %s10842_s17  ;;  %3788 = vrot.lane.b32.xlu0 %v3780_v31, %s6966_s27  ;;  %v8967_v59 = vpop.permute.xlu0 %3568 }
0x11d7   : > { %10845 = vst [vmem:[#allocation15_spill] sm:$0xff] %v8967_v59 }
0x11da   : > { %3830 = vrot.lane.b32.xlu0 %v3827_v21, %s10842_s17  ;;  %3832 = vrot.lane.b32.xlu1 %v3825_v56, %s10842_s17  ;;  %v8969_v34 = vpop.permute.xlu0 %3588  ;;  %v3642_v56 = vrot.slane %v8907_v37, %v7237_v62  ;;  %s10854_s17 = smov 70  }
0x11db   : > { %10846 = vst [vmem:[#allocation16_spill] sm:$0xff] %v8969_v34  ;;  %v3751_v34 = vrot.slane %v8945_v40, 4 }
0x11dc   : > { %v3644_v8 = vmul.f32 %v10840_v35, %v3642_v56 }
0x11de   : > { %v8971_v49 = vpop.permute.xlu0 %3603 }
0x11df   : > { %10847 = vst [vmem:[#allocation52_spill] sm:$0xff] %v8971_v49 }
0x11e2   : > { %v3671_v0 = vpop.permute.xlu0 %3670 }
0x11e3   : > { %v3676_v31 = vrot.slane %v3671_v0, 4 }
0x11e5   : > { %v3679_v23 = vsel %vm560_vm0, %v3676_v31, %v3677_v33 }
0x11e6   : > { %v3675_v42 = vpop.permute.xlu0 %3674  ;;  %v3680_v6 = vsel %vm696_vm3, %v3671_v0, %v3679_v23 }
0x11e7   : > { %v3678_v49 = vrot.slane %v3675_v42, 4  ;;  %v3687_v31 = vadd.f32 %v3680_v6, %v3644_v8 }
0x11e9   : > { %v3681_v12 = vsel %vm560_vm0, %v3677_v33, %v3678_v49 }
0x11ea   : > { %v3708_v13 = vpop.permute.xlu0 %3707  ;;  %v3682_v23 = vsel %vm696_vm3, %v8919_v36, %v3681_v12  ;;  %v3683_v12 = vsel %vm696_vm3, %v3675_v42, %v3678_v49 }
0x11eb   : > { %v3713_v21 = vrot.slane %v3708_v13, 4 }
0x11ed   : > { %v3716_v59 = vsel %vm560_vm0, %v3713_v21, %v3714_v61 }
0x11ee   : > { %v3712_v5 = vpop.permute.xlu0 %3711  ;;  %v3717_v37 = vsel %vm734_vm4, %v3708_v13, %v3716_v59  ;;  %v3631_v13 = vld [vmem:[#allocation2 + $0x10] sm:$0xf] }
0x11ef   : > { %v3715_v44 = vrot.slane %v3712_v5, 4  ;;  %v3724_v0 = vadd.f32 %v3717_v37, %v3687_v31 }
0x11f1   : > { %v3718_v55 = vsel %vm560_vm0, %v3714_v61, %v3715_v44  ;;  %v3720_v14 = vsel %vm734_vm4, %v3712_v5, %v3715_v44 }
0x11f2   : > { %v3745_v17 = vpop.permute.xlu0 %3744  ;;  %v3719_v6 = vsel %vm734_vm4, %v8929_v4, %v3718_v55 }
0x11f3   : > { %v3750_v32 = vrot.slane %v3745_v17, 4 }
0x11f5   : > { %v3753_v45 = vsel %vm560_vm0, %v3750_v32, %v3751_v34  ;;  %v3645_v32 = vmul.f32 %v3642_v56, %v8910_v19 }
0x11f6   : > { %v3749_v24 = vpop.permute.xlu0 %3748  ;;  %v3754_v21 = vsel %vm772_vm5, %v3745_v17, %v3753_v45 }
0x11f7   : > { %v3752_v11 = vrot.slane %v3749_v24, 4  ;;  %v3761_v8 = vadd.f32 %v3754_v21, %v3724_v0  ;;  %v3688_v45 = vadd.f32 %v3682_v23, %v3645_v32 }
0x11f9   : > { %v3755_v33 = vsel %vm560_vm0, %v3751_v34, %v3752_v11  ;;  %v3646_v34 = vmul.f32 %v3642_v56, %v3631_v13  ;;  %v3725_v31 = vadd.f32 %v3719_v6, %v3688_v45  ;;  %v3757_v32 = vsel %vm772_vm5, %v3749_v24, %v3752_v11 }
0x11fa   : > { %v3756_v37 = vsel %vm772_vm5, %v8945_v40, %v3755_v33 }
0x11fb   : > { %v3689_v23 = vadd.f32 %v3683_v12, %v3646_v34  ;;  %v3762_v0 = vadd.f32 %v3756_v37, %v3725_v31 }
0x11fd   : > { %v3726_v42 = vadd.f32 %v3720_v14, %v3689_v23  ;;  %v10849_v14 = vmov 11  }
0x1244   : > { %v3787_v46 = vpop.permute.xlu1 %3786  ;;  %v3785_v39 = vpop.permute.xlu0 %3784 }
0x1245   : > { %v3791_v51 = vrot.slane %v3787_v46, 4  ;;  %v3790_v20 = vrot.slane %v3785_v39, 4 }
0x1247   : > { %v3792_v59 = vsel %vm811_vm6, %v3790_v20, %v3785_v39  ;;  %v3793_v17 = vsel %vm560_vm0, %v3790_v20, %v3791_v51 }
0x1248   : > { %v3829_v61 = vpop.permute.xlu1 %3828  ;;  %v3789_v58 = vpop.permute.xlu0 %3788  ;;  %v3799_v36 = vadd.f32 %v3792_v59, %v3761_v8  ;;  %v3794_v4 = vsel %vm811_vm6, %v3793_v17, %v3787_v46  ;;  %v3763_v46 = vadd.f32 %v3757_v32, %v3726_v42 }
0x1249   : > { %v3834_v3 = vrot.slane %v3829_v61, 4  ;;  %v3800_v40 = vadd.f32 %v3794_v4, %v3762_v0  ;;  %v3795_v59 = vsel %vm811_vm6, %v3791_v51, %v3789_v58  ;;  %v10850_v58 = vmov 7  }
0x124a   : > { %v3801_v6 = vadd.f32 %v3795_v59, %v3763_v46  ;;  %v6634_v59 = vld [vmem:[%s10409_s3 + $0x1] ss:$8 sm:$0xf] }
0x124b   : > { %v3836_v39 = vsel %vm856_vm1, %v3834_v3, %v3829_v61 }
0x124c   : > { %v3843_v55 = vmul.f32 %v3836_v39, %v3799_v36  ;;  %v3831_v21 = vpop.permute.xlu0 %3830  ;;  %v3833_v33 = vpop.permute.xlu1 %3832  ;;  %v10851_v36 = vmov 16  }
0x124d   : > { %v3835_v20 = vrot.slane %v3831_v21, 4 }
0x124e   : > { %v3849_v49 = vcombine.high %v3843_v55, %v3843_v55  ;;  %3851 = vrot.lane.b32.xlu0 %v3843_v55, %s10848_s23 }
0x124f   : > { %v3837_v56 = vsel %vm560_vm0, %v3834_v3, %v3835_v20  ;;  %v3839_v13 = vsel %vm856_vm1, %v3835_v20, %v3833_v33  ;;  %v10852_v20 = vmov 21   ;;  %v10853_v33 = vmov 2  }
0x1250   : > { %v3838_v44 = vsel %vm856_vm1, %v3837_v56, %v3831_v21  ;;  %3853 = vrot.lane.b32.xlu1 %v3849_v49, %s10848_s23  ;;  %v3845_v11 = vmul.f32 %v3839_v13, %v3801_v6  ;;  %vm10872_vm1 = vcmask 465920  }
0x1251   : > { %v3844_v5 = vmul.f32 %v3838_v44, %v3800_v40  ;;  %v6635_v44 = vld [vmem:[%s10409_s3 + $0x1] ss:$8 sm:$0x10] }
0x1253   : > { %v3850_v24 = vcombine.high %v3844_v5, %v3844_v5  ;;  %3855 = vrot.lane.b32.xlu0 %v3844_v5, %s10848_s23  ;;  %v4049_v5 = vor.u32 %v6635_v44, %v6634_v59 }
0x1255   : > { %3857 = vrot.lane.b32.xlu1 %v3850_v24, %s10848_s23  ;;  %v4054_v24 = vrot.slane %v4049_v5, %v10732_v30 }
0x1257   : > { %3859 = vrot.lane.b32.xlu0 %v3845_v11, %s10848_s23  ;;  %v4058_v11 = vrot.slane %v4049_v5, %v10733_v2  ;;  %s10855_s23 = smov 58  }
0x1259   : > { %3879 = vperm.xlu1 %6830, %v8881_v28  }
0x125b   : > { %3899 = vperm.xlu0 %6819, %v8881_v28  }
0x125d   : > { %6831 = vset.pattern.permute.xlu1 %v10849_v14 }
0x125f   : > { %6835 = vset.pattern.permute.xlu0 %v10850_v58 }
0x12c0   : > { %v9015_v3 = vpop.permute.xlu0 %3851 }
0x12c2   : > { %v9029_v37 = vpop.permute.xlu1 %3853 }
0x12c5   : > { %v9017_v51 = vpop.permute.xlu0 %3855 }
0x12c7   : > { %v9031_v34 = vpop.permute.xlu1 %3857 }
0x12c9   : > { %v9019_v8 = vpop.permute.xlu0 %3859 }
0x12d4   : > { %v3880_v39 = vpop.permute.xlu1 %3879 }
0x12d6   : > { %v3900_v61 = vpop.permute.xlu0 %3899 }
0x12d7   : > { %v3907_v45 = vrot.slane %v3900_v61, %v7237_v62 }
0x12d9   : > { %v3909_v17 = vmul.f32 %v10840_v35, %v3907_v45  ;;  %v3910_v12 = vmul.f32 %v3907_v45, %v8910_v19 }
0x12db   : > { %3919 = vrot.lane.b32.xlu0 %v3909_v17, %s6963_s24  ;;  %3915 = vrot.lane.b32.xlu1 %v3909_v17, %s6963_s24  ;;  %v4011_v17 = vld [vmem:[#allocation2 + $0x14] sm:$0xf] }
0x12df   : > { %3917 = vrot.lane.b32.xlu1 %v3910_v12, %s6963_s24  ;;  %v4071_v12 = vcombine.low %v4054_v24, %v4058_v11  ;;  %v3887_v11 = vrot.slane %v3880_v39, %v7237_v62 }
0x12e3   : > { %3936 = vperm.xlu1 %6831, %v8881_v28  }
0x12e7   : > { %6832 = vset.pattern.permute.xlu1 %v10851_v36 }
0x134d   : > { %v3916_v31 = vpop.permute.xlu1 %3915 }
0x1351   : > { %v9033_v55 = vpop.permute.xlu1 %3917 }
0x1352   : > { %v3922_v59 = vrot.slane %v9033_v55, 4 }
0x135e   : > { %v3937_v4 = vpop.permute.xlu1 %3936 }
0x135f   : > { %v3944_v21 = vrot.slane %v3937_v4, %v7237_v62  ;;  %v4062_v4 = vrot.slane %v4049_v5, %v10818_v50 }
0x1361   : > { %v3946_v23 = vmul.f32 %v10840_v35, %v3944_v21  ;;  %v3947_v0 = vmul.f32 %v3944_v21, %v8910_v19  ;;  %v4066_v21 = vrot.slane %v4049_v5, %v10825_v38 }
0x1363   : > { %3954 = vrot.lane.b32.xlu1 %v3947_v0, %s6964_s26  ;;  %3952 = vrot.lane.b32.xlu0 %v3946_v23, %s6964_s26  ;;  %v4072_v0 = vcombine.low %v4062_v4, %v4066_v21 }
0x1367   : > { %3973 = vperm.xlu1 %6832, %v8881_v28   ;;  %3956 = vrot.lane.b32.xlu0 %v3946_v23, %s6964_s26 }
0x136b   : > { %6833 = vset.pattern.permute.xlu1 %v10852_v20 }
0x13d5   : > { %v9043_v32 = vpop.permute.xlu1 %3954 }
0x13e2   : > { %v3974_v49 = vpop.permute.xlu1 %3973 }
0x13e3   : > { %v3981_v42 = vrot.slane %v3974_v49, %v7237_v62  ;;  %v4070_v49 = vrot.slane %v4049_v5, %v10843_v63 }
0x13e5   : > { %v3983_v40 = vmul.f32 %v10840_v35, %v3981_v42  ;;  %v3984_v56 = vmul.f32 %v3981_v42, %v8910_v19  ;;  %v3920_v42 = vpop.permute.xlu0 %3919 }
0x13e6   : > { %v3923_v21 = vrot.slane %v3920_v42, 4 }
0x13e7   : > { %3991 = vrot.lane.b32.xlu1 %v3984_v56, %s6965_s22  ;;  %3989 = vrot.lane.b32.xlu0 %v3983_v40, %s6965_s22 }
0x13e8   : > { %v3926_v14 = vsel %vm560_vm0, %v3922_v59, %v3923_v21  ;;  %v3928_v43 = vsel %vm696_vm3, %v3920_v42, %v3923_v21 }
0x13eb   : > { %4013 = vperm.xlu1 %6833, %v8881_v28   ;;  %3993 = vrot.lane.b32.xlu0 %v3983_v40, %s6965_s22  ;;  %v3953_v40 = vpop.permute.xlu0 %3952 }
0x13ec   : > { %v3958_v24 = vrot.slane %v3953_v40, 4 }
0x13ef   : > { %6834 = vset.pattern.permute.xlu1 %v10853_v33  ;;  %v3957_v56 = vpop.permute.xlu0 %3956 }
0x1459   : > { %v9059_v46 = vpop.permute.xlu1 %3991  ;;  %v3990_v44 = vpop.permute.xlu0 %3989 }
0x145a   : > { %v3996_v5 = vrot.slane %v9059_v46, 4 }
0x145d   : > { %v3994_v4 = vpop.permute.xlu0 %3993 }
0x145e   : > { %v3997_v53 = vrot.slane %v3994_v4, 4 }
0x1466   : > { %v4014_v13 = vpop.permute.xlu1 %4013 }
0x1467   : > { %v4021_v6 = vrot.slane %v4014_v13, %v7237_v62  ;;  %v3921_v13 = vrot.slane %v3916_v31, 4 }
0x1469   : > { %v4023_v61 = vmul.f32 %v4021_v6, %v8947_v10  ;;  %v4024_v45 = vmul.f32 %v4021_v6, %v8949_v48  ;;  %v4025_v23 = vmul.f32 %v4021_v6, %v4011_v17  ;;  %v3959_v6 = vrot.slane %v9043_v32, 4 }
0x146a   : > { %v3889_v17 = vmul.f32 %v10840_v35, %v3887_v11 }
0x146b   : > { %4031 = vrot.lane.b32.xlu1 %v4024_v45, %s6966_s27  ;;  %4029 = vrot.lane.b32.xlu0 %v4023_v61, %s6966_s27  ;;  %v3924_v61 = vsel %vm560_vm0, %v3921_v13, %v3922_v59  ;;  %v3995_v45 = vrot.slane %v3990_v44, 4  ;;  %v3890_v13 = vmul.f32 %v3887_v11, %v8910_v19  ;;  %v4000_v59 = vsel %vm560_vm0, %v3996_v5, %v3997_v53 }
0x146f   : > { %4073 = vrot.lane.b32.xlu1 %v4071_v12, %s10854_s17  ;;  %4033 = vrot.lane.b32.xlu0 %v4025_v23, %s6966_s27  ;;  %v3961_v12 = vsel %vm560_vm0, %v3958_v24, %v3959_v6  ;;  %v3925_v23 = vsel %vm696_vm3, %v3916_v31, %v3924_v61  ;;  %v3877_v31 = vld [vmem:[#allocation2 + $0x10] sm:$0xf]  ;;  %v3927_v61 = vsel %vm696_vm3, %v9033_v55, %v3926_v14 }
0x1470   : > { %v3962_v39 = vsel %vm734_vm4, %v3953_v40, %v3961_v12  ;;  %v3932_v29 = vadd.f32 %v3925_v23, %v3889_v17  ;;  %v3933_v7 = vadd.f32 %v3927_v61, %v3890_v13 }
0x1473   : > { %4075 = vrot.lane.b32.xlu0 %v4072_v0, %s10854_s17  ;;  %4077 = vrot.lane.b32.xlu1 %v4070_v49, %s10854_s17  ;;  %v3960_v0 = vrot.slane %v3957_v56, 4  ;;  %v3998_v49 = vsel %vm560_vm0, %v3995_v45, %v3996_v5  ;;  %v3969_v45 = vadd.f32 %v3962_v39, %v3932_v29  ;;  %v4001_v29 = vsel %vm772_vm5, %v9059_v46, %v4000_v59  ;;  %s10860_s17 = smov 71  }
0x1474   : > { %v3999_v24 = vsel %vm772_vm5, %v3990_v44, %v3998_v49 }
0x1475   : > { %v3963_v18 = vsel %vm560_vm0, %v3959_v6, %v3960_v0  ;;  %v4006_v12 = vadd.f32 %v3999_v24, %v3969_v45  ;;  %v3891_v6 = vmul.f32 %v3887_v11, %v3877_v31  ;;  %v3965_v55 = vsel %vm734_vm4, %v3957_v56, %v3960_v0 }
0x1476   : > { %v3964_v17 = vsel %vm734_vm4, %v9043_v32, %v3963_v18 }
0x1477   : > { %v3934_v11 = vadd.f32 %v3928_v43, %v3891_v6  ;;  %v10858_v6 = vmov 17  }
0x1479   : > { %v3971_v42 = vadd.f32 %v3965_v55, %v3934_v11  ;;  %v10859_v11 = vmov 22  }
0x14dd   : > { %v4032_v41 = vpop.permute.xlu1 %4031  ;;  %v4030_v47 = vpop.permute.xlu0 %4029 }
0x14de   : > { %v4036_v1 = vrot.slane %v4032_v41, 4  ;;  %v4035_v60 = vrot.slane %v4030_v47, 4 }
0x14e0   : > { %v4037_v40 = vsel %vm811_vm6, %v4035_v60, %v4030_v47  ;;  %v4038_v44 = vsel %vm560_vm0, %v4035_v60, %v4036_v1  ;;  %v3970_v47 = vadd.f32 %v3964_v17, %v3933_v7  ;;  %v4002_v60 = vsel %vm772_vm5, %v3994_v4, %v3997_v53 }
0x14e1   : > { %v4074_v23 = vpop.permute.xlu1 %4073  ;;  %v4034_v57 = vpop.permute.xlu0 %4033  ;;  %v4044_v15 = vadd.f32 %v4037_v40, %v4006_v12  ;;  %v4039_v32 = vsel %vm811_vm6, %v4038_v44, %v4032_v41  ;;  %v4008_v41 = vadd.f32 %v4002_v60, %v3971_v42 }
0x14e2   : > { %v4079_v49 = vrot.slane %v4074_v23, 4  ;;  %v4007_v39 = vadd.f32 %v4001_v29, %v3970_v47  ;;  %v4040_v7 = vsel %vm811_vm6, %v4036_v1, %v4034_v57  ;;  %v10856_v57 = vmov 12  }
0x14e3   : > { %v4046_v0 = vadd.f32 %v4040_v7, %v4008_v41  ;;  %v10857_v1 = vmov 8  }
0x14e4   : > { %v4081_v14 = vsel %vm1104_vm2, %v4079_v49, %v4074_v23  ;;  %v4045_v21 = vadd.f32 %v4039_v32, %v4007_v39 }
0x14e5   : > { %v4088_v18 = vmul.f32 %v4081_v14, %v4044_v15  ;;  %v4076_v5 = vpop.permute.xlu0 %4075  ;;  %v4078_v31 = vpop.permute.xlu1 %4077 }
0x14e6   : > { %v4080_v13 = vrot.slane %v4076_v5, 4 }
0x14e7   : > { %v4094_v24 = vcombine.high %v4088_v18, %v4088_v18  ;;  %4096 = vrot.lane.b32.xlu0 %v4088_v18, %s10855_s23 }
0x14e8   : > { %v4082_v46 = vsel %vm560_vm0, %v4079_v49, %v4080_v13  ;;  %v4084_v56 = vsel %vm1104_vm2, %v4080_v13, %v4078_v31 }
0x14e9   : > { %v4083_v15 = vsel %vm1104_vm2, %v4082_v46, %v4076_v5  ;;  %4098 = vrot.lane.b32.xlu1 %v4094_v24, %s10855_s23  ;;  %v4090_v4 = vmul.f32 %v4084_v56, %v4046_v0  ;;  %v6637_v46 = vld [vmem:[%s10409_s3 + $0x2] ss:$8 sm:$0x10]  ;;  %vm10873_vm2 = vmmov %vm10872_vm1 }
0x14ea   : > { %v4089_v43 = vmul.f32 %v4083_v15, %v4045_v21  ;;  %v6636_v21 = vld [vmem:[%s10409_s3 + $0x2] ss:$8 sm:$0xf] }
0x14eb   : > { %v4294_v7 = vor.u32 %v6637_v46, %v6636_v21 }
0x14ec   : > { %v4095_v53 = vcombine.high %v4089_v43, %v4089_v43  ;;  %4100 = vrot.lane.b32.xlu0 %v4089_v43, %s10855_s23 }
0x14ed   : > { %v4299_v43 = vrot.slane %v4294_v7, %v10732_v30  ;;  %v4303_v56 = vrot.slane %v4294_v7, %v10733_v2 }
0x14ee   : > { %4102 = vrot.lane.b32.xlu1 %v4095_v53, %s10855_s23 }
0x14f0   : > { %4104 = vrot.lane.b32.xlu0 %v4090_v4, %s10855_s23  ;;  %v4256_v4 = vld [vmem:[#allocation2 + $0x14] sm:$0xf]  ;;  %s10861_s23 = smov 57  }
0x14f2   : > { %4124 = vperm.xlu1 %6834, %v8881_v28  }
0x14f4   : > { %4144 = vperm.xlu0 %6835, %v8881_v28  }
0x14f6   : > { %6836 = vset.pattern.permute.xlu1 %v10856_v57 }
0x14f8   : > { %6840 = vset.pattern.permute.xlu0 %v10857_v1 }
0x1559   : > { %v9116_v61 = vpop.permute.xlu0 %4096 }
0x155b   : > { %v9130_v44 = vpop.permute.xlu1 %4098 }
0x155e   : > { %v9118_v45 = vpop.permute.xlu0 %4100 }
0x1560   : > { %v9132_v49 = vpop.permute.xlu1 %4102 }
0x1562   : > { %v9120_v59 = vpop.permute.xlu0 %4104 }
0x156d   : > { %v4125_v29 = vpop.permute.xlu1 %4124 }
0x156f   : > { %v4145_v40 = vpop.permute.xlu0 %4144 }
0x1570   : > { %v4152_v17 = vrot.slane %v4145_v40, %v7237_v62  ;;  %v4316_v40 = vcombine.low %v4299_v43, %v4303_v56 }
0x1572   : > { %v4154_v12 = vmul.f32 %v10840_v35, %v4152_v17  ;;  %v4155_v23 = vmul.f32 %v4152_v17, %v8910_v19  ;;  %v4307_v17 = vrot.slane %v4294_v7, %v10818_v50 }
0x1574   : > { %4164 = vrot.lane.b32.xlu0 %v4154_v12, %s6963_s24  ;;  %4160 = vrot.lane.b32.xlu1 %v4154_v12, %s6963_s24  ;;  %v4311_v12 = vrot.slane %v4294_v7, %v10825_v38 }
0x1578   : > { %4162 = vrot.lane.b32.xlu1 %v4155_v23, %s6963_s24 }
0x157c   : > { %4181 = vperm.xlu1 %6836, %v8881_v28  }
0x1580   : > { %6837 = vset.pattern.permute.xlu1 %v10858_v6 }
0x15e6   : > { %v4161_v14 = vpop.permute.xlu1 %4160 }
0x15ea   : > { %v9134_v47 = vpop.permute.xlu1 %4162 }
0x15f7   : > { %v4182_v55 = vpop.permute.xlu1 %4181 }
0x15f8   : > { %v4189_v18 = vrot.slane %v4182_v55, %v7237_v62  ;;  %v4317_v55 = vcombine.low %v4307_v17, %v4311_v12 }
0x15fa   : > { %v4191_v32 = vmul.f32 %v10840_v35, %v4189_v18  ;;  %v4192_v5 = vmul.f32 %v4189_v18, %v8910_v19  ;;  %v4315_v18 = vrot.slane %v4294_v7, %v10843_v63 }
0x15fc   : > { %4199 = vrot.lane.b32.xlu1 %v4192_v5, %s6964_s26  ;;  %4197 = vrot.lane.b32.xlu0 %v4191_v32, %s6964_s26 }
0x1600   : > { %4218 = vperm.xlu1 %6837, %v8881_v28   ;;  %4201 = vrot.lane.b32.xlu0 %v4191_v32, %s6964_s26  ;;  %v4165_v32 = vpop.permute.xlu0 %4164 }
0x1604   : > { %6838 = vset.pattern.permute.xlu1 %v10859_v11 }
0x166e   : > { %v9144_v39 = vpop.permute.xlu1 %4199  ;;  %v4198_v5 = vpop.permute.xlu0 %4197 }
0x166f   : > { %v4204_v21 = vrot.slane %v9144_v39, 4  ;;  %v4203_v46 = vrot.slane %v4198_v5, 4 }
0x167b   : > { %v4219_v13 = vpop.permute.xlu1 %4218 }
0x167c   : > { %v4226_v60 = vrot.slane %v4219_v13, %v7237_v62  ;;  %v4202_v13 = vpop.permute.xlu0 %4201 }
0x167d   : > { %v4205_v17 = vrot.slane %v4202_v13, 4 }
0x167e   : > { %v4228_v24 = vmul.f32 %v10840_v35, %v4226_v60  ;;  %v4229_v42 = vmul.f32 %v4226_v60, %v8910_v19  ;;  %v4167_v60 = vrot.slane %v9134_v47, 4 }
0x1680   : > { %4236 = vrot.lane.b32.xlu1 %v4229_v42, %s6965_s22  ;;  %4234 = vrot.lane.b32.xlu0 %v4228_v24, %s6965_s22  ;;  %v4166_v42 = vrot.slane %v4161_v14, 4 }
0x1684   : > { %4258 = vperm.xlu1 %6838, %v8881_v28   ;;  %4238 = vrot.lane.b32.xlu0 %v4228_v24, %s6965_s22 }
0x1688   : > { %6839 = vset.pattern.permute.xlu1 %v10823_v54  ;;  %v4208_v54 = vsel %vm560_vm0, %v4204_v21, %v4205_v17 }
0x16f2   : > { %v9160_v31 = vpop.permute.xlu1 %4236  ;;  %v4235_v24 = vpop.permute.xlu0 %4234 }
0x16f3   : > { %v4241_v7 = vrot.slane %v9160_v31, 4  ;;  %v4240_v43 = vrot.slane %v4235_v24, 4 }
0x16f5   : > { %v4243_v12 = vsel %vm560_vm0, %v4240_v43, %v4241_v7 }
0x16ff   : > { %v4259_v15 = vpop.permute.xlu1 %4258 }
0x1700   : > { %v4266_v41 = vrot.slane %v4259_v15, %v7237_v62  ;;  %v4132_v15 = vrot.slane %v4125_v29, %v7237_v62 }
0x1702   : > { %v4268_v0 = vmul.f32 %v4266_v41, %v8947_v10  ;;  %v4269_v53 = vmul.f32 %v4266_v41, %v8949_v48  ;;  %v4270_v23 = vmul.f32 %v4266_v41, %v4256_v4  ;;  %v4169_v41 = vsel %vm560_vm0, %v4166_v42, %v4167_v60 }
0x1703   : > { %v4134_v56 = vmul.f32 %v10840_v35, %v4132_v15  ;;  %v4168_v4 = vrot.slane %v4165_v32, 4 }
0x1704   : > { %4276 = vrot.lane.b32.xlu1 %v4269_v53, %s6966_s27  ;;  %4274 = vrot.lane.b32.xlu0 %v4268_v0, %s6966_s27  ;;  %v4206_v0 = vsel %vm560_vm0, %v4203_v46, %v4204_v21  ;;  %v4239_v53 = vpop.permute.xlu0 %4238  ;;  %v4244_v46 = vsel %vm772_vm5, %v4235_v24, %v4243_v12 }
0x1705   : > { %v4207_v29 = vsel %vm734_vm4, %v4198_v5, %v4206_v0  ;;  %v4173_v11 = vsel %vm696_vm3, %v4165_v32, %v4168_v4 }
0x1708   : > { %4318 = vrot.lane.b32.xlu1 %v4316_v40, %s10860_s17  ;;  %4278 = vrot.lane.b32.xlu0 %v4270_v23, %s6966_s27  ;;  %v4170_v40 = vsel %vm696_vm3, %v4161_v14, %v4169_v41  ;;  %v4171_v23 = vsel %vm560_vm0, %v4167_v60, %v4168_v4  ;;  %v4122_v14 = vld [vmem:[#allocation2 + $0x10] sm:$0xf] }
0x1709   : > { %v4177_v42 = vadd.f32 %v4170_v40, %v4134_v56  ;;  %v4172_v41 = vsel %vm696_vm3, %v9134_v47, %v4171_v23  ;;  %v4209_v56 = vsel %vm734_vm4, %v9144_v39, %v4208_v54  ;;  %v4136_v21 = vmul.f32 %v4132_v15, %v4122_v14 }
0x170a   : > { %v4210_v23 = vsel %vm734_vm4, %v4202_v13, %v4205_v17 }
0x170b   : > { %v4214_v43 = vadd.f32 %v4207_v29, %v4177_v42 }
0x170c   : > { %4320 = vrot.lane.b32.xlu0 %v4317_v55, %s10860_s17  ;;  %4322 = vrot.lane.b32.xlu1 %v4315_v18, %s10860_s17  ;;  %v4242_v55 = vrot.slane %v4239_v53, 4  ;;  %v4135_v18 = vmul.f32 %v4132_v15, %v8910_v19  ;;  %v4179_v15 = vadd.f32 %v4173_v11, %v4136_v21  ;;  %s10865_s17 = smov 72  }
0x170d   : > { %v4251_v0 = vadd.f32 %v4244_v46, %v4214_v43 }
0x170e   : > { %v4245_v60 = vsel %vm560_vm0, %v4241_v7, %v4242_v55  ;;  %v4178_v27 = vadd.f32 %v4172_v41, %v4135_v18  ;;  %v4216_v32 = vadd.f32 %v4210_v23, %v4179_v15 }
0x170f   : > { %v4246_v47 = vsel %vm772_vm5, %v9160_v31, %v4245_v60 }
0x1776   : > { %v4277_v57 = vpop.permute.xlu1 %4276  ;;  %v4275_v6 = vpop.permute.xlu0 %4274 }
0x1777   : > { %v4281_v9 = vrot.slane %v4277_v57, 4  ;;  %v4280_v36 = vrot.slane %v4275_v6, 4 }
0x1779   : > { %v4282_v5 = vsel %vm811_vm6, %v4280_v36, %v4275_v6  ;;  %v4283_v24 = vsel %vm560_vm0, %v4280_v36, %v4281_v9  ;;  %v4215_v6 = vadd.f32 %v4209_v56, %v4178_v27  ;;  %v4247_v36 = vsel %vm772_vm5, %v4239_v53, %v4242_v55 }
0x177a   : > { %v4319_v40 = vpop.permute.xlu1 %4318  ;;  %v4279_v33 = vpop.permute.xlu0 %4278  ;;  %v4289_v1 = vadd.f32 %v4282_v5, %v4251_v0  ;;  %v4284_v39 = vsel %vm811_vm6, %v4283_v24, %v4277_v57  ;;  %v4253_v57 = vadd.f32 %v4247_v36, %v4216_v32  ;;  %v6638_v32 = vld [vmem:[%s10409_s3 + $0x3] ss:$8 sm:$0xf] }
0x177b   : > { %v4324_v12 = vrot.slane %v4319_v40, 4  ;;  %v4252_v18 = vadd.f32 %v4246_v47, %v4215_v6  ;;  %v4285_v27 = vsel %vm811_vm6, %v4281_v9, %v4279_v33  ;;  %v10862_v9 = vmov 9  }
0x177c   : > { %v4291_v17 = vadd.f32 %v4285_v27, %v4253_v57 }
0x177d   : > { %v4326_v7 = vsel %vm1352_vm7, %v4324_v12, %v4319_v40  ;;  %v4290_v4 = vadd.f32 %v4284_v39, %v4252_v18  ;;  %v10863_v40 = vmov 18  }
0x177e   : > { %v4333_v54 = vmul.f32 %v4326_v7, %v4289_v1  ;;  %v4321_v29 = vpop.permute.xlu0 %4320  ;;  %v4323_v14 = vpop.permute.xlu1 %4322 }
0x177f   : > { %v4325_v42 = vrot.slane %v4321_v29, 4 }
0x1780   : > { %v4339_v46 = vcombine.high %v4333_v54, %v4333_v54  ;;  %4341 = vrot.lane.b32.xlu0 %v4333_v54, %s10861_s23 }
0x1781   : > { %v4327_v31 = vsel %vm560_vm0, %v4324_v12, %v4325_v42  ;;  %v4329_v13 = vsel %vm1352_vm7, %v4325_v42, %v4323_v14 }
0x1782   : > { %v4328_v1 = vsel %vm1352_vm7, %v4327_v31, %v4321_v29  ;;  %4343 = vrot.lane.b32.xlu1 %v4339_v46, %s10861_s23  ;;  %v4335_v55 = vmul.f32 %v4329_v13, %v4291_v17  ;;  %v10864_v29 = vmov 23   ;;  %v4501_v17 = vld [vmem:[#allocation2 + $0x14] sm:$0xf]  ;;  %vm10874_vm7 = vmmov %vm10872_vm1 }
0x1783   : > { %v4334_v11 = vmul.f32 %v4328_v1, %v4290_v4  ;;  %v6639_v4 = vld [vmem:[%s10409_s3 + $0x3] ss:$8 sm:$0x10] }
0x1784   : > { %v4539_v14 = vor.u32 %v6639_v4, %v6638_v32 }
0x1785   : > { %v4340_v53 = vcombine.high %v4334_v11, %v4334_v11  ;;  %4345 = vrot.lane.b32.xlu0 %v4334_v11, %s10861_s23 }
0x1786   : > { %v4548_v57 = vrot.slane %v4539_v14, %v10733_v2 }
0x1787   : > { %4347 = vrot.lane.b32.xlu1 %v4340_v53, %s10861_s23 }
0x1789   : > { %4349 = vrot.lane.b32.xlu0 %v4335_v55, %s10861_s23  ;;  %v4552_v55 = vrot.slane %v4539_v14, %v10818_v50  ;;  %s10866_s23 = smov 56  }
0x178b   : > { %4369 = vperm.xlu1 %6839, %v8881_v28  }
0x178d   : > { %4389 = vperm.xlu0 %6840, %v8881_v28  }
0x178f   : > { %6841 = vset.pattern.permute.xlu1 %v10802_v22 }
0x1791   : > { %6845 = vset.pattern.permute.xlu0 %v10862_v9 }
0x17f2   : > { %v9217_v33 = vpop.permute.xlu0 %4341 }
0x17f4   : > { %v9231_v21 = vpop.permute.xlu1 %4343 }
0x17f7   : > { %v9219_v41 = vpop.permute.xlu0 %4345 }
0x17f9   : > { %v9233_v24 = vpop.permute.xlu1 %4347 }
0x17fb   : > { %v9221_v43 = vpop.permute.xlu0 %4349 }
0x1806   : > { %v4370_v12 = vpop.permute.xlu1 %4369 }
0x1808   : > { %v4390_v60 = vpop.permute.xlu0 %4389 }
0x1809   : > { %v4397_v5 = vrot.slane %v4390_v60, %v7237_v62  ;;  %v4556_v60 = vrot.slane %v4539_v14, %v10825_v38 }
0x180b   : > { %v4399_v56 = vmul.f32 %v10840_v35, %v4397_v5  ;;  %v4400_v0 = vmul.f32 %v4397_v5, %v8910_v19 }
0x180d   : > { %4409 = vrot.lane.b32.xlu0 %v4399_v56, %s6963_s24  ;;  %4405 = vrot.lane.b32.xlu1 %v4399_v56, %s6963_s24  ;;  %v4562_v56 = vcombine.low %v4552_v55, %v4556_v60 }
0x1811   : > { %4407 = vrot.lane.b32.xlu1 %v4400_v0, %s6963_s24 }
0x1815   : > { %4426 = vperm.xlu1 %6841, %v8881_v28  }
0x1819   : > { %6842 = vset.pattern.permute.xlu1 %v10863_v40 }
0x187f   : > { %v4406_v47 = vpop.permute.xlu1 %4405 }
0x1883   : > { %v9235_v7 = vpop.permute.xlu1 %4407 }
0x1890   : > { %v4427_v6 = vpop.permute.xlu1 %4426 }
0x1891   : > { %v4434_v23 = vrot.slane %v4427_v6, %v7237_v62 }
0x1893   : > { %v4436_v54 = vmul.f32 %v10840_v35, %v4434_v23  ;;  %v4437_v39 = vmul.f32 %v4434_v23, %v8910_v19  ;;  %v4412_v23 = vrot.slane %v9235_v7, 4 }
0x1895   : > { %4444 = vrot.lane.b32.xlu1 %v4437_v39, %s6964_s26  ;;  %4442 = vrot.lane.b32.xlu0 %v4436_v54, %s6964_s26  ;;  %v4411_v39 = vrot.slane %v4406_v47, 4 }
0x1899   : > { %4463 = vperm.xlu1 %6842, %v8881_v28   ;;  %4446 = vrot.lane.b32.xlu0 %v4436_v54, %s6964_s26 }
0x189d   : > { %6843 = vset.pattern.permute.xlu1 %v10864_v29 }
0x1907   : > { %v9245_v15 = vpop.permute.xlu1 %4444 }
0x1914   : > { %v4464_v18 = vpop.permute.xlu1 %4463 }
0x1915   : > { %v4471_v42 = vrot.slane %v4464_v18, %v7237_v62  ;;  %v4449_v18 = vrot.slane %v9245_v15, 4 }
0x1917   : > { %v4473_v36 = vmul.f32 %v10840_v35, %v4471_v42  ;;  %v4474_v46 = vmul.f32 %v4471_v42, %v8910_v19 }
0x1919   : > { %4481 = vrot.lane.b32.xlu1 %v4474_v46, %s6965_s22  ;;  %4479 = vrot.lane.b32.xlu0 %v4473_v36, %s6965_s22  ;;  %v4414_v46 = vsel %vm560_vm0, %v4411_v39, %v4412_v23 }
0x191d   : > { %4503 = vperm.xlu1 %6843, %v8881_v28   ;;  %4483 = vrot.lane.b32.xlu0 %v4473_v36, %s6965_s22  ;;  %v4544_v28 = vrot.slane %v4539_v14, %v10732_v30  ;;  %v4377_v36 = vrot.slane %v4370_v12, %v7237_v62 }
0x191f   : > { %v4561_v53 = vcombine.low %v4544_v28, %v4548_v57  ;;  %v4415_v57 = vsel %vm696_vm3, %v4406_v47, %v4414_v46  ;;  %v4380_v55 = vmul.f32 %v4377_v36, %v8910_v19  ;;  %v4367_v47 = vld [vmem:[#allocation2 + $0x10] sm:$0xf] }
0x1921   : > { %6844 = vset.pattern.permute.xlu1 %v10824_v25 }
0x198b   : > { %v9261_v31 = vpop.permute.xlu1 %4481 }
0x198c   : > { %v4486_v32 = vrot.slane %v9261_v31, 4 }
0x1998   : > { %v4504_v27 = vpop.permute.xlu1 %4503 }
0x1999   : > { %v4511_v1 = vrot.slane %v4504_v27, %v7237_v62 }
0x199b   : > { %v4513_v11 = vmul.f32 %v4511_v1, %v8947_v10  ;;  %v4514_v13 = vmul.f32 %v4511_v1, %v8949_v48  ;;  %v4515_v5 = vmul.f32 %v4511_v1, %v4501_v17  ;;  %v4560_v10 = vrot.slane %v4539_v14, %v10843_v63  ;;  %v4410_v48 = vpop.permute.xlu0 %4409 }
0x199c   : > { %v4379_v14 = vmul.f32 %v10840_v35, %v4377_v36  ;;  %v4413_v28 = vrot.slane %v4410_v48, 4 }
0x199d   : > { %4521 = vrot.lane.b32.xlu1 %v4514_v13, %s6966_s27  ;;  %4519 = vrot.lane.b32.xlu0 %v4513_v11, %s6966_s27 }
0x199e   : > { %v4416_v17 = vsel %vm560_vm0, %v4412_v23, %v4413_v28  ;;  %v4422_v60 = vadd.f32 %v4415_v57, %v4379_v14  ;;  %v4418_v22 = vsel %vm696_vm3, %v4410_v48, %v4413_v28 }
0x199f   : > { %v4443_v0 = vpop.permute.xlu0 %4442  ;;  %v4417_v46 = vsel %vm696_vm3, %v9235_v7, %v4416_v17 }
0x19a0   : > { %v4448_v42 = vrot.slane %v4443_v0, 4  ;;  %v4423_v40 = vadd.f32 %v4417_v46, %v4380_v55  ;;  %v10867_v46 = vmov 14  }
0x19a1   : > { %4563 = vrot.lane.b32.xlu1 %v4561_v53, %s10865_s17  ;;  %4523 = vrot.lane.b32.xlu0 %v4515_v5, %s6966_s27 }
0x19a2   : > { %v4451_v27 = vsel %vm560_vm0, %v4448_v42, %v4449_v18 }
0x19a3   : > { %v4447_v6 = vpop.permute.xlu0 %4446  ;;  %v4452_v12 = vsel %vm734_vm4, %v4443_v0, %v4451_v27 }
0x19a4   : > { %v4450_v11 = vrot.slane %v4447_v6, 4 }
0x19a5   : > { %4565 = vrot.lane.b32.xlu0 %v4562_v56, %s10865_s17  ;;  %4567 = vrot.lane.b32.xlu1 %v4560_v10, %s10865_s17  ;;  %s10926_s17 = smov 6  }
0x19a6   : > { %v4453_v10 = vsel %vm560_vm0, %v4449_v18, %v4450_v11  ;;  %v4381_v18 = vmul.f32 %v4377_v36, %v4367_v47 }
0x19a7   : > { %v4480_v54 = vpop.permute.xlu0 %4479  ;;  %v4454_v19 = vsel %vm734_vm4, %v9245_v15, %v4453_v10 }
0x19a8   : > { %v4485_v4 = vrot.slane %v4480_v54, 4  ;;  %v4460_v17 = vadd.f32 %v4454_v19, %v4423_v40  ;;  %v4424_v36 = vadd.f32 %v4418_v22, %v4381_v18 }
0x19aa   : > { %v4488_v13 = vsel %vm560_vm0, %v4485_v4, %v4486_v32  ;;  %v4459_v4 = vadd.f32 %v4452_v12, %v4422_v60  ;;  %v4455_v12 = vsel %vm734_vm4, %v4447_v6, %v4450_v11 }
0x19ab   : > { %v4484_v1 = vpop.permute.xlu0 %4483  ;;  %v4489_v39 = vsel %vm772_vm5, %v4480_v54, %v4488_v13  ;;  %v4461_v48 = vadd.f32 %v4455_v12, %v4424_v36 }
0x19ac   : > { %v4487_v53 = vrot.slane %v4484_v1, 4  ;;  %v4496_v14 = vadd.f32 %v4489_v39, %v4459_v4  ;;  %v6924_v4 = vld [vmem:[%s10412_s6] sm:$0xf] }
0x19ae   : > { %v4490_v23 = vsel %vm560_vm0, %v4486_v32, %v4487_v53 }
0x19af   : > { %v4491_v7 = vsel %vm772_vm5, %v9261_v31, %v4490_v23  ;;  %v9325_v23 = vld [vmem:[%s10420_s14] sm:$0xf] }
0x19b0   : > { %v4497_v55 = vadd.f32 %v4491_v7, %v4460_v17 }
0x1a0f   : > { %v4522_v5 = vpop.permute.xlu1 %4521  ;;  %v4520_v56 = vpop.permute.xlu0 %4519 }
0x1a10   : > { %v4526_v42 = vrot.slane %v4522_v5, 4  ;;  %v4525_v25 = vrot.slane %v4520_v56, 4 }
0x1a12   : > { %v4527_v0 = vsel %vm811_vm6, %v4525_v25, %v4520_v56  ;;  %v4528_v54 = vsel %vm560_vm0, %v4525_v25, %v4526_v42  ;;  %v4492_v25 = vsel %vm772_vm5, %v4484_v1, %v4487_v53 }
0x1a13   : > { %v4564_v27 = vpop.permute.xlu1 %4563  ;;  %v4524_v57 = vpop.permute.xlu0 %4523  ;;  %v4534_v29 = vadd.f32 %v4527_v0, %v4496_v14  ;;  %v4529_v60 = vsel %vm811_vm6, %v4528_v54, %v4522_v5  ;;  %v4498_v6 = vadd.f32 %v4492_v25, %v4461_v48  ;;  %v9336_v54 = vld [vmem:[#allocation2 + $0x8] sm:$0xff] }
0x1a14   : > { %v4569_v13 = vrot.slane %v4564_v27, 4  ;;  %v4535_v28 = vadd.f32 %v4529_v60, %v4497_v55  ;;  %v4530_v40 = vsel %vm811_vm6, %v4526_v42, %v4524_v57  ;;  %v6923_v42 = vld [vmem:[%s10416_s10] sm:$0xf] }
0x1a15   : > { %v4536_v5 = vadd.f32 %v4530_v40, %v4498_v6  ;;  %v6641_v40 = vld [vmem:[%s10409_s3 + $0x4] ss:$8 sm:$0x10] }
0x1a16   : > { %v4571_v32 = vsel %vm1600_vm8, %v4569_v13, %v4564_v27 }
0x1a17   : > { %v4578_v15 = vmul.f32 %v4571_v32, %v4534_v29  ;;  %v4566_v56 = vpop.permute.xlu0 %4565  ;;  %v4568_v47 = vpop.permute.xlu1 %4567 }
0x1a18   : > { %v4570_v10 = vrot.slane %v4566_v56, 4 }
0x1a19   : > { %v4584_v39 = vcombine.high %v4578_v15, %v4578_v15  ;;  %4586 = vrot.lane.b32.xlu0 %v4578_v15, %s10866_s23 }
0x1a1a   : > { %v4572_v31 = vsel %vm560_vm0, %v4569_v13, %v4570_v10  ;;  %v4574_v11 = vsel %vm1600_vm8, %v4570_v10, %v4568_v47  ;;  %v10868_v10 = vmov 24   ;;  %v6640_v47 = vld [vmem:[%s10409_s3 + $0x4] ss:$8 sm:$0xf] }
0x1a1b   : > { %v4573_v29 = vsel %vm1600_vm8, %v4572_v31, %v4566_v56  ;;  %4588 = vrot.lane.b32.xlu1 %v4584_v39, %s10866_s23  ;;  %v4580_v53 = vmul.f32 %v4574_v11, %v4536_v5  ;;  %v4784_v6 = vor.u32 %v6641_v40, %v6640_v47  ;;  %v4745_v11 = vld [vmem:[#allocation2 + $0xc] sm:$0xff]  ;;  %vm10875_vm8 = vmmov %vm10872_vm1 }
0x1a1c   : > { %v4579_v22 = vmul.f32 %v4573_v29, %v4535_v28 }
0x1a1e   : > { %v4585_v1 = vcombine.high %v4579_v22, %v4579_v22  ;;  %4590 = vrot.lane.b32.xlu0 %v4579_v22, %s10866_s23  ;;  %v4744_v22 = vld [vmem:[#allocation2 + $0x4] sm:$0xff] }
0x1a20   : > { %4592 = vrot.lane.b32.xlu1 %v4585_v1, %s10866_s23 }
0x1a22   : > { %4594 = vrot.lane.b32.xlu0 %v4580_v53, %s10866_s23  ;;  %v4789_v53 = vrot.slane %v4784_v6, %v10732_v30  ;;  %s11013_s23 = smov 113  }
0x1a24   : > { %4614 = vperm.xlu1 %6844, %v6923_v42  }
0x1a26   : > { %4634 = vperm.xlu0 %6845, %v6923_v42  }
0x1a28   : > { %6847 = vset.pattern.permute.xlu1 %v10867_v46 }
0x1a2a   : > { %6846 = vset.pattern.permute.xlu0 %v10808_v26 }
0x1a2b   : > { %1940 = vperm.xlu0 %6846, %v6924_v4  }
0x1a2f   : > { %3626 = vperm.xlu0 %6846, %v9325_v23  }
0x1a8b   : > { %v9328_v0 = vpop.permute.xlu0 %4586 }
0x1a8d   : > { %v9343_v7 = vpop.permute.xlu1 %4588 }
0x1a90   : > { %v9330_v19 = vpop.permute.xlu0 %4590 }
0x1a92   : > { %v9345_v32 = vpop.permute.xlu1 %4592 }
0x1a94   : > { %v9332_v14 = vpop.permute.xlu0 %4594 }
0x1a9f   : > { %v4615_v17 = vpop.permute.xlu1 %4614 }
0x1aa1   : > { %v4635_v27 = vpop.permute.xlu0 %4634 }
0x1aa2   : > { %v4642_v57 = vrot.slane %v4635_v27, %v7237_v62 }
0x1aa4   : > { %v4644_v18 = vmul.f32 %v10840_v35, %v4642_v57  ;;  %v4645_v13 = vmul.f32 %v4642_v57, %v9336_v54  ;;  %v4746_v57 = vld [vmem:[#allocation2 + $0x14] sm:$0xf] }
0x1aa6   : > { %4654 = vrot.lane.b32.xlu0 %v4644_v18, %s6963_s24  ;;  %4650 = vrot.lane.b32.xlu1 %v4644_v18, %s6963_s24 }
0x1aaa   : > { %4652 = vrot.lane.b32.xlu1 %v4645_v13, %s6963_s24  ;;  %v4797_v13 = vrot.slane %v4784_v6, %v10818_v50 }
0x1aae   : > { %4671 = vperm.xlu1 %6847, %v6923_v42  }
0x1ab2   : > { %6848 = vset.pattern.permute.xlu1 %v10799_v16 }
0x1b18   : > { %v9347_v12 = vpop.permute.xlu1 %4650 }
0x1b1c   : > { %v9349_v15 = vpop.permute.xlu1 %4652 }
0x1b1d   : > { %v4657_v40 = vrot.slane %v9349_v15, 4 }
0x1b29   : > { %v4672_v60 = vpop.permute.xlu1 %4671 }
0x1b2a   : > { %v4679_v56 = vrot.slane %v4672_v60, %v7237_v62  ;;  %v4801_v60 = vrot.slane %v4784_v6, %v10825_v38 }
0x1b2c   : > { %v4681_v36 = vmul.f32 %v10840_v35, %v4679_v56  ;;  %v4682_v55 = vmul.f32 %v4679_v56, %v9336_v54 }
0x1b2e   : > { %4689 = vrot.lane.b32.xlu1 %v4682_v55, %s6964_s26  ;;  %4687 = vrot.lane.b32.xlu0 %v4681_v36, %s6964_s26  ;;  %v4805_v55 = vrot.slane %v4784_v6, %v10843_v63 }
0x1b32   : > { %4708 = vperm.xlu1 %6848, %v6923_v42   ;;  %4691 = vrot.lane.b32.xlu0 %v4681_v36, %s6964_s26  ;;  %v4807_v36 = vcombine.low %v4797_v13, %v4801_v60 }
0x1b36   : > { %6849 = vset.pattern.permute.xlu1 %v10868_v10 }
0x1ba0   : > { %v9358_v25 = vpop.permute.xlu1 %4689 }
0x1bad   : > { %v4709_v39 = vpop.permute.xlu1 %4708 }
0x1bae   : > { %v4716_v48 = vrot.slane %v4709_v39, %v7237_v62  ;;  %v9387_v39 = vpop.permute.xlu0 %1940 }
0x1baf   : > { %10870 = vst [vmem:[#allocation53_spill] sm:$0xff] %v9387_v39 }
0x1bb0   : > { %v4718_v28 = vmul.f32 %v10840_v35, %v4716_v48  ;;  %v4719_v31 = vmul.f32 %v4716_v48, %v9336_v54 }
0x1bb2   : > { %4726 = vrot.lane.b32.xlu1 %v4719_v31, %s6965_s22  ;;  %4724 = vrot.lane.b32.xlu0 %v4718_v28, %s6965_s22  ;;  %v9389_v48 = vpop.permute.xlu0 %3626 }
0x1bb6   : > { %4748 = vperm.xlu1 %6849, %v6923_v42   ;;  %4728 = vrot.lane.b32.xlu0 %v4718_v28, %s6965_s22  ;;  %v4793_v42 = vrot.slane %v4784_v6, %v10733_v2  ;;  %v4655_v28 = vpop.permute.xlu0 %4654  ;;  %v4622_v6 = vrot.slane %v4615_v17, %v7237_v62 }
0x1bb7   : > { %v4658_v13 = vrot.slane %v4655_v28, 4 }
0x1bb8   : > { %v4806_v18 = vcombine.low %v4789_v53, %v4793_v42  ;;  %v4625_v26 = vmul.f32 %v9336_v54, %v4622_v6 }
0x1bb9   : > { %v4663_v38 = vsel %vm696_vm3, %v4655_v28, %v4658_v13 }
0x1bba   : > { %6850 = vset.pattern.permute.xlu1 %v10821_v52  ;;  %v4688_v31 = vpop.permute.xlu0 %4687 }
0x1bbe   : > { %v4692_v47 = vpop.permute.xlu0 %4691 }
0x1c24   : > { %v9373_v29 = vpop.permute.xlu1 %4726 }
0x1c25   : > { %v4731_v42 = vrot.slane %v9373_v29, 4 }
0x1c31   : > { %v4749_v5 = vpop.permute.xlu1 %4748 }
0x1c32   : > { %v4756_v1 = vrot.slane %v4749_v5, %v7237_v62  ;;  %v4694_v5 = vrot.slane %v9358_v25, 4 }
0x1c34   : > { %v4758_v4 = vmul.f32 %v4756_v1, %v4744_v22  ;;  %v4759_v27 = vmul.f32 %v4756_v1, %v4745_v11  ;;  %v4760_v56 = vmul.f32 %v4756_v1, %v4746_v57  ;;  %v4725_v22 = vpop.permute.xlu0 %4724  ;;  %v4656_v11 = vrot.slane %v9347_v12, 4 }
0x1c35   : > { %v4693_v1 = vrot.slane %v4688_v31, 4 }
0x1c36   : > { %4766 = vrot.lane.b32.xlu1 %v4759_v27, %s6966_s27  ;;  %4764 = vrot.lane.b32.xlu0 %v4758_v4, %s6966_s27  ;;  %v4659_v53 = vsel %vm560_vm0, %v4656_v11, %v4657_v40  ;;  %v4730_v4 = vrot.slane %v4725_v22, 4  ;;  %v4624_v27 = vmul.f32 %v10840_v35, %v4622_v6 }
0x1c37   : > { %v4696_v57 = vsel %vm560_vm0, %v4693_v1, %v4694_v5  ;;  %v4660_v60 = vsel %vm696_vm3, %v9347_v12, %v4659_v53  ;;  %v4612_v12 = vld [vmem:[#allocation2 + $0x10] sm:$0xf] }
0x1c38   : > { %v4697_v17 = vsel %vm734_vm4, %v4688_v31, %v4696_v57  ;;  %v4667_v16 = vadd.f32 %v4660_v60, %v4624_v27 }
0x1c3a   : > { %4808 = vrot.lane.b32.xlu1 %v4806_v18, %s10869_s19  ;;  %4768 = vrot.lane.b32.xlu0 %v4760_v56, %s6966_s27  ;;  %v4729_v18 = vpop.permute.xlu0 %4728  ;;  %v4695_v56 = vrot.slane %v4692_v47, 4 }
0x1c3b   : > { %v4732_v11 = vrot.slane %v4729_v18, 4 }
0x1c3c   : > { %v4698_v1 = vsel %vm560_vm0, %v4694_v5, %v4695_v56  ;;  %v4626_v5 = vmul.f32 %v4622_v6, %v4612_v12 }
0x1c3d   : > { %v4699_v54 = vsel %vm734_vm4, %v9358_v25, %v4698_v1 }
0x1c3e   : > { %4810 = vrot.lane.b32.xlu0 %v4807_v36, %s10869_s19  ;;  %4812 = vrot.lane.b32.xlu1 %v4805_v55, %s10869_s19  ;;  %v4733_v36 = vsel %vm560_vm0, %v4730_v4, %v4731_v42  ;;  %v4661_v55 = vsel %vm560_vm0, %v4657_v40, %v4658_v13  ;;  %v4704_v4 = vadd.f32 %v4697_v17, %v4667_v16  ;;  %s549_s19 = scalar_lea.vmem %s10421_s15, %s7141_s0 }
0x1c3f   : > { %v4734_v39 = vsel %vm772_vm5, %v4725_v22, %v4733_v36  ;;  %v4662_v53 = vsel %vm696_vm3, %v9349_v15, %v4661_v55  ;;  %v4735_v40 = vsel %vm560_vm0, %v4731_v42, %v4732_v11  ;;  %v4700_v55 = vsel %vm734_vm4, %v4692_v47, %v4695_v56 }
0x1c40   : > { %v4741_v27 = vadd.f32 %v4734_v39, %v4704_v4  ;;  %v4668_v62 = vadd.f32 %v4662_v53, %v4625_v26  ;;  %v4736_v16 = vsel %vm772_vm5, %v9373_v29, %v4735_v40  ;;  %v4669_v6 = vadd.f32 %v4663_v38, %v4626_v5 }
0x1c41   : > { %v3861_v53 = vsel %vm882_vm10, %v9015_v3, %v9029_v37  ;;  %v4106_v3 = vsel %vm1130_vm11, %v9116_v61, %v9130_v44  ;;  %v4109_v61 = vsel %vm1130_vm11, %v9132_v49, %v9120_v59 }
0x1c42   : > { %v4705_v42 = vadd.f32 %v4699_v54, %v4668_v62  ;;  %v4706_v28 = vadd.f32 %v4700_v55, %v4669_v6  ;;  %v3870_v4 = vadd.f32 %v3861_v53, %v9389_v48 }
0x1c44   : > { %v4742_v26 = vadd.f32 %v4736_v16, %v4705_v42  ;;  %v4115_v54 = vadd.f32 %v4106_v3, %v3870_v4 }
0x1ca8   : > { %v4767_v10 = vpop.permute.xlu1 %4766  ;;  %v4765_v35 = vpop.permute.xlu0 %4764 }
0x1ca9   : > { %v4771_v9 = vrot.slane %v4767_v10, 4  ;;  %v4770_v52 = vrot.slane %v4765_v35, 4 }
0x1cab   : > { %v4772_v31 = vsel %vm811_vm6, %v4770_v52, %v4765_v35  ;;  %v4773_v22 = vsel %vm560_vm0, %v4770_v52, %v4771_v9  ;;  %v4737_v52 = vsel %vm772_vm5, %v4729_v18, %v4732_v11 }
0x1cac   : > { %v4809_v57 = vpop.permute.xlu1 %4808  ;;  %v4769_v60 = vpop.permute.xlu0 %4768  ;;  %v4779_v63 = vadd.f32 %v4772_v31, %v4741_v27  ;;  %v4774_v39 = vsel %vm811_vm6, %v4773_v22, %v4767_v10  ;;  %v4743_v10 = vadd.f32 %v4737_v52, %v4706_v28 }
0x1cad   : > { %v4814_v36 = vrot.slane %v4809_v57, 4  ;;  %v4780_v13 = vadd.f32 %v4774_v39, %v4742_v26  ;;  %v4775_v62 = vsel %vm811_vm6, %v4771_v9, %v4769_v60  ;;  %v9433_v9 = vld [vmem:[%s10417_s11] sm:$0xf] }
0x1cae   : > { %v4781_v56 = vadd.f32 %v4775_v62, %v4743_v10  ;;  %v10883_v62 = vld [vmem:[#allocation10_spill] sm:$0xff] }
0x1caf   : > { %v4816_v15 = vsel %vm1848_vm9, %v4814_v36, %v4809_v57  ;;  %v4351_v57 = vsel %vm10872_vm1, %v9217_v33, %v9231_v21 }
0x1cb0   : > { %v4823_v25 = vmul.f32 %v4816_v15, %v4779_v63  ;;  %v4811_v17 = vpop.permute.xlu0 %4810  ;;  %v4813_v12 = vpop.permute.xlu1 %4812  ;;  %v4360_v60 = vadd.f32 %v4351_v57, %v4115_v54 }
0x1cb1   : > { %v4815_v35 = vrot.slane %v4811_v17, 4 }
0x1cb2   : > { %v4829_v1 = vcombine.high %v4823_v25, %v4823_v25  ;;  %4831 = vrot.lane.b32.xlu0 %v4823_v25, %s10871_s29 }
0x1cb3   : > { %v4817_v29 = vsel %vm560_vm0, %v4814_v36, %v4815_v35  ;;  %v4819_v47 = vsel %vm1848_vm9, %v4815_v35, %v4813_v12 }
0x1cb4   : > { %v4818_v63 = vsel %vm1848_vm9, %v4817_v29, %v4811_v17  ;;  %4833 = vrot.lane.b32.xlu1 %v4829_v1, %s10871_s29  ;;  %v4825_v11 = vmul.f32 %v4819_v47, %v4781_v56  ;;  %vm10876_vm9 = vcmask 457728   ;;  %v10884_v47 = vld [vmem:[#allocation5_spill] sm:$0xff] }
0x1cb5   : > { %v4824_v38 = vmul.f32 %v4818_v63, %v4780_v13  ;;  %v4596_v33 = vsel %vm10876_vm9, %v9328_v0, %v9343_v7  ;;  %vm10879_vm1 = vmmov %vm10876_vm9 }
0x1cb6   : > { %v4605_v15 = vadd.f32 %v4596_v33, %v4360_v60  ;;  %v4598_v26 = vsel %vm10879_vm1, %v9330_v19, %v9345_v32 }
0x1cb7   : > { %v4830_v18 = vcombine.high %v4824_v38, %v4824_v38  ;;  %4835 = vrot.lane.b32.xlu0 %v4824_v38, %s10871_s29 }
0x1cb9   : > { %4837 = vrot.lane.b32.xlu1 %v4830_v18, %s10871_s29 }
0x1cbb   : > { %4839 = vrot.lane.b32.xlu0 %v4825_v11, %s10871_s29  ;;  %s10966_s29 = smov 122  }
0x1cbd   : > { %4899 = vperm.xlu1 %6850, %v9325_v23   ;;  %v3862_v23 = vsel %vm882_vm10, %v9029_v37, %v9017_v51  ;;  %v4107_v37 = vsel %vm1130_vm11, %v9130_v44, %v9118_v45 }
0x1cbe   : > { %v3871_v40 = vadd.f32 %v3862_v23, %v9389_v48  ;;  %v9512_v23 = vld [vmem:[#allocation3] sm:$0xff] }
0x1cbf   : > { %4905 = vperm.xlu0 %6846, %v9433_v9  }
0x1cc0   : > { %v4116_v27 = vadd.f32 %v4107_v37, %v3871_v40 }
0x1cc1   : > { %6851 = vset.pattern.permute.xlu1 %v10850_v58  ;;  %v3863_v58 = vsel %vm882_vm10, %v9017_v51, %v9031_v34  ;;  %v3874_v51 = vadd.f32 %v9019_v8, %v9389_v48 }
0x1cc2   : > { %4920 = vperm.xlu1 %6851, %v9433_v9  }
0x1cc3   : > { %6853 = vset.pattern.permute.xlu0 %v10852_v20  ;;  %v3864_v20 = vsel %vm882_vm10, %v9031_v34, %v9019_v8  ;;  %v4108_v34 = vsel %vm1130_vm11, %v9118_v45, %v9132_v49  ;;  %v4352_v8 = vsel %vm10873_vm2, %v9231_v21, %v9219_v41  ;;  %v4353_v45 = vsel %vm10874_vm7, %v9219_v41, %v9233_v24  ;;  %v4855_v21 = vld [vmem:[%s10408_s2] sm:$0x1f]  ;;  %vm10878_vm11 = vmmov %vm10876_vm9 }
0x1cc4   : > { %v3873_v31 = vadd.f32 %v3864_v20, %v9389_v48  ;;  %v4361_v36 = vadd.f32 %v4352_v8, %v4116_v27  ;;  %v4354_v49 = vsel %vm10875_vm8, %v9233_v24, %v9221_v43  ;;  %vm10877_vm10 = vcmask 449536   ;;  %vm10880_vm2 = vmmov %vm10879_vm1 }
0x1cc5   : > { %v4597_v41 = vsel %vm10878_vm11, %v9343_v7, %v9330_v19  ;;  %v4860_v25 = vrot.slane %v4855_v21, %v10732_v30  ;;  %v4864_v17 = vrot.slane %v4855_v21, %v10733_v2  ;;  %v4599_v35 = vsel %vm10880_vm2, %v9345_v32, %v9332_v14  ;;  %vm10881_vm7 = vmmov %vm10877_vm10 }
0x1cc6   : > { %6852 = vset.pattern.permute.xlu1 %v10867_v46  ;;  %v3872_v46 = vadd.f32 %v3863_v58, %v9389_v48  ;;  %v4118_v22 = vadd.f32 %v4109_v61, %v3873_v31  ;;  %v4119_v48 = vadd.f32 %v9120_v59, %v3874_v51  ;;  %v4606_v0 = vadd.f32 %v4597_v41, %v4361_v36  ;;  %vm10882_vm8 = vmmov %vm10881_vm7  ;;  %v10888_v31 = vld [vmem:[#allocation14_spill] sm:$0xff] }
0x1cc7   : > { %v4868_v13 = vrot.slane %v4855_v21, %v10818_v50  ;;  %v4876_v63 = vrot.slane %v4855_v21, %v10883_v62  ;;  %v4872_v56 = vrot.slane %v4855_v21, %v10884_v47  ;;  %vm10885_vm9 = vmmov %vm10881_vm7  ;;  %v10891_v8 = vmov 28  }
0x1cc8   : > { %v4117_v5 = vadd.f32 %v4108_v34, %v3872_v46  ;;  %v4363_v55 = vadd.f32 %v4354_v49, %v4118_v22  ;;  %v4364_v24 = vadd.f32 %v9221_v43, %v4119_v48  ;;  %v10889_v34 = vmov 8  }
0x1cc9   : > { %v10893_v48 = vmov 42   ;;  %v10894_v36 = vmov 1   ;;  %vm10915_vm11 = vcmask 23552   ;;  %vm2341_vm1 = vcmask 1022976  }
0x1cca   : > { %v4362_v42 = vadd.f32 %v4353_v45, %v4117_v5  ;;  %v4608_v28 = vadd.f32 %v4599_v35, %v4363_v55  ;;  %v4609_v12 = vadd.f32 %v9332_v14, %v4364_v24  ;;  %v10895_v45 = vmov 22  }
0x1ccb   : > { %vm2561_vm2 = vcmask 998400  }
0x1ccc   : > { %v4607_v1 = vadd.f32 %v4598_v26, %v4362_v42 }
0x1d24   : > { %v4832_v44 = vpop.permute.xlu0 %4831 }
0x1d26   : > { %v4834_v16 = vpop.permute.xlu1 %4833 }
0x1d27   : > { %v4841_v59 = vsel %vm10877_vm10, %v4832_v44, %v4834_v16  ;;  %vm10886_vm10 = vcmask 404480   ;;  %v10892_v44 = vmov 35  }
0x1d28   : > { %v4850_v39 = vadd.f32 %v4841_v59, %v4605_v15 }
0x1d29   : > { %v4836_v6 = vpop.permute.xlu0 %4835 }
0x1d2a   : > { %v4842_v52 = vsel %vm10881_vm7, %v4834_v16, %v4836_v6  ;;  %v4882_v10 = vmul.f32 %v4860_v25, %v4850_v39  ;;  %vm2781_vm7 = vcmask 973824  }
0x1d2b   : > { %v4851_v7 = vadd.f32 %v4842_v52, %v4606_v0  ;;  %v4838_v43 = vpop.permute.xlu1 %4837 }
0x1d2c   : > { %v4843_v29 = vsel %vm10882_vm8, %v4836_v6, %v4838_v43  ;;  %vm3001_vm8 = vcmask 949248  }
0x1d2d   : > { %v4883_v19 = vmul.f32 %v4864_v17, %v4851_v7  ;;  %v4852_v38 = vadd.f32 %v4843_v29, %v4607_v1  ;;  %v4840_v32 = vpop.permute.xlu0 %4839 }
0x1d2e   : > { %v4844_v18 = vsel %vm10885_vm9, %v4838_v43, %v4840_v32  ;;  %v4854_v11 = vadd.f32 %v4840_v32, %v4609_v12  ;;  %vm3221_vm9 = vcmask 924672  }
0x1d2f   : > { %v9510_v53 = vcombine.low %v4882_v10, %v4883_v19  ;;  %v4853_v4 = vadd.f32 %v4844_v18, %v4608_v28  ;;  %v4884_v14 = vmul.f32 %v4868_v13, %v4852_v38  ;;  %v10900_v13 = vmov 15  }
0x1d30   : > { %v4886_v40 = vmul.f32 %v4876_v63, %v4854_v11 }
0x1d31   : > { %4895 = vst [vmem:[#allocation3] sm:$0xff] %v9510_v53  ;;  %v4885_v58 = vmul.f32 %v4872_v56, %v4853_v4 }
0x1d32   : > { %4897 = vst.msk [vmem:[#allocation3 + $0x10] sm:$0xf] %vm10886_vm10, %v4886_v40  ;;  %vm3440_vm10 = vcmask 900096  }
0x1d33   : > { %v9516_v20 = vcombine.low %v4884_v14, %v4885_v58  ;;  %v10910_v58 = vmov 9  }
0x1d35   : > { %4896 = vst [vmem:[#allocation3 + $0x8] sm:$0xff] %v9516_v20 }
0x1d38   : > { %v9519_v3 = vpop.permute.xlu1 %4899 }
0x1d39   : > { %10887 = vst [vmem:[#allocation10_spill] sm:$0xff] %v9519_v3  ;;  %v5047_v43 = vld [vmem:[#allocation3 + $0x10] sm:$0xf] }
0x1d3a   : > { %v9543_v49 = vpop.permute.xlu0 %4905 }
0x1d3b   : > { %10896 = vst [vmem:[#allocation55_spill] sm:$0xff] %v9543_v49 }
0x1d3c   : > { %v4918_v37 = vld [vmem:[#allocation3 + $0x8] sm:$0xf]  ;;  %v4970_v41 = vld [vmem:[#allocation3 + $0xc] sm:$0xf] }
0x1d3d   : > { %v4921_v46 = vpop.permute.xlu1 %4920  ;;  %v9550_v59 = vld [vmem:[#allocation3 + $0x4] sm:$0xff] }
0x1d3e   : > { %v4928_v54 = vrot.slane %v4921_v46, %v10888_v31  ;;  %v9588_v4 = vld [vmem:[#allocation3 + $0x8] sm:$0xf] }
0x1d40   : > { %v4930_v51 = vmul.f32 %v4928_v54, %v9510_v53  ;;  %v4931_v27 = vmul.f32 %v4928_v54, %v4918_v37 }
0x1d42   : > { %4934 = vrot.lane.b32.xlu1 %v4930_v51, %s6965_s22  ;;  %4936 = vrot.lane.b32.xlu0 %v4931_v27, %s6965_s22 }
0x1d46   : > { %4945 = vperm.xlu1 %6852, %v9433_v9  }
0x1d4a   : > { %6858 = vset.pattern.permute.xlu1 %v10889_v34  ;;  %v10911_v34 = vmov 29  }
0x1db4   : > { %v9527_v61 = vpop.permute.xlu1 %4934  ;;  %v9545_v33 = vpop.permute.xlu0 %4936 }
0x1db5   : > { %10890 = vst [vmem:[#allocation54_spill] sm:$0xff] %v9527_v61  ;;  %10897 = vst [vmem:[#allocation56_spill] sm:$0xff] %v9545_v33 }
0x1dc1   : > { %v4946_v57 = vpop.permute.xlu1 %4945 }
0x1dc2   : > { %v4953_v60 = vrot.slane %v4946_v57, %v10888_v31  ;;  %v10912_v57 = vmov 36  }
0x1dc4   : > { %v4955_v5 = vmul.f32 %v4953_v60, %v9510_v53  ;;  %v4956_v22 = vmul.f32 %v4953_v60, %v4918_v37  ;;  %v10913_v60 = vmov 43  }
0x1dc6   : > { %4961 = vrot.lane.b32.xlu1 %v4956_v22, %s10803_s18  ;;  %4959 = vrot.lane.b32.xlu0 %v4955_v5, %s10803_s18  ;;  %v10914_v5 = vmov 2   ;;  %v9614_v22 = vld [vmem:[%s10415_s9] sm:$0xf] }
0x1dca   : > { %4972 = vperm.xlu0 %6853, %v9433_v9  }
0x1dce   : > { %6854 = vset.pattern.permute.xlu0 %v10891_v8  ;;  %v6928_v8 = vld [vmem:[%s10413_s7] sm:$0xf] }
0x1dcf   : > { %4997 = vperm.xlu0 %6854, %v9433_v9  }
0x1dd3   : > { %6855 = vset.pattern.permute.xlu0 %v10892_v44  ;;  %v6642_v44 = vld [vmem:[%s10410_s4 + $0x1] ss:$8 sm:$0x3] }
0x1dd4   : > { %5022 = vperm.xlu0 %6855, %v9433_v9  }
0x1dd8   : > { %6856 = vset.pattern.permute.xlu0 %v10893_v48  ;;  %v5279_v48 = vrot.slane %v6642_v44, %v10732_v30 }
0x1dd9   : > { %5049 = vperm.xlu0 %6856, %v9433_v9  }
0x1ddd   : > { %6857 = vset.pattern.permute.xlu0 %v10894_v36 }
0x1dde   : > { %5094 = vperm.xlu0 %6857, %v9433_v9  }
0x1de2   : > { %6860 = vset.pattern.permute.xlu0 %v10895_v45  ;;  %v5283_v45 = vrot.slane %v6642_v44, %v10733_v2 }
0x1e38   : > { %v9547_v21 = vpop.permute.xlu0 %4959  ;;  %v9569_v29 = vpop.permute.xlu1 %4961 }
0x1e39   : > { %10898 = vst [vmem:[#allocation57_spill] sm:$0xff] %v9547_v21  ;;  %10901 = vst [vmem:[#allocation58_spill] sm:$0xff] %v9569_v29 }
0x1e45   : > { %v4973_v16 = vpop.permute.xlu0 %4972 }
0x1e46   : > { %v4980_v15 = vrot.slane %v4973_v16, %v10888_v31  ;;  %v5284_v16 = vcombine.low %v5279_v48, %v5283_v45 }
0x1e48   : > { %v4982_v42 = vmul.f32 %v4980_v15, %v9550_v59  ;;  %v4983_v24 = vmul.f32 %v4980_v15, %v4970_v41 }
0x1e4a   : > { %4986 = vrot.lane.b32.xlu1 %v4982_v42, %s6963_s24  ;;  %v4998_v55 = vpop.permute.xlu0 %4997 }
0x1e4b   : > { %v5005_v25 = vrot.slane %v4998_v55, %v10888_v31 }
0x1e4d   : > { %v5007_v39 = vmul.f32 %v5005_v25, %v9550_v59  ;;  %v5008_v17 = vmul.f32 %v5005_v25, %v4970_v41 }
0x1e4e   : > { %4988 = vrot.lane.b32.xlu1 %v4983_v24, %s6963_s24 }
0x1e4f   : > { %v5023_v0 = vpop.permute.xlu0 %5022 }
0x1e50   : > { %v5030_v6 = vrot.slane %v5023_v0, %v10888_v31  ;;  %v5163_v0 = vld [vmem:[#allocation3 + $0xc] sm:$0xf] }
0x1e52   : > { %5011 = vrot.lane.b32.xlu1 %v5007_v39, %s6966_s27  ;;  %v5032_v26 = vmul.f32 %v5030_v6, %v9550_v59  ;;  %v5033_v52 = vmul.f32 %v5030_v6, %v4970_v41 }
0x1e54   : > { %v5050_v35 = vpop.permute.xlu0 %5049 }
0x1e55   : > { %v5057_v7 = vrot.slane %v5050_v35, %v10888_v31 }
0x1e56   : > { %5013 = vrot.lane.b32.xlu1 %v5008_v17, %s6966_s27 }
0x1e57   : > { %v5059_v1 = vmul.f32 %v5057_v7, %v9516_v20  ;;  %v5060_v28 = vmul.f32 %v5057_v7, %v5047_v43 }
0x1e59   : > { %v5095_v15 = vpop.permute.xlu0 %5094 }
0x1e5a   : > { %5036 = vrot.lane.b32.xlu1 %v5032_v26, %s10899_s30  ;;  %v5102_v44 = vrot.slane %v5095_v15, %v10888_v31 }
0x1e5e   : > { %5038 = vrot.lane.b32.xlu1 %v5033_v52, %s10899_s30 }
0x1e62   : > { %5063 = vrot.lane.b32.xlu1 %v5059_v1, %s6964_s26 }
0x1e66   : > { %5065 = vrot.lane.b32.xlu1 %v5060_v28, %s6964_s26 }
0x1e6a   : > { %5109 = vperm.xlu1 %6858, %v9433_v9  }
0x1e6e   : > { %6859 = vset.pattern.permute.xlu1 %v10900_v13 }
0x1ebc   : > { %v9571_v12 = vpop.permute.xlu1 %4986 }
0x1ebd   : > { %10902 = vst [vmem:[#allocation59_spill] sm:$0xff] %v9571_v12 }
0x1ec0   : > { %v9573_v62 = vpop.permute.xlu1 %4988 }
0x1ec1   : > { %10903 = vst [vmem:[#allocation60_spill] sm:$0xff] %v9573_v62 }
0x1ec4   : > { %v9575_v63 = vpop.permute.xlu1 %5011 }
0x1ec5   : > { %10904 = vst [vmem:[#allocation61_spill] sm:$0xff] %v9575_v63 }
0x1ec8   : > { %v9577_v10 = vpop.permute.xlu1 %5013 }
0x1ec9   : > { %10905 = vst [vmem:[#allocation62_spill] sm:$0xff] %v9577_v10 }
0x1ecc   : > { %v9579_v19 = vpop.permute.xlu1 %5036 }
0x1ecd   : > { %10906 = vst [vmem:[#allocation63_spill] sm:$0xff] %v9579_v19 }
0x1ed0   : > { %v9581_v38 = vpop.permute.xlu1 %5038 }
0x1ed1   : > { %10907 = vst [vmem:[#allocation64_spill] sm:$0xff] %v9581_v38 }
0x1ed4   : > { %v9583_v56 = vpop.permute.xlu1 %5063 }
0x1ed5   : > { %10908 = vst [vmem:[#allocation65_spill] sm:$0xff] %v9583_v56 }
0x1ed8   : > { %v9585_v32 = vpop.permute.xlu1 %5065 }
0x1ed9   : > { %10909 = vst [vmem:[#allocation66_spill] sm:$0xff] %v9585_v32 }
0x1ee5   : > { %v5110_v18 = vpop.permute.xlu1 %5109 }
0x1ee6   : > { %v5117_v11 = vrot.slane %v5110_v18, %v10888_v31 }
0x1ee8   : > { %v5119_v40 = vmul.f32 %v5117_v11, %v9510_v53  ;;  %v5120_v14 = vmul.f32 %v5117_v11, %v9588_v4  ;;  %v5246_v11 = vld [vmem:[#allocation3 + $0x10] sm:$0xf] }
0x1eea   : > { %5125 = vrot.lane.b32.xlu0 %v5120_v14, %s6965_s22  ;;  %5123 = vrot.lane.b32.xlu1 %v5119_v40, %s6965_s22 }
0x1eee   : > { %5136 = vperm.xlu1 %6859, %v9433_v9  }
0x1ef2   : > { %6865 = vset.pattern.permute.xlu1 %v10910_v58 }
0x1f5c   : > { %v9596_v46 = vpop.permute.xlu1 %5123  ;;  %v5126_v42 = vpop.permute.xlu0 %5125 }
0x1f69   : > { %v5137_v54 = vpop.permute.xlu1 %5136 }
0x1f6a   : > { %v5144_v37 = vrot.slane %v5137_v54, %v10888_v31 }
0x1f6c   : > { %v5146_v51 = vmul.f32 %v5144_v37, %v9510_v53  ;;  %v5147_v27 = vmul.f32 %v5144_v37, %v9588_v4 }
0x1f6e   : > { %5152 = vrot.lane.b32.xlu1 %v5147_v27, %s10803_s18  ;;  %5150 = vrot.lane.b32.xlu0 %v5146_v51, %s10803_s18  ;;  %v5127_v27 = vrot.slane %v9596_v46, 4 }
0x1f72   : > { %5165 = vperm.xlu0 %6860, %v9433_v9  }
0x1f76   : > { %6861 = vset.pattern.permute.xlu0 %v10911_v34  ;;  %v5128_v34 = vrot.slane %v5126_v42, 4 }
0x1f77   : > { %5192 = vperm.xlu0 %6861, %v9433_v9  }
0x1f78   : > { %v5129_v48 = vsel %vm560_vm0, %v5127_v27, %v5128_v34 }
0x1f7b   : > { %6862 = vset.pattern.permute.xlu0 %v10912_v57 }
0x1f7c   : > { %5219 = vperm.xlu0 %6862, %v9433_v9  }
0x1f80   : > { %6863 = vset.pattern.permute.xlu0 %v10913_v60 }
0x1f81   : > { %5248 = vperm.xlu0 %6863, %v9433_v9  }
0x1f85   : > { %6864 = vset.pattern.permute.xlu0 %v10914_v5 }
0x1f86   : > { %3448 = vperm.xlu0 %6864, %v9614_v22  }
0x1f8a   : > { %3493 = vperm.xlu0 %6864, %v6928_v8  }
0x1f8e   : > { %5285 = vrot.lane.b32.xlu0 %v5284_v16, %s10820_s28  ;;  %s10916_s28 = smov 125  }
0x1fe0   : > { %v5151_v55 = vpop.permute.xlu0 %5150  ;;  %v5153_v14 = vpop.permute.xlu1 %5152 }
0x1fe1   : > { %v5155_v57 = vrot.slane %v5153_v14, 4  ;;  %v5154_v60 = vrot.slane %v5151_v55, 4 }
0x1fed   : > { %v5166_v41 = vpop.permute.xlu0 %5165 }
0x1fee   : > { %v5173_v24 = vrot.slane %v5166_v41, %v10888_v31  ;;  %v5156_v41 = vsel %vm560_vm0, %v5154_v60, %v5155_v57 }
0x1fef   : > { %v5157_v15 = vsel %vm2001_vm15, %v5151_v55, %v5156_v41 }
0x1ff0   : > { %v5175_v25 = vmul.f32 %v5173_v24, %v9550_v59  ;;  %v5176_v17 = vmul.f32 %v5173_v24, %v5163_v0 }
0x1ff2   : > { %5179 = vrot.lane.b32.xlu1 %v5175_v25, %s6963_s24  ;;  %v5193_v39 = vpop.permute.xlu0 %5192 }
0x1ff3   : > { %v5200_v6 = vrot.slane %v5193_v39, %v10888_v31  ;;  %v5130_v39 = vsel %vm772_vm5, %v9596_v46, %v5129_v48 }
0x1ff5   : > { %v5202_v26 = vmul.f32 %v5200_v6, %v9550_v59  ;;  %v5203_v52 = vmul.f32 %v5200_v6, %v5163_v0 }
0x1ff6   : > { %5181 = vrot.lane.b32.xlu1 %v5176_v17, %s6963_s24  ;;  %v5104_v17 = vmul.f32 %v5102_v44, %v9510_v53 }
0x1ff7   : > { %v5220_v35 = vpop.permute.xlu0 %5219 }
0x1ff8   : > { %v5227_v7 = vrot.slane %v5220_v35, %v10888_v31 }
0x1ffa   : > { %5206 = vrot.lane.b32.xlu1 %v5202_v26, %s6966_s27  ;;  %v5229_v1 = vmul.f32 %v5227_v7, %v9550_v59  ;;  %v5230_v28 = vmul.f32 %v5227_v7, %v5163_v0  ;;  %v5133_v7 = vadd.f32 %v5130_v39, %v5104_v17 }
0x1ffc   : > { %v5249_v43 = vpop.permute.xlu0 %5248 }
0x1ffd   : > { %v5256_v13 = vrot.slane %v5249_v43, %v10888_v31 }
0x1ffe   : > { %5208 = vrot.lane.b32.xlu1 %v5203_v52, %s6966_s27  ;;  %v5105_v52 = vmul.f32 %v5102_v44, %v9588_v4 }
0x1fff   : > { %v5258_v18 = vmul.f32 %v5256_v13, %v9516_v20  ;;  %v5259_v40 = vmul.f32 %v5256_v13, %v5246_v11  ;;  %v5160_v11 = vadd.f32 %v5157_v15, %v5133_v7 }
0x2001   : > { %v9645_v45 = vpop.permute.xlu0 %3448 }
0x2002   : > { %5233 = vrot.lane.b32.xlu1 %v5229_v1, %s10899_s30 }
0x2005   : > { %v9654_v1 = vpop.permute.xlu0 %3493 }
0x2006   : > { %5235 = vrot.lane.b32.xlu1 %v5230_v28, %s10899_s30 }
0x2009   : > { %v5286_v55 = vpop.permute.xlu0 %5285 }
0x200a   : > { %5262 = vrot.lane.b32.xlu1 %v5258_v18, %s6964_s26  ;;  %v5134_v18 = vadd.f32 %v5126_v42, %v5105_v52 }
0x200c   : > { %v5161_v34 = vadd.f32 %v5153_v14, %v5134_v18 }
0x200e   : > { %5264 = vrot.lane.b32.xlu1 %v5259_v40, %s6964_s26 }
0x2064   : > { %v5180_v58 = vpop.permute.xlu1 %5179 }
0x2065   : > { %v5183_v24 = vrot.slane %v5180_v58, 4 }
0x2068   : > { %v5182_v54 = vpop.permute.xlu1 %5181 }
0x2069   : > { %v5184_v16 = vrot.slane %v5182_v54, 4  ;;  %v5190_v44 = vadd.f32 %v5182_v54, %v5161_v34 }
0x206b   : > { %v5185_v6 = vsel %vm560_vm0, %v5183_v24, %v5184_v16  ;;  %v5287_v24 = vrot.slane %v5286_v55, 4 }
0x206c   : > { %v5207_v37 = vpop.permute.xlu1 %5206  ;;  %v5186_v13 = vsel %vm696_vm3, %v5180_v58, %v5185_v6 }
0x206d   : > { %v5210_v26 = vrot.slane %v5207_v37, 4  ;;  %v5189_v57 = vadd.f32 %v5186_v13, %v5160_v11  ;;  %v5288_v14 = vsel %vm10915_vm11, %v5287_v24, %v5286_v55  ;;  %v10923_v55 = vmov 37  }
0x206e   : > { %vm11010_vm11 = vcmask 97280  }
0x2070   : > { %v5209_v51 = vpop.permute.xlu1 %5208 }
0x2071   : > { %v5211_v25 = vrot.slane %v5209_v51, 4 }
0x2073   : > { %v5212_v43 = vsel %vm560_vm0, %v5210_v26, %v5211_v25  ;;  %v5217_v25 = vadd.f32 %v5209_v51, %v5190_v44  ;;  %v10917_v51 = vmov 23   ;;  %v6643_v44 = vld [vmem:[%s10410_s4 + $0x2] ss:$8 sm:$0x3] }
0x2074   : > { %v5234_v8 = vpop.permute.xlu1 %5233  ;;  %v5213_v27 = vsel %vm811_vm6, %v5207_v37, %v5212_v43  ;;  %v9676_v43 = vld [vmem:[#allocation3 + $0x8] sm:$0xf] }
0x2075   : > { %v5237_v28 = vrot.slane %v5234_v8, 4  ;;  %v5216_v41 = vadd.f32 %v5213_v27, %v5189_v57  ;;  %v10922_v57 = vmov 30  }
0x2078   : > { %v5236_v0 = vpop.permute.xlu1 %5235 }
0x2079   : > { %v5238_v35 = vrot.slane %v5236_v0, 4  ;;  %v5244_v17 = vadd.f32 %v5236_v0, %v5217_v25 }
0x207b   : > { %v5239_v40 = vsel %vm560_vm0, %v5237_v28, %v5238_v35 }
0x207c   : > { %v5263_v46 = vpop.permute.xlu1 %5262  ;;  %v5240_v4 = vsel %vm2079_vm14, %v5234_v8, %v5239_v40  ;;  %v10918_v8 = vmov 16  }
0x207d   : > { %v5266_v48 = vrot.slane %v5263_v46, 4  ;;  %v5243_v42 = vadd.f32 %v5240_v4, %v5216_v41  ;;  %v10925_v4 = vmov 3  }
0x2080   : > { %v5265_v60 = vpop.permute.xlu1 %5264 }
0x2081   : > { %v5267_v16 = vrot.slane %v5265_v60, 4  ;;  %v5273_v37 = vadd.f32 %v5265_v60, %v5244_v17  ;;  %v10924_v60 = vmov 44  }
0x2083   : > { %v5268_v58 = vsel %vm560_vm0, %v5266_v48, %v5267_v16  ;;  %v5292_v54 = vmul.f32 %v5287_v24, %v5273_v37  ;;  %v5496_v48 = vrot.slane %v6643_v44, %v10732_v30  ;;  %v5500_v16 = vrot.slane %v6643_v44, %v10733_v2  ;;  %v10927_v24 = vld [vmem:[#allocation20_spill] sm:$0xff]  ;;  %v10936_v44 = vld [vmem:[#allocation30_spill] sm:$0xff] }
0x2084   : > { %v5269_v39 = vsel %vm734_vm4, %v5263_v46, %v5268_v58  ;;  %v10921_v46 = vmov 10   ;;  %v1973_v25 = vrot.slane %v10927_v24, 4  ;;  %v10928_v58 = vld [vmem:[#allocation53_spill] sm:$0xff] }
0x2085   : > { %v5272_v6 = vadd.f32 %v5269_v39, %v5243_v42  ;;  %v5501_v41 = vcombine.low %v5496_v48, %v5500_v16  ;;  %v1948_v42 = vrot.slane %v10928_v58, %v10888_v31  ;;  %v10929_v39 = vld [vmem:[#allocation17_spill] sm:$0xff]  ;;  %v2077_v48 = vrot.slane %v10936_v44, 4 }
0x2086   : > { %v1974_v17 = vrot.slane %v10929_v39, 4 }
0x2087   : > { %v5291_v26 = vmul.f32 %v5288_v14, %v5272_v6  ;;  %v10930_v6 = vld [vmem:[#allocation35_spill] sm:$0xff]  ;;  %v1950_v37 = vmul.f32 %v1948_v42, %v9512_v23 }
0x2088   : > { %v1999_v14 = vrot.slane %v10930_v6, 4  ;;  %v10938_v42 = vld [vmem:[#allocation23_spill] sm:$0xff]  ;;  %v10939_v6 = vld [vmem:[#allocation9_spill] sm:$0xff] }
0x2089   : > { %v5295_v35 = vcombine.high %v5291_v26, %v5291_v26  ;;  %5296 = vrot.lane.b32.xlu1 %v5291_v26, %s10916_s28  ;;  %v10931_v26 = vld [vmem:[#allocation50_spill] sm:$0xff]  ;;  %v2104_v39 = vrot.slane %v10938_v42, 4 }
0x208b   : > { %5298 = vrot.lane.b32.xlu0 %v5295_v35, %s10916_s28  ;;  %v1998_v35 = vrot.slane %v10931_v26, 4 }
0x208d   : > { %5300 = vrot.lane.b32.xlu1 %v5292_v54, %s10916_s28 }
0x208f   : > { %5311 = vperm.xlu0 %6864, %v9433_v9  }
0x2091   : > { %5326 = vperm.xlu1 %6865, %v9433_v9  }
0x2093   : > { %6867 = vset.pattern.permute.xlu0 %v10917_v51  ;;  %v2000_v51 = vsel %vm560_vm0, %v1998_v35, %v1999_v14  ;;  %v2105_v14 = vrot.slane %v10939_v6, 4  ;;  %v10949_v6 = vld [vmem:[#allocation48_spill] sm:$0xff] }
0x2095   : > { %6866 = vset.pattern.permute.xlu1 %v10918_v8  ;;  %v10932_v8 = vld [vmem:[#allocation25_spill] sm:$0xff] }
0x20fb   : > { %v9671_v0 = vpop.permute.xlu1 %5296 }
0x20fc   : > { %10919 = vst [vmem:[#allocation67_spill] sm:$0xff] %v9671_v0 }
0x20ff   : > { %v9673_v15 = vpop.permute.xlu1 %5300 }
0x2100   : > { %10920 = vst [vmem:[#allocation68_spill] sm:$0xff] %v9673_v15  ;;  %v11005_v15 = vld [vmem:[#allocation28_spill] sm:$0xff] }
0x210c   : > { %v5327_v52 = vpop.permute.xlu1 %5326 }
0x210d   : > { %v5334_v7 = vrot.slane %v5327_v52, %v10888_v31  ;;  %v2027_v52 = vrot.slane %v10932_v8, 4 }
0x210f   : > { %v5336_v28 = vmul.f32 %v5334_v7, %v9510_v53  ;;  %v5337_v13 = vmul.f32 %v5334_v7, %v9676_v43 }
0x2111   : > { %5340 = vrot.lane.b32.xlu1 %v5336_v28, %s6965_s22  ;;  %5342 = vrot.lane.b32.xlu0 %v5337_v13, %s6965_s22  ;;  %v10933_v28 = vld [vmem:[#allocation22_spill] sm:$0xff] }
0x2112   : > { %v2026_v13 = vrot.slane %v10933_v28, 4 }
0x2115   : > { %5353 = vperm.xlu1 %6866, %v9433_v9  }
0x2119   : > { %6872 = vset.pattern.permute.xlu1 %v10921_v46  ;;  %v2002_v46 = vsel %vm2001_vm15, %v10931_v26, %v2000_v51  ;;  %v2106_v26 = vsel %vm560_vm0, %v2104_v39, %v2105_v14  ;;  %v10947_v39 = vld [vmem:[#allocation40_spill] sm:$0xff] }
0x211a   : > { %v2107_v8 = vsel %vm734_vm4, %v10938_v42, %v2106_v26 }
0x2183   : > { %v9684_v18 = vpop.permute.xlu1 %5340 }
0x2190   : > { %v5354_v11 = vpop.permute.xlu1 %5353 }
0x2191   : > { %v5361_v40 = vrot.slane %v5354_v11, %v10888_v31  ;;  %v2028_v11 = vsel %vm560_vm0, %v2026_v13, %v2027_v52 }
0x2193   : > { %v5363_v27 = vmul.f32 %v5361_v40, %v9510_v53  ;;  %v5364_v34 = vmul.f32 %v5361_v40, %v9676_v43  ;;  %v10934_v40 = vld [vmem:[#allocation33_spill] sm:$0xff] }
0x2195   : > { %5369 = vrot.lane.b32.xlu1 %v5364_v34, %s10803_s18  ;;  %5367 = vrot.lane.b32.xlu0 %v5363_v27, %s10803_s18  ;;  %v2052_v27 = vrot.slane %v10934_v40, 4  ;;  %v10935_v34 = vld [vmem:[#allocation37_spill] sm:$0xff] }
0x2199   : > { %5382 = vperm.xlu0 %6867, %v9433_v9  }
0x219d   : > { %6868 = vset.pattern.permute.xlu0 %v10922_v57  ;;  %v2051_v57 = vrot.slane %v10935_v34, 4 }
0x219e   : > { %5409 = vperm.xlu0 %6868, %v9433_v9  }
0x21a2   : > { %6869 = vset.pattern.permute.xlu0 %v10923_v55  ;;  %v2029_v55 = vsel %vm696_vm3, %v10933_v28, %v2028_v11 }
0x21a3   : > { %5436 = vperm.xlu0 %6869, %v9433_v9  }
0x21a7   : > { %6870 = vset.pattern.permute.xlu0 %v10924_v60  ;;  %v2053_v60 = vsel %vm560_vm0, %v2051_v57, %v2052_v27  ;;  %v10941_v27 = vld [vmem:[#allocation41_spill] sm:$0xff] }
0x21a8   : > { %5465 = vperm.xlu0 %6870, %v9433_v9   ;;  %v10943_v57 = vld [vmem:[#allocation45_spill] sm:$0xff] }
0x21ac   : > { %6871 = vset.pattern.permute.xlu0 %v10925_v4 }
0x21ad   : > { %3522 = vperm.xlu0 %6871, %v9614_v22   ;;  %v1975_v22 = vsel %vm560_vm0, %v1973_v25, %v1974_v17  ;;  %v2054_v25 = vsel %vm811_vm6, %v10935_v34, %v2053_v60 }
0x21ae   : > { %v1976_v54 = vsel %vm772_vm5, %v10927_v24, %v1975_v22  ;;  %v2110_v22 = vld [vmem:[%s10410_s4] ss:$8 sm:$0x3] }
0x21af   : > { %v1978_v7 = vadd.f32 %v1976_v54, %v1950_v37  ;;  %v2115_v35 = vrot.slane %v2110_v22, %v10732_v30  ;;  %v2119_v54 = vrot.slane %v2110_v22, %v10733_v2 }
0x21b1   : > { %5502 = vrot.lane.b32.xlu0 %v5501_v41, %s10926_s17  ;;  %v2004_v23 = vadd.f32 %v2002_v46, %v1978_v7  ;;  %v10937_v41 = vld [vmem:[#allocation39_spill] sm:$0xff]  ;;  %v2120_v52 = vcombine.low %v2115_v35, %v2119_v54  ;;  %v10950_v35 = vld [vmem:[#allocation29_spill] sm:$0xff] }
0x21b2   : > { %v2076_v24 = vrot.slane %v10937_v41, 4  ;;  %v10940_v46 = vld [vmem:[#allocation43_spill] sm:$0xff] }
0x21b3   : > { %v2031_v16 = vadd.f32 %v2029_v55, %v2004_v23  ;;  %v10942_v23 = vld [vmem:[#allocation32_spill] sm:$0xff]  ;;  %v10951_v54 = vld [vmem:[#allocation47_spill] sm:$0xff] }
0x21b4   : > { %v2078_v58 = vsel %vm560_vm0, %v2076_v24, %v2077_v48  ;;  %v2343_v34 = vsel %vm2341_vm1, %v10942_v23, %v10941_v27  ;;  %v2342_v55 = vsel %vm2341_vm1, %v10943_v57, %v10942_v23  ;;  %v10944_v48 = vld [vmem:[#allocation46_spill] sm:$0xff]  ;;  %v10946_v24 = vld [vmem:[#allocation49_spill] sm:$0xff]  ;;  %v10956_v27 = vld [vmem:[#allocation31_spill] sm:$0xff] }
0x21b5   : > { %v2056_v17 = vadd.f32 %v2054_v25, %v2031_v16  ;;  %v2080_v37 = vsel %vm2079_vm14, %v10937_v41, %v2078_v58  ;;  %v10945_v16 = vld [vmem:[#allocation38_spill] sm:$0xff] }
0x21b6   : > { %v2563_v41 = vsel %vm2561_vm2, %v10945_v16, %v10944_v48  ;;  %v2562_v25 = vsel %vm2561_vm2, %v10946_v24, %v10945_v16  ;;  %v10959_v16 = vld [vmem:[#allocation21_spill] sm:$0xff] }
0x21b7   : > { %v2082_v51 = vadd.f32 %v2080_v37, %v2056_v17  ;;  %v10948_v17 = vld [vmem:[#allocation24_spill] sm:$0xff] }
0x21b8   : > { %v2783_v22 = vsel %vm2781_vm7, %v10948_v17, %v10947_v39  ;;  %v2782_v14 = vsel %vm2781_vm7, %v10949_v6, %v10948_v17 }
0x21b9   : > { %v2109_v7 = vadd.f32 %v2107_v8, %v2082_v51  ;;  %v3002_v51 = vsel %vm3001_vm8, %v10951_v54, %v10950_v35  ;;  %v10952_v8 = vld [vmem:[#allocation13_spill] sm:$0xff] }
0x21bb   : > { %v2122_v28 = vmul.f32 %v2120_v52, %v2109_v7  ;;  %v3003_v52 = vsel %vm3001_vm8, %v10950_v35, %v10952_v8  ;;  %v9770_v7 = vpop.permute.xlu0 %5298 }
0x21bc   : > { %10953 = vst [vmem:[#allocation20_spill] sm:$0xff] %v9770_v7 }
0x21bd   : > { %v2124_v13 = vcombine.high %v2122_v28, %v2122_v28  ;;  %v2126_v11 = vadd.f32 %v2122_v28, %v10940_v46 }
0x21bf   : > { %v2127_v40 = vadd.f32 %v2124_v13, %v10940_v46  ;;  %v2346_v60 = vadd.f32 %v2342_v55, %v2126_v11  ;;  %v10954_v46 = vld [vmem:[#allocation44_spill] sm:$0xff]  ;;  %v10955_v11 = vld [vmem:[#allocation19_spill] sm:$0xff] }
0x21c0   : > { %v3223_v23 = vsel %vm3221_vm9, %v10954_v46, %v10956_v27 }
0x21c1   : > { %v2347_v44 = vadd.f32 %v2343_v34, %v2127_v40  ;;  %v2566_v58 = vadd.f32 %v2562_v25, %v2346_v60  ;;  %v3222_v40 = vsel %vm3221_vm9, %v10955_v11, %v10954_v46  ;;  %v9778_v34 = vpop.permute.xlu0 %5311  ;;  %v10957_v60 = vld [vmem:[#allocation12_spill] sm:$0xff]  ;;  %v10961_v46 = vld [vmem:[#allocation18_spill] sm:$0xff] }
0x21c3   : > { %v2567_v42 = vadd.f32 %v2563_v41, %v2347_v44  ;;  %v2786_v37 = vadd.f32 %v2782_v14, %v2566_v58  ;;  %v10958_v44 = vld [vmem:[#allocation36_spill] sm:$0xff]  ;;  %v3442_v41 = vsel %vm3440_vm10, %v10957_v60, %v10959_v16  ;;  %v10960_v14 = vld [vmem:[#allocation51_spill] sm:$0xff] }
0x21c4   : > { %v3441_v48 = vsel %vm3440_vm10, %v10958_v44, %v10957_v60 }
0x21c5   : > { %v2787_v26 = vadd.f32 %v2783_v22, %v2567_v42  ;;  %v3006_v28 = vadd.f32 %v3002_v51, %v2786_v37  ;;  %v9786_v24 = vpop.permute.xlu0 %5342 }
0x21c7   : > { %v3007_v13 = vadd.f32 %v3003_v52, %v2787_v26  ;;  %v3226_v57 = vadd.f32 %v3222_v40, %v3006_v28 }
0x21c9   : > { %v3227_v55 = vadd.f32 %v3223_v23, %v3007_v13  ;;  %v3445_v25 = vadd.f32 %v3441_v48, %v3226_v57 }
0x21cb   : > { %v3446_v58 = vadd.f32 %v3442_v41, %v3227_v55  ;;  %v3454_v39 = vrot.slane %v3445_v25, %v10732_v30  ;;  %v3471_v22 = vrot.slane %v3445_v25, %v10733_v2  ;;  %v3487_v51 = vrot.slane %v3445_v25, %v10818_v50 }
0x21cc   : > { %v3503_v55 = vrot.slane %v3445_v25, %v10884_v47 }
0x21cd   : > { %v3458_v17 = vrot.slane %v3446_v58, %v10732_v30  ;;  %v3464_v37 = vmul.f32 %v10960_v14, %v3454_v39  ;;  %v3475_v35 = vrot.slane %v3446_v58, %v10733_v2  ;;  %v3491_v28 = vrot.slane %v3446_v58, %v10818_v50 }
0x21ce   : > { %v3480_v11 = vmul.f32 %v10961_v46, %v3471_v22  ;;  %v3496_v27 = vmul.f32 %v9654_v1, %v3487_v51  ;;  %v3507_v60 = vrot.slane %v3446_v58, %v10884_v47 }
0x21cf   : > { %v3465_v26 = vmul.f32 %v10960_v14, %v3458_v17  ;;  %v3466_v8 = vadd.f32 %v3464_v37, %v9645_v45  ;;  %v3481_v40 = vmul.f32 %v10961_v46, %v3475_v35  ;;  %v3497_v23 = vmul.f32 %v9654_v1, %v3491_v28  ;;  %v10963_v28 = vld [vmem:[#allocation6_spill] sm:$0xff] }
0x21d1   : > { %v3467_v52 = vadd.f32 %v3465_v26, %v9645_v45  ;;  %v5380_v45 = vld [vmem:[#allocation3 + $0xc] sm:$0xf]  ;;  %v3482_v44 = vadd.f32 %v3480_v11, %v3466_v8  ;;  %v10964_v11 = vld [vmem:[#allocation26_spill] sm:$0xff] }
0x21d3   : > { %v3483_v48 = vadd.f32 %v3481_v40, %v3467_v52  ;;  %v3498_v39 = vadd.f32 %v3496_v27, %v3482_v44  ;;  %v3542_v40 = vrot.slane %v10964_v11, %v10888_v31 }
0x21d5   : > { %v3499_v17 = vadd.f32 %v3497_v23, %v3483_v48 }
0x2207   : > { %v9788_v42 = vpop.permute.xlu0 %5367 }
0x2214   : > { %v5383_v6 = vpop.permute.xlu0 %5382 }
0x2215   : > { %v5390_v54 = vrot.slane %v5383_v6, %v10888_v31  ;;  %v10962_v6 = vld [vmem:[#allocation42_spill] sm:$0xff] }
0x2216   : > { %v3512_v1 = vmul.f32 %v10962_v6, %v3503_v55  ;;  %v3513_v14 = vmul.f32 %v10962_v6, %v3507_v60  ;;  %v10965_v60 = vld [vmem:[#allocation27_spill] sm:$0xff] }
0x2217   : > { %v5392_v13 = vmul.f32 %v5390_v54, %v9550_v59  ;;  %v5393_v16 = vmul.f32 %v5390_v54, %v5380_v45  ;;  %v3556_v44 = vrot.slane %v10965_v60, %v10888_v31 }
0x2218   : > { %v3514_v25 = vadd.f32 %v3512_v1, %v3498_v39  ;;  %v3515_v26 = vadd.f32 %v3513_v14, %v3499_v17  ;;  %v5370_v17 = vpop.permute.xlu1 %5369 }
0x2219   : > { %5396 = vrot.lane.b32.xlu1 %v5392_v13, %s6963_s24  ;;  %v5410_v57 = vpop.permute.xlu0 %5409 }
0x221a   : > { %v5417_v41 = vrot.slane %v5410_v57, %v10888_v31  ;;  %v3518_v51 = vcombine.low %v3514_v25, %v3515_v26  ;;  %v5372_v25 = vrot.slane %v5370_v17, 4  ;;  %v5371_v26 = vrot.slane %v9788_v42, 4 }
0x221c   : > { %v5419_v37 = vmul.f32 %v5417_v41, %v9550_v59  ;;  %v5420_v58 = vmul.f32 %v5417_v41, %v5380_v45  ;;  %v3520_v13 = vmul.f32 %v3518_v51, %v10963_v28 }
0x221d   : > { %5398 = vrot.lane.b32.xlu1 %v5393_v16, %s6963_s24 }
0x221e   : > { %v5437_v22 = vpop.permute.xlu0 %5436 }
0x221f   : > { %v5444_v35 = vrot.slane %v5437_v22, %v10888_v31 }
0x2221   : > { %5423 = vrot.lane.b32.xlu1 %v5419_v37, %s6966_s27  ;;  %v5446_v8 = vmul.f32 %v5444_v35, %v9550_v59  ;;  %v5447_v27 = vmul.f32 %v5444_v35, %v5380_v45  ;;  %v5463_v45 = vld [vmem:[#allocation3 + $0x10] sm:$0xf]  ;;  %v5345_v37 = vrot.slane %v9786_v24, 4  ;;  %v5319_v35 = vrot.slane %v9778_v34, %v10888_v31 }
0x2223   : > { %v5466_v54 = vpop.permute.xlu0 %5465  ;;  %v5321_v11 = vmul.f32 %v5319_v35, %v9510_v53 }
0x2224   : > { %v5473_v23 = vrot.slane %v5466_v54, %v10888_v31 }
0x2225   : > { %5425 = vrot.lane.b32.xlu1 %v5420_v58, %s6966_s27 }
0x2226   : > { %v5475_v48 = vmul.f32 %v5473_v23, %v9516_v20  ;;  %v5476_v39 = vmul.f32 %v5473_v23, %v5463_v45  ;;  %v5344_v20 = vrot.slane %v9684_v18, 4 }
0x2228   : > { %v3523_v52 = vpop.permute.xlu0 %3522  ;;  %v5346_v54 = vsel %vm560_vm0, %v5344_v20, %v5345_v37 }
0x2229   : > { %v3530_v46 = vrot.slane %v3523_v52, %v10888_v31  ;;  %5450 = vrot.lane.b32.xlu1 %v5446_v8, %s10899_s30  ;;  %v5373_v8 = vsel %vm560_vm0, %v5371_v26, %v5372_v25 }
0x222a   : > { %v5374_v34 = vsel %vm2001_vm15, %v9788_v42, %v5373_v8 }
0x222b   : > { %v3532_v57 = vmul.f32 %v3530_v46, %v3520_v13  ;;  %v5347_v13 = vsel %vm772_vm5, %v9684_v18, %v5346_v54 }
0x222c   : > { %v5503_v25 = vpop.permute.xlu0 %5502 }
0x222d   : > { %v3544_v55 = vadd.f32 %v3542_v40, %v3532_v57  ;;  %5452 = vrot.lane.b32.xlu1 %v5447_v27, %s10899_s30  ;;  %v5322_v57 = vmul.f32 %v5319_v35, %v9676_v43  ;;  %v5504_v8 = vrot.slane %v5503_v25, 4 }
0x222f   : > { %v3545_v16 = vmax.f32 %v3544_v55, 0.0  ;;  %v5350_v55 = vadd.f32 %v5347_v13, %v5321_v11  ;;  %v5351_v18 = vadd.f32 %v9786_v24, %v5322_v57 }
0x2231   : > { %v3558_v41 = vmul.f32 %v3556_v44, %v3545_v16  ;;  %5479 = vrot.lane.b32.xlu1 %v5475_v48, %s6964_s26  ;;  %v5378_v20 = vadd.f32 %v5370_v17, %v5351_v18  ;;  %v5505_v17 = vsel %vm2546_vm12, %v5504_v8, %v5503_v25  ;;  %v10975_v25 = vmov 13  }
0x2232   : > { %vm11008_vm12 = vcmask 72704  }
0x2233   : > { %3559 = vst [vmem:[%s549_s19] sm:$0xff] %v3558_v41  ;;  %v5377_v41 = vadd.f32 %v5374_v34, %v5350_v55  ;;  %v9869_v55 = vld [vmem:[#allocation3 + $0x8] sm:$0xf] }
0x2235   : > { %5481 = vrot.lane.b32.xlu1 %v5476_v39, %s6964_s26 }
0x228b   : > { %v5397_v22 = vpop.permute.xlu1 %5396 }
0x228c   : > { %v5400_v52 = vrot.slane %v5397_v22, 4 }
0x228f   : > { %v5399_v6 = vpop.permute.xlu1 %5398 }
0x2290   : > { %v5401_v51 = vrot.slane %v5399_v6, 4  ;;  %v5407_v26 = vadd.f32 %v5399_v6, %v5378_v20  ;;  %v9887_v20 = vld [vmem:[%s10417_s11] sm:$0xf] }
0x2292   : > { %v5402_v40 = vsel %vm560_vm0, %v5400_v52, %v5401_v51 }
0x2293   : > { %v5424_v1 = vpop.permute.xlu1 %5423  ;;  %v5403_v48 = vsel %vm696_vm3, %v5397_v22, %v5402_v40 }
0x2294   : > { %v5427_v27 = vrot.slane %v5424_v1, 4  ;;  %v5406_v37 = vadd.f32 %v5403_v48, %v5377_v41  ;;  %v10971_v48 = vmov 11  }
0x2297   : > { %v5426_v14 = vpop.permute.xlu1 %5425 }
0x2298   : > { %v5428_v28 = vrot.slane %v5426_v14, 4  ;;  %v5434_v22 = vadd.f32 %v5426_v14, %v5407_v26  ;;  %v10967_v14 = vmov 24   ;;  %v10978_v26 = vmov 40  }
0x229a   : > { %v5429_v60 = vsel %vm560_vm0, %v5427_v27, %v5428_v28 }
0x229b   : > { %v5451_v58 = vpop.permute.xlu1 %5450  ;;  %v5430_v39 = vsel %vm811_vm6, %v5424_v1, %v5429_v60 }
0x229c   : > { %v5454_v44 = vrot.slane %v5451_v58, 4  ;;  %v5433_v51 = vadd.f32 %v5430_v39, %v5406_v37  ;;  %v10973_v37 = vmov 38  }
0x229f   : > { %v5453_v46 = vpop.permute.xlu1 %5452 }
0x22a0   : > { %v5455_v23 = vrot.slane %v5453_v46, 4  ;;  %v5461_v13 = vadd.f32 %v5453_v46, %v5434_v22 }
0x22a2   : > { %v5456_v45 = vsel %vm560_vm0, %v5454_v44, %v5455_v23 }
0x22a3   : > { %v5480_v16 = vpop.permute.xlu1 %5479  ;;  %v5457_v43 = vsel %vm2079_vm14, %v5451_v58, %v5456_v45  ;;  %v10968_v58 = vmov 17  }
0x22a4   : > { %v5483_v35 = vrot.slane %v5480_v16, 4  ;;  %v5460_v52 = vadd.f32 %v5457_v43, %v5433_v51  ;;  %v10977_v43 = vmov 33  }
0x22a7   : > { %v5482_v42 = vpop.permute.xlu1 %5481 }
0x22a8   : > { %v5484_v54 = vrot.slane %v5482_v42, 4  ;;  %v5490_v1 = vadd.f32 %v5482_v42, %v5461_v13  ;;  %v10976_v42 = vmov 20  }
0x22aa   : > { %v5485_v24 = vsel %vm560_vm0, %v5483_v35, %v5484_v54  ;;  %v5509_v6 = vmul.f32 %v5504_v8, %v5490_v1  ;;  %v10979_v35 = vmov 41   ;;  %v10980_v54 = vmov 5  }
0x22ab   : > { %v5486_v28 = vsel %vm734_vm4, %v5480_v16, %v5485_v24 }
0x22ac   : > { %v5489_v11 = vadd.f32 %v5486_v28, %v5460_v52 }
0x22ae   : > { %v5508_v40 = vmul.f32 %v5505_v17, %v5489_v11  ;;  %v9916_v17 = vld [vmem:[#allocation3 + $0xc] sm:$0xf] }
0x22b0   : > { %v5512_v27 = vcombine.high %v5508_v40, %v5508_v40  ;;  %5513 = vrot.lane.b32.xlu1 %v5508_v40, %s10966_s29 }
0x22b2   : > { %5515 = vrot.lane.b32.xlu0 %v5512_v27, %s10966_s29 }
0x22b4   : > { %5517 = vrot.lane.b32.xlu1 %v5509_v6, %s10966_s29 }
0x22b6   : > { %5528 = vperm.xlu0 %6871, %v9433_v9  }
0x22b8   : > { %5543 = vperm.xlu1 %6872, %v9433_v9  }
0x22ba   : > { %6874 = vset.pattern.permute.xlu0 %v10967_v14  ;;  %v10982_v14 = vmov 18  }
0x22bc   : > { %6873 = vset.pattern.permute.xlu1 %v10968_v58  ;;  %v10983_v58 = vmov 25  }
0x2322   : > { %v9864_v46 = vpop.permute.xlu1 %5513 }
0x2323   : > { %10969 = vst [vmem:[#allocation53_spill] sm:$0xff] %v9864_v46 }
0x2324   : > { %v9909_v51 = vpop.permute.xlu0 %5515 }
0x2325   : > { %10981 = vst [vmem:[#allocation35_spill] sm:$0xff] %v9909_v51 }
0x2326   : > { %v9866_v23 = vpop.permute.xlu1 %5517 }
0x2327   : > { %10970 = vst [vmem:[#allocation17_spill] sm:$0xff] %v9866_v23  ;;  %v11004_v23 = vld [vmem:[#allocation16_spill] sm:$0xff] }
0x2331   : > { %v5529_v8 = vpop.permute.xlu0 %5528 }
0x2333   : > { %v5544_v34 = vpop.permute.xlu1 %5543 }
0x2334   : > { %v5551_v57 = vrot.slane %v5544_v34, %v10888_v31  ;;  %v10984_v34 = vmov 19  }
0x2336   : > { %v5553_v60 = vmul.f32 %v5551_v57, %v9510_v53  ;;  %v5554_v44 = vmul.f32 %v5551_v57, %v9869_v55  ;;  %v10986_v57 = vmov 26  }
0x2338   : > { %5557 = vrot.lane.b32.xlu1 %v5553_v60, %s6965_s22  ;;  %5559 = vrot.lane.b32.xlu0 %v5554_v44, %s6965_s22  ;;  %v10987_v60 = vmov 45   ;;  %v10988_v44 = vmov 39  }
0x233c   : > { %5570 = vperm.xlu1 %6873, %v9433_v9   ;;  %v10972_v9 = vmov 31  }
0x2340   : > { %6877 = vset.pattern.permute.xlu1 %v10971_v48  ;;  %v10989_v48 = vmov 27  }
0x23aa   : > { %v9877_v16 = vpop.permute.xlu1 %5557  ;;  %v9911_v22 = vpop.permute.xlu0 %5559 }
0x23b7   : > { %v5571_v18 = vpop.permute.xlu1 %5570 }
0x23b8   : > { %v5578_v41 = vrot.slane %v5571_v18, %v10888_v31  ;;  %v10990_v18 = vmov 46  }
0x23ba   : > { %v5580_v45 = vmul.f32 %v5578_v41, %v9510_v53  ;;  %v5581_v39 = vmul.f32 %v5578_v41, %v9869_v55  ;;  %v10974_v53 = vmov 12   ;;  %v10991_v41 = vmov 34  }
0x23bc   : > { %5586 = vrot.lane.b32.xlu1 %v5581_v39, %s10803_s18  ;;  %5584 = vrot.lane.b32.xlu0 %v5580_v45, %s10803_s18  ;;  %v10992_v45 = vmov 47   ;;  %v10993_v39 = vmov 48  }
0x23c0   : > { %5599 = vperm.xlu0 %6874, %v9887_v20  }
0x23c4   : > { %6875 = vset.pattern.permute.xlu0 %v10972_v9  ;;  %v10994_v9 = vmov 4  }
0x23c5   : > { %5626 = vperm.xlu0 %6875, %v9887_v20  }
0x23c9   : > { %6876 = vset.pattern.permute.xlu0 %v10973_v37  ;;  %v10995_v37 = vmov 6  }
0x23ca   : > { %5653 = vperm.xlu0 %6876, %v9887_v20  }
0x23ce   : > { %6879 = vset.pattern.permute.xlu0 %v10974_v53  ;;  %v10996_v53 = vmov 0  }
0x23cf   : > { %5977 = vperm.xlu0 %6879, %v9887_v20  }
0x23d3   : > { %6882 = vset.pattern.permute.xlu0 %v10975_v25 }
0x23d4   : > { %6194 = vperm.xlu0 %6882, %v9887_v20  }
0x23d8   : > { %6885 = vset.pattern.permute.xlu0 %v10976_v42 }
0x23d9   : > { %6221 = vperm.xlu0 %6885, %v9887_v20  }
0x23dd   : > { %6888 = vset.pattern.permute.xlu0 %v10977_v43  ;;  %v5561_v43 = vrot.slane %v9877_v16, 4 }
0x23de   : > { %6060 = vperm.xlu0 %6888, %v9887_v20  }
0x23e2   : > { %6891 = vset.pattern.permute.xlu0 %v10978_v26  ;;  %v5562_v26 = vrot.slane %v9911_v22, 4 }
0x23e3   : > { %6087 = vperm.xlu0 %6891, %v9887_v20  }
0x23e7   : > { %6894 = vset.pattern.permute.xlu0 %v10979_v35 }
0x23e8   : > { %6306 = vperm.xlu0 %6894, %v9887_v20  }
0x23ec   : > { %6897 = vset.pattern.permute.xlu0 %v10980_v54 }
0x23ed   : > { %5962 = vperm.xlu0 %6897, %v9887_v20  }
0x23f1   : > { %6900 = vset.pattern.permute.xlu0 %v10914_v5 }
0x242e   : > { %v5585_v52 = vpop.permute.xlu0 %5584  ;;  %v9955_v25 = vpop.permute.xlu1 %5586 }
0x242f   : > { %v5589_v35 = vrot.slane %v9955_v25, 4 }
0x243b   : > { %v5600_v24 = vpop.permute.xlu0 %5599 }
0x243c   : > { %v5607_v28 = vrot.slane %v5600_v24, %v10888_v31  ;;  %v5588_v24 = vrot.slane %v5585_v52, 4 }
0x243e   : > { %v5609_v13 = vmul.f32 %v5607_v28, %v9550_v59  ;;  %v5610_v1 = vmul.f32 %v5607_v28, %v9916_v17 }
0x2440   : > { %5613 = vrot.lane.b32.xlu1 %v5609_v13, %s6963_s24  ;;  %v5627_v11 = vpop.permute.xlu0 %5626  ;;  %v9963_v13 = vrot.slane %v5529_v8, %v10888_v31 }
0x2441   : > { %v5634_v40 = vrot.slane %v5627_v11, %v10888_v31  ;;  %v5563_v11 = vsel %vm560_vm0, %v5561_v43, %v5562_v26  ;;  %v9985_v43 = vld [vmem:[#allocation3] sm:$0xff] }
0x2443   : > { %v5636_v27 = vmul.f32 %v5634_v40, %v9550_v59  ;;  %v5637_v6 = vmul.f32 %v5634_v40, %v9916_v17  ;;  %v10985_v59 = vmov 32  }
0x2444   : > { %5615 = vrot.lane.b32.xlu1 %v5610_v1, %s6963_s24  ;;  %v5590_v1 = vsel %vm560_vm0, %v5588_v24, %v5589_v35 }
0x2445   : > { %v5591_v8 = vsel %vm2001_vm15, %v5585_v52, %v5590_v1 }
0x2448   : > { %5640 = vrot.lane.b32.xlu1 %v5636_v27, %s6966_s27  ;;  %v5564_v27 = vsel %vm772_vm5, %v9877_v16, %v5563_v11 }
0x244c   : > { %5642 = vrot.lane.b32.xlu1 %v5637_v6, %s6966_s27 }
0x2450   : > { %5760 = vperm.xlu1 %6877, %v9887_v20  }
0x2454   : > { %6878 = vset.pattern.permute.xlu1 %v10982_v14  ;;  %v9970_v14 = vld [vmem:[#allocation3] sm:$0xff] }
0x2455   : > { %5787 = vperm.xlu1 %6878, %v9887_v20   ;;  %10997 = vst [vmem:[#allocation50_spill] sm:$0xff] %v9970_v14 }
0x2459   : > { %6880 = vset.pattern.permute.xlu1 %v10983_v58  ;;  %v5538_v58 = vmul.f32 %v9970_v14, %v9963_v13 }
0x245a   : > { %5816 = vperm.xlu1 %6880, %v9887_v20  }
0x245e   : > { %6881 = vset.pattern.permute.xlu1 %v10984_v34 }
0x245f   : > { %6004 = vperm.xlu1 %6881, %v9887_v20  }
0x2463   : > { %6883 = vset.pattern.permute.xlu1 %v10985_v59  ;;  %v5567_v59 = vadd.f32 %v5564_v27, %v5538_v58  ;;  %v9999_v58 = vld [vmem:[#allocation3 + $0x8] sm:$0xf] }
0x2464   : > { %5843 = vperm.xlu1 %6883, %v9887_v20  }
0x2468   : > { %6884 = vset.pattern.permute.xlu1 %v10986_v57 }
0x2469   : > { %6033 = vperm.xlu1 %6884, %v9887_v20  }
0x246d   : > { %6886 = vset.pattern.permute.xlu1 %v10987_v60 }
0x246e   : > { %5682 = vperm.xlu1 %6886, %v9887_v20  }
0x2472   : > { %6887 = vset.pattern.permute.xlu1 %v10988_v44  ;;  %v5594_v44 = vadd.f32 %v5591_v8, %v5567_v59 }
0x2473   : > { %5870 = vperm.xlu1 %6887, %v9887_v20  }
0x2477   : > { %6889 = vset.pattern.permute.xlu1 %v10989_v48 }
0x2478   : > { %6250 = vperm.xlu1 %6889, %v9887_v20  }
0x247c   : > { %6890 = vset.pattern.permute.xlu1 %v10990_v18 }
0x247d   : > { %5899 = vperm.xlu1 %6890, %v9887_v20  }
0x2481   : > { %6892 = vset.pattern.permute.xlu1 %v10991_v41 }
0x2482   : > { %6277 = vperm.xlu1 %6892, %v9887_v20  }
0x2486   : > { %6893 = vset.pattern.permute.xlu1 %v10992_v45 }
0x2487   : > { %6116 = vperm.xlu1 %6893, %v9887_v20  }
0x248b   : > { %6895 = vset.pattern.permute.xlu1 %v10993_v39 }
0x248c   : > { %6332 = vperm.xlu1 %6895, %v9887_v20  }
0x2490   : > { %6896 = vset.pattern.permute.xlu1 %v10994_v9 }
0x2491   : > { %5745 = vperm.xlu1 %6896, %v9887_v20  }
0x2495   : > { %6898 = vset.pattern.permute.xlu1 %v10995_v37  ;;  %v5654_v37 = vpop.permute.xlu0 %5653 }
0x2496   : > { %6179 = vperm.xlu1 %6898, %v9887_v20  }
0x2499   : > { %v5978_v24 = vpop.permute.xlu0 %5977 }
0x249a   : > { %6899 = vset.pattern.permute.xlu1 %v10996_v53  ;;  %v5985_v1 = vrot.slane %v5978_v24, %v10888_v31 }
0x249c   : > { %v5988_v8 = vmul.f32 %v5985_v1, %v9999_v58 }
0x24b2   : > { %v5614_v42 = vpop.permute.xlu1 %5613 }
0x24b3   : > { %v5617_v40 = vrot.slane %v5614_v42, 4 }
0x24b6   : > { %v9960_v28 = vpop.permute.xlu1 %5615 }
0x24b7   : > { %v5618_v20 = vrot.slane %v9960_v28, 4 }
0x24b9   : > { %v5619_v34 = vsel %vm560_vm0, %v5617_v40, %v5618_v20 }
0x24ba   : > { %v5641_v6 = vpop.permute.xlu1 %5640  ;;  %v5620_v57 = vsel %vm696_vm3, %v5614_v42, %v5619_v34  ;;  %v9987_v42 = vld [vmem:[#allocation3 + $0x8] sm:$0xf]  ;;  %v5987_v34 = vmul.f32 %v5985_v1, %v9985_v43 }
0x24bb   : > { %v5644_v48 = vrot.slane %v5641_v6, 4  ;;  %v5623_v41 = vadd.f32 %v5620_v57, %v5594_v44  ;;  %v10006_v57 = vld [vmem:[#allocation3 + $0x4] sm:$0xff]  ;;  %v5814_v44 = vld [vmem:[#allocation3 + $0xc] sm:$0xf] }
0x24be   : > { %v9977_v60 = vpop.permute.xlu1 %5642 }
0x24bf   : > { %v5645_v18 = vrot.slane %v9977_v60, 4 }
0x24c1   : > { %v5646_v16 = vsel %vm560_vm0, %v5644_v48, %v5645_v18 }
0x24c2   : > { %v5647_v45 = vsel %vm811_vm6, %v5641_v6, %v5646_v16 }
0x24c3   : > { %v9982_v39 = vadd.f32 %v5647_v45, %v5623_v41  ;;  %v6195_v45 = vpop.permute.xlu0 %6194 }
0x24cb   : > { %v5761_v53 = vpop.permute.xlu1 %5760 }
0x24cc   : > { %v5768_v52 = vrot.slane %v5761_v53, %v10888_v31  ;;  %v6202_v53 = vrot.slane %v6195_v45, %v10888_v31 }
0x24ce   : > { %v5770_v26 = vmul.f32 %v9985_v43, %v5768_v52  ;;  %v5771_v35 = vmul.f32 %v5768_v52, %v9987_v42 }
0x24d0   : > { %5776 = vrot.lane.b32.xlu0 %v5771_v35, %s6965_s22  ;;  %5774 = vrot.lane.b32.xlu1 %v5770_v26, %s6965_s22  ;;  %v5788_v11 = vpop.permute.xlu1 %5787  ;;  %v10017_v35 = vld [vmem:[#allocation3 + $0x8] sm:$0xf] }
0x24d1   : > { %v5795_v20 = vrot.slane %v5788_v11, %v10888_v31  ;;  %v5661_v11 = vrot.slane %v5654_v37, %v10888_v31  ;;  %v6205_v1 = vmul.f32 %v6202_v53, %v10017_v35 }
0x24d3   : > { %v5797_v40 = vmul.f32 %v9985_v43, %v5795_v20  ;;  %v5798_v27 = vmul.f32 %v5795_v20, %v9987_v42  ;;  %v6204_v20 = vmul.f32 %v6202_v53, %v9985_v43 }
0x24d5   : > { %5803 = vrot.lane.b32.xlu0 %v5798_v27, %s10803_s18  ;;  %5801 = vrot.lane.b32.xlu1 %v5797_v40, %s10803_s18  ;;  %v5817_v6 = vpop.permute.xlu1 %5816  ;;  %v6931_v40 = vld [vmem:[#allocation3 + $0x4] sm:$0xff] }
0x24d6   : > { %v5824_v59 = vrot.slane %v5817_v6, %v10888_v31  ;;  %v5663_v27 = vmul.f32 %v6931_v40, %v5661_v11  ;;  %v5664_v6 = vmul.f32 %v5661_v11, %v9916_v17 }
0x24d8   : > { %v5826_v18 = vmul.f32 %v5824_v59, %v10006_v57  ;;  %v5827_v16 = vmul.f32 %v5824_v59, %v5814_v44 }
0x24d9   : > { %5993 = vrot.lane.b32.xlu0 %v5988_v8, %s6965_s22  ;;  %5991 = vrot.lane.b32.xlu1 %v5987_v34, %s6965_s22 }
0x24da   : > { %v6005_v48 = vpop.permute.xlu1 %6004 }
0x24db   : > { %v6012_v41 = vrot.slane %v6005_v48, %v10888_v31 }
0x24dd   : > { %5832 = vrot.lane.b32.xlu0 %v5827_v16, %s6963_s24  ;;  %5830 = vrot.lane.b32.xlu1 %v5826_v18, %s6963_s24  ;;  %v6014_v52 = vmul.f32 %v6012_v41, %v9985_v43  ;;  %v6015_v26 = vmul.f32 %v6012_v41, %v9999_v58  ;;  %v6222_v18 = vpop.permute.xlu0 %6221  ;;  %v6031_v16 = vld [vmem:[#allocation3 + $0xc] sm:$0xf] }
0x24de   : > { %v6229_v17 = vrot.slane %v6222_v18, %v10888_v31 }
0x24df   : > { %v5844_v24 = vpop.permute.xlu1 %5843 }
0x24e0   : > { %v5851_v34 = vrot.slane %v5844_v24, %v10888_v31 }
0x24e1   : > { %6020 = vrot.lane.b32.xlu0 %v6015_v26, %s10803_s18  ;;  %6018 = vrot.lane.b32.xlu1 %v6014_v52, %s10803_s18  ;;  %v6231_v52 = vmul.f32 %v6229_v17, %v9985_v43  ;;  %v6232_v26 = vmul.f32 %v6229_v17, %v10017_v35 }
0x24e2   : > { %v5853_v37 = vmul.f32 %v5851_v34, %v10006_v57  ;;  %v5854_v59 = vmul.f32 %v5851_v34, %v5814_v44 }
0x24e4   : > { %v6034_v8 = vpop.permute.xlu1 %6033 }
0x24e5   : > { %6210 = vrot.lane.b32.xlu0 %v6205_v1, %s6965_s22  ;;  %6208 = vrot.lane.b32.xlu1 %v6204_v20, %s6965_s22  ;;  %v6041_v48 = vrot.slane %v6034_v8, %v10888_v31  ;;  %v10040_v20 = vld [vmem:[#allocation3 + $0x8] sm:$0xff]  ;;  %v5680_v1 = vld [vmem:[#allocation3 + $0x10] sm:$0xf]  ;;  %v6061_v8 = vpop.permute.xlu0 %6060  ;;  %s11001_s22 = smov 18  }
0x24e7   : > { %v6043_v45 = vmul.f32 %v6931_v40, %v6041_v48  ;;  %v6044_v53 = vmul.f32 %v6041_v48, %v6031_v16 }
0x24e9   : > { %5669 = vrot.lane.b32.xlu0 %v5664_v6, %s10899_s30  ;;  %5667 = vrot.lane.b32.xlu1 %v5663_v27, %s10899_s30  ;;  %v5683_v41 = vpop.permute.xlu1 %5682 }
0x24ea   : > { %v5690_v24 = vrot.slane %v5683_v41, %v10888_v31 }
0x24ec   : > { %v5692_v27 = vmul.f32 %v10040_v20, %v5690_v24  ;;  %v5693_v6 = vmul.f32 %v5690_v24, %v5680_v1  ;;  %v5897_v1 = vld [vmem:[#allocation3 + $0x10] sm:$0xf] }
0x24ed   : > { %5859 = vrot.lane.b32.xlu0 %v5854_v59, %s6966_s27  ;;  %5857 = vrot.lane.b32.xlu1 %v5853_v37, %s6966_s27  ;;  %v6068_v59 = vrot.slane %v6061_v8, %v10888_v31 }
0x24ee   : > { %v5871_v11 = vpop.permute.xlu1 %5870 }
0x24ef   : > { %v5878_v34 = vrot.slane %v5871_v11, %v10888_v31  ;;  %v6070_v41 = vmul.f32 %v6931_v40, %v6068_v59  ;;  %v6071_v17 = vmul.f32 %v6068_v59, %v6031_v16 }
0x24f1   : > { %6049 = vrot.lane.b32.xlu0 %v6044_v53, %s6963_s24  ;;  %6047 = vrot.lane.b32.xlu1 %v6043_v45, %s6963_s24  ;;  %v5880_v48 = vmul.f32 %v5878_v34, %v10006_v57  ;;  %v5881_v18 = vmul.f32 %v5878_v34, %v5814_v44  ;;  %v6088_v44 = vpop.permute.xlu0 %6087 }
0x24f3   : > { %v6251_v37 = vpop.permute.xlu1 %6250 }
0x24f4   : > { %v6258_v45 = vrot.slane %v6251_v37, %v10888_v31  ;;  %v6644_v37 = vld [vmem:[%s10410_s4 + $0x3] ss:$8 sm:$0x3] }
0x24f5   : > { %6237 = vrot.lane.b32.xlu0 %v6232_v26, %s10803_s18  ;;  %6235 = vrot.lane.b32.xlu1 %v6231_v52, %s10803_s18  ;;  %v6248_v52 = vld [vmem:[#allocation3 + $0xc] sm:$0xf]  ;;  %s11009_s18 = smov 119  }
0x24f6   : > { %v6260_v26 = vmul.f32 %v6258_v45, %v10006_v57  ;;  %v6261_v24 = vmul.f32 %v6258_v45, %v6248_v52  ;;  %v5717_v45 = vrot.slane %v6644_v37, %v10733_v2 }
0x24f8   : > { %v5900_v53 = vpop.permute.xlu1 %5899 }
0x24f9   : > { %5698 = vrot.lane.b32.xlu0 %v5693_v6, %s6964_s26  ;;  %5696 = vrot.lane.b32.xlu1 %v5692_v27, %s6964_s26  ;;  %v5907_v11 = vrot.slane %v5900_v53, %v10888_v31  ;;  %v6095_v6 = vrot.slane %v6088_v44, %v10888_v31  ;;  %v6645_v53 = vld [vmem:[%s10410_s4 + $0x4] ss:$8 sm:$0x3] }
0x24fa   : > { %v5934_v44 = vrot.slane %v6645_v53, %v10733_v2 }
0x24fb   : > { %v5909_v34 = vmul.f32 %v10040_v20, %v5907_v11  ;;  %v5910_v8 = vmul.f32 %v5907_v11, %v5897_v1  ;;  %v6097_v59 = vmul.f32 %v6931_v40, %v6095_v6  ;;  %v5930_v11 = vrot.slane %v6645_v53, %v10732_v30 }
0x24fd   : > { %5886 = vrot.lane.b32.xlu0 %v5881_v18, %s10899_s30  ;;  %5884 = vrot.lane.b32.xlu1 %v5880_v48, %s10899_s30  ;;  %v6278_v27 = vpop.permute.xlu1 %6277  ;;  %v6098_v48 = vmul.f32 %v6095_v6, %v6031_v16 }
0x24fe   : > { %v6285_v18 = vrot.slane %v6278_v27, %v10888_v31  ;;  %v6307_v27 = vpop.permute.xlu0 %6306 }
0x2501   : > { %6076 = vrot.lane.b32.xlu0 %v6071_v17, %s6966_s27  ;;  %6074 = vrot.lane.b32.xlu1 %v6070_v41, %s6966_s27  ;;  %v5713_v17 = vrot.slane %v6644_v37, %v10732_v30 }
0x2502   : > { %v6117_v41 = vpop.permute.xlu1 %6116 }
0x2503   : > { %v6124_v40 = vrot.slane %v6117_v41, %v10888_v31  ;;  %v5718_v16 = vcombine.low %v5713_v17, %v5717_v45  ;;  %v6647_v41 = vld [vmem:[%s10410_s4 + $0x6] ss:$8 sm:$0x3] }
0x2505   : > { %6266 = vrot.lane.b32.xlu0 %v6261_v24, %s6963_s24  ;;  %6264 = vrot.lane.b32.xlu1 %v6260_v26, %s6963_s24  ;;  %v6287_v26 = vmul.f32 %v6285_v18, %v10006_v57  ;;  %v6288_v24 = vmul.f32 %v6285_v18, %v6248_v52  ;;  %v6126_v1 = vmul.f32 %v10040_v20, %v6124_v40  ;;  %v6114_v52 = vld [vmem:[#allocation3 + $0x10] sm:$0xf]  ;;  %s11011_s24 = smov 116  }
0x2506   : > { %v5935_v57 = vcombine.low %v5930_v11, %v5934_v44  ;;  %v6127_v37 = vmul.f32 %v6124_v40, %v6114_v52  ;;  %v6304_v40 = vld [vmem:[#allocation3 + $0x10] sm:$0xf] }
0x2507   : > { %v6333_v6 = vpop.permute.xlu1 %6332 }
0x2509   : > { %5915 = vrot.lane.b32.xlu0 %v5910_v8, %s6964_s26  ;;  %5913 = vrot.lane.b32.xlu1 %v5909_v34, %s6964_s26  ;;  %v6646_v34 = vld [vmem:[%s10410_s4 + $0x5] ss:$8 sm:$0x3]  ;;  %v6314_v8 = vrot.slane %v6307_v27, %v10888_v31  ;;  %v5963_v27 = vpop.permute.xlu0 %5962 }
0x250a   : > { %v6151_v18 = vrot.slane %v6646_v34, %v10733_v2 }
0x250b   : > { %v6316_v17 = vmul.f32 %v6314_v8, %v10040_v20  ;;  %v6317_v44 = vmul.f32 %v6314_v8, %v6304_v40 }
0x250d   : > { %6103 = vrot.lane.b32.xlu0 %v6098_v48, %s10899_s30  ;;  %6101 = vrot.lane.b32.xlu1 %v6097_v59, %s10899_s30  ;;  %v6340_v59 = vrot.slane %v6333_v6, %v10888_v31  ;;  %v6147_v48 = vrot.slane %v6646_v34, %v10732_v30 }
0x250f   : > { %v6342_v45 = vmul.f32 %v6340_v59, %v10040_v20  ;;  %v6152_v53 = vcombine.low %v6147_v48, %v6151_v18  ;;  %v5746_v20 = vpop.permute.xlu1 %5745 }
0x2511   : > { %6293 = vrot.lane.b32.xlu0 %v6288_v24, %s6966_s27  ;;  %6291 = vrot.lane.b32.xlu1 %v6287_v26, %s6966_s27  ;;  %s10999_s27 = smov 12   ;;  %v6363_v26 = vrot.slane %v6647_v41, %v10732_v30  ;;  %v6367_v24 = vrot.slane %v6647_v41, %v10733_v2  ;;  %v11006_v30 = vld [vmem:[#allocation52_spill] sm:$0xff] }
0x2513   : > { %v6368_v11 = vcombine.low %v6363_v26, %v6367_v24  ;;  %v6180_v6 = vpop.permute.xlu1 %6179 }
0x2515   : > { %6130 = vrot.lane.b32.xlu0 %v6126_v1, %s6964_s26  ;;  %5719 = vrot.lane.b32.xlu1 %v5718_v16, %s10998_s20  ;;  %v6343_v16 = vmul.f32 %v6340_v59, %v6304_v40  ;;  %v5753_v1 = vrot.slane %v5746_v20, %v10888_v31  ;;  %s11014_s20 = smov 110  }
0x2517   : > { %v5755_v18 = vmul.f32 %v9985_v43, %v5753_v1 }
0x2519   : > { %5936 = vrot.lane.b32.xlu0 %v5935_v57, %s10999_s27  ;;  %6132 = vrot.lane.b32.xlu1 %v6127_v37, %s6964_s26  ;;  %v5756_v57 = vmul.f32 %v5753_v1, %v9987_v42 }
0x251d   : > { %6346 = vrot.lane.b32.xlu0 %v6342_v45, %s6964_s26  ;;  %6320 = vrot.lane.b32.xlu1 %v6316_v17, %s10899_s30 }
0x2521   : > { %6153 = vrot.lane.b32.xlu0 %v6152_v53, %s11000_s25  ;;  %6348 = vrot.lane.b32.xlu1 %v6343_v16, %s6964_s26 }
0x2525   : > { %6369 = vrot.lane.b32.xlu0 %v6368_v11, %s11001_s22  ;;  %6322 = vrot.lane.b32.xlu1 %v6317_v44, %s10899_s30  ;;  %s554_s22 = scalar_lea.vmem %s10422_s16, %s7141_s0 }
0x2542   : > { %v5775_v52 = vpop.permute.xlu1 %5774  ;;  %v5777_v34 = vpop.permute.xlu0 %5776 }
0x2543   : > { %v5778_v37 = vrot.slane %v5775_v52, 4  ;;  %v5779_v59 = vrot.slane %v5777_v34, 4  ;;  %v5785_v48 = vadd.f32 %v5777_v34, %v5756_v57 }
0x2545   : > { %v5780_v8 = vsel %vm560_vm0, %v5778_v37, %v5779_v59  ;;  %v10137_v59 = vld [vmem:[%s10420_s14] sm:$0xf] }
0x2546   : > { %v5781_v41 = vsel %vm772_vm5, %v5775_v52, %v5780_v8  ;;  %v11003_v8 = vld [vmem:[#allocation34_spill] sm:$0xff] }
0x2547   : > { %v10108_v17 = vadd.f32 %v5781_v41, %v5755_v18  ;;  %v5802_v45 = vpop.permute.xlu1 %5801  ;;  %v5804_v53 = vpop.permute.xlu0 %5803 }
0x2548   : > { %v10110_v26 = vadd.f32 %v5804_v53, %v5785_v48  ;;  %v11002_v48 = vld [vmem:[#allocation15_spill] sm:$0xff] }
0x2549   : > { %v3571_v18 = vadd.f32 %v10137_v59, %v11002_v48 }
0x254b   : > { %v5992_v24 = vpop.permute.xlu1 %5991  ;;  %v10112_v40 = vpop.permute.xlu0 %5993  ;;  %v3581_v41 = vadd.f32 %v11003_v8, %v3571_v18  ;;  %v11007_v8 = vld [vmem:[#allocation11_spill] sm:$0xff] }
0x254c   : > { %v5995_v38 = vrot.slane %v5992_v24, 4  ;;  %v5996_v63 = vrot.slane %v10112_v40, 4 }
0x254d   : > { %v3591_v46 = vadd.f32 %v11004_v23, %v3581_v41  ;;  %v5539_v23 = vmul.f32 %v9963_v13, %v9869_v55  ;;  %v5970_v55 = vrot.slane %v5963_v27, %v10888_v31  ;;  %v6187_v13 = vrot.slane %v6180_v6, %v10888_v31 }
0x254f   : > { %v10114_v42 = vpop.permute.xlu1 %5830  ;;  %v10116_v16 = vpop.permute.xlu0 %5832  ;;  %v3601_v0 = vadd.f32 %v11005_v15, %v3591_v46  ;;  %v5805_v15 = vrot.slane %v5802_v45, 4  ;;  %v5806_v46 = vrot.slane %v5804_v53, 4  ;;  %v5997_v53 = vsel %vm560_vm0, %v5995_v38, %v5996_v63 }
0x2550   : > { %v5834_v12 = vrot.slane %v10114_v42, 4  ;;  %v5835_v62 = vrot.slane %v10116_v16, 4  ;;  %v5972_v31 = vmul.f32 %v5970_v55, %v9985_v43  ;;  %v5973_v21 = vmul.f32 %v5970_v55, %v9999_v58 }
0x2551   : > { %v3606_v48 = vmul.f32 %v11006_v30, %v3601_v0  ;;  %v5568_v30 = vadd.f32 %v9911_v22, %v5539_v23  ;;  %v5998_v33 = vsel %vm772_vm5, %v5992_v24, %v5997_v53 }
0x2552   : > { %v6002_v9 = vadd.f32 %v10112_v40, %v5973_v21 }
0x2553   : > { %v10118_v11 = vpop.permute.xlu1 %6018  ;;  %v10120_v44 = vpop.permute.xlu0 %6020  ;;  %v3610_v32 = vadd.f32 %v11007_v8, %v3606_v48  ;;  %v5595_v14 = vadd.f32 %v9955_v25, %v5568_v30  ;;  %v5807_v8 = vsel %vm560_vm0, %v5805_v15, %v5806_v46 }
0x2554   : > { %v6023_v22 = vrot.slane %v10120_v44, 4  ;;  %v5808_v63 = vsel %vm2001_vm15, %v5802_v45, %v5807_v8  ;;  %v6189_v45 = vmul.f32 %v6187_v13, %v9985_v43 }
0x2555   : > { %v6633_v0 = vmul.f32 -1.442695, %v3610_v32  ;;  %v6022_v32 = vrot.slane %v10118_v11, 4  ;;  %v5624_v15 = vadd.f32 %v9960_v28, %v5595_v14  ;;  %v5836_v28 = vsel %vm560_vm0, %v5834_v12, %v5835_v62 }
0x2556   : > { %v5811_v8 = vadd.f32 %v5808_v63, %v10108_v17  ;;  %v6001_v62 = vadd.f32 %v5998_v33, %v5972_v31  ;;  %v5837_v43 = vsel %vm696_vm3, %v10114_v42, %v5836_v28  ;;  %v5841_v17 = vadd.f32 %v10116_v16, %v10110_v26 }
0x2557   : > { %v10122_v20 = vpop.permute.xlu1 %6208  ;;  %v10124_v1 = vpop.permute.xlu0 %6210  ;;  %6913 = vpow2.f32 %v6633_v0  ;;  %v5651_v29 = vadd.f32 %v9977_v60, %v5624_v15  ;;  %v6024_v14 = vsel %vm560_vm0, %v6022_v32, %v6023_v22 }
0x2558   : > { %v6212_v25 = vrot.slane %v10122_v20, 4  ;;  %v6213_v23 = vrot.slane %v10124_v1, 4  ;;  %v6025_v21 = vsel %vm2001_vm15, %v10118_v11, %v6024_v14 }
0x255a   : > { %v6214_v61 = vsel %vm560_vm0, %v6212_v25, %v6213_v23  ;;  %v5840_v23 = vadd.f32 %v5837_v43, %v5811_v8 }
0x255b   : > { %v10126_v57 = vpop.permute.xlu1 %5667  ;;  %v10128_v52 = vpop.permute.xlu0 %5669  ;;  %v6215_v40 = vsel %vm772_vm5, %v10122_v20, %v6214_v61 }
0x255c   : > { %v5671_v27 = vrot.slane %v10126_v57, 4  ;;  %v5672_v6 = vrot.slane %v10128_v52, 4  ;;  %v6218_v15 = vadd.f32 %v6215_v40, %v6189_v45  ;;  %v5678_v63 = vadd.f32 %v10128_v52, %v5651_v29 }
0x255e   : > { %v5673_v0 = vsel %vm560_vm0, %v5671_v27, %v5672_v6  ;;  %v6028_v27 = vadd.f32 %v6025_v21, %v6001_v62  ;;  %v6029_v6 = vadd.f32 %v10120_v44, %v6002_v9 }
0x255f   : > { %v10130_v34 = vpop.permute.xlu1 %5857  ;;  %v10132_v37 = vpop.permute.xlu0 %5859  ;;  %v5674_v22 = vsel %vm2079_vm14, %v10126_v57, %v5673_v0 }
0x2560   : > { %v5861_v38 = vrot.slane %v10130_v34, 4  ;;  %v5862_v46 = vrot.slane %v10132_v37, 4  ;;  %v5677_v14 = vadd.f32 %v5674_v22, %v9982_v39 }
0x2562   : > { %v5863_v58 = vsel %vm560_vm0, %v5861_v38, %v5862_v46  ;;  %v5868_v38 = vadd.f32 %v10132_v37, %v5841_v17 }
0x2563   : > { %v10142_v47 = vpop.permute.xlu1 %6047  ;;  %v10144_v50 = vpop.permute.xlu0 %6049  ;;  %v5864_v31 = vsel %vm811_vm6, %v10130_v34, %v5863_v58  ;;  %v6190_v34 = vmul.f32 %v6187_v13, %v10017_v35 }
0x2564   : > { %v6051_v33 = vrot.slane %v10142_v47, 4  ;;  %v6052_v26 = vrot.slane %v10144_v50, 4  ;;  %v5867_v58 = vadd.f32 %v5864_v31, %v5840_v23 }
0x2566   : > { %v6053_v28 = vsel %vm560_vm0, %v6051_v33, %v6052_v26 }
0x2567   : > { %v10147_v51 = vpop.permute.xlu1 %6235  ;;  %v10149_v3 = vpop.permute.xlu0 %6237 }
0x2568   : > { %v6239_v42 = vrot.slane %v10147_v51, 4  ;;  %v6240_v16 = vrot.slane %v10149_v3, 4 }
0x256a   : > { %v6241_v35 = vsel %vm560_vm0, %v6239_v42, %v6240_v16 }
0x256b   : > { %v10152_v7 = vpop.permute.xlu1 %5696  ;;  %v10154_v2 = vpop.permute.xlu0 %5698 }
0x256c   : > { %v5700_v60 = vrot.slane %v10152_v7, 4  ;;  %v5701_v24 = vrot.slane %v10154_v2, 4  ;;  %v5707_v26 = vadd.f32 %v10154_v2, %v5678_v63 }
0x256e   : > { %v5702_v61 = vsel %vm560_vm0, %v5700_v60, %v5701_v24  ;;  %v6054_v60 = vsel %vm696_vm3, %v10142_v47, %v6053_v28 }
0x256f   : > { %v10157_v56 = vpop.permute.xlu1 %5884  ;;  %v10159_v18 = vpop.permute.xlu0 %5886  ;;  %v5703_v0 = vsel %vm734_vm4, %v10152_v7, %v5702_v61 }
0x2570   : > { %v5888_v53 = vrot.slane %v10157_v56, 4  ;;  %v5889_v32 = vrot.slane %v10159_v18, 4  ;;  %v10255_v7 = vpop.eup %6913  ;;  %v5706_v43 = vadd.f32 %v5703_v0, %v5677_v14 }
0x2572   : > { %v5890_v46 = vsel %vm560_vm0, %v5888_v53, %v5889_v32 }
0x2573   : > { %v10164_v41 = vpop.permute.xlu1 %6074  ;;  %v10166_v19 = vpop.permute.xlu0 %6076  ;;  %v5891_v39 = vsel %vm2079_vm14, %v10157_v56, %v5890_v46  ;;  %v6242_v56 = vsel %vm2001_vm15, %v10147_v51, %v6241_v35  ;;  %v6057_v51 = vadd.f32 %v6054_v60, %v6028_v27  ;;  %v6219_v27 = vadd.f32 %v10124_v1, %v6190_v34 }
0x2574   : > { %v6078_v13 = vrot.slane %v10164_v41, 4  ;;  %v6079_v9 = vrot.slane %v10166_v19, 4  ;;  %v5894_v31 = vadd.f32 %v5891_v39, %v5867_v58 }
0x2576   : > { %v6080_v32 = vsel %vm560_vm0, %v6078_v13, %v6079_v9  ;;  %v6245_v9 = vadd.f32 %v6242_v56, %v6218_v15 }
0x2577   : > { %v10171_v10 = vpop.permute.xlu1 %6264  ;;  %v10173_v48 = vpop.permute.xlu0 %6266  ;;  %v6081_v46 = vsel %vm811_vm6, %v10164_v41, %v6080_v32 }
0x2578   : > { %v6268_v37 = vrot.slane %v10171_v10, 4  ;;  %v6269_v45 = vrot.slane %v10173_v48, 4 }
0x257a   : > { %v6270_v42 = vsel %vm560_vm0, %v6268_v37, %v6269_v45  ;;  %v6084_v45 = vadd.f32 %v6081_v46, %v6057_v51  ;;  %v11015_v46 = vmov 4  }
0x257b   : > { %v10191_v30 = vpop.permute.xlu1 %5913  ;;  %v10193_v49 = vpop.permute.xlu0 %5915  ;;  %v6271_v35 = vsel %vm696_vm3, %v10171_v10, %v6270_v42  ;;  %v6058_v10 = vadd.f32 %v10144_v50, %v6029_v6 }
0x257c   : > { %v5917_v11 = vrot.slane %v10191_v30, 4  ;;  %v5918_v20 = vrot.slane %v10193_v49, 4  ;;  %v6274_v39 = vadd.f32 %v6271_v35, %v6245_v9  ;;  %v11020_v35 = vld [vmem:[#allocation14_spill] sm:$0xff] }
0x257d   : > { %v6085_v50 = vadd.f32 %v10166_v19, %v6058_v10  ;;  %v11025_v10 = vld [vmem:[#allocation50_spill] sm:$0xff] }
0x257e   : > { %v5919_v29 = vsel %vm560_vm0, %v5917_v11, %v5918_v20 }
0x257f   : > { %v10209_v55 = vpop.permute.xlu1 %6101  ;;  %v10211_v12 = vpop.permute.xlu0 %6103  ;;  %v5920_v53 = vsel %vm734_vm4, %v10191_v30, %v5919_v29 }
0x2580   : > { %v6105_v24 = vrot.slane %v10209_v55, 4  ;;  %v6106_v62 = vrot.slane %v10211_v12, 4  ;;  %v5923_v23 = vadd.f32 %v5920_v53, %v5894_v31 }
0x2582   : > { %v6107_v11 = vsel %vm560_vm0, %v6105_v24, %v6106_v62 }
0x2583   : > { %v10234_v25 = vpop.permute.xlu1 %6291  ;;  %v10236_v57 = vpop.permute.xlu0 %6293  ;;  %v6108_v41 = vsel %vm2079_vm14, %v10209_v55, %v6107_v11 }
0x2584   : > { %v6295_v17 = vrot.slane %v10234_v25, 4  ;;  %v6296_v21 = vrot.slane %v10236_v57, 4 }
0x2586   : > { %v6297_v28 = vsel %vm560_vm0, %v6295_v17, %v6296_v21 }
0x2587   : > { %v5720_v44 = vpop.permute.xlu1 %5719  ;;  %v6131_v52 = vpop.permute.xlu0 %6130  ;;  %v6298_v37 = vsel %vm811_vm6, %v10234_v25, %v6297_v28 }
0x2588   : > { %v5721_v8 = vrot.slane %v5720_v44, 4  ;;  %v6134_v20 = vrot.slane %v6131_v52, 4 }
0x258a   : > { %v5722_v40 = vsel %vm11008_vm12, %v5721_v8, %v5720_v44  ;;  %v5726_v63 = vmul.f32 %v5721_v8, %v5707_v26  ;;  %v5895_v44 = vadd.f32 %v10159_v18, %v5868_v38  ;;  %v6246_v8 = vadd.f32 %v10149_v3, %v6219_v27 }
0x258b   : > { %v5725_v47 = vmul.f32 %v5722_v40, %v5706_v43  ;;  %v10269_v22 = vpop.permute.xlu1 %6132  ;;  %v5937_v33 = vpop.permute.xlu0 %5936  ;;  %v6111_v18 = vadd.f32 %v6108_v41, %v6084_v45  ;;  %v6301_v38 = vadd.f32 %v6298_v37, %v6274_v39  ;;  %vm11012_vm12 = vcmask 121856   ;;  %v11023_v41 = vld [vmem:[#allocation59_spill] sm:$0xff] }
0x258c   : > { %v6135_v16 = vrot.slane %v10269_v22, 4  ;;  %v5938_v61 = vrot.slane %v5937_v33, 4  ;;  %v5924_v34 = vadd.f32 %v10193_v49, %v5895_v44  ;;  %v6275_v3 = vadd.f32 %v10173_v48, %v6246_v8 }
0x258d   : > { %v5729_v30 = vcombine.high %v5725_v47, %v5725_v47  ;;  %5730 = vrot.lane.b32.xlu1 %v5725_v47, %s11009_s18  ;;  %v6112_v40 = vadd.f32 %v10211_v12, %v6085_v50  ;;  %v4990_v44 = vrot.slane %v11023_v41, 4 }
0x258e   : > { %v5939_v2 = vsel %vm11010_vm11, %v5938_v61, %v5937_v33  ;;  %v6136_v14 = vsel %vm560_vm0, %v6134_v20, %v6135_v16  ;;  %v5943_v6 = vmul.f32 %v5938_v61, %v5924_v34  ;;  %v6302_v53 = vadd.f32 %v10236_v57, %v6275_v3 }
0x258f   : > { %v5942_v0 = vmul.f32 %v5939_v2, %v5923_v23  ;;  %v6321_v58 = vpop.permute.xlu1 %6320  ;;  %5732 = vrot.lane.b32.xlu0 %v5729_v30, %s11009_s18  ;;  %v6347_v13 = vpop.permute.xlu0 %6346  ;;  %v6137_v1 = vsel %vm734_vm4, %v6131_v52, %v6136_v14  ;;  %v6141_v26 = vadd.f32 %v10269_v22, %v6112_v40  ;;  %v3614_v57 = vadd.f32 1.0, %v10255_v7  ;;  %v3620_v23 = vld [vmem:[%s10418_s12] sm:$0xf]  ;;  %v11017_v2 = vld [vmem:[#allocation56_spill] sm:$0xff] }
0x2590   : > { %v6324_v29 = vrot.slane %v6321_v58, 4  ;;  %v6350_v24 = vrot.slane %v6347_v13, 4  ;;  %v6140_v52 = vadd.f32 %v6137_v1, %v6111_v18  ;;  %v11018_v14 = vld [vmem:[#allocation58_spill] sm:$0xff]  ;;  %v11026_v1 = vld [vmem:[#allocation61_spill] sm:$0xff] }
0x2591   : > { %5734 = vrot.lane.b32.xlu1 %v5726_v63, %s11009_s18  ;;  %v5946_v15 = vcombine.high %v5942_v0, %v5942_v0  ;;  %6915 = vrcp.f32 %v3614_v57  ;;  %v4939_v63 = vrot.slane %v11017_v2, 4  ;;  %v5015_v34 = vrot.slane %v11026_v1, 4  ;;  %v5073_v40 = vld [vmem:[%s10410_s4] ss:$8 sm:$0x3]  ;;  %v11035_v2 = vld [vmem:[#allocation68_spill] sm:$0xff] }
0x2592   : > { %v6325_v55 = vsel %vm2079_vm14, %v6324_v29, %v6321_v58 }
0x2593   : > { %v6349_v60 = vpop.permute.xlu1 %6348  ;;  %5947 = vrot.lane.b32.xlu0 %v5942_v0, %s11011_s24  ;;  %v6154_v25 = vpop.permute.xlu0 %6153  ;;  %v6329_v49 = vadd.f32 %v6325_v55, %v6301_v38  ;;  %v4964_v0 = vrot.slane %v11018_v14, 4  ;;  %v11028_v38 = vld [vmem:[#allocation63_spill] sm:$0xff]  ;;  %v11036_v14 = vld [vmem:[#allocation10_spill] sm:$0xff] }
0x2594   : > { %v6351_v62 = vrot.slane %v6349_v60, 4  ;;  %v6155_v43 = vrot.slane %v6154_v25, 4 }
0x2595   : > { %5949 = vrot.lane.b32.xlu1 %v5946_v15, %s11011_s24  ;;  %v11027_v15 = vld [vmem:[#allocation64_spill] sm:$0xff] }
0x2596   : > { %v6352_v17 = vsel %vm560_vm0, %v6350_v24, %v6351_v62  ;;  %v6156_v21 = vsel %vm11012_vm12, %v6155_v43, %v6154_v25  ;;  %v6160_v61 = vmul.f32 %v6155_v43, %v6141_v26  ;;  %v5041_v55 = vrot.slane %v11027_v15, 4  ;;  %v11029_v62 = vld [vmem:[#allocation66_spill] sm:$0xff] }
0x2597   : > { %v6159_v56 = vmul.f32 %v6156_v21, %v6140_v52  ;;  %v6323_v32 = vpop.permute.xlu1 %6322  ;;  %5951 = vrot.lane.b32.xlu0 %v5943_v6, %s11011_s24  ;;  %v6353_v19 = vsel %vm734_vm4, %v6347_v13, %v6352_v17  ;;  %v6370_v48 = vpop.permute.xlu0 %6369  ;;  %v11021_v13 = vld [vmem:[#allocation55_spill] sm:$0xff]  ;;  %v5040_v24 = vrot.slane %v11028_v38, 4  ;;  %v5068_v43 = vrot.slane %v11029_v62, 4  ;;  %v11030_v52 = vld [vmem:[#allocation65_spill] sm:$0xff] }
0x2598   : > { %v6326_v47 = vsel %vm2079_vm14, %v6324_v29, %v6323_v32  ;;  %v6356_v31 = vadd.f32 %v6353_v19, %v6329_v49  ;;  %v6371_v33 = vrot.slane %v6370_v48, 4  ;;  %v5067_v49 = vrot.slane %v11030_v52, 4 }
0x2599   : > { %v6163_v42 = vcombine.high %v6159_v56, %v6159_v56  ;;  %v6330_v16 = vadd.f32 %v6326_v47, %v6302_v53  ;;  %6164 = vrot.lane.b32.xlu1 %v6159_v56, %s11013_s23  ;;  %v5042_v6 = vsel %vm560_vm0, %v5040_v24, %v5041_v55  ;;  %v11031_v47 = vld [vmem:[#allocation7_spill] sm:$0xff] }
0x259a   : > { %v6372_v12 = vsel %vm3425_vm13, %v6371_v33, %v6370_v48  ;;  %v5069_v56 = vsel %vm560_vm0, %v5067_v49, %v5068_v43  ;;  %v5043_v19 = vsel %vm2079_vm14, %v11028_v38, %v5042_v6 }
0x259b   : > { %v6375_v11 = vmul.f32 %v6372_v12, %v6356_v31  ;;  %6166 = vrot.lane.b32.xlu0 %v6163_v42, %s11013_s23  ;;  %v6357_v30 = vadd.f32 %v6349_v60, %v6330_v16  ;;  %v5078_v31 = vrot.slane %v5073_v40, %v11031_v47  ;;  %v5070_v16 = vsel %vm734_vm4, %v11030_v52, %v5069_v56 }
0x259d   : > { %6168 = vrot.lane.b32.xlu1 %v6160_v61, %s11013_s23  ;;  %v6379_v20 = vcombine.high %v6375_v11, %v6375_v11  ;;  %v6376_v22 = vmul.f32 %v6371_v33, %v6357_v30  ;;  %v11032_v33 = vld [vmem:[#allocation8_spill] sm:$0xff] }
0x259e   : > { %v6916_v7 = vpop.eup %6915  ;;  %v5082_v26 = vrot.slane %v5073_v40, %v11032_v33 }
0x259f   : > { %6380 = vrot.lane.b32.xlu0 %v6375_v11, %s11014_s20  ;;  %v3617_v51 = vadd.f32 1.0, %v6916_v7 }
0x25a0   : > { %v5083_v11 = vcombine.low %v5078_v31, %v5082_v26 }
0x25a1   : > { %6382 = vrot.lane.b32.xlu1 %v6379_v20, %s11014_s20 }
0x25a3   : > { %6384 = vrot.lane.b32.xlu0 %v6376_v22, %s11014_s20 }
0x25a5   : > { %6406 = vperm.xlu1 %6899, %v3620_v23  }
0x25a7   : > { %6393 = vperm.xlu0 %6900, %v10137_v59  }
0x25a9   : > { %6901 = vset.pattern.permute.xlu1 %v10894_v36  ;;  %v11016_v36 = vld [vmem:[#allocation54_spill] sm:$0xff] }
0x25aa   : > { %6422 = vperm.xlu1 %6901, %v3620_v23   ;;  %v4938_v28 = vrot.slane %v11016_v36, 4 }
0x25ab   : > { %6903 = vset.pattern.permute.xlu0 %v10925_v4 }
0x25ac   : > { %6454 = vperm.xlu0 %6903, %v3620_v23   ;;  %v4940_v27 = vsel %vm560_vm0, %v4938_v28, %v4939_v63 }
0x25ad   : > { %v4941_v45 = vsel %vm772_vm5, %v11016_v36, %v4940_v27  ;;  %v11034_v36 = vld [vmem:[#allocation67_spill] sm:$0xff]  ;;  %v11038_v27 = vld [vmem:[#allocation53_spill] sm:$0xff] }
0x25ae   : > { %6902 = vset.pattern.permute.xlu1 %v10914_v5  ;;  %v11019_v5 = vld [vmem:[#allocation57_spill] sm:$0xff] }
0x25af   : > { %6438 = vperm.xlu1 %6902, %v3620_v23   ;;  %v4963_v58 = vrot.slane %v11019_v5, 4 }
0x25b0   : > { %6906 = vset.pattern.permute.xlu0 %v10980_v54  ;;  %v4913_v54 = vrot.slane %v11021_v13, %v11020_v35 }
0x25b1   : > { %6493 = vperm.xlu0 %6906, %v3617_v51   ;;  %v4965_v29 = vsel %vm560_vm0, %v4963_v58, %v4964_v0 }
0x25b2   : > { %v4915_v8 = vmul.f32 %v11025_v10, %v4913_v54  ;;  %v4966_v60 = vsel %vm2001_vm15, %v11019_v5, %v4965_v29  ;;  %v11037_v54 = vld [vmem:[#allocation35_spill] sm:$0xff] }
0x25b3   : > { %6904 = vset.pattern.permute.xlu1 %v10925_v4  ;;  %v11022_v4 = vld [vmem:[#allocation60_spill] sm:$0xff] }
0x25b4   : > { %6467 = vperm.xlu1 %6904, %v10137_v59   ;;  %v4991_v9 = vrot.slane %v11022_v4, 4  ;;  %v4943_v18 = vadd.f32 %v4941_v45, %v4915_v8  ;;  %v5519_v4 = vsel %vm2561_vm2, %v11038_v27, %v11037_v54 }
0x25b6   : > { %v4992_v39 = vsel %vm560_vm0, %v4990_v44, %v4991_v9  ;;  %v4968_v3 = vadd.f32 %v4966_v60, %v4943_v18  ;;  %v11039_v9 = vld [vmem:[#allocation17_spill] sm:$0xff] }
0x25b7   : > { %v4993_v50 = vsel %vm696_vm3, %v11023_v41, %v4992_v39  ;;  %v5520_v29 = vsel %vm2561_vm2, %v11037_v54, %v11039_v9 }
0x25b8   : > { %6905 = vset.pattern.permute.xlu1 %v11015_v46  ;;  %v4995_v53 = vadd.f32 %v4993_v50, %v4968_v3  ;;  %v11033_v46 = vld [vmem:[#allocation20_spill] sm:$0xff] }
0x25b9   : > { %6479 = vperm.xlu1 %6905, %v10137_v59   ;;  %v11024_v59 = vld [vmem:[#allocation62_spill] sm:$0xff]  ;;  %v5302_v28 = vsel %vm2341_vm1, %v11034_v36, %v11033_v46  ;;  %v5303_v63 = vsel %vm2341_vm1, %v11033_v46, %v11035_v2 }
0x25ba   : > { %v5016_v37 = vrot.slane %v11024_v59, 4 }
0x25bc   : > { %v5017_v25 = vsel %vm560_vm0, %v5015_v34, %v5016_v37 }
0x25bd   : > { %v5018_v21 = vsel %vm811_vm6, %v11026_v1, %v5017_v25 }
0x25be   : > { %v5020_v48 = vadd.f32 %v5018_v21, %v4995_v53 }
0x25c0   : > { %v5045_v12 = vadd.f32 %v5043_v19, %v5020_v48 }
0x25c2   : > { %v5072_v61 = vadd.f32 %v5070_v16, %v5045_v12  ;;  %v11040_v16 = vld [vmem:[#allocation4_spill] sm:$0xff] }
0x25c4   : > { %v5085_v22 = vmul.f32 %v5083_v11, %v5072_v61  ;;  %v11041_v61 = vld [vmem:[#allocation5_spill] sm:$0xff] }
0x25c6   : > { %v5087_v51 = vcombine.high %v5085_v22, %v5085_v22  ;;  %v5089_v0 = vadd.f32 %v5085_v22, %v11036_v14 }
0x25c8   : > { %v5090_v5 = vadd.f32 %v5087_v51, %v11036_v14  ;;  %v5306_v41 = vadd.f32 %v5302_v28, %v5089_v0 }
0x25ca   : > { %v5307_v44 = vadd.f32 %v5303_v63, %v5090_v5  ;;  %v5523_v45 = vadd.f32 %v5519_v4, %v5306_v41  ;;  %v6933_v5 = vld [vmem:[#allocation2 + $0x8] sm:$0xff] }
0x25cc   : > { %v5524_v10 = vadd.f32 %v5520_v29, %v5307_v44 }
0x25ff   : > { %v5731_v17 = vpop.permute.xlu1 %5730 }
0x2601   : > { %v5733_v32 = vpop.permute.xlu0 %5732 }
0x2602   : > { %v5736_v59 = vsel %vm2781_vm7, %v5731_v17, %v5733_v32 }
0x2603   : > { %v5735_v42 = vpop.permute.xlu1 %5734  ;;  %v5740_v1 = vadd.f32 %v5736_v59, %v5523_v45 }
0x2604   : > { %v5737_v37 = vsel %vm2781_vm7, %v5733_v32, %v5735_v42 }
0x2605   : > { %v5948_v57 = vpop.permute.xlu0 %5947  ;;  %v5741_v34 = vadd.f32 %v5737_v37, %v5524_v10 }
0x2607   : > { %v5950_v30 = vpop.permute.xlu1 %5949 }
0x2608   : > { %v5953_v8 = vsel %vm3001_vm8, %v5948_v57, %v5950_v30 }
0x2609   : > { %v5952_v20 = vpop.permute.xlu0 %5951  ;;  %v5957_v25 = vadd.f32 %v5953_v8, %v5740_v1 }
0x260a   : > { %v5954_v39 = vsel %vm3001_vm8, %v5950_v30, %v5952_v20 }
0x260b   : > { %v6165_v23 = vpop.permute.xlu1 %6164  ;;  %v5958_v38 = vadd.f32 %v5954_v39, %v5741_v34 }
0x260d   : > { %v6167_v7 = vpop.permute.xlu0 %6166 }
0x260e   : > { %v6170_v60 = vsel %vm3221_vm9, %v6165_v23, %v6167_v7 }
0x260f   : > { %v6169_v58 = vpop.permute.xlu1 %6168  ;;  %v6174_v43 = vadd.f32 %v6170_v60, %v5957_v25 }
0x2610   : > { %v6171_v18 = vsel %vm3221_vm9, %v6167_v7, %v6169_v58 }
0x2611   : > { %v6381_v13 = vpop.permute.xlu0 %6380  ;;  %v6175_v50 = vadd.f32 %v6171_v18, %v5958_v38 }
0x2613   : > { %v6383_v15 = vpop.permute.xlu1 %6382 }
0x2614   : > { %v6386_v24 = vsel %vm3440_vm10, %v6381_v13, %v6383_v15 }
0x2615   : > { %v6385_v55 = vpop.permute.xlu0 %6384  ;;  %v6390_v3 = vadd.f32 %v6386_v24, %v6174_v43 }
0x2616   : > { %v6387_v62 = vsel %vm3440_vm10, %v6383_v15, %v6385_v55 }
0x2617   : > { %v6391_v6 = vadd.f32 %v6387_v62, %v6175_v50  ;;  %v6399_v49 = vrot.slane %v6390_v3, %v11031_v47  ;;  %v6416_v32 = vrot.slane %v6390_v3, %v11032_v33  ;;  %v6432_v12 = vrot.slane %v6390_v3, %v11040_v16 }
0x2618   : > { %v6448_v11 = vrot.slane %v6390_v3, %v11041_v61 }
0x2619   : > { %v6403_v17 = vrot.slane %v6391_v6, %v11031_v47  ;;  %v6420_v19 = vrot.slane %v6391_v6, %v11032_v33  ;;  %v6436_v57 = vrot.slane %v6391_v6, %v11040_v16  ;;  %v6452_v47 = vrot.slane %v6391_v6, %v11041_v61 }
0x2620   : > { %v6407_v52 = vpop.permute.xlu1 %6406 }
0x2621   : > { %v6409_v40 = vmul.f32 %v6407_v52, %v6399_v49  ;;  %v6410_v53 = vmul.f32 %v6407_v52, %v6403_v17 }
0x2622   : > { %v6394_v21 = vpop.permute.xlu0 %6393 }
0x2623   : > { %v6411_v26 = vadd.f32 %v6409_v40, %v6394_v21  ;;  %v6412_v42 = vadd.f32 %v6410_v53, %v6394_v21 }
0x2625   : > { %v6423_v56 = vpop.permute.xlu1 %6422 }
0x2626   : > { %v6425_v48 = vmul.f32 %v6423_v56, %v6416_v32  ;;  %v6426_v31 = vmul.f32 %v6423_v56, %v6420_v19 }
0x2627   : > { %v6455_v30 = vpop.permute.xlu0 %6454 }
0x2628   : > { %v6427_v22 = vadd.f32 %v6425_v48, %v6411_v26  ;;  %v6428_v23 = vadd.f32 %v6426_v31, %v6412_v42  ;;  %v6457_v46 = vmul.f32 %v6455_v30, %v6448_v11  ;;  %v6458_v33 = vmul.f32 %v6455_v30, %v6452_v47 }
0x262a   : > { %v6439_v20 = vpop.permute.xlu1 %6438 }
0x262b   : > { %v6441_v7 = vmul.f32 %v6439_v20, %v6432_v12  ;;  %v6442_v51 = vmul.f32 %v6439_v20, %v6436_v57 }
0x262c   : > { %v6494_v9 = vpop.permute.xlu0 %6493 }
0x262d   : > { %v6443_v36 = vadd.f32 %v6441_v7, %v6427_v22  ;;  %v6444_v28 = vadd.f32 %v6442_v51, %v6428_v23  ;;  %v6501_v41 = vrot.slane %v6494_v9, %v11020_v35 }
0x262f   : > { %v6459_v2 = vadd.f32 %v6457_v46, %v6443_v36  ;;  %v6460_v63 = vadd.f32 %v6458_v33, %v6444_v28  ;;  %v6468_v14 = vpop.permute.xlu1 %6467 }
0x2630   : > { %v6475_v13 = vrot.slane %v6468_v14, %v11020_v35 }
0x2631   : > { %v6463_v0 = vcombine.low %v6459_v2, %v6460_v63 }
0x2633   : > { %v6465_v58 = vmul.f32 %v6933_v5, %v6463_v0 }
0x2634   : > { %v6480_v54 = vpop.permute.xlu1 %6479 }
0x2635   : > { %v6477_v27 = vmul.f32 %v6475_v13, %v6465_v58  ;;  %v6487_v4 = vrot.slane %v6480_v54, %v11020_v35 }
0x2637   : > { %v6489_v29 = vadd.f32 %v6487_v4, %v6477_v27 }
0x2639   : > { %v6490_v44 = vmax.f32 %v6489_v29, 0.0 }
0x263b   : > { %v6503_v59 = vmul.f32 %v6501_v41, %v6490_v44 }
0x263d   : > { %6504 = vst [vmem:[%s554_s22] sm:$0xff] %v6503_v59 }
0x263e PF: > { %s27_s21 = sadd.s32 1, %s6940_s21  }
0x263f   : > { %p24_p4 = scmp.ge.s32.totalorder %s27_s21, 4  }
0x2641   :  { %26 = sbr.rel (!%p24_p4) target bundleno = 2 (0x2), region = 135 }

</bundles_post_ra>
